<compile_context>
chip_gen: v7x
topology: tpu7x:2x2x1
jax: 0.10.0
libtpu: 0.0.40
codegen_flags: <defaults>
</compile_context>

<pallas_src>
import functools

import jax
import jax.numpy as jnp
from jax.experimental import pallas as pl
from jax.experimental.pallas import tpu as pltpu


NUM_EMBEDDINGS = 256
EMBEDDING_DIM = 128
COMMITMENT_COST = 0.25

_VMEM_LIMIT = 32 * 1024 * 1024


# ----------------------------------------------------------------------------
# Fused GEMM + bias + activation kernel (bf16 MXU operands, f32 epilogue)
# ----------------------------------------------------------------------------
def _gemm_bias_act_kernel(a_ref, w_ref, b_ref, o_ref, *, activation):
    a = a_ref[...].astype(jnp.bfloat16)                 # MXU operand in bf16
    acc = jnp.dot(a, w_ref[...], preferred_element_type=jnp.float32)
    acc = acc + b_ref[...]                              # (1, N) broadcast, f32
    if activation == "relu":
        acc = jnp.maximum(acc, 0.0)
    elif activation == "tanh":
        acc = jnp.tanh(acc)
    o_ref[...] = acc.astype(o_ref.dtype)                # bf16 or f32 on store


def _pick_tm(m):
    """Single grid step unless every tile still has >= 256 rows (d4: M=512)."""
    if m >= 512 and m % 256 == 0:
        return 256
    return m


def gemm_bias_act(a, w, bias, activation, out_dtype=jnp.bfloat16):
    """a: (M, K) bf16/f32, w: (K, N) bf16 (pre-packed), bias: (1, N) f32."""
    m, k = a.shape
    n = w.shape[1]
    tm = _pick_tm(m)
    return pl.pallas_call(
        functools.partial(_gemm_bias_act_kernel, activation=activation),
        out_shape=jax.ShapeDtypeStruct((m, n), out_dtype),
        grid=(m // tm,),
        in_specs=[
            pl.BlockSpec((tm, k), lambda i: (i, 0)),
            pl.BlockSpec((k, n), lambda i: (0, 0)),
            pl.BlockSpec((1, n), lambda i: (0, 0)),
        ],
        out_specs=pl.BlockSpec((tm, n), lambda i: (i, 0)),
        compiler_params=pltpu.CompilerParams(
            dimension_semantics=("parallel",),
            vmem_limit_bytes=_VMEM_LIMIT),
    )(a, w, bias)


# ----------------------------------------------------------------------------
# Conv2d: NHWC im2col (no transposes, bf16) + fused GEMM kernel
# ----------------------------------------------------------------------------
def _im2col_nhwc(x, kh, kw, stride, padding):
    """x: (B, H, W, C) -> ((B*OH*OW, kh*kw*C), OH, OW). Tap-major, channel-minor."""
    b, h, w, c = x.shape
    xp = jnp.pad(x, ((0, 0), (padding, padding), (padding, padding), (0, 0)))
    oh = (h + 2 * padding - kh) // stride + 1
    ow = (w + 2 * padding - kw) // stride + 1
    taps = []
    for i in range(kh):
        for j in range(kw):
            taps.append(xp[:, i:i + stride * (oh - 1) + 1:stride,
                           j:j + stride * (ow - 1) + 1:stride, :])
    a = jnp.stack(taps, axis=3)                          # (B, OH, OW, kh*kw, C)
    return a.reshape(b * oh * ow, kh * kw * c), oh, ow


def conv2d_layer(x, w_packed, bias, ksize, stride, padding, activation,
                 out_dtype=jnp.bfloat16):
    """x: (B, H, W, Cin) NHWC; w_packed: (ksize*ksize*Cin, Cout) bf16."""
    b = x.shape[0]
    a, oh, ow = _im2col_nhwc(x, ksize, ksize, stride, padding)
    out = gemm_bias_act(a, w_packed, bias, activation, out_dtype)
    return out.reshape(b, oh, ow, w_packed.shape[1])


# ----------------------------------------------------------------------------
# ConvTranspose2d(k=4, s=2, p=1): single GEMM per layer.
#   out[2m+py, 2n+px] = sum_{a,b in {0,1}} x_pad[m+py+a, n+px+b] . W[3-py-2a, 3-px-2b]
# The 3x3 "same" im2col (M, 9*Cin) covers every (py+a, px+b) tap; the combined
# weight (9*Cin, 4*Cout) places each phase's 4 taps in its column block and
# zeros elsewhere -> one lane-dense GEMM, interleave phases afterwards.
# ----------------------------------------------------------------------------
def conv_transpose2d_layer(x, w_combined, bias_combined, activation,
                           out_dtype=jnp.bfloat16):
    """x: (B, H, W, Cin) bf16; w_combined: (9*Cin, 4*Cout) bf16 -> (B, 2H, 2W, Cout)."""
    b, h, w, _ = x.shape
    cout = w_combined.shape[1] // 4
    a, _, _ = _im2col_nhwc(x, 3, 3, 1, 1)                # (B*H*W, 9*Cin)
    o = gemm_bias_act(a, w_combined, bias_combined, activation, out_dtype)
    o = o.reshape(b, h, w, 2, 2, cout)                   # (b, m, n, py, px, c)
    o = jnp.transpose(o, (0, 1, 3, 2, 4, 5))             # (b, m, py, n, px, c)
    return o.reshape(b, 2 * h, 2 * w, cout)


# ----------------------------------------------------------------------------
# Vector quantizer kernel: distances + argmin only (indices out).
# Codebook gather (exact f32) and the scalar loss happen in XLA on (8,128).
# ----------------------------------------------------------------------------
def _vq_argmin_kernel(f_ref, e_ref, e2_ref, idx_ref):
    f = f_ref[...]                                       # (M, D) f32
    f2 = jnp.sum(f * f, axis=1, keepdims=True)           # (M, 1)
    # Cross term uses bf16 MXU operands (near-tie codes may differ from f32 torch).
    cross = jax.lax.dot_general(
        f.astype(jnp.bfloat16), e_ref[...].astype(jnp.bfloat16),
        (((1,), (1,)), ((), ())), preferred_element_type=jnp.float32)
    d = f2 + e2_ref[...] - 2.0 * cross                   # (M, E)
    idx_ref[...] = jnp.argmin(d, axis=1, keepdims=True).astype(jnp.int32)


def vq_layer(z_nhwc, codebook, codebook_sq, commitment_cost):
    """Reproduces PyTorch `inputs.view(-1, D)` applied to the NCHW latent
    (reference omits permute(0,2,3,1) -> rows mix channels/spatial; kept verbatim)."""
    b, h, w, d = z_nhwc.shape
    z_nchw = jnp.transpose(z_nhwc, (0, 3, 1, 2))
    f = z_nchw.reshape(-1, d)                            # row-major == torch .view
    m = f.shape[0]
    e = codebook.shape[0]
    idx = pl.pallas_call(
        _vq_argmin_kernel,
        out_shape=jax.ShapeDtypeStruct((m, 1), jnp.int32),
        grid=(1,),
        in_specs=[pl.BlockSpec((m, d), lambda i: (0, 0)),
                  pl.BlockSpec((e, d), lambda i: (0, 0)),
                  pl.BlockSpec((1, e), lambda i: (0, 0))],
        out_specs=pl.BlockSpec((m, 1), lambda i: (0, 0)),
        compiler_params=pltpu.CompilerParams(
            dimension_semantics=("arbitrary",),
            vmem_limit_bytes=_VMEM_LIMIT),
    )(f, codebook, codebook_sq)
    q = jnp.take(codebook, idx[:, 0], axis=0)            # exact f32 gather (XLA)
    # codebook_loss + commitment_cost * commitment_loss == (1 + cc) * mse(q, f)
    vq_loss = (1.0 + commitment_cost) * jnp.mean(jnp.square(q - f))
    q_nchw = q.reshape(b, d, h, w)
    return jnp.transpose(q_nchw, (0, 2, 3, 1)), vq_loss  # NHWC quantized, scalar


# ----------------------------------------------------------------------------
# Parameters: raw (PyTorch layout) + one-time packing
# ----------------------------------------------------------------------------
def init_params(key):
    ks = jax.random.split(key, 9)

    def conv_p(k, o, c, kh, kw):
        fan_in = c * kh * kw
        return (jax.random.normal(k, (o, c, kh, kw), jnp.float32) / jnp.sqrt(fan_in),
                jnp.zeros((o,), jnp.float32))

    def convt_p(k, cin, cout, kh, kw):
        fan_in = cin * kh * kw
        return (jax.random.normal(k, (cin, cout, kh, kw), jnp.float32) / jnp.sqrt(fan_in),
                jnp.zeros((cout,), jnp.float32))

    return {
        "e1": conv_p(ks[0], 64, 3, 4, 4),
        "e2": conv_p(ks[1], 128, 64, 4, 4),
        "e3": conv_p(ks[2], 256, 128, 4, 4),
        "e4": conv_p(ks[3], EMBEDDING_DIM, 256, 3, 3),
        "codebook": jax.random.uniform(
            ks[4], (NUM_EMBEDDINGS, EMBEDDING_DIM), jnp.float32,
            minval=-1.0 / NUM_EMBEDDINGS, maxval=1.0 / NUM_EMBEDDINGS),
        "d1": convt_p(ks[5], EMBEDDING_DIM, 256, 4, 4),
        "d2": convt_p(ks[6], 256, 128, 4, 4),
        "d3": convt_p(ks[7], 128, 64, 4, 4),
        "d4": conv_p(ks[8], 3, 64, 3, 3),
    }


def _pack_conv_weight(w, pad_cin=0, pad_cout=0):
    """(O, C, KH, KW) -> ((KH*KW*(C+pad_cin)), O+pad_cout) bf16; tap-major,
    channel-minor (im2col order); zero rows/columns for the padding."""
    o, c, kh, kw = w.shape
    wt = jnp.transpose(w, (2, 3, 1, 0))                  # (KH, KW, C, O)
    if pad_cin:
        wt = jnp.pad(wt, ((0, 0), (0, 0), (0, pad_cin), (0, 0)))
    if pad_cout:
        wt = jnp.pad(wt, ((0, 0), (0, 0), (0, 0), (0, pad_cout)))
    return wt.reshape(kh * kw * (c + pad_cin), o + pad_cout).astype(jnp.bfloat16)


def _pack_convt_weight_combined(w_t):
    """(Cin, Cout, 4, 4) -> (9*Cin, 4*Cout) bf16 combined sub-pixel weight:
    phase p = py*2+px occupies column block p; its 4 live taps sit at the 3x3
    im2col row blocks t = (py+a)*3 + (px+b) with weight W[:,:,3-py-2a,3-px-2b]."""
    cin, cout, kh, kw = w_t.shape
    assert kh == 4 and kw == 4
    wc = jnp.zeros((9 * cin, 4 * cout), jnp.float32)
    for py in range(2):
        for px in range(2):
            p = py * 2 + px
            for a in range(2):
                for bb in range(2):
                    t = (py + a) * 3 + (px + bb)
                    blk = w_t[:, :, 3 - py - 2 * a, 3 - px - 2 * bb]   # (Cin, Cout)
                    wc = wc.at[t * cin:(t + 1) * cin, p * cout:(p + 1) * cout].set(blk)
    return wc.astype(jnp.bfloat16)


def prepare_params(params):
    """One-time weight/bias packing — runs OUTSIDE the jitted forward."""
    prep = {}
    # e1: pad input channels 3 -> 8 so K = 4*4*8 = 128 (lane multiple).
    prep["e1_w"] = _pack_conv_weight(params["e1"][0], pad_cin=5)
    prep["e1_b"] = params["e1"][1].reshape(1, -1)
    for name in ("e2", "e3", "e4"):
        w, bias = params[name]
        prep[name + "_w"] = _pack_conv_weight(w)
        prep[name + "_b"] = bias.reshape(1, -1)
    # d4: pad Cout 3 -> 128 for a lane-dense output block (slice [:, :3] outside).
    prep["d4_w"] = _pack_conv_weight(params["d4"][0], pad_cout=125)
    prep["d4_b"] = jnp.pad(params["d4"][1], (0, 125)).reshape(1, -1)
    # Conv-transpose layers: combined (9*Cin, 4*Cout) weight + tiled bias.
    for name in ("d1", "d2", "d3"):
        w, bias = params[name]
        prep[name + "_w"] = _pack_convt_weight_combined(w)
        prep[name + "_b"] = jnp.tile(bias, 4).reshape(1, -1)
    cb = params["codebook"]
    prep["codebook"] = cb
    prep["codebook_sq"] = jnp.sum(cb * cb, axis=1, keepdims=True).T    # (1, E)
    return prep


# ----------------------------------------------------------------------------
# EnhancedVQVAE forward
# ----------------------------------------------------------------------------
def enhanced_vqvae_forward(x_nchw, prep):
    # Single NCHW -> NHWC layout change at the input; pad channels 3 -> 8 and
    # carry bf16 activations everywhere between layers.
    x = jnp.transpose(x_nchw, (0, 2, 3, 1))
    x = jnp.pad(x, ((0, 0), (0, 0), (0, 0), (0, 5))).astype(jnp.bfloat16)
    # encoder
    h = conv2d_layer(x, prep["e1_w"], prep["e1_b"], 4, 2, 1, "relu")
    h = conv2d_layer(h, prep["e2_w"], prep["e2_b"], 4, 2, 1, "relu")
    h = conv2d_layer(h, prep["e3_w"], prep["e3_b"], 4, 2, 1, "relu")
    z = conv2d_layer(h, prep["e4_w"], prep["e4_b"], 3, 1, 1, None,
                     out_dtype=jnp.float32)
    # vector quantizer (NCHW .view quirk handled inside the wrapper)
    quantized, vq_loss = vq_layer(z, prep["codebook"], prep["codebook_sq"],
                                  COMMITMENT_COST)
    # decoder (combined sub-pixel transposed convs)
    h = conv_transpose2d_layer(quantized.astype(jnp.bfloat16),
                               prep["d1_w"], prep["d1_b"], "relu")
    h = conv_transpose2d_layer(h, prep["d2_w"], prep["d2_b"], "relu")
    h = conv_transpose2d_layer(h, prep["d3_w"], prep["d3_b"], None)
    y = conv2d_layer(h, prep["d4_w"], prep["d4_b"], 3, 1, 1, "tanh",
                     out_dtype=jnp.float32)              # (B, 16, 16, 128)
    y = y[..., :3]                                        # drop zero-padded channels
    return jnp.transpose(y, (0, 3, 1, 2)), vq_loss


if __name__ == "__main__":
    key = jax.random.PRNGKey(0)
    k_params, k_x = jax.random.split(key)
    params = init_params(k_params)
    prep = prepare_params(params)              # one-time packing, outside jit
    # NCHW input, matching PyTorch: (batch=2, channels=3, H=16, W=16)
    x = jax.random.normal(k_x, (2, 3, 16, 16), jnp.float32)

    fwd = jax.jit(enhanced_vqvae_forward)
    x_recon, vq_loss = fwd(x, prep)
    x_recon = jax.block_until_ready(x_recon)
    vq_loss = jax.block_until_ready(vq_loss)

    assert x_recon.shape == (2, 3, 16, 16), x_recon.shape
    assert vq_loss.shape == (), vq_loss.shape
    assert bool(jnp.all(jnp.isfinite(x_recon)))
    assert bool(jnp.isfinite(vq_loss))
    print("KERNEL_OK")
</pallas_src>

<mosaic_0001>
module attributes {stable_mosaic.version = 11 : i64} {
  func.func @_gemm_bias_act_kernel(%arg0: i32, %arg1: memref<128x128xbf16, #tpu.memory_space<vmem>>, %arg2: memref<128x64xbf16, #tpu.memory_space<vmem>>, %arg3: memref<1x64xf32, #tpu.memory_space<vmem>>, %arg4: memref<128x64xbf16, #tpu.memory_space<vmem>>) attributes {dimension_semantics = [#tpu.dimension_semantics<parallel>], iteration_bounds = array<i64: 1>, scalar_prefetch = 0 : i64, scratch_operands = 0 : i64, tpu.core_type = #tpu.core_type<tc>, window_params = [{transform_indices = @transform_0, window_bounds = array<i64: 128, 128>}, {pipeline_mode = #tpu.pipeline_mode<synchronous>, transform_indices = @transform_1, window_bounds = array<i64: 128, 64>}, {pipeline_mode = #tpu.pipeline_mode<synchronous>, transform_indices = @transform_2, window_bounds = array<i64: 1, 64>}, {transform_indices = @transform_3, window_bounds = array<i64: 128, 64>}]} {
    %c0 = arith.constant 0 : index
    %c0_0 = arith.constant 0 : index
    %0 = vector.load %arg1[%c0, %c0_0] : memref<128x128xbf16, #tpu.memory_space<vmem>>, vector<128x128xbf16>
    %c0_1 = arith.constant 0 : index
    %c0_2 = arith.constant 0 : index
    %1 = vector.load %arg2[%c0_1, %c0_2] : memref<128x64xbf16, #tpu.memory_space<vmem>>, vector<128x64xbf16>
    %cst = arith.constant dense<0.000000e+00> : vector<128x64xf32>
    %2 = tpu.matmul %0, %1, %cst {dimension_numbers = #tpu.dot_dimension_numbers<[1], [0], [0], [1], [0, 0, 1, 1], [], []>} : vector<128x128xbf16>, vector<128x64xbf16>, vector<128x64xf32> -> vector<128x64xf32>
    %c0_3 = arith.constant 0 : index
    %c0_4 = arith.constant 0 : index
    %3 = vector.load %arg3[%c0_3, %c0_4] : memref<1x64xf32, #tpu.memory_space<vmem>>, vector<1x64xf32>
    %4 = vector.broadcast %3 : vector<1x64xf32> to vector<128x64xf32>
    %5 = arith.addf %2, %4 : vector<128x64xf32>
    %cst_5 = arith.constant 0.000000e+00 : f32
    %6 = vector.broadcast %cst_5 : f32 to vector<128x64xf32>
    %7 = arith.maximumf %5, %6 : vector<128x64xf32>
    %8 = arith.truncf %7 : vector<128x64xf32> to vector<128x64xbf16>
    %c0_6 = arith.constant 0 : index
    %c0_7 = arith.constant 0 : index
    %9 = vector.load %arg4[%c0_6, %c0_7] : memref<128x64xbf16, #tpu.memory_space<vmem>>, vector<128x64xbf16>
    tpu.vector_store %arg4[%c0_6, %c0_7], %8 {strides = array<i32>} : memref<128x64xbf16, #tpu.memory_space<vmem>>, vector<128x64xbf16>,
    return
  }
  func.func @transform_0(%arg0: i32) -> (i32, i32) {
    %c0_i32 = arith.constant 0 : i32
    %c0_i32_0 = arith.constant 0 : i32
    return %arg0, %c0_i32 : i32, i32
  }
  func.func @transform_1(%arg0: i32) -> (i32, i32) {
    %c0_i32 = arith.constant 0 : i32
    %c0_i32_0 = arith.constant 0 : i32
    %c0_i32_1 = arith.constant 0 : i32
    return %c0_i32, %c0_i32_0 : i32, i32
  }
  func.func @transform_2(%arg0: i32) -> (i32, i32) {
    %c0_i32 = arith.constant 0 : i32
    %c0_i32_0 = arith.constant 0 : i32
    %c0_i32_1 = arith.constant 0 : i32
    return %c0_i32, %c0_i32_0 : i32, i32
  }
  func.func @transform_3(%arg0: i32) -> (i32, i32) {
    %c0_i32 = arith.constant 0 : i32
    %c0_i32_0 = arith.constant 0 : i32
    return %arg0, %c0_i32 : i32, i32
  }
}

module attributes {stable_mosaic.version = 11 : i64} {
  func.func @_gemm_bias_act_kernel(%arg0: i32, %arg1: memref<32x1024xbf16, #tpu.memory_space<vmem>>, %arg2: memref<1024x128xbf16, #tpu.memory_space<vmem>>, %arg3: memref<1x128xf32, #tpu.memory_space<vmem>>, %arg4: memref<32x128xbf16, #tpu.memory_space<vmem>>) attributes {dimension_semantics = [#tpu.dimension_semantics<parallel>], iteration_bounds = array<i64: 1>, scalar_prefetch = 0 : i64, scratch_operands = 0 : i64, tpu.core_type = #tpu.core_type<tc>, window_params = [{transform_indices = @transform_0, window_bounds = array<i64: 32, 1024>}, {pipeline_mode = #tpu.pipeline_mode<synchronous>, transform_indices = @transform_1, window_bounds = array<i64: 1024, 128>}, {pipeline_mode = #tpu.pipeline_mode<synchronous>, transform_indices = @transform_2, window_bounds = array<i64: 1, 128>}, {transform_indices = @transform_3, window_bounds = array<i64: 32, 128>}]} {
    %c0 = arith.constant 0 : index
    %c0_0 = arith.constant 0 : index
    %0 = vector.load %arg1[%c0, %c0_0] : memref<32x1024xbf16, #tpu.memory_space<vmem>>, vector<32x1024xbf16>
    %c0_1 = arith.constant 0 : index
    %c0_2 = arith.constant 0 : index
    %1 = vector.load %arg2[%c0_1, %c0_2] : memref<1024x128xbf16, #tpu.memory_space<vmem>>, vector<1024x128xbf16>
    %cst = arith.constant dense<0.000000e+00> : vector<32x128xf32>
    %2 = tpu.matmul %0, %1, %cst {dimension_numbers = #tpu.dot_dimension_numbers<[1], [0], [0], [1], [0, 0, 1, 1], [], []>} : vector<32x1024xbf16>, vector<1024x128xbf16>, vector<32x128xf32> -> vector<32x128xf32>
    %c0_3 = arith.constant 0 : index
    %c0_4 = arith.constant 0 : index
    %3 = vector.load %arg3[%c0_3, %c0_4] : memref<1x128xf32, #tpu.memory_space<vmem>>, vector<1x128xf32>
    %4 = vector.broadcast %3 : vector<1x128xf32> to vector<32x128xf32>
    %5 = arith.addf %2, %4 : vector<32x128xf32>
    %cst_5 = arith.constant 0.000000e+00 : f32
    %6 = vector.broadcast %cst_5 : f32 to vector<32x128xf32>
    %7 = arith.maximumf %5, %6 : vector<32x128xf32>
    %8 = arith.truncf %7 : vector<32x128xf32> to vector<32x128xbf16>
    %c0_6 = arith.constant 0 : index
    %c0_7 = arith.constant 0 : index
    %9 = vector.load %arg4[%c0_6, %c0_7] : memref<32x128xbf16, #tpu.memory_space<vmem>>, vector<32x128xbf16>
    tpu.vector_store %arg4[%c0_6, %c0_7], %8 {strides = array<i32>} : memref<32x128xbf16, #tpu.memory_space<vmem>>, vector<32x128xbf16>,
    return
  }
  func.func @transform_0(%arg0: i32) -> (i32, i32) {
    %c0_i32 = arith.constant 0 : i32
    %c0_i32_0 = arith.constant 0 : i32
    return %arg0, %c0_i32 : i32, i32
  }
  func.func @transform_1(%arg0: i32) -> (i32, i32) {
    %c0_i32 = arith.constant 0 : i32
    %c0_i32_0 = arith.constant 0 : i32
    %c0_i32_1 = arith.constant 0 : i32
    return %c0_i32, %c0_i32_0 : i32, i32
  }
  func.func @transform_2(%arg0: i32) -> (i32, i32) {
    %c0_i32 = arith.constant 0 : i32
    %c0_i32_0 = arith.constant 0 : i32
    %c0_i32_1 = arith.constant 0 : i32
    return %c0_i32, %c0_i32_0 : i32, i32
  }
  func.func @transform_3(%arg0: i32) -> (i32, i32) {
    %c0_i32 = arith.constant 0 : i32
    %c0_i32_0 = arith.constant 0 : i32
    return %arg0, %c0_i32 : i32, i32
  }
}

module attributes {stable_mosaic.version = 11 : i64} {
  func.func @_gemm_bias_act_kernel(%arg0: i32, %arg1: memref<8x2048xbf16, #tpu.memory_space<vmem>>, %arg2: memref<2048x256xbf16, #tpu.memory_space<vmem>>, %arg3: memref<1x256xf32, #tpu.memory_space<vmem>>, %arg4: memref<8x256xbf16, #tpu.memory_space<vmem>>) attributes {dimension_semantics = [#tpu.dimension_semantics<parallel>], iteration_bounds = array<i64: 1>, scalar_prefetch = 0 : i64, scratch_operands = 0 : i64, tpu.core_type = #tpu.core_type<tc>, window_params = [{transform_indices = @transform_0, window_bounds = array<i64: 8, 2048>}, {pipeline_mode = #tpu.pipeline_mode<synchronous>, transform_indices = @transform_1, window_bounds = array<i64: 2048, 256>}, {pipeline_mode = #tpu.pipeline_mode<synchronous>, transform_indices = @transform_2, window_bounds = array<i64: 1, 256>}, {transform_indices = @transform_3, window_bounds = array<i64: 8, 256>}]} {
    %c0 = arith.constant 0 : index
    %c0_0 = arith.constant 0 : index
    %0 = vector.load %arg1[%c0, %c0_0] : memref<8x2048xbf16, #tpu.memory_space<vmem>>, vector<8x2048xbf16>
    %c0_1 = arith.constant 0 : index
    %c0_2 = arith.constant 0 : index
    %1 = vector.load %arg2[%c0_1, %c0_2] : memref<2048x256xbf16, #tpu.memory_space<vmem>>, vector<2048x256xbf16>
    %cst = arith.constant dense<0.000000e+00> : vector<8x256xf32>
    %2 = tpu.matmul %0, %1, %cst {dimension_numbers = #tpu.dot_dimension_numbers<[1], [0], [0], [1], [0, 0, 1, 1], [], []>} : vector<8x2048xbf16>, vector<2048x256xbf16>, vector<8x256xf32> -> vector<8x256xf32>
    %c0_3 = arith.constant 0 : index
    %c0_4 = arith.constant 0 : index
    %3 = vector.load %arg3[%c0_3, %c0_4] : memref<1x256xf32, #tpu.memory_space<vmem>>, vector<1x256xf32>
    %4 = vector.broadcast %3 : vector<1x256xf32> to vector<8x256xf32>
    %5 = arith.addf %2, %4 : vector<8x256xf32>
    %cst_5 = arith.constant 0.000000e+00 : f32
    %6 = vector.broadcast %cst_5 : f32 to vector<8x256xf32>
    %7 = arith.maximumf %5, %6 : vector<8x256xf32>
    %8 = arith.truncf %7 : vector<8x256xf32> to vector<8x256xbf16>
    %c0_6 = arith.constant 0 : index
    %c0_7 = arith.constant 0 : index
    %9 = vector.load %arg4[%c0_6, %c0_7] : memref<8x256xbf16, #tpu.memory_space<vmem>>, vector<8x256xbf16>
    tpu.vector_store %arg4[%c0_6, %c0_7], %8 {strides = array<i32>} : memref<8x256xbf16, #tpu.memory_space<vmem>>, vector<8x256xbf16>,
    return
  }
  func.func @transform_0(%arg0: i32) -> (i32, i32) {
    %c0_i32 = arith.constant 0 : i32
    %c0_i32_0 = arith.constant 0 : i32
    return %arg0, %c0_i32 : i32, i32
  }
  func.func @transform_1(%arg0: i32) -> (i32, i32) {
    %c0_i32 = arith.constant 0 : i32
    %c0_i32_0 = arith.constant 0 : i32
    %c0_i32_1 = arith.constant 0 : i32
    return %c0_i32, %c0_i32_0 : i32, i32
  }
  func.func @transform_2(%arg0: i32) -> (i32, i32) {
    %c0_i32 = arith.constant 0 : i32
    %c0_i32_0 = arith.constant 0 : i32
    %c0_i32_1 = arith.constant 0 : i32
    return %c0_i32, %c0_i32_0 : i32, i32
  }
  func.func @transform_3(%arg0: i32) -> (i32, i32) {
    %c0_i32 = arith.constant 0 : i32
    %c0_i32_0 = arith.constant 0 : i32
    return %arg0, %c0_i32 : i32, i32
  }
}

module attributes {stable_mosaic.version = 11 : i64} {
  func.func @_gemm_bias_act_kernel(%arg0: i32, %arg1: memref<8x2304xbf16, #tpu.memory_space<vmem>>, %arg2: memref<2304x128xbf16, #tpu.memory_space<vmem>>, %arg3: memref<1x128xf32, #tpu.memory_space<vmem>>, %arg4: memref<8x128xf32, #tpu.memory_space<vmem>>) attributes {dimension_semantics = [#tpu.dimension_semantics<parallel>], iteration_bounds = array<i64: 1>, scalar_prefetch = 0 : i64, scratch_operands = 0 : i64, tpu.core_type = #tpu.core_type<tc>, window_params = [{transform_indices = @transform_0, window_bounds = array<i64: 8, 2304>}, {pipeline_mode = #tpu.pipeline_mode<synchronous>, transform_indices = @transform_1, window_bounds = array<i64: 2304, 128>}, {pipeline_mode = #tpu.pipeline_mode<synchronous>, transform_indices = @transform_2, window_bounds = array<i64: 1, 128>}, {transform_indices = @transform_3, window_bounds = array<i64: 8, 128>}]} {
    %c0 = arith.constant 0 : index
    %c0_0 = arith.constant 0 : index
    %0 = vector.load %arg1[%c0, %c0_0] : memref<8x2304xbf16, #tpu.memory_space<vmem>>, vector<8x2304xbf16>
    %c0_1 = arith.constant 0 : index
    %c0_2 = arith.constant 0 : index
    %1 = vector.load %arg2[%c0_1, %c0_2] : memref<2304x128xbf16, #tpu.memory_space<vmem>>, vector<2304x128xbf16>
    %cst = arith.constant dense<0.000000e+00> : vector<8x128xf32>
    %2 = tpu.matmul %0, %1, %cst {dimension_numbers = #tpu.dot_dimension_numbers<[1], [0], [0], [1], [0, 0, 1, 1], [], []>} : vector<8x2304xbf16>, vector<2304x128xbf16>, vector<8x128xf32> -> vector<8x128xf32>
    %c0_3 = arith.constant 0 : index
    %c0_4 = arith.constant 0 : index
    %3 = vector.load %arg3[%c0_3, %c0_4] : memref<1x128xf32, #tpu.memory_space<vmem>>, vector<1x128xf32>
    %4 = vector.broadcast %3 : vector<1x128xf32> to vector<8x128xf32>
    %5 = arith.addf %2, %4 : vector<8x128xf32>
    %c0_5 = arith.constant 0 : index
    %c0_6 = arith.constant 0 : index
    %6 = vector.load %arg4[%c0_5, %c0_6] : memref<8x128xf32, #tpu.memory_space<vmem>>, vector<8x128xf32>
    tpu.vector_store %arg4[%c0_5, %c0_6], %5 {strides = array<i32>} : memref<8x128xf32, #tpu.memory_space<vmem>>, vector<8x128xf32>,
    return
  }
  func.func @transform_0(%arg0: i32) -> (i32, i32) {
    %c0_i32 = arith.constant 0 : i32
    %c0_i32_0 = arith.constant 0 : i32
    return %arg0, %c0_i32 : i32, i32
  }
  func.func @transform_1(%arg0: i32) -> (i32, i32) {
    %c0_i32 = arith.constant 0 : i32
    %c0_i32_0 = arith.constant 0 : i32
    %c0_i32_1 = arith.constant 0 : i32
    return %c0_i32, %c0_i32_0 : i32, i32
  }
  func.func @transform_2(%arg0: i32) -> (i32, i32) {
    %c0_i32 = arith.constant 0 : i32
    %c0_i32_0 = arith.constant 0 : i32
    %c0_i32_1 = arith.constant 0 : i32
    return %c0_i32, %c0_i32_0 : i32, i32
  }
  func.func @transform_3(%arg0: i32) -> (i32, i32) {
    %c0_i32 = arith.constant 0 : i32
    %c0_i32_0 = arith.constant 0 : i32
    return %arg0, %c0_i32 : i32, i32
  }
}

module attributes {stable_mosaic.version = 11 : i64} {
  func.func @_vq_argmin_kernel(%arg0: i32, %arg1: memref<8x128xf32, #tpu.memory_space<vmem>>, %arg2: memref<256x128xf32, #tpu.memory_space<vmem>>, %arg3: memref<1x256xf32, #tpu.memory_space<vmem>>, %arg4: memref<8x1xi32, #tpu.memory_space<vmem>>) attributes {dimension_semantics = [#tpu.dimension_semantics<arbitrary>], iteration_bounds = array<i64: 1>, scalar_prefetch = 0 : i64, scratch_operands = 0 : i64, tpu.core_type = #tpu.core_type<tc>, window_params = [{pipeline_mode = #tpu.pipeline_mode<synchronous>, transform_indices = @transform_0, window_bounds = array<i64: 8, 128>}, {pipeline_mode = #tpu.pipeline_mode<synchronous>, transform_indices = @transform_1, window_bounds = array<i64: 256, 128>}, {pipeline_mode = #tpu.pipeline_mode<synchronous>, transform_indices = @transform_2, window_bounds = array<i64: 1, 256>}, {pipeline_mode = #tpu.pipeline_mode<synchronous>, transform_indices = @transform_3, window_bounds = array<i64: 8, 1>}]} {
    %c0 = arith.constant 0 : index
    %c0_0 = arith.constant 0 : index
    %0 = vector.load %arg1[%c0, %c0_0] : memref<8x128xf32, #tpu.memory_space<vmem>>, vector<8x128xf32>
    %1 = arith.mulf %0, %0 : vector<8x128xf32>
    %cst = arith.constant dense<0.000000e+00> : vector<8xf32>
    %2 = vector.multi_reduction <add>, %1, %cst [1] : vector<8x128xf32> to vector<8xf32>
    %3 = vector.shape_cast %2 : vector<8xf32> to vector<8x1xf32>
    %4 = arith.truncf %0 : vector<8x128xf32> to vector<8x128xbf16>
    %c0_1 = arith.constant 0 : index
    %c0_2 = arith.constant 0 : index
    %5 = vector.load %arg2[%c0_1, %c0_2] : memref<256x128xf32, #tpu.memory_space<vmem>>, vector<256x128xf32>
    %6 = arith.truncf %5 : vector<256x128xf32> to vector<256x128xbf16>
    %cst_3 = arith.constant dense<0.000000e+00> : vector<8x256xf32>
    %7 = tpu.matmul %4, %6, %cst_3 {dimension_numbers = #tpu.dot_dimension_numbers<[1], [1], [0], [0], [0, 0, 1, 0], [], []>} : vector<8x128xbf16>, vector<256x128xbf16>, vector<8x256xf32> -> vector<8x256xf32>
    %c0_4 = arith.constant 0 : index
    %c0_5 = arith.constant 0 : index
    %8 = vector.load %arg3[%c0_4, %c0_5] : memref<1x256xf32, #tpu.memory_space<vmem>>, vector<1x256xf32>
    %9 = vector.broadcast %3 : vector<8x1xf32> to vector<8x256xf32>
    %10 = vector.broadcast %8 : vector<1x256xf32> to vector<8x256xf32>
    %11 = arith.addf %9, %10 : vector<8x256xf32>
    %cst_6 = arith.constant 2.000000e+00 : f32
    %12 = vector.broadcast %cst_6 : f32 to vector<8x256xf32>
    %13 = arith.mulf %12, %7 : vector<8x256xf32>
    %14 = arith.subf %11, %13 : vector<8x256xf32>
    %15 = tpu.reduce_index %14 {axis = 1 : i32, kind = #tpu.reduction_kind<arg_min>} : vector<8x256xf32> -> vector<8xi32>
    %16 = vector.shape_cast %15 : vector<8xi32> to vector<8x1xi32>
    %c0_7 = arith.constant 0 : index
    %c0_8 = arith.constant 0 : index
    %17 = vector.load %arg4[%c0_7, %c0_8] : memref<8x1xi32, #tpu.memory_space<vmem>>, vector<8x1xi32>
    tpu.vector_store %arg4[%c0_7, %c0_8], %16 {strides = array<i32>} : memref<8x1xi32, #tpu.memory_space<vmem>>, vector<8x1xi32>,
    return
  }
  func.func @transform_0(%arg0: i32) -> (i32, i32) {
    %c0_i32 = arith.constant 0 : i32
    %c0_i32_0 = arith.constant 0 : i32
    %c0_i32_1 = arith.constant 0 : i32
    return %c0_i32, %c0_i32_0 : i32, i32
  }
  func.func @transform_1(%arg0: i32) -> (i32, i32) {
    %c0_i32 = arith.constant 0 : i32
    %c0_i32_0 = arith.constant 0 : i32
    %c0_i32_1 = arith.constant 0 : i32
    return %c0_i32, %c0_i32_0 : i32, i32
  }
  func.func @transform_2(%arg0: i32) -> (i32, i32) {
    %c0_i32 = arith.constant 0 : i32
    %c0_i32_0 = arith.constant 0 : i32
    %c0_i32_1 = arith.constant 0 : i32
    return %c0_i32, %c0_i32_0 : i32, i32
  }
  func.func @transform_3(%arg0: i32) -> (i32, i32) {
    %c0_i32 = arith.constant 0 : i32
    %c0_i32_0 = arith.constant 0 : i32
    %c0_i32_1 = arith.constant 0 : i32
    return %c0_i32, %c0_i32_0 : i32, i32
  }
}

module attributes {stable_mosaic.version = 11 : i64} {
  func.func @_gemm_bias_act_kernel(%arg0: i32, %arg1: memref<8x1152xbf16, #tpu.memory_space<vmem>>, %arg2: memref<1152x1024xbf16, #tpu.memory_space<vmem>>, %arg3: memref<1x1024xf32, #tpu.memory_space<vmem>>, %arg4: memref<8x1024xbf16, #tpu.memory_space<vmem>>) attributes {dimension_semantics = [#tpu.dimension_semantics<parallel>], iteration_bounds = array<i64: 1>, scalar_prefetch = 0 : i64, scratch_operands = 0 : i64, tpu.core_type = #tpu.core_type<tc>, window_params = [{transform_indices = @transform_0, window_bounds = array<i64: 8, 1152>}, {pipeline_mode = #tpu.pipeline_mode<synchronous>, transform_indices = @transform_1, window_bounds = array<i64: 1152, 1024>}, {pipeline_mode = #tpu.pipeline_mode<synchronous>, transform_indices = @transform_2, window_bounds = array<i64: 1, 1024>}, {transform_indices = @transform_3, window_bounds = array<i64: 8, 1024>}]} {
    %c0 = arith.constant 0 : index
    %c0_0 = arith.constant 0 : index
    %0 = vector.load %arg1[%c0, %c0_0] : memref<8x1152xbf16, #tpu.memory_space<vmem>>, vector<8x1152xbf16>
    %c0_1 = arith.constant 0 : index
    %c0_2 = arith.constant 0 : index
    %1 = vector.load %arg2[%c0_1, %c0_2] : memref<1152x1024xbf16, #tpu.memory_space<vmem>>, vector<1152x1024xbf16>
    %cst = arith.constant dense<0.000000e+00> : vector<8x1024xf32>
    %2 = tpu.matmul %0, %1, %cst {dimension_numbers = #tpu.dot_dimension_numbers<[1], [0], [0], [1], [0, 0, 1, 1], [], []>} : vector<8x1152xbf16>, vector<1152x1024xbf16>, vector<8x1024xf32> -> vector<8x1024xf32>
    %c0_3 = arith.constant 0 : index
    %c0_4 = arith.constant 0 : index
    %3 = vector.load %arg3[%c0_3, %c0_4] : memref<1x1024xf32, #tpu.memory_space<vmem>>, vector<1x1024xf32>
    %4 = vector.broadcast %3 : vector<1x1024xf32> to vector<8x1024xf32>
    %5 = arith.addf %2, %4 : vector<8x1024xf32>
    %cst_5 = arith.constant 0.000000e+00 : f32
    %6 = vector.broadcast %cst_5 : f32 to vector<8x1024xf32>
    %7 = arith.maximumf %5, %6 : vector<8x1024xf32>
    %8 = arith.truncf %7 : vector<8x1024xf32> to vector<8x1024xbf16>
    %c0_6 = arith.constant 0 : index
    %c0_7 = arith.constant 0 : index
    %9 = vector.load %arg4[%c0_6, %c0_7] : memref<8x1024xbf16, #tpu.memory_space<vmem>>, vector<8x1024xbf16>
    tpu.vector_store %arg4[%c0_6, %c0_7], %8 {strides = array<i32>} : memref<8x1024xbf16, #tpu.memory_space<vmem>>, vector<8x1024xbf16>,
    return
  }
  func.func @transform_0(%arg0: i32) -> (i32, i32) {
    %c0_i32 = arith.constant 0 : i32
    %c0_i32_0 = arith.constant 0 : i32
    return %arg0, %c0_i32 : i32, i32
  }
  func.func @transform_1(%arg0: i32) -> (i32, i32) {
    %c0_i32 = arith.constant 0 : i32
    %c0_i32_0 = arith.constant 0 : i32
    %c0_i32_1 = arith.constant 0 : i32
    return %c0_i32, %c0_i32_0 : i32, i32
  }
  func.func @transform_2(%arg0: i32) -> (i32, i32) {
    %c0_i32 = arith.constant 0 : i32
    %c0_i32_0 = arith.constant 0 : i32
    %c0_i32_1 = arith.constant 0 : i32
    return %c0_i32, %c0_i32_0 : i32, i32
  }
  func.func @transform_3(%arg0: i32) -> (i32, i32) {
    %c0_i32 = arith.constant 0 : i32
    %c0_i32_0 = arith.constant 0 : i32
    return %arg0, %c0_i32 : i32, i32
  }
}

module attributes {stable_mosaic.version = 11 : i64} {
  func.func @_gemm_bias_act_kernel(%arg0: i32, %arg1: memref<32x2304xbf16, #tpu.memory_space<vmem>>, %arg2: memref<2304x512xbf16, #tpu.memory_space<vmem>>, %arg3: memref<1x512xf32, #tpu.memory_space<vmem>>, %arg4: memref<32x512xbf16, #tpu.memory_space<vmem>>) attributes {dimension_semantics = [#tpu.dimension_semantics<parallel>], iteration_bounds = array<i64: 1>, scalar_prefetch = 0 : i64, scratch_operands = 0 : i64, tpu.core_type = #tpu.core_type<tc>, window_params = [{transform_indices = @transform_0, window_bounds = array<i64: 32, 2304>}, {pipeline_mode = #tpu.pipeline_mode<synchronous>, transform_indices = @transform_1, window_bounds = array<i64: 2304, 512>}, {pipeline_mode = #tpu.pipeline_mode<synchronous>, transform_indices = @transform_2, window_bounds = array<i64: 1, 512>}, {transform_indices = @transform_3, window_bounds = array<i64: 32, 512>}]} {
    %c0 = arith.constant 0 : index
    %c0_0 = arith.constant 0 : index
    %0 = vector.load %arg1[%c0, %c0_0] : memref<32x2304xbf16, #tpu.memory_space<vmem>>, vector<32x2304xbf16>
    %c0_1 = arith.constant 0 : index
    %c0_2 = arith.constant 0 : index
    %1 = vector.load %arg2[%c0_1, %c0_2] : memref<2304x512xbf16, #tpu.memory_space<vmem>>, vector<2304x512xbf16>
    %cst = arith.constant dense<0.000000e+00> : vector<32x512xf32>
    %2 = tpu.matmul %0, %1, %cst {dimension_numbers = #tpu.dot_dimension_numbers<[1], [0], [0], [1], [0, 0, 1, 1], [], []>} : vector<32x2304xbf16>, vector<2304x512xbf16>, vector<32x512xf32> -> vector<32x512xf32>
    %c0_3 = arith.constant 0 : index
    %c0_4 = arith.constant 0 : index
    %3 = vector.load %arg3[%c0_3, %c0_4] : memref<1x512xf32, #tpu.memory_space<vmem>>, vector<1x512xf32>
    %4 = vector.broadcast %3 : vector<1x512xf32> to vector<32x512xf32>
    %5 = arith.addf %2, %4 : vector<32x512xf32>
    %cst_5 = arith.constant 0.000000e+00 : f32
    %6 = vector.broadcast %cst_5 : f32 to vector<32x512xf32>
    %7 = arith.maximumf %5, %6 : vector<32x512xf32>
    %8 = arith.truncf %7 : vector<32x512xf32> to vector<32x512xbf16>
    %c0_6 = arith.constant 0 : index
    %c0_7 = arith.constant 0 : index
    %9 = vector.load %arg4[%c0_6, %c0_7] : memref<32x512xbf16, #tpu.memory_space<vmem>>, vector<32x512xbf16>
    tpu.vector_store %arg4[%c0_6, %c0_7], %8 {strides = array<i32>} : memref<32x512xbf16, #tpu.memory_space<vmem>>, vector<32x512xbf16>,
    return
  }
  func.func @transform_0(%arg0: i32) -> (i32, i32) {
    %c0_i32 = arith.constant 0 : i32
    %c0_i32_0 = arith.constant 0 : i32
    return %arg0, %c0_i32 : i32, i32
  }
  func.func @transform_1(%arg0: i32) -> (i32, i32) {
    %c0_i32 = arith.constant 0 : i32
    %c0_i32_0 = arith.constant 0 : i32
    %c0_i32_1 = arith.constant 0 : i32
    return %c0_i32, %c0_i32_0 : i32, i32
  }
  func.func @transform_2(%arg0: i32) -> (i32, i32) {
    %c0_i32 = arith.constant 0 : i32
    %c0_i32_0 = arith.constant 0 : i32
    %c0_i32_1 = arith.constant 0 : i32
    return %c0_i32, %c0_i32_0 : i32, i32
  }
  func.func @transform_3(%arg0: i32) -> (i32, i32) {
    %c0_i32 = arith.constant 0 : i32
    %c0_i32_0 = arith.constant 0 : i32
    return %arg0, %c0_i32 : i32, i32
  }
}

module attributes {stable_mosaic.version = 11 : i64} {
  func.func @_gemm_bias_act_kernel(%arg0: i32, %arg1: memref<128x1152xbf16, #tpu.memory_space<vmem>>, %arg2: memref<1152x256xbf16, #tpu.memory_space<vmem>>, %arg3: memref<1x256xf32, #tpu.memory_space<vmem>>, %arg4: memref<128x256xbf16, #tpu.memory_space<vmem>>) attributes {dimension_semantics = [#tpu.dimension_semantics<parallel>], iteration_bounds = array<i64: 1>, scalar_prefetch = 0 : i64, scratch_operands = 0 : i64, tpu.core_type = #tpu.core_type<tc>, window_params = [{transform_indices = @transform_0, window_bounds = array<i64: 128, 1152>}, {pipeline_mode = #tpu.pipeline_mode<synchronous>, transform_indices = @transform_1, window_bounds = array<i64: 1152, 256>}, {pipeline_mode = #tpu.pipeline_mode<synchronous>, transform_indices = @transform_2, window_bounds = array<i64: 1, 256>}, {transform_indices = @transform_3, window_bounds = array<i64: 128, 256>}]} {
    %c0 = arith.constant 0 : index
    %c0_0 = arith.constant 0 : index
    %0 = vector.load %arg1[%c0, %c0_0] : memref<128x1152xbf16, #tpu.memory_space<vmem>>, vector<128x1152xbf16>
    %c0_1 = arith.constant 0 : index
    %c0_2 = arith.constant 0 : index
    %1 = vector.load %arg2[%c0_1, %c0_2] : memref<1152x256xbf16, #tpu.memory_space<vmem>>, vector<1152x256xbf16>
    %cst = arith.constant dense<0.000000e+00> : vector<128x256xf32>
    %2 = tpu.matmul %0, %1, %cst {dimension_numbers = #tpu.dot_dimension_numbers<[1], [0], [0], [1], [0, 0, 1, 1], [], []>} : vector<128x1152xbf16>, vector<1152x256xbf16>, vector<128x256xf32> -> vector<128x256xf32>
    %c0_3 = arith.constant 0 : index
    %c0_4 = arith.constant 0 : index
    %3 = vector.load %arg3[%c0_3, %c0_4] : memref<1x256xf32, #tpu.memory_space<vmem>>, vector<1x256xf32>
    %4 = vector.broadcast %3 : vector<1x256xf32> to vector<128x256xf32>
    %5 = arith.addf %2, %4 : vector<128x256xf32>
    %6 = arith.truncf %5 : vector<128x256xf32> to vector<128x256xbf16>
    %c0_5 = arith.constant 0 : index
    %c0_6 = arith.constant 0 : index
    %7 = vector.load %arg4[%c0_5, %c0_6] : memref<128x256xbf16, #tpu.memory_space<vmem>>, vector<128x256xbf16>
    tpu.vector_store %arg4[%c0_5, %c0_6], %6 {strides = array<i32>} : memref<128x256xbf16, #tpu.memory_space<vmem>>, vector<128x256xbf16>,
    return
  }
  func.func @transform_0(%arg0: i32) -> (i32, i32) {
    %c0_i32 = arith.constant 0 : i32
    %c0_i32_0 = arith.constant 0 : i32
    return %arg0, %c0_i32 : i32, i32
  }
  func.func @transform_1(%arg0: i32) -> (i32, i32) {
    %c0_i32 = arith.constant 0 : i32
    %c0_i32_0 = arith.constant 0 : i32
    %c0_i32_1 = arith.constant 0 : i32
    return %c0_i32, %c0_i32_0 : i32, i32
  }
  func.func @transform_2(%arg0: i32) -> (i32, i32) {
    %c0_i32 = arith.constant 0 : i32
    %c0_i32_0 = arith.constant 0 : i32
    %c0_i32_1 = arith.constant 0 : i32
    return %c0_i32, %c0_i32_0 : i32, i32
  }
  func.func @transform_3(%arg0: i32) -> (i32, i32) {
    %c0_i32 = arith.constant 0 : i32
    %c0_i32_0 = arith.constant 0 : i32
    return %arg0, %c0_i32 : i32, i32
  }
}

module attributes {stable_mosaic.version = 11 : i64} {
  func.func @_gemm_bias_act_kernel(%arg0: i32, %arg1: memref<256x576xbf16, #tpu.memory_space<vmem>>, %arg2: memref<576x128xbf16, #tpu.memory_space<vmem>>, %arg3: memref<1x128xf32, #tpu.memory_space<vmem>>, %arg4: memref<256x128xf32, #tpu.memory_space<vmem>>) attributes {dimension_semantics = [#tpu.dimension_semantics<parallel>], iteration_bounds = array<i64: 2>, scalar_prefetch = 0 : i64, scratch_operands = 0 : i64, tpu.core_type = #tpu.core_type<tc>, window_params = [{transform_indices = @transform_0, window_bounds = array<i64: 256, 576>}, {pipeline_mode = #tpu.pipeline_mode<synchronous>, transform_indices = @transform_1, window_bounds = array<i64: 576, 128>}, {pipeline_mode = #tpu.pipeline_mode<synchronous>, transform_indices = @transform_2, window_bounds = array<i64: 1, 128>}, {transform_indices = @transform_3, window_bounds = array<i64: 256, 128>}]} {
    %c0 = arith.constant 0 : index
    %c0_0 = arith.constant 0 : index
    %0 = vector.load %arg1[%c0, %c0_0] : memref<256x576xbf16, #tpu.memory_space<vmem>>, vector<256x576xbf16>
    %c0_1 = arith.constant 0 : index
    %c0_2 = arith.constant 0 : index
    %1 = vector.load %arg2[%c0_1, %c0_2] : memref<576x128xbf16, #tpu.memory_space<vmem>>, vector<576x128xbf16>
    %cst = arith.constant dense<0.000000e+00> : vector<256x128xf32>
    %2 = tpu.matmul %0, %1, %cst {dimension_numbers = #tpu.dot_dimension_numbers<[1], [0], [0], [1], [0, 0, 1, 1], [], []>} : vector<256x576xbf16>, vector<576x128xbf16>, vector<256x128xf32> -> vector<256x128xf32>
    %c0_3 = arith.constant 0 : index
    %c0_4 = arith.constant 0 : index
    %3 = vector.load %arg3[%c0_3, %c0_4] : memref<1x128xf32, #tpu.memory_space<vmem>>, vector<1x128xf32>
    %4 = vector.broadcast %3 : vector<1x128xf32> to vector<256x128xf32>
    %5 = arith.addf %2, %4 : vector<256x128xf32>
    %6 = math.tanh %5 : vector<256x128xf32>
    %c0_5 = arith.constant 0 : index
    %c0_6 = arith.constant 0 : index
    %7 = vector.load %arg4[%c0_5, %c0_6] : memref<256x128xf32, #tpu.memory_space<vmem>>, vector<256x128xf32>
    tpu.vector_store %arg4[%c0_5, %c0_6], %6 {strides = array<i32>} : memref<256x128xf32, #tpu.memory_space<vmem>>, vector<256x128xf32>,
    return
  }
  func.func @transform_0(%arg0: i32) -> (i32, i32) {
    %c0_i32 = arith.constant 0 : i32
    %c0_i32_0 = arith.constant 0 : i32
    return %arg0, %c0_i32 : i32, i32
  }
  func.func @transform_1(%arg0: i32) -> (i32, i32) {
    %c0_i32 = arith.constant 0 : i32
    %c0_i32_0 = arith.constant 0 : i32
    %c0_i32_1 = arith.constant 0 : i32
    return %c0_i32, %c0_i32_0 : i32, i32
  }
  func.func @transform_2(%arg0: i32) -> (i32, i32) {
    %c0_i32 = arith.constant 0 : i32
    %c0_i32_0 = arith.constant 0 : i32
    %c0_i32_1 = arith.constant 0 : i32
    return %c0_i32, %c0_i32_0 : i32, i32
  }
  func.func @transform_3(%arg0: i32) -> (i32, i32) {
    %c0_i32 = arith.constant 0 : i32
    %c0_i32_0 = arith.constant 0 : i32
    return %arg0, %c0_i32 : i32, i32
  }
}

</mosaic_0001>

<bundles_post_ra>
// kernel: enhanced_vqvae_forward.9
= control target key start
LH: loop header
LB: loop body
LE: loop exit
PB: predicated region body
PF: predicated region fallthrough
CT: control target
= control target key end

     0   :  { %vm327_vm0 = vcmask 519168   ;;  %s612_s1 = inlined_call_operand.vmem [shape: bf16[128,64], index: 1, kind: input, shape index: {}]   ;;  %s613_s0 = inlined_call_operand.vmem [shape: bf16[128,128], index: 0, kind: input, shape index: {}]   ;;  %s614_s2 = inlined_call_operand.vmem [shape: f32[1,64], index: 2, kind: input, shape index: {}]   ;;  %s615_s3 = inlined_call_operand.vmem [shape: bf16[128,64], index: 3, kind: output, shape index: {}]  }
   0x1   :  { %v461_v0 = vld [vmem:[%s612_s1] sm:$0xff]   ;;  %v462_v1 = vld [vmem:[%s612_s1 + $0x8] sm:$0xff]   ;;  %v463_v2 = vld [vmem:[%s612_s1 + $0x10] sm:$0xff]  }
   0x2   :  { %413 = vmatprep.subr.bf16.mxu0 %v461_v0  ;;  %445 = vmatprep.subr.bf16.mxu1 %v461_v0  ;;  %v464_v3 = vld [vmem:[%s612_s1 + $0x18] sm:$0xff]   ;;  %v469_v4 = vld [vmem:[%s613_s0] sm:$0xff]   ;;  %v466_v7 = vld [vmem:[%s612_s1 + $0x28] sm:$0xff]  }
   0x3   :  { %414 = vmatpush3.bf16.msra.mxu0 %v461_v0  ;;  %453 = vmatpush3.bf16.msra.mxu1 %v461_v0  ;;  %v470_v5 = vld [vmem:[%s613_s0 + $0x20] sm:$0xff]   ;;  %v467_v8 = vld [vmem:[%s612_s1 + $0x30] sm:$0xff]   ;;  %v468_v9 = vld [vmem:[%s612_s1 + $0x38] sm:$0xff]  }
   0x4   :  { %415 = vmatprep.subr.bf16.mxu0 %v462_v1  ;;  %446 = vmatprep.subr.bf16.mxu1 %v462_v1  ;;  %v465_v6 = vld [vmem:[%s612_s1 + $0x20] sm:$0xff]   ;;  %v471_v10 = vld [vmem:[%s613_s0 + $0x8] sm:$0xff]   ;;  %v473_v12 = vld [vmem:[%s613_s0 + $0x10] sm:$0xff]  }
   0x5   :  { %429 = vmatprep.mubr.bf16.mxu0 %v469_v4  ;;  %437 = vmatprep.mubr.bf16.mxu1 %v470_v5  ;;  %v472_v11 = vld [vmem:[%s613_s0 + $0x28] sm:$0xff]   ;;  %v474_v13 = vld [vmem:[%s613_s0 + $0x30] sm:$0xff]   ;;  %v475_v14 = vld [vmem:[%s613_s0 + $0x18] sm:$0xff]  }
   0x6   :  { %v476_v15 = vld [vmem:[%s613_s0 + $0x38] sm:$0xff]   ;;  %v348_v16 = vld [vmem:[%s614_s2] ss:$0 sm:$0xff] }
   0x7   :  { %416 = vmatpush3.bf16.msra.mxu0 %v462_v1  ;;  %454 = vmatpush3.bf16.msra.mxu1 %v462_v1 }
   0x8   :  { %417 = vmatprep.subr.bf16.mxu0 %v463_v2  ;;  %447 = vmatprep.subr.bf16.mxu1 %v463_v2 }
   0xb   :  { %418 = vmatpush3.bf16.msra.mxu0 %v463_v2  ;;  %455 = vmatpush3.bf16.msra.mxu1 %v463_v2 }
   0xc   :  { %419 = vmatprep.subr.bf16.mxu0 %v464_v3  ;;  %448 = vmatprep.subr.bf16.mxu1 %v464_v3 }
   0xf   :  { %420 = vmatpush3.bf16.msra.mxu0 %v464_v3  ;;  %456 = vmatpush3.bf16.msra.mxu1 %v464_v3 }
  0x10   :  { %421 = vmatprep.subr.bf16.mxu0 %v465_v6  ;;  %449 = vmatprep.subr.bf16.mxu1 %v465_v6 }
  0x13   :  { %422 = vmatpush3.bf16.msra.mxu0 %v465_v6  ;;  %457 = vmatpush3.bf16.msra.mxu1 %v465_v6 }
  0x14   :  { %423 = vmatprep.subr.bf16.mxu0 %v466_v7  ;;  %450 = vmatprep.subr.bf16.mxu1 %v466_v7 }
  0x17   :  { %424 = vmatpush3.bf16.msra.mxu0 %v466_v7  ;;  %458 = vmatpush3.bf16.msra.mxu1 %v466_v7 }
  0x18   :  { %425 = vmatprep.subr.bf16.mxu0 %v467_v8  ;;  %451 = vmatprep.subr.bf16.mxu1 %v467_v8 }
  0x1b   :  { %426 = vmatpush3.bf16.msra.mxu0 %v467_v8  ;;  %459 = vmatpush3.bf16.msra.mxu1 %v467_v8 }
  0x1c   :  { %427 = vmatprep.subr.bf16.mxu0 %v468_v9  ;;  %452 = vmatprep.subr.bf16.mxu1 %v468_v9 }
  0x1f   :  { %428 = vmatpush3.bf16.msra.mxu0 %v468_v9  ;;  %460 = vmatpush3.bf16.msra.mxu1 %v468_v9 }
  0x22   :  { %430 = vmatmul.mubr.bf16.vlgmr.msra.gmra.mrb[0].mxu0 %v471_v10  ;;  %438 = vmatmul.mubr.bf16.vlgmr.msra.gmra.mrb[0].mxu1 %v472_v11 }
  0x23   :  { %433 = vmatprep.mubr.bf16.mxu0 %v473_v12  ;;  %441 = vmatprep.mubr.bf16.mxu1 %v474_v13 }
  0x2a   :  { %434 = vmatmul.mubr.bf16.gmra.mrb[4].mxu0 %v475_v14  ;;  %442 = vmatmul.mubr.bf16.gmra.mrb[4].mxu1 %v476_v15 }
  0xf5   :  { %v431_v17 = vpop.f32.mrb[0].mxu0  ;;  %v439_v18 = vpop.f32.mrb[0].mxu1 }
  0xf6   :  { %v193_v19 = vadd.f32 %v431_v17, %v348_v16  ;;  %v225_v20 = vadd.f32 %v439_v18, %v348_v16  ;;  %v184_v21 = vpop.f32.mrb[1].mxu0  ;;  %v216_v22 = vpop.f32.mrb[1].mxu1 }
  0xf7   :  { %v185_v23 = vadd.f32 %v348_v16, %v184_v21  ;;  %v217_v24 = vadd.f32 %v348_v16, %v216_v22  ;;  %v432_v25 = vpop.f32.mrb[2].mxu0  ;;  %v440_v26 = vpop.f32.mrb[2].mxu1 }
  0xf8   :  { %v249_v27 = vmax.f32 %v193_v19, 0.0  ;;  %v257_v28 = vmax.f32 %v225_v20, 0.0  ;;  %v196_v29 = vadd.f32 %v432_v25, %v348_v16  ;;  %v228_v30 = vadd.f32 %v440_v26, %v348_v16  ;;  %v187_v31 = vpop.f32.mrb[3].mxu0  ;;  %v219_v32 = vpop.f32.mrb[3].mxu1 }
  0xf9   :  { %v247_v33 = vmax.f32 %v185_v23, 0.0  ;;  %v255_v34 = vmax.f32 %v217_v24, 0.0  ;;  %v188_v35 = vadd.f32 %v348_v16, %v187_v31  ;;  %v220_v36 = vadd.f32 %v348_v16, %v219_v32 }
  0xfa   :  { %v383_v37 = vpack.c.bf16 %v249_v27, %v249_v27  ;;  %v391_v38 = vpack.c.bf16 %v257_v28, %v257_v28  ;;  %v250_v39 = vmax.f32 %v196_v29, 0.0  ;;  %v258_v40 = vmax.f32 %v228_v30, 0.0 }
  0xfb   :  { %v381_v41 = vpack.c.bf16 %v247_v33, %v247_v33  ;;  %v389_v42 = vpack.c.bf16 %v255_v34, %v255_v34  ;;  %v248_v43 = vmax.f32 %v188_v35, 0.0  ;;  %v256_v44 = vmax.f32 %v220_v36, 0.0 }
  0xfc   :  { %330 = vst.msk [vmem:[%s615_s3 + $0x8] sm:$0xf] %vm327_vm0, %v383_v37  ;;  %338 = vst.msk [vmem:[%s615_s3 + $0x28] sm:$0xf] %vm327_vm0, %v391_v38  ;;  %v384_v45 = vpack.c.bf16 %v250_v39, %v250_v39  ;;  %v392_v46 = vpack.c.bf16 %v258_v40, %v258_v40 }
  0xfd   :  { %328 = vst.msk [vmem:[%s615_s3] sm:$0xf] %vm327_vm0, %v381_v41  ;;  %336 = vst.msk [vmem:[%s615_s3 + $0x20] sm:$0xf] %vm327_vm0, %v389_v42  ;;  %v382_v47 = vpack.c.bf16 %v248_v43, %v248_v43  ;;  %v390_v48 = vpack.c.bf16 %v256_v44, %v256_v44  ;;  %v435_v49 = vpop.f32.mrb[4].mxu0  ;;  %v443_v50 = vpop.f32.mrb[4].mxu1 }
  0xfe   :  { %331 = vst.msk [vmem:[%s615_s3 + $0xc] sm:$0xf] %vm327_vm0, %v384_v45  ;;  %339 = vst.msk [vmem:[%s615_s3 + $0x2c] sm:$0xf] %vm327_vm0, %v392_v46  ;;  %v209_v51 = vadd.f32 %v435_v49, %v348_v16  ;;  %v241_v52 = vadd.f32 %v443_v50, %v348_v16  ;;  %v200_v53 = vpop.f32.mrb[5].mxu0  ;;  %v232_v54 = vpop.f32.mrb[5].mxu1 }
  0xff   :  { %329 = vst.msk [vmem:[%s615_s3 + $0x4] sm:$0xf] %vm327_vm0, %v382_v47  ;;  %337 = vst.msk [vmem:[%s615_s3 + $0x24] sm:$0xf] %vm327_vm0, %v390_v48  ;;  %v201_v55 = vadd.f32 %v348_v16, %v200_v53  ;;  %v233_v56 = vadd.f32 %v348_v16, %v232_v54  ;;  %v436_v57 = vpop.f32.mrb[6].mxu0  ;;  %v444_v58 = vpop.f32.mrb[6].mxu1 }
 0x100   :  { %v253_v59 = vmax.f32 %v209_v51, 0.0  ;;  %v261_v60 = vmax.f32 %v241_v52, 0.0  ;;  %v212_v61 = vadd.f32 %v436_v57, %v348_v16  ;;  %v244_v62 = vadd.f32 %v444_v58, %v348_v16  ;;  %v203_v63 = vpop.f32.mrb[7].mxu0  ;;  %v235_v0 = vpop.f32.mrb[7].mxu1 }
 0x101   :  { %v251_v1 = vmax.f32 %v201_v55, 0.0  ;;  %v259_v2 = vmax.f32 %v233_v56, 0.0  ;;  %v204_v3 = vadd.f32 %v348_v16, %v203_v63  ;;  %v236_v4 = vadd.f32 %v348_v16, %v235_v0 }
 0x102   :  { %v387_v5 = vpack.c.bf16 %v253_v59, %v253_v59  ;;  %v395_v6 = vpack.c.bf16 %v261_v60, %v261_v60  ;;  %v254_v7 = vmax.f32 %v212_v61, 0.0  ;;  %v262_v8 = vmax.f32 %v244_v62, 0.0 }
 0x103   :  { %v385_v9 = vpack.c.bf16 %v251_v1, %v251_v1  ;;  %v393_v10 = vpack.c.bf16 %v259_v2, %v259_v2  ;;  %v252_v11 = vmax.f32 %v204_v3, 0.0  ;;  %v260_v12 = vmax.f32 %v236_v4, 0.0 }
 0x104   :  { %334 = vst.msk [vmem:[%s615_s3 + $0x18] sm:$0xf] %vm327_vm0, %v387_v5  ;;  %342 = vst.msk [vmem:[%s615_s3 + $0x38] sm:$0xf] %vm327_vm0, %v395_v6  ;;  %v388_v13 = vpack.c.bf16 %v254_v7, %v254_v7  ;;  %v396_v14 = vpack.c.bf16 %v262_v8, %v262_v8 }
 0x105   :  { %332 = vst.msk [vmem:[%s615_s3 + $0x10] sm:$0xf] %vm327_vm0, %v385_v9  ;;  %340 = vst.msk [vmem:[%s615_s3 + $0x30] sm:$0xf] %vm327_vm0, %v393_v10  ;;  %v386_v15 = vpack.c.bf16 %v252_v11, %v252_v11  ;;  %v394_v16 = vpack.c.bf16 %v260_v12, %v260_v12 }
 0x106   :  { %335 = vst.msk [vmem:[%s615_s3 + $0x1c] sm:$0xf] %vm327_vm0, %v388_v13  ;;  %343 = vst.msk [vmem:[%s615_s3 + $0x3c] sm:$0xf] %vm327_vm0, %v396_v14 }
 0x107   :  { %333 = vst.msk [vmem:[%s615_s3 + $0x14] sm:$0xf] %vm327_vm0, %v386_v15  ;;  %341 = vst.msk [vmem:[%s615_s3 + $0x34] sm:$0xf] %vm327_vm0, %v394_v16 }

// kernel: enhanced_vqvae_forward.10
= control target key start
LH: loop header
LB: loop body
LE: loop exit
PB: predicated region body
PF: predicated region fallthrough
CT: control target
= control target key end

     0   :  { %s1399_s1 = inlined_call_operand.vmem [shape: bf16[1024,128], index: 1, kind: input, shape index: {}]   ;;  %s1400_s0 = inlined_call_operand.vmem [shape: bf16[32,1024], index: 0, kind: input, shape index: {}]   ;;  %s1401_s2 = inlined_call_operand.vmem [shape: f32[1,128], index: 2, kind: input, shape index: {}]   ;;  %s1402_s3 = inlined_call_operand.vmem [shape: bf16[32,128], index: 3, kind: output, shape index: {}]  }
   0x1   :  { %v1066_v0 = vld [vmem:[%s1399_s1 + $0x40] sm:$0xff]   ;;  %v1070_v4 = vld [vmem:[%s1399_s1 + $0x48] sm:$0xff]   ;;  %v1074_v8 = vld [vmem:[%s1399_s1 + $0x50] sm:$0xff]  }
   0x2   :  { %v1067_v1 = vld [vmem:[%s1399_s1 + $0xc0] sm:$0xff]   ;;  %954 = vmatprep.subr.bf16.mxu0 %v1066_v0  ;;  %v1071_v5 = vld [vmem:[%s1399_s1 + $0xc8] sm:$0xff]   ;;  %v1075_v9 = vld [vmem:[%s1399_s1 + $0xd0] sm:$0xff]  }
   0x3   :  { %v1068_v2 = vld [vmem:[%s1399_s1] sm:$0xff]   ;;  %982 = vmatprep.subr.bf16.mxu1 %v1067_v1  ;;  %v1072_v6 = vld [vmem:[%s1399_s1 + $0x8] sm:$0xff]   ;;  %v1076_v10 = vld [vmem:[%s1399_s1 + $0x10] sm:$0xff]  }
   0x4   :  { %v1069_v3 = vld [vmem:[%s1399_s1 + $0x80] sm:$0xff]   ;;  %955 = vmatpush3.bf16.msra.mxu0 %v1068_v2  ;;  %v1073_v7 = vld [vmem:[%s1399_s1 + $0x88] sm:$0xff]   ;;  %v1077_v11 = vld [vmem:[%s1399_s1 + $0x90] sm:$0xff]  }
   0x5   :  { %983 = vmatpush3.bf16.msra.mxu1 %v1069_v3  ;;  %956 = vmatprep.subr.bf16.mxu0 %v1070_v4  ;;  %v1078_v12 = vld [vmem:[%s1399_s1 + $0x58] sm:$0xff]   ;;  %v1082_v16 = vld [vmem:[%s1399_s1 + $0x60] sm:$0xff]   ;;  %v1086_v20 = vld [vmem:[%s1399_s1 + $0x68] sm:$0xff]  }
   0x6   :  { %984 = vmatprep.subr.bf16.mxu1 %v1071_v5  ;;  %v1079_v13 = vld [vmem:[%s1399_s1 + $0xd8] sm:$0xff]   ;;  %v1083_v17 = vld [vmem:[%s1399_s1 + $0xe0] sm:$0xff]   ;;  %v1087_v21 = vld [vmem:[%s1399_s1 + $0xe8] sm:$0xff]  }
   0x7   :  { %v1080_v14 = vld [vmem:[%s1399_s1 + $0x18] sm:$0xff]   ;;  %v1084_v18 = vld [vmem:[%s1399_s1 + $0x20] sm:$0xff]   ;;  %v1088_v22 = vld [vmem:[%s1399_s1 + $0x28] sm:$0xff]  }
   0x8   :  { %957 = vmatpush3.bf16.msra.mxu0 %v1072_v6  ;;  %v1081_v15 = vld [vmem:[%s1399_s1 + $0x98] sm:$0xff]   ;;  %v1085_v19 = vld [vmem:[%s1399_s1 + $0xa0] sm:$0xff]   ;;  %v1089_v23 = vld [vmem:[%s1399_s1 + $0xa8] sm:$0xff]  }
   0x9   :  { %985 = vmatpush3.bf16.msra.mxu1 %v1073_v7  ;;  %958 = vmatprep.subr.bf16.mxu0 %v1074_v8  ;;  %v1090_v24 = vld [vmem:[%s1399_s1 + $0x70] sm:$0xff]   ;;  %v1094_v28 = vld [vmem:[%s1399_s1 + $0x78] sm:$0xff]   ;;  %v15_v32 = vld [vmem:[%s1400_s0] sm:$0xff] }
   0xa   :  { %986 = vmatprep.subr.bf16.mxu1 %v1075_v9  ;;  %v1091_v25 = vld [vmem:[%s1399_s1 + $0xf0] sm:$0xff]   ;;  %v1095_v29 = vld [vmem:[%s1399_s1 + $0xf8] sm:$0xff]   ;;  %v19_v33 = vld [vmem:[%s1400_s0 + $0x20] sm:$0xff] }
   0xb   :  { %v1092_v26 = vld [vmem:[%s1399_s1 + $0x30] sm:$0xff]   ;;  %v1096_v30 = vld [vmem:[%s1399_s1 + $0x38] sm:$0xff]   ;;  %v16_v34 = vld [vmem:[%s1400_s0 + $0x8] sm:$0xff]  ;;  %v855_v35 = vcombine.low %v15_v32, %v19_v33  ;;  %v856_v36 = vcombine.high %v15_v32, %v19_v33 }
   0xc   :  { %959 = vmatpush3.bf16.msra.mxu0 %v1076_v10  ;;  %v1093_v27 = vld [vmem:[%s1399_s1 + $0xb0] sm:$0xff]   ;;  %v1097_v31 = vld [vmem:[%s1399_s1 + $0xb8] sm:$0xff]   ;;  %v20_v37 = vld [vmem:[%s1400_s0 + $0x28] sm:$0xff] }
   0xd   :  { %987 = vmatpush3.bf16.msra.mxu1 %v1077_v11  ;;  %960 = vmatprep.subr.bf16.mxu0 %v1078_v12  ;;  %v857_v38 = vcombine.low %v16_v34, %v20_v37  ;;  %v858_v39 = vcombine.high %v16_v34, %v20_v37  ;;  %v1098_v40 = vld [vmem:[%s1399_s1 + $0x140] sm:$0xff]   ;;  %v1102_v44 = vld [vmem:[%s1399_s1 + $0x148] sm:$0xff]   ;;  %v1106_v48 = vld [vmem:[%s1399_s1 + $0x150] sm:$0xff]  }
   0xe   :  { %988 = vmatprep.subr.bf16.mxu1 %v1079_v13  ;;  %662 = vmatprep.mubr.bf16.mxu0 %v856_v36  ;;  %v1099_v41 = vld [vmem:[%s1399_s1 + $0x1c0] sm:$0xff]   ;;  %v1103_v45 = vld [vmem:[%s1399_s1 + $0x1c8] sm:$0xff]   ;;  %v1107_v49 = vld [vmem:[%s1399_s1 + $0x1d0] sm:$0xff]  }
   0xf   :  { %711 = vmatprep.mubr.bf16.mxu1 %v858_v39  ;;  %v1100_v42 = vld [vmem:[%s1399_s1 + $0x100] sm:$0xff]   ;;  %v1104_v46 = vld [vmem:[%s1399_s1 + $0x108] sm:$0xff]   ;;  %v1108_v50 = vld [vmem:[%s1399_s1 + $0x110] sm:$0xff]  }
  0x10   :  { %961 = vmatpush3.bf16.msra.mxu0 %v1080_v14  ;;  %v1101_v43 = vld [vmem:[%s1399_s1 + $0x180] sm:$0xff]   ;;  %v1105_v47 = vld [vmem:[%s1399_s1 + $0x188] sm:$0xff]   ;;  %v1109_v51 = vld [vmem:[%s1399_s1 + $0x190] sm:$0xff]  }
  0x11   :  { %989 = vmatpush3.bf16.msra.mxu1 %v1081_v15  ;;  %962 = vmatprep.subr.bf16.mxu0 %v1082_v16  ;;  %v1110_v52 = vld [vmem:[%s1399_s1 + $0x158] sm:$0xff]   ;;  %v1114_v56 = vld [vmem:[%s1399_s1 + $0x160] sm:$0xff]   ;;  %v1118_v63 = vld [vmem:[%s1399_s1 + $0x168] sm:$0xff]  }
  0x12   :  { %990 = vmatprep.subr.bf16.mxu1 %v1083_v17  ;;  %v1111_v53 = vld [vmem:[%s1399_s1 + $0x1d8] sm:$0xff]   ;;  %v1115_v57 = vld [vmem:[%s1399_s1 + $0x1e0] sm:$0xff]   ;;  %v1119_v1 = vld [vmem:[%s1399_s1 + $0x1e8] sm:$0xff]  }
  0x13   :  { %v1112_v54 = vld [vmem:[%s1399_s1 + $0x118] sm:$0xff]   ;;  %v1116_v58 = vld [vmem:[%s1399_s1 + $0x120] sm:$0xff]   ;;  %v1120_v2 = vld [vmem:[%s1399_s1 + $0x128] sm:$0xff]  }
  0x14   :  { %963 = vmatpush3.bf16.msra.mxu0 %v1084_v18  ;;  %v1113_v55 = vld [vmem:[%s1399_s1 + $0x198] sm:$0xff]   ;;  %v1117_v59 = vld [vmem:[%s1399_s1 + $0x1a0] sm:$0xff]   ;;  %v1121_v3 = vld [vmem:[%s1399_s1 + $0x1a8] sm:$0xff]  }
  0x15   :  { %991 = vmatpush3.bf16.msra.mxu1 %v1085_v19  ;;  %964 = vmatprep.subr.bf16.mxu0 %v1086_v20  ;;  %v23_v60 = vld [vmem:[%s1400_s0 + $0x40] sm:$0xff]  ;;  %v24_v4 = vld [vmem:[%s1400_s0 + $0x48] sm:$0xff]  ;;  %v1122_v8 = vld [vmem:[%s1399_s1 + $0x170] sm:$0xff]  }
  0x16   :  { %992 = vmatprep.subr.bf16.mxu1 %v1087_v21  ;;  %v27_v61 = vld [vmem:[%s1400_s0 + $0x60] sm:$0xff]  ;;  %v28_v5 = vld [vmem:[%s1400_s0 + $0x68] sm:$0xff]  ;;  %v1123_v9 = vld [vmem:[%s1399_s1 + $0x1f0] sm:$0xff]  }
  0x17   :  { %v864_v62 = vcombine.high %v23_v60, %v27_v61  ;;  %v863_v0 = vcombine.low %v23_v60, %v27_v61  ;;  %v866_v6 = vcombine.high %v24_v4, %v28_v5  ;;  %v865_v7 = vcombine.low %v24_v4, %v28_v5  ;;  %v1124_v10 = vld [vmem:[%s1399_s1 + $0x130] sm:$0xff]   ;;  %v1126_v12 = vld [vmem:[%s1399_s1 + $0x178] sm:$0xff]   ;;  %v854_v34 = vld [vmem:[%s1401_s2] ss:$0 sm:$0xff] }
  0x18   :  { %965 = vmatpush3.bf16.msra.mxu0 %v1088_v22  ;;  %v1125_v11 = vld [vmem:[%s1399_s1 + $0x1b0] sm:$0xff]   ;;  %v1127_v13 = vld [vmem:[%s1399_s1 + $0x1f8] sm:$0xff]  }
  0x19   :  { %993 = vmatpush3.bf16.msra.mxu1 %v1089_v23  ;;  %966 = vmatprep.subr.bf16.mxu0 %v1090_v24  ;;  %v1128_v14 = vld [vmem:[%s1399_s1 + $0x138] sm:$0xff]   ;;  %v17_v16 = vld [vmem:[%s1400_s0 + $0x10] sm:$0xff] }
  0x1a   :  { %994 = vmatprep.subr.bf16.mxu1 %v1091_v25  ;;  %v1129_v15 = vld [vmem:[%s1399_s1 + $0x1b8] sm:$0xff]   ;;  %v21_v17 = vld [vmem:[%s1400_s0 + $0x30] sm:$0xff] }
  0x1b   :  { %v18_v18 = vld [vmem:[%s1400_s0 + $0x18] sm:$0xff]  ;;  %v859_v20 = vcombine.low %v17_v16, %v21_v17  ;;  %v860_v21 = vcombine.high %v17_v16, %v21_v17  ;;  %v25_v24 = vld [vmem:[%s1400_s0 + $0x50] sm:$0xff] }
  0x1c   :  { %967 = vmatpush3.bf16.msra.mxu0 %v1092_v26  ;;  %v22_v19 = vld [vmem:[%s1400_s0 + $0x38] sm:$0xff]  ;;  %v29_v25 = vld [vmem:[%s1400_s0 + $0x70] sm:$0xff] }
  0x1d   :  { %995 = vmatpush3.bf16.msra.mxu1 %v1093_v27  ;;  %968 = vmatprep.subr.bf16.mxu0 %v1094_v28  ;;  %v861_v22 = vcombine.low %v18_v18, %v22_v19  ;;  %v862_v23 = vcombine.high %v18_v18, %v22_v19  ;;  %v26_v26 = vld [vmem:[%s1400_s0 + $0x58] sm:$0xff]  ;;  %v868_v27 = vcombine.high %v25_v24, %v29_v25 }
  0x1e   :  { %996 = vmatprep.subr.bf16.mxu1 %v1095_v29  ;;  %v30_v28 = vld [vmem:[%s1400_s0 + $0x78] sm:$0xff] }
  0x1f   :  { %v870_v29 = vcombine.high %v26_v26, %v30_v28 }
  0x20   :  { %969 = vmatpush3.bf16.msra.mxu0 %v1096_v30  ;;  %v867_v30 = vcombine.low %v25_v24, %v29_v25 }
  0x21   :  { %997 = vmatpush3.bf16.msra.mxu1 %v1097_v31  ;;  %1010 = vmatprep.subr.bf16.mxu0 %v1098_v40  ;;  %v869_v31 = vcombine.low %v26_v26, %v30_v28 }
  0x22   :  { %1038 = vmatprep.subr.bf16.mxu1 %v1099_v41 }
  0x23   :  { %663 = vmatmul.mubr.bf16.vlgmr.msra.gmra.mrb[0].mxu0 %v855_v35 }
  0x24   :  { %712 = vmatmul.mubr.bf16.vlgmr.msra.gmra.mrb[0].mxu1 %v857_v38  ;;  %1011 = vmatpush3.bf16.msra.mxu0 %v1100_v42 }
  0x25   :  { %1039 = vmatpush3.bf16.msra.mxu1 %v1101_v43  ;;  %1012 = vmatprep.subr.bf16.mxu0 %v1102_v44 }
  0x26   :  { %1040 = vmatprep.subr.bf16.mxu1 %v1103_v45  ;;  %670 = vmatprep.mubr.bf16.mxu0 %v864_v62 }
  0x27   :  { %719 = vmatprep.mubr.bf16.mxu1 %v866_v6 }
  0x28   :  { %1013 = vmatpush3.bf16.msra.mxu0 %v1104_v46 }
  0x29   :  { %1041 = vmatpush3.bf16.msra.mxu1 %v1105_v47  ;;  %1014 = vmatprep.subr.bf16.mxu0 %v1106_v48 }
  0x2a   :  { %1042 = vmatprep.subr.bf16.mxu1 %v1107_v49 }
  0x2b   :  { %671 = vmatmul.mubr.bf16.gmra.mrb[4].mxu0 %v863_v0 }
  0x2c   :  { %1015 = vmatpush3.bf16.msra.mxu0 %v1108_v50  ;;  %720 = vmatmul.mubr.bf16.gmra.mrb[4].mxu1 %v865_v7 }
  0x2d   :  { %1043 = vmatpush3.bf16.msra.mxu1 %v1109_v51  ;;  %1016 = vmatprep.subr.bf16.mxu0 %v1110_v52 }
  0x2e   :  { %1044 = vmatprep.subr.bf16.mxu1 %v1111_v53  ;;  %760 = vmatprep.mubr.bf16.mxu0 %v860_v21 }
  0x2f   :  { %809 = vmatprep.mubr.bf16.mxu1 %v862_v23 }
  0x30   :  { %1017 = vmatpush3.bf16.msra.mxu0 %v1112_v54 }
  0x31   :  { %1045 = vmatpush3.bf16.msra.mxu1 %v1113_v55  ;;  %1018 = vmatprep.subr.bf16.mxu0 %v1114_v56 }
  0x32   :  { %1046 = vmatprep.subr.bf16.mxu1 %v1115_v57 }
  0x34   :  { %1019 = vmatpush3.bf16.msra.mxu0 %v1116_v58 }
  0x35   :  { %1047 = vmatpush3.bf16.msra.mxu1 %v1117_v59  ;;  %1020 = vmatprep.subr.bf16.mxu0 %v1118_v63 }
  0x36   :  { %1048 = vmatprep.subr.bf16.mxu1 %v1119_v1 }
  0x38   :  { %1021 = vmatpush3.bf16.msra.mxu0 %v1120_v2 }
  0x39   :  { %1049 = vmatpush3.bf16.msra.mxu1 %v1121_v3  ;;  %1022 = vmatprep.subr.bf16.mxu0 %v1122_v8 }
  0x3a   :  { %1050 = vmatprep.subr.bf16.mxu1 %v1123_v9 }
  0x3c   :  { %1023 = vmatpush3.bf16.msra.mxu0 %v1124_v10 }
  0x3d   :  { %1051 = vmatpush3.bf16.msra.mxu1 %v1125_v11  ;;  %1024 = vmatprep.subr.bf16.mxu0 %v1126_v12 }
  0x3e   :  { %1052 = vmatprep.subr.bf16.mxu1 %v1127_v13 }
  0x40   :  { %1025 = vmatpush3.bf16.msra.mxu0 %v1128_v14 }
  0x41   :  { %1053 = vmatpush3.bf16.msra.mxu1 %v1129_v15 }
  0x43   :  { %761 = vmatmul.mubr.bf16.vlgmr.msra.gmra.mrb[8].mxu0 %v859_v20 }
  0x44   :  { %810 = vmatmul.mubr.bf16.vlgmr.msra.gmra.mrb[8].mxu1 %v861_v22  ;;  %768 = vmatprep.mubr.bf16.mxu0 %v868_v27 }
  0x45   :  { %817 = vmatprep.mubr.bf16.mxu1 %v870_v29 }
  0x4b   :  { %769 = vmatmul.mubr.bf16.gmra.mrb[12].mxu0 %v867_v30 }
  0x4c   :  { %818 = vmatmul.mubr.bf16.gmra.mrb[12].mxu1 %v869_v31 }
  0xf6   :  { %v970_v32 = vpop.f32.mrb[0].mxu0 }
  0xf7   :  { %v998_v33 = vpop.f32.mrb[0].mxu1  ;;  %v971_v35 = vpop.f32.mrb[1].mxu0 }
  0xf8   :  { %v972_v36 = vadd.f32 %v971_v35, %v970_v32  ;;  %v999_v37 = vpop.f32.mrb[1].mxu1  ;;  %v973_v38 = vpop.f32.mrb[2].mxu0 }
  0xf9   :  { %v1000_v39 = vadd.f32 %v999_v37, %v998_v33  ;;  %v1001_v40 = vpop.f32.mrb[2].mxu1  ;;  %v974_v41 = vpop.f32.mrb[3].mxu0 }
  0xfa   :  { %v665_v42 = vadd.f32 %v972_v36, %v854_v34  ;;  %v975_v43 = vadd.f32 %v974_v41, %v973_v38  ;;  %v1002_v44 = vpop.f32.mrb[3].mxu1 }
  0xfb   :  { %v1003_v45 = vadd.f32 %v1002_v44, %v1001_v40 }
  0xfc   :  { %v714_v46 = vadd.f32 %v1000_v39, %v665_v42  ;;  %v668_v47 = vadd.f32 %v975_v43, %v854_v34 }
  0xfe   :  { %v717_v48 = vadd.f32 %v1003_v45, %v668_v47  ;;  %v976_v49 = vpop.f32.mrb[4].mxu0 }
  0xff   :  { %v977_v50 = vpop.f32.mrb[5].mxu0  ;;  %v1004_v56 = vpop.f32.mrb[4].mxu1 }
 0x100   :  { %v978_v51 = vadd.f32 %v977_v50, %v976_v49  ;;  %v979_v52 = vpop.f32.mrb[6].mxu0  ;;  %v1005_v57 = vpop.f32.mrb[5].mxu1 }
 0x101   :  { %v980_v53 = vpop.f32.mrb[7].mxu0  ;;  %v1006_v59 = vadd.f32 %v1005_v57, %v1004_v56  ;;  %v1007_v60 = vpop.f32.mrb[6].mxu1 }
 0x102   :  { %v981_v54 = vadd.f32 %v980_v53, %v979_v52  ;;  %v673_v55 = vadd.f32 %v978_v51, %v854_v34  ;;  %v1008_v61 = vpop.f32.mrb[7].mxu1 }
 0x103   :  { %v1009_v63 = vadd.f32 %v1008_v61, %v1007_v60 }
 0x104   :  { %v676_v58 = vadd.f32 %v981_v54, %v854_v34  ;;  %v722_v62 = vadd.f32 %v1006_v59, %v673_v55 }
 0x106   :  { %v725_v0 = vadd.f32 %v1009_v63, %v676_v58 }
 0x116   :  { %v1026_v1 = vpop.f32.mrb[8].mxu0 }
 0x117   :  { %v1054_v2 = vpop.f32.mrb[8].mxu1  ;;  %v1027_v3 = vpop.f32.mrb[9].mxu0 }
 0x118   :  { %v1055_v4 = vpop.f32.mrb[9].mxu1  ;;  %v1028_v5 = vadd.f32 %v1027_v3, %v1026_v1  ;;  %v1029_v7 = vpop.f32.mrb[10].mxu0 }
 0x119   :  { %v1056_v6 = vadd.f32 %v1055_v4, %v1054_v2  ;;  %v1057_v8 = vpop.f32.mrb[10].mxu1  ;;  %v1030_v9 = vpop.f32.mrb[11].mxu0 }
 0x11a   :  { %v1058_v10 = vpop.f32.mrb[11].mxu1  ;;  %v763_v11 = vadd.f32 %v1028_v5, %v714_v46  ;;  %v1031_v12 = vadd.f32 %v1030_v9, %v1029_v7 }
 0x11b   :  { %v1059_v13 = vadd.f32 %v1058_v10, %v1057_v8 }
 0x11c   :  { %v812_v14 = vadd.f32 %v1056_v6, %v763_v11  ;;  %v766_v15 = vadd.f32 %v1031_v12, %v717_v48 }
 0x11e   :  { %v815_v16 = vadd.f32 %v1059_v13, %v766_v15  ;;  %v1032_v17 = vpop.f32.mrb[12].mxu0  ;;  %v826_v21 = vmax.f32 %v812_v14, 0.0 }
 0x11f   :  { %v1060_v18 = vpop.f32.mrb[12].mxu1  ;;  %v1033_v19 = vpop.f32.mrb[13].mxu0 }
 0x120   :  { %v1061_v20 = vpop.f32.mrb[13].mxu1  ;;  %v827_v22 = vmax.f32 %v815_v16, 0.0  ;;  %v1034_v23 = vadd.f32 %v1033_v19, %v1032_v17  ;;  %v1035_v25 = vpop.f32.mrb[14].mxu0 }
 0x121   :  { %v1062_v24 = vadd.f32 %v1061_v20, %v1060_v18  ;;  %v1063_v26 = vpop.f32.mrb[14].mxu1  ;;  %v1036_v27 = vpop.f32.mrb[15].mxu0 }
 0x122   :  { %v1064_v28 = vpop.f32.mrb[15].mxu1  ;;  %v946_v29 = vpack.c.bf16 %v827_v22, %v826_v21  ;;  %v771_v30 = vadd.f32 %v1034_v23, %v722_v62  ;;  %v1037_v31 = vadd.f32 %v1036_v27, %v1035_v25 }
 0x123   :  { %v1065_v32 = vadd.f32 %v1064_v28, %v1063_v26 }
 0x124   :  { %947 = vst [vmem:[%s1402_s3] sm:$0xff] %v946_v29   ;;  %v820_v33 = vadd.f32 %v1062_v24, %v771_v30  ;;  %v774_v34 = vadd.f32 %v1037_v31, %v725_v0 }
 0x126   :  { %v823_v35 = vadd.f32 %v1065_v32, %v774_v34  ;;  %v828_v36 = vmax.f32 %v820_v33, 0.0 }
 0x128   :  { %v829_v37 = vmax.f32 %v823_v35, 0.0 }
 0x12a   :  { %v951_v38 = vpack.c.bf16 %v829_v37, %v828_v36 }
 0x12c   :  { %953 = vst [vmem:[%s1402_s3 + $0x8] sm:$0xff] %v951_v38  }

// kernel: enhanced_vqvae_forward.12
= control target key start
LH: loop header
LB: loop body
LE: loop exit
PB: predicated region body
PF: predicated region fallthrough
CT: control target
= control target key end

     0   :  { %s2619_s1 = inlined_call_operand.vmem [shape: bf16[2304,128], index: 1, kind: input, shape index: {}]   ;;  %s2620_s0 = inlined_call_operand.vmem [shape: bf16[8,2304], index: 0, kind: input, shape index: {}]   ;;  %s2621_s2 = inlined_call_operand.vmem [shape: f32[1,128], index: 2, kind: input, shape index: {}]   ;;  %s2622_s3 = inlined_call_operand.vmem [shape: f32[8,128], index: 3, kind: output, shape index: {}]  }
   0x1   :  { %v1972_v0 = vld [vmem:[%s2619_s1 + $0x40] sm:$0xff]   ;;  %v1976_v4 = vld [vmem:[%s2619_s1 + $0x48] sm:$0xff]   ;;  %v1980_v8 = vld [vmem:[%s2619_s1 + $0x50] sm:$0xff]  }
   0x2   :  { %v1973_v1 = vld [vmem:[%s2619_s1] sm:$0xff]   ;;  %1774 = vmatprep.subr.bf16.mxu0 %v1972_v0  ;;  %v1977_v5 = vld [vmem:[%s2619_s1 + $0x8] sm:$0xff]   ;;  %v1981_v9 = vld [vmem:[%s2619_s1 + $0x10] sm:$0xff]  }
   0x3   :  { %v1974_v2 = vld [vmem:[%s2619_s1 + $0xc0] sm:$0xff]   ;;  %1775 = vmatpush3.bf16.msra.mxu0 %v1973_v1  ;;  %v1978_v6 = vld [vmem:[%s2619_s1 + $0xc8] sm:$0xff]   ;;  %v1982_v10 = vld [vmem:[%s2619_s1 + $0xd0] sm:$0xff]  }
   0x4   :  { %v1975_v3 = vld [vmem:[%s2619_s1 + $0x80] sm:$0xff]   ;;  %1796 = vmatprep.subr.bf16.mxu1 %v1974_v2  ;;  %1776 = vmatprep.subr.bf16.mxu0 %v1976_v4  ;;  %v1979_v7 = vld [vmem:[%s2619_s1 + $0x88] sm:$0xff]   ;;  %v1983_v11 = vld [vmem:[%s2619_s1 + $0x90] sm:$0xff]  }
   0x5   :  { %1797 = vmatpush3.bf16.msra.mxu1 %v1975_v3  ;;  %v1984_v12 = vld [vmem:[%s2619_s1 + $0x58] sm:$0xff]   ;;  %v1988_v16 = vld [vmem:[%s2619_s1 + $0x60] sm:$0xff]   ;;  %v1992_v20 = vld [vmem:[%s2619_s1 + $0x68] sm:$0xff]  }
   0x6   :  { %1798 = vmatprep.subr.bf16.mxu1 %v1978_v6  ;;  %v1985_v13 = vld [vmem:[%s2619_s1 + $0x18] sm:$0xff]   ;;  %v1989_v17 = vld [vmem:[%s2619_s1 + $0x20] sm:$0xff]   ;;  %v1993_v21 = vld [vmem:[%s2619_s1 + $0x28] sm:$0xff]  }
   0x7   :  { %1777 = vmatpush3.bf16.msra.mxu0 %v1977_v5  ;;  %v1986_v14 = vld [vmem:[%s2619_s1 + $0xd8] sm:$0xff]   ;;  %v1990_v18 = vld [vmem:[%s2619_s1 + $0xe0] sm:$0xff]   ;;  %v1994_v22 = vld [vmem:[%s2619_s1 + $0xe8] sm:$0xff]  }
   0x8   :  { %1778 = vmatprep.subr.bf16.mxu0 %v1980_v8  ;;  %v1987_v15 = vld [vmem:[%s2619_s1 + $0x98] sm:$0xff]   ;;  %v1991_v19 = vld [vmem:[%s2619_s1 + $0xa0] sm:$0xff]   ;;  %v1995_v23 = vld [vmem:[%s2619_s1 + $0xa8] sm:$0xff]  }
   0x9   :  { %1799 = vmatpush3.bf16.msra.mxu1 %v1979_v7  ;;  %v1996_v24 = vld [vmem:[%s2619_s1 + $0x70] sm:$0xff]   ;;  %v2000_v28 = vld [vmem:[%s2619_s1 + $0x78] sm:$0xff]   ;;  %v15_v31 = vld [vmem:[%s2620_s0] sm:$0xff] }
   0xa   :  { %1800 = vmatprep.subr.bf16.mxu1 %v1982_v10  ;;  %v1997_v25 = vld [vmem:[%s2619_s1 + $0x30] sm:$0xff]   ;;  %v2001_v29 = vld [vmem:[%s2619_s1 + $0x38] sm:$0xff]   ;;  %v1612_v32 = vcombine.low %v15_v31, %v15_v31  ;;  %v1613_v33 = vcombine.high %v15_v31, %v15_v31  ;;  %v2006_v35 = vld [vmem:[%s2619_s1 + $0x140] sm:$0xff]  }
   0xb   :  { %1779 = vmatpush3.bf16.msra.mxu0 %v1981_v9  ;;  %v1998_v26 = vld [vmem:[%s2619_s1 + $0xf0] sm:$0xff]   ;;  %v2002_v30 = vld [vmem:[%s2619_s1 + $0xf8] sm:$0xff]   ;;  %v16_v36 = vld [vmem:[%s2620_s0 + $0x8] sm:$0xff] }
   0xc   :  { %1780 = vmatprep.subr.bf16.mxu0 %v1984_v12  ;;  %v1999_v27 = vld [vmem:[%s2619_s1 + $0xb0] sm:$0xff]   ;;  %v2005_v34 = vld [vmem:[%s2619_s1 + $0xb8] sm:$0xff]   ;;  %1278 = vmatprep.mubr.bf16.mxu0 %v1613_v33  ;;  %v1614_v37 = vcombine.low %v16_v36, %v16_v36  ;;  %v1615_v38 = vcombine.high %v16_v36, %v16_v36  ;;  %v2009_v39 = vld [vmem:[%s2619_s1 + $0x100] sm:$0xff]  }
   0xd   :  { %1801 = vmatpush3.bf16.msra.mxu1 %v1983_v11  ;;  %v2010_v40 = vld [vmem:[%s2619_s1 + $0x1c0] sm:$0xff]   ;;  %v2012_v42 = vld [vmem:[%s2619_s1 + $0x148] sm:$0xff]   ;;  %v2016_v46 = vld [vmem:[%s2619_s1 + $0x150] sm:$0xff]  }
   0xe   :  { %1802 = vmatprep.subr.bf16.mxu1 %v1986_v14  ;;  %1318 = vmatprep.mubr.bf16.mxu1 %v1615_v38  ;;  %v2011_v41 = vld [vmem:[%s2619_s1 + $0x180] sm:$0xff]   ;;  %v2013_v43 = vld [vmem:[%s2619_s1 + $0x108] sm:$0xff]   ;;  %v2017_v47 = vld [vmem:[%s2619_s1 + $0x110] sm:$0xff]  }
   0xf   :  { %1781 = vmatpush3.bf16.msra.mxu0 %v1985_v13  ;;  %v2014_v44 = vld [vmem:[%s2619_s1 + $0x1c8] sm:$0xff]   ;;  %v2018_v48 = vld [vmem:[%s2619_s1 + $0x1d0] sm:$0xff]   ;;  %v2020_v50 = vld [vmem:[%s2619_s1 + $0x158] sm:$0xff]  }
  0x10   :  { %1782 = vmatprep.subr.bf16.mxu0 %v1988_v16  ;;  %v2015_v45 = vld [vmem:[%s2619_s1 + $0x188] sm:$0xff]   ;;  %v2019_v49 = vld [vmem:[%s2619_s1 + $0x190] sm:$0xff]   ;;  %v2021_v51 = vld [vmem:[%s2619_s1 + $0x118] sm:$0xff]  }
  0x11   :  { %1803 = vmatpush3.bf16.msra.mxu1 %v1987_v15  ;;  %v2022_v52 = vld [vmem:[%s2619_s1 + $0x1d8] sm:$0xff]   ;;  %v2024_v54 = vld [vmem:[%s2619_s1 + $0x160] sm:$0xff]   ;;  %v2028_v58 = vld [vmem:[%s2619_s1 + $0x168] sm:$0xff]  }
  0x12   :  { %1804 = vmatprep.subr.bf16.mxu1 %v1990_v18  ;;  %v2023_v53 = vld [vmem:[%s2619_s1 + $0x198] sm:$0xff]   ;;  %v2025_v55 = vld [vmem:[%s2619_s1 + $0x120] sm:$0xff]   ;;  %v2029_v59 = vld [vmem:[%s2619_s1 + $0x128] sm:$0xff]  }
  0x13   :  { %1783 = vmatpush3.bf16.msra.mxu0 %v1989_v17  ;;  %v2026_v56 = vld [vmem:[%s2619_s1 + $0x1e0] sm:$0xff]   ;;  %v2030_v60 = vld [vmem:[%s2619_s1 + $0x1e8] sm:$0xff]   ;;  %v2032_v62 = vld [vmem:[%s2619_s1 + $0x170] sm:$0xff]  }
  0x14   :  { %1784 = vmatprep.subr.bf16.mxu0 %v1992_v20  ;;  %v2027_v57 = vld [vmem:[%s2619_s1 + $0x1a0] sm:$0xff]   ;;  %v2031_v61 = vld [vmem:[%s2619_s1 + $0x1a8] sm:$0xff]   ;;  %v2033_v63 = vld [vmem:[%s2619_s1 + $0x130] sm:$0xff]  }
  0x15   :  { %1805 = vmatpush3.bf16.msra.mxu1 %v1991_v19  ;;  %v2034_v0 = vld [vmem:[%s2619_s1 + $0x1f0] sm:$0xff]   ;;  %v2036_v2 = vld [vmem:[%s2619_s1 + $0x178] sm:$0xff]   ;;  %v2042_v9 = vld [vmem:[%s2619_s1 + $0x240] sm:$0xff]  }
  0x16   :  { %1806 = vmatprep.subr.bf16.mxu1 %v1994_v22  ;;  %v2035_v1 = vld [vmem:[%s2619_s1 + $0x1b0] sm:$0xff]   ;;  %v2037_v3 = vld [vmem:[%s2619_s1 + $0x138] sm:$0xff]   ;;  %v2045_v13 = vld [vmem:[%s2619_s1 + $0x200] sm:$0xff]  }
  0x17   :  { %1785 = vmatpush3.bf16.msra.mxu0 %v1993_v21  ;;  %v2038_v4 = vld [vmem:[%s2619_s1 + $0x1f8] sm:$0xff]   ;;  %v17_v5 = vld [vmem:[%s2620_s0 + $0x10] sm:$0xff]  ;;  %v2046_v14 = vld [vmem:[%s2619_s1 + $0x2c0] sm:$0xff]  }
  0x18   :  { %1786 = vmatprep.subr.bf16.mxu0 %v1996_v24  ;;  %v1616_v6 = vcombine.low %v17_v5, %v17_v5  ;;  %v1617_v7 = vcombine.high %v17_v5, %v17_v5  ;;  %v2041_v8 = vld [vmem:[%s2619_s1 + $0x1b8] sm:$0xff]   ;;  %v2047_v15 = vld [vmem:[%s2619_s1 + $0x280] sm:$0xff]   ;;  %v2048_v16 = vld [vmem:[%s2619_s1 + $0x248] sm:$0xff]  }
  0x19   :  { %1807 = vmatpush3.bf16.msra.mxu1 %v1995_v23  ;;  %v18_v10 = vld [vmem:[%s2620_s0 + $0x18] sm:$0xff]  ;;  %v2049_v17 = vld [vmem:[%s2619_s1 + $0x208] sm:$0xff]   ;;  %v2052_v20 = vld [vmem:[%s2619_s1 + $0x250] sm:$0xff]  }
  0x1a   :  { %1808 = vmatprep.subr.bf16.mxu1 %v1998_v26  ;;  %v1618_v11 = vcombine.low %v18_v10, %v18_v10  ;;  %v1619_v12 = vcombine.high %v18_v10, %v18_v10  ;;  %v2050_v18 = vld [vmem:[%s2619_s1 + $0x2c8] sm:$0xff]   ;;  %v2053_v21 = vld [vmem:[%s2619_s1 + $0x210] sm:$0xff]   ;;  %v2056_v24 = vld [vmem:[%s2619_s1 + $0x258] sm:$0xff]  }
  0x1b   :  { %1787 = vmatpush3.bf16.msra.mxu0 %v1997_v25  ;;  %v2051_v19 = vld [vmem:[%s2619_s1 + $0x288] sm:$0xff]   ;;  %v2054_v22 = vld [vmem:[%s2619_s1 + $0x2d0] sm:$0xff]   ;;  %v2057_v25 = vld [vmem:[%s2619_s1 + $0x218] sm:$0xff]  }
  0x1c   :  { %1788 = vmatprep.subr.bf16.mxu0 %v2000_v28  ;;  %v2055_v23 = vld [vmem:[%s2619_s1 + $0x290] sm:$0xff]   ;;  %v2058_v26 = vld [vmem:[%s2619_s1 + $0x2d8] sm:$0xff]   ;;  %v2060_v28 = vld [vmem:[%s2619_s1 + $0x260] sm:$0xff]  }
  0x1d   :  { %1809 = vmatpush3.bf16.msra.mxu1 %v1999_v27  ;;  %v2059_v27 = vld [vmem:[%s2619_s1 + $0x298] sm:$0xff]   ;;  %v2063_v31 = vld [vmem:[%s2619_s1 + $0x2a0] sm:$0xff]   ;;  %v2065_v33 = vld [vmem:[%s2619_s1 + $0x228] sm:$0xff]  }
  0x1e   :  { %1810 = vmatprep.subr.bf16.mxu1 %v2002_v30  ;;  %v2062_v30 = vld [vmem:[%s2619_s1 + $0x2e0] sm:$0xff]   ;;  %v2068_v36 = vld [vmem:[%s2619_s1 + $0x270] sm:$0xff]  }
  0x1f   :  { %1789 = vmatpush3.bf16.msra.mxu0 %v2001_v29  ;;  %v2061_v29 = vld [vmem:[%s2619_s1 + $0x220] sm:$0xff]   ;;  %v2070_v38 = vld [vmem:[%s2619_s1 + $0x2f0] sm:$0xff]  }
  0x20   :  { %1818 = vmatprep.subr.bf16.mxu0 %v2006_v35  ;;  %v2067_v35 = vld [vmem:[%s2619_s1 + $0x2a8] sm:$0xff]   ;;  %v2099_v5 = vld [vmem:[%s2619_s1 + $0x3a0] sm:$0xff]   ;;  %v2104_v10 = vld [vmem:[%s2619_s1 + $0x370] sm:$0xff]  }
  0x21   :  { %1811 = vmatpush3.bf16.msra.mxu1 %v2005_v34  ;;  %v2066_v34 = vld [vmem:[%s2619_s1 + $0x2e8] sm:$0xff]  }
  0x22   :  { %1279 = vmatmul.mubr.bf16.vlgmr.msra.gmra.mrb[0].mxu0 %v1612_v32  ;;  %1840 = vmatprep.subr.bf16.mxu1 %v2010_v40  ;;  %v2064_v32 = vld [vmem:[%s2619_s1 + $0x268] sm:$0xff]   ;;  %v2072_v40 = vld [vmem:[%s2619_s1 + $0x278] sm:$0xff]  }
  0x23   :  { %1819 = vmatpush3.bf16.msra.mxu0 %v2009_v39  ;;  %1358 = vmatprep.mubr.bf16.mxu0 %v1617_v7  ;;  %v2071_v39 = vld [vmem:[%s2619_s1 + $0x2b0] sm:$0xff]   ;;  %v2101_v7 = vld [vmem:[%s2619_s1 + $0x328] sm:$0xff]  }
  0x24   :  { %1319 = vmatmul.mubr.bf16.vlgmr.msra.gmra.mrb[0].mxu1 %v1614_v37  ;;  %1820 = vmatprep.subr.bf16.mxu0 %v2012_v42  ;;  %v2069_v37 = vld [vmem:[%s2619_s1 + $0x230] sm:$0xff]   ;;  %v2074_v42 = vld [vmem:[%s2619_s1 + $0x2f8] sm:$0xff]  }
  0x25   :  { %1841 = vmatpush3.bf16.msra.mxu1 %v2011_v41  ;;  %1398 = vmatprep.mubr.bf16.mxu1 %v1619_v12  ;;  %v2073_v41 = vld [vmem:[%s2619_s1 + $0x238] sm:$0xff]   ;;  %v2106_v12 = vld [vmem:[%s2619_s1 + $0x3f0] sm:$0xff]  }
  0x26   :  { %1842 = vmatprep.subr.bf16.mxu1 %v2014_v44 }
  0x27   :  { %1821 = vmatpush3.bf16.msra.mxu0 %v2013_v43  ;;  %v19_v43 = vld [vmem:[%s2620_s0 + $0x20] sm:$0xff] }
  0x28   :  { %1822 = vmatprep.subr.bf16.mxu0 %v2016_v46  ;;  %v1620_v44 = vcombine.low %v19_v43, %v19_v43  ;;  %v2077_v46 = vld [vmem:[%s2619_s1 + $0x2b8] sm:$0xff]  }
  0x29   :  { %1843 = vmatpush3.bf16.msra.mxu1 %v2015_v45  ;;  %v1621_v45 = vcombine.high %v19_v43, %v19_v43 }
  0x2a   :  { %1844 = vmatprep.subr.bf16.mxu1 %v2018_v48  ;;  %v20_v48 = vld [vmem:[%s2620_s0 + $0x28] sm:$0xff] }
  0x2b   :  { %1823 = vmatpush3.bf16.msra.mxu0 %v2017_v47  ;;  %v2078_v47 = vld [vmem:[%s2619_s1 + $0x340] sm:$0xff]  }
  0x2c   :  { %1824 = vmatprep.subr.bf16.mxu0 %v2020_v50  ;;  %v1623_v50 = vcombine.high %v20_v48, %v20_v48 }
  0x2d   :  { %1845 = vmatpush3.bf16.msra.mxu1 %v2019_v49  ;;  %v1622_v49 = vcombine.low %v20_v48, %v20_v48 }
  0x2e   :  { %1846 = vmatprep.subr.bf16.mxu1 %v2022_v52  ;;  %v2082_v52 = vld [vmem:[%s2619_s1 + $0x3c0] sm:$0xff]  }
  0x2f   :  { %1825 = vmatpush3.bf16.msra.mxu0 %v2021_v51  ;;  %v2081_v51 = vld [vmem:[%s2619_s1 + $0x300] sm:$0xff]  }
  0x30   :  { %1826 = vmatprep.subr.bf16.mxu0 %v2024_v54  ;;  %v2084_v54 = vld [vmem:[%s2619_s1 + $0x348] sm:$0xff]  }
  0x31   :  { %1847 = vmatpush3.bf16.msra.mxu1 %v2023_v53  ;;  %v2083_v53 = vld [vmem:[%s2619_s1 + $0x380] sm:$0xff]  }
  0x32   :  { %1848 = vmatprep.subr.bf16.mxu1 %v2026_v56  ;;  %v2086_v56 = vld [vmem:[%s2619_s1 + $0x3c8] sm:$0xff]  }
  0x33   :  { %1827 = vmatpush3.bf16.msra.mxu0 %v2025_v55  ;;  %v2085_v55 = vld [vmem:[%s2619_s1 + $0x308] sm:$0xff]  }
  0x34   :  { %1828 = vmatprep.subr.bf16.mxu0 %v2028_v58  ;;  %v2088_v58 = vld [vmem:[%s2619_s1 + $0x350] sm:$0xff]  }
  0x35   :  { %1849 = vmatpush3.bf16.msra.mxu1 %v2027_v57  ;;  %v2087_v57 = vld [vmem:[%s2619_s1 + $0x388] sm:$0xff]  }
  0x36   :  { %1850 = vmatprep.subr.bf16.mxu1 %v2030_v60  ;;  %v2090_v60 = vld [vmem:[%s2619_s1 + $0x3d0] sm:$0xff]  }
  0x37   :  { %1829 = vmatpush3.bf16.msra.mxu0 %v2029_v59  ;;  %v2089_v59 = vld [vmem:[%s2619_s1 + $0x310] sm:$0xff]  }
  0x38   :  { %1830 = vmatprep.subr.bf16.mxu0 %v2032_v62  ;;  %v2092_v62 = vld [vmem:[%s2619_s1 + $0x358] sm:$0xff]  }
  0x39   :  { %1851 = vmatpush3.bf16.msra.mxu1 %v2031_v61  ;;  %v2091_v61 = vld [vmem:[%s2619_s1 + $0x390] sm:$0xff]  }
  0x3a   :  { %1852 = vmatprep.subr.bf16.mxu1 %v2034_v0  ;;  %v2094_v0 = vld [vmem:[%s2619_s1 + $0x3d8] sm:$0xff]  }
  0x3b   :  { %1831 = vmatpush3.bf16.msra.mxu0 %v2033_v63  ;;  %v2093_v63 = vld [vmem:[%s2619_s1 + $0x318] sm:$0xff]  }
  0x3c   :  { %1832 = vmatprep.subr.bf16.mxu0 %v2036_v2  ;;  %v2096_v2 = vld [vmem:[%s2619_s1 + $0x360] sm:$0xff]  }
  0x3d   :  { %1853 = vmatpush3.bf16.msra.mxu1 %v2035_v1  ;;  %v2095_v1 = vld [vmem:[%s2619_s1 + $0x398] sm:$0xff]  }
  0x3e   :  { %1854 = vmatprep.subr.bf16.mxu1 %v2038_v4  ;;  %v2098_v4 = vld [vmem:[%s2619_s1 + $0x3e0] sm:$0xff]  }
  0x3f   :  { %1833 = vmatpush3.bf16.msra.mxu0 %v2037_v3  ;;  %v2097_v3 = vld [vmem:[%s2619_s1 + $0x320] sm:$0xff]  }
  0x40   :  { %1862 = vmatprep.subr.bf16.mxu0 %v2042_v9  ;;  %v2103_v9 = vld [vmem:[%s2619_s1 + $0x3a8] sm:$0xff]  }
  0x41   :  { %1855 = vmatpush3.bf16.msra.mxu1 %v2041_v8  ;;  %v2102_v8 = vld [vmem:[%s2619_s1 + $0x3e8] sm:$0xff]  }
  0x42   :  { %1359 = vmatmul.mubr.bf16.vlgmr.msra.gmra.mrb[4].mxu0 %v1616_v6  ;;  %1884 = vmatprep.subr.bf16.mxu1 %v2046_v14  ;;  %v2100_v6 = vld [vmem:[%s2619_s1 + $0x368] sm:$0xff]   ;;  %v2108_v14 = vld [vmem:[%s2619_s1 + $0x378] sm:$0xff]  }
  0x43   :  { %1863 = vmatpush3.bf16.msra.mxu0 %v2045_v13  ;;  %1438 = vmatprep.mubr.bf16.mxu0 %v1621_v45  ;;  %v2107_v13 = vld [vmem:[%s2619_s1 + $0x3b0] sm:$0xff]  }
  0x44   :  { %1399 = vmatmul.mubr.bf16.vlgmr.msra.gmra.mrb[4].mxu1 %v1618_v11  ;;  %1864 = vmatprep.subr.bf16.mxu0 %v2048_v16  ;;  %v2105_v11 = vld [vmem:[%s2619_s1 + $0x330] sm:$0xff]   ;;  %v2110_v16 = vld [vmem:[%s2619_s1 + $0x3f8] sm:$0xff]  }
  0x45   :  { %1885 = vmatpush3.bf16.msra.mxu1 %v2047_v15  ;;  %1478 = vmatprep.mubr.bf16.mxu1 %v1623_v50  ;;  %v2109_v15 = vld [vmem:[%s2619_s1 + $0x338] sm:$0xff]  }
  0x46   :  { %1886 = vmatprep.subr.bf16.mxu1 %v2050_v18 }
  0x47   :  { %1865 = vmatpush3.bf16.msra.mxu0 %v2049_v17  ;;  %v21_v17 = vld [vmem:[%s2620_s0 + $0x30] sm:$0xff] }
  0x48   :  { %1866 = vmatprep.subr.bf16.mxu0 %v2052_v20  ;;  %v1624_v18 = vcombine.low %v21_v17, %v21_v17  ;;  %v2113_v20 = vld [vmem:[%s2619_s1 + $0x3b8] sm:$0xff]  }
  0x49   :  { %1887 = vmatpush3.bf16.msra.mxu1 %v2051_v19  ;;  %v1625_v19 = vcombine.high %v21_v17, %v21_v17 }
  0x4a   :  { %1888 = vmatprep.subr.bf16.mxu1 %v2054_v22  ;;  %v22_v22 = vld [vmem:[%s2620_s0 + $0x38] sm:$0xff] }
  0x4b   :  { %1867 = vmatpush3.bf16.msra.mxu0 %v2053_v21  ;;  %v2114_v21 = vld [vmem:[%s2619_s1 + $0x440] sm:$0xff]  }
  0x4c   :  { %1868 = vmatprep.subr.bf16.mxu0 %v2056_v24  ;;  %v1627_v24 = vcombine.high %v22_v22, %v22_v22 }
  0x4d   :  { %1889 = vmatpush3.bf16.msra.mxu1 %v2055_v23  ;;  %v1626_v23 = vcombine.low %v22_v22, %v22_v22 }
  0x4e   :  { %1890 = vmatprep.subr.bf16.mxu1 %v2058_v26  ;;  %v2118_v26 = vld [vmem:[%s2619_s1 + $0x448] sm:$0xff]  }
  0x4f   :  { %1869 = vmatpush3.bf16.msra.mxu0 %v2057_v25  ;;  %v2117_v25 = vld [vmem:[%s2619_s1 + $0x400] sm:$0xff]  }
  0x50   :  { %1870 = vmatprep.subr.bf16.mxu0 %v2060_v28  ;;  %v2120_v28 = vld [vmem:[%s2619_s1 + $0x450] sm:$0xff]  }
  0x51   :  { %1891 = vmatpush3.bf16.msra.mxu1 %v2059_v27  ;;  %v2119_v27 = vld [vmem:[%s2619_s1 + $0x408] sm:$0xff]  }
  0x52   :  { %1892 = vmatprep.subr.bf16.mxu1 %v2062_v30  ;;  %v2122_v30 = vld [vmem:[%s2619_s1 + $0x458] sm:$0xff]  }
  0x53   :  { %1871 = vmatpush3.bf16.msra.mxu0 %v2061_v29  ;;  %v2121_v29 = vld [vmem:[%s2619_s1 + $0x410] sm:$0xff]  }
  0x54   :  { %1872 = vmatprep.subr.bf16.mxu0 %v2064_v32  ;;  %v2124_v32 = vld [vmem:[%s2619_s1 + $0x460] sm:$0xff]  }
  0x55   :  { %1893 = vmatpush3.bf16.msra.mxu1 %v2063_v31  ;;  %v2123_v31 = vld [vmem:[%s2619_s1 + $0x418] sm:$0xff]  }
  0x56   :  { %1894 = vmatprep.subr.bf16.mxu1 %v2066_v34  ;;  %v23_v34 = vld [vmem:[%s2620_s0 + $0x40] sm:$0xff] }
  0x57   :  { %1873 = vmatpush3.bf16.msra.mxu0 %v2065_v33  ;;  %v2125_v33 = vld [vmem:[%s2619_s1 + $0x420] sm:$0xff]  }
  0x58   :  { %1874 = vmatprep.subr.bf16.mxu0 %v2068_v36  ;;  %v1629_v36 = vcombine.high %v23_v34, %v23_v34 }
  0x59   :  { %1895 = vmatpush3.bf16.msra.mxu1 %v2067_v35  ;;  %v2126_v35 = vld [vmem:[%s2619_s1 + $0x468] sm:$0xff]  }
  0x5a   :  { %1896 = vmatprep.subr.bf16.mxu1 %v2070_v38  ;;  %v2128_v38 = vld [vmem:[%s2619_s1 + $0x470] sm:$0xff]  }
  0x5b   :  { %1875 = vmatpush3.bf16.msra.mxu0 %v2069_v37  ;;  %v2127_v37 = vld [vmem:[%s2619_s1 + $0x428] sm:$0xff]  }
  0x5c   :  { %1876 = vmatprep.subr.bf16.mxu0 %v2072_v40  ;;  %v2130_v40 = vld [vmem:[%s2619_s1 + $0x478] sm:$0xff]  }
  0x5d   :  { %1897 = vmatpush3.bf16.msra.mxu1 %v2071_v39  ;;  %v2129_v39 = vld [vmem:[%s2619_s1 + $0x430] sm:$0xff]  }
  0x5e   :  { %1898 = vmatprep.subr.bf16.mxu1 %v2074_v42  ;;  %v1628_v42 = vcombine.low %v23_v34, %v23_v34 }
  0x5f   :  { %1877 = vmatpush3.bf16.msra.mxu0 %v2073_v41  ;;  %v2131_v41 = vld [vmem:[%s2619_s1 + $0x438] sm:$0xff]  }
  0x60   :  { %1906 = vmatprep.subr.bf16.mxu0 %v2078_v47 }
  0x61   :  { %1899 = vmatpush3.bf16.msra.mxu1 %v2077_v46 }
  0x62   :  { %1439 = vmatmul.mubr.bf16.vlgmr.msra.gmra.mrb[8].mxu0 %v1620_v44  ;;  %1928 = vmatprep.subr.bf16.mxu1 %v2082_v52  ;;  %v1611_v44 = vld [vmem:[%s2621_s2] ss:$0 sm:$0xff] }
  0x63   :  { %1907 = vmatpush3.bf16.msra.mxu0 %v2081_v51  ;;  %1518 = vmatprep.mubr.bf16.mxu0 %v1625_v19 }
  0x64   :  { %1479 = vmatmul.mubr.bf16.vlgmr.msra.gmra.mrb[8].mxu1 %v1622_v49  ;;  %1908 = vmatprep.subr.bf16.mxu0 %v2084_v54 }
  0x65   :  { %1929 = vmatpush3.bf16.msra.mxu1 %v2083_v53  ;;  %1558 = vmatprep.mubr.bf16.mxu1 %v1627_v24 }
  0x66   :  { %1930 = vmatprep.subr.bf16.mxu1 %v2086_v56 }
  0x67   :  { %1909 = vmatpush3.bf16.msra.mxu0 %v2085_v55 }
  0x68   :  { %1910 = vmatprep.subr.bf16.mxu0 %v2088_v58 }
  0x69   :  { %1931 = vmatpush3.bf16.msra.mxu1 %v2087_v57 }
  0x6a   :  { %1932 = vmatprep.subr.bf16.mxu1 %v2090_v60 }
  0x6b   :  { %1911 = vmatpush3.bf16.msra.mxu0 %v2089_v59 }
  0x6c   :  { %1912 = vmatprep.subr.bf16.mxu0 %v2092_v62 }
  0x6d   :  { %1933 = vmatpush3.bf16.msra.mxu1 %v2091_v61 }
  0x6e   :  { %1934 = vmatprep.subr.bf16.mxu1 %v2094_v0 }
  0x6f   :  { %1913 = vmatpush3.bf16.msra.mxu0 %v2093_v63 }
  0x70   :  { %1914 = vmatprep.subr.bf16.mxu0 %v2096_v2 }
  0x71   :  { %1935 = vmatpush3.bf16.msra.mxu1 %v2095_v1 }
  0x72   :  { %1936 = vmatprep.subr.bf16.mxu1 %v2098_v4 }
  0x73   :  { %1915 = vmatpush3.bf16.msra.mxu0 %v2097_v3 }
  0x74   :  { %1916 = vmatprep.subr.bf16.mxu0 %v2100_v6 }
  0x75   :  { %1937 = vmatpush3.bf16.msra.mxu1 %v2099_v5 }
  0x76   :  { %1938 = vmatprep.subr.bf16.mxu1 %v2102_v8 }
  0x77   :  { %1917 = vmatpush3.bf16.msra.mxu0 %v2101_v7 }
  0x78   :  { %1918 = vmatprep.subr.bf16.mxu0 %v2104_v10 }
  0x79   :  { %1939 = vmatpush3.bf16.msra.mxu1 %v2103_v9 }
  0x7a   :  { %1940 = vmatprep.subr.bf16.mxu1 %v2106_v12 }
  0x7b   :  { %1919 = vmatpush3.bf16.msra.mxu0 %v2105_v11 }
  0x7c   :  { %1920 = vmatprep.subr.bf16.mxu0 %v2108_v14 }
  0x7d   :  { %1941 = vmatpush3.bf16.msra.mxu1 %v2107_v13 }
  0x7e   :  { %1942 = vmatprep.subr.bf16.mxu1 %v2110_v16 }
  0x7f   :  { %1921 = vmatpush3.bf16.msra.mxu0 %v2109_v15 }
  0x80   :  { %1950 = vmatprep.subr.bf16.mxu0 %v2114_v21 }
  0x81   :  { %1943 = vmatpush3.bf16.msra.mxu1 %v2113_v20 }
  0x82   :  { %1519 = vmatmul.mubr.bf16.vlgmr.msra.gmra.mrb[12].mxu0 %v1624_v18 }
  0x83   :  { %1951 = vmatpush3.bf16.msra.mxu0 %v2117_v25  ;;  %1598 = vmatprep.mubr.bf16.mxu0 %v1629_v36 }
  0x84   :  { %1559 = vmatmul.mubr.bf16.vlgmr.msra.gmra.mrb[12].mxu1 %v1626_v23  ;;  %1952 = vmatprep.subr.bf16.mxu0 %v2118_v26 }
  0x87   :  { %1953 = vmatpush3.bf16.msra.mxu0 %v2119_v27 }
  0x88   :  { %1954 = vmatprep.subr.bf16.mxu0 %v2120_v28 }
  0x8b   :  { %1955 = vmatpush3.bf16.msra.mxu0 %v2121_v29 }
  0x8c   :  { %1956 = vmatprep.subr.bf16.mxu0 %v2122_v30 }
  0x8f   :  { %1957 = vmatpush3.bf16.msra.mxu0 %v2123_v31 }
  0x90   :  { %1958 = vmatprep.subr.bf16.mxu0 %v2124_v32 }
  0x93   :  { %1959 = vmatpush3.bf16.msra.mxu0 %v2125_v33 }
  0x94   :  { %1960 = vmatprep.subr.bf16.mxu0 %v2126_v35 }
  0x97   :  { %1961 = vmatpush3.bf16.msra.mxu0 %v2127_v37 }
  0x98   :  { %1962 = vmatprep.subr.bf16.mxu0 %v2128_v38 }
  0x9b   :  { %1963 = vmatpush3.bf16.msra.mxu0 %v2129_v39 }
  0x9c   :  { %1964 = vmatprep.subr.bf16.mxu0 %v2130_v40 }
  0x9f   :  { %1965 = vmatpush3.bf16.msra.mxu0 %v2131_v41 }
  0xa2   :  { %1599 = vmatmul.mubr.bf16.vlgmr.msra.gmra.mrb[16].mxu0 %v1628_v42 }
  0xf5   :  { %v1790_v43 = vpop.f32.mrb[0].mxu0 }
  0xf6   :  { %v1791_v45 = vpop.f32.mrb[1].mxu0 }
  0xf7   :  { %v1792_v46 = vadd.f32 %v1791_v45, %v1790_v43  ;;  %v1793_v47 = vpop.f32.mrb[2].mxu0  ;;  %v1812_v48 = vpop.f32.mrb[0].mxu1 }
  0xf8   :  { %v1794_v49 = vpop.f32.mrb[3].mxu0  ;;  %v1813_v50 = vpop.f32.mrb[1].mxu1 }
  0xf9   :  { %v1281_v51 = vadd.f32 %v1792_v46, %v1611_v44  ;;  %v1814_v52 = vadd.f32 %v1813_v50, %v1812_v48  ;;  %v1815_v53 = vpop.f32.mrb[2].mxu1 }
  0xfa   :  { %v1816_v54 = vpop.f32.mrb[3].mxu1 }
  0xfb   :  { %v1321_v55 = vadd.f32 %v1814_v52, %v1281_v51 }
 0x115   :  { %v1834_v56 = vpop.f32.mrb[4].mxu0 }
 0x116   :  { %v1835_v57 = vpop.f32.mrb[5].mxu0 }
 0x117   :  { %v1836_v58 = vadd.f32 %v1835_v57, %v1834_v56  ;;  %v1837_v59 = vpop.f32.mrb[6].mxu0  ;;  %v1856_v60 = vpop.f32.mrb[4].mxu1 }
 0x118   :  { %v1838_v61 = vpop.f32.mrb[7].mxu0  ;;  %v1857_v63 = vpop.f32.mrb[5].mxu1 }
 0x119   :  { %v1361_v62 = vadd.f32 %v1836_v58, %v1321_v55  ;;  %v1858_v0 = vadd.f32 %v1857_v63, %v1856_v60  ;;  %v1859_v1 = vpop.f32.mrb[6].mxu1 }
 0x11a   :  { %v1860_v2 = vpop.f32.mrb[7].mxu1 }
 0x11b   :  { %v1401_v3 = vadd.f32 %v1858_v0, %v1361_v62 }
 0x135   :  { %v1878_v4 = vpop.f32.mrb[8].mxu0 }
 0x136   :  { %v1879_v5 = vpop.f32.mrb[9].mxu0 }
 0x137   :  { %v1880_v6 = vadd.f32 %v1879_v5, %v1878_v4  ;;  %v1881_v7 = vpop.f32.mrb[10].mxu0  ;;  %v1900_v8 = vpop.f32.mrb[8].mxu1 }
 0x138   :  { %v1882_v9 = vpop.f32.mrb[11].mxu0  ;;  %v1901_v10 = vpop.f32.mrb[9].mxu1 }
 0x139   :  { %v1441_v11 = vadd.f32 %v1880_v6, %v1401_v3  ;;  %v1902_v12 = vadd.f32 %v1901_v10, %v1900_v8  ;;  %v1903_v13 = vpop.f32.mrb[10].mxu1 }
 0x13a   :  { %v1904_v14 = vpop.f32.mrb[11].mxu1 }
 0x13b   :  { %v1481_v15 = vadd.f32 %v1902_v12, %v1441_v11 }
 0x155   :  { %v1922_v16 = vpop.f32.mrb[12].mxu0 }
 0x156   :  { %v1923_v17 = vpop.f32.mrb[13].mxu0 }
 0x157   :  { %v1924_v18 = vadd.f32 %v1923_v17, %v1922_v16  ;;  %v1925_v19 = vpop.f32.mrb[14].mxu0  ;;  %v1944_v20 = vpop.f32.mrb[12].mxu1 }
 0x158   :  { %v1926_v21 = vpop.f32.mrb[15].mxu0  ;;  %v1945_v22 = vpop.f32.mrb[13].mxu1 }
 0x159   :  { %v1521_v23 = vadd.f32 %v1924_v18, %v1481_v15  ;;  %v1946_v24 = vadd.f32 %v1945_v22, %v1944_v20  ;;  %v1947_v25 = vpop.f32.mrb[14].mxu1 }
 0x15a   :  { %v1948_v26 = vpop.f32.mrb[15].mxu1 }
 0x15b   :  { %v1561_v27 = vadd.f32 %v1946_v24, %v1521_v23 }
 0x175   :  { %v1966_v28 = vpop.f32.mrb[16].mxu0 }
 0x176   :  { %v1967_v29 = vpop.f32.mrb[17].mxu0 }
 0x177   :  { %v1968_v30 = vadd.f32 %v1967_v29, %v1966_v28  ;;  %v1969_v31 = vpop.f32.mrb[18].mxu0 }
 0x178   :  { %v1970_v32 = vpop.f32.mrb[19].mxu0 }
 0x179   :  { %v1601_v33 = vadd.f32 %v1968_v30, %v1561_v27 }
 0x17b   :  { %1606 = vst [vmem:[%s2622_s3] sm:$0xff] %v1601_v33 }

// kernel: enhanced_vqvae_forward.11
= control target key start
LH: loop header
LB: loop body
LE: loop exit
PB: predicated region body
PF: predicated region fallthrough
CT: control target
= control target key end

     0   :  { %s3525_s1 = inlined_call_operand.vmem [shape: bf16[2048,256], index: 1, kind: input, shape index: {}]   ;;  %s3526_s0 = inlined_call_operand.vmem [shape: bf16[8,2048], index: 0, kind: input, shape index: {}]   ;;  %s3527_s2 = inlined_call_operand.vmem [shape: f32[1,256], index: 2, kind: input, shape index: {}]   ;;  %s3528_s3 = inlined_call_operand.vmem [shape: bf16[8,256], index: 3, kind: output, shape index: {}]  }
   0x1   :  { %v2271_v0 = vld [vmem:[%s3525_s1 + $0x4] ss:$8 sps:$4 sm:$0xff]   ;;  %v2275_v2 = vld [vmem:[%s3525_s1] ss:$8 sps:$4 sm:$0xff]   ;;  %v2277_v4 = vld [vmem:[%s3525_s1 + $0x14] ss:$8 sps:$4 sm:$0xff]  }
   0x2   :  { %v2273_v1 = vld [vmem:[%s3525_s1 + $0x404] ss:$8 sps:$4 sm:$0xff]   ;;  %1626 = vmatprep.subr.bf16.mxu1 %v2271_v0  ;;  %v2276_v3 = vld [vmem:[%s3525_s1 + $0x400] ss:$8 sps:$4 sm:$0xff]   ;;  %v2279_v5 = vld [vmem:[%s3525_s1 + $0x414] ss:$8 sps:$4 sm:$0xff]  }
   0x3   :  { %1790 = vmatprep.subr.bf16.mxu0 %v2273_v1  ;;  %1627 = vmatpush1.bf16.msra.mxu1 %v2275_v2  ;;  %v2281_v6 = vld [vmem:[%s3525_s1 + $0x10] ss:$8 sps:$4 sm:$0xff]   ;;  %v2283_v8 = vld [vmem:[%s3525_s1 + $0x24] ss:$8 sps:$4 sm:$0xff]   ;;  %v2287_v10 = vld [vmem:[%s3525_s1 + $0x20] ss:$8 sps:$4 sm:$0xff]  }
   0x4   :  { %1791 = vmatpush1.bf16.msra.mxu0 %v2276_v3  ;;  %1628 = vmatprep.subr.bf16.mxu1 %v2277_v4  ;;  %v2282_v7 = vld [vmem:[%s3525_s1 + $0x410] ss:$8 sps:$4 sm:$0xff]   ;;  %v2285_v9 = vld [vmem:[%s3525_s1 + $0x424] ss:$8 sps:$4 sm:$0xff]   ;;  %v2288_v11 = vld [vmem:[%s3525_s1 + $0x420] ss:$8 sps:$4 sm:$0xff]  }
   0x5   :  { %1792 = vmatprep.subr.bf16.mxu0 %v2279_v5  ;;  %v2289_v12 = vld [vmem:[%s3525_s1 + $0x34] ss:$8 sps:$4 sm:$0xff]   ;;  %v2293_v14 = vld [vmem:[%s3525_s1 + $0x30] ss:$8 sps:$4 sm:$0xff]   ;;  %v2295_v16 = vld [vmem:[%s3525_s1 + $0x44] ss:$8 sps:$4 sm:$0xff]  }
   0x6   :  { %v2291_v13 = vld [vmem:[%s3525_s1 + $0x434] ss:$8 sps:$4 sm:$0xff]   ;;  %v2294_v15 = vld [vmem:[%s3525_s1 + $0x430] ss:$8 sps:$4 sm:$0xff]   ;;  %v2297_v17 = vld [vmem:[%s3525_s1 + $0x444] ss:$8 sps:$4 sm:$0xff]  }
   0x7   :  { %1629 = vmatpush1.bf16.msra.mxu1 %v2281_v6  ;;  %v2299_v18 = vld [vmem:[%s3525_s1 + $0x40] ss:$8 sps:$4 sm:$0xff]   ;;  %v2301_v20 = vld [vmem:[%s3525_s1 + $0x54] ss:$8 sps:$4 sm:$0xff]   ;;  %v2305_v22 = vld [vmem:[%s3525_s1 + $0x50] ss:$8 sps:$4 sm:$0xff]  }
   0x8   :  { %1793 = vmatpush1.bf16.msra.mxu0 %v2282_v7  ;;  %1630 = vmatprep.subr.bf16.mxu1 %v2283_v8  ;;  %v2300_v19 = vld [vmem:[%s3525_s1 + $0x440] ss:$8 sps:$4 sm:$0xff]   ;;  %v2303_v21 = vld [vmem:[%s3525_s1 + $0x454] ss:$8 sps:$4 sm:$0xff]   ;;  %v2306_v23 = vld [vmem:[%s3525_s1 + $0x450] ss:$8 sps:$4 sm:$0xff]  }
   0x9   :  { %1794 = vmatprep.subr.bf16.mxu0 %v2285_v9  ;;  %v2307_v24 = vld [vmem:[%s3525_s1 + $0x64] ss:$8 sps:$4 sm:$0xff]   ;;  %v2311_v26 = vld [vmem:[%s3525_s1 + $0x60] ss:$8 sps:$4 sm:$0xff]   ;;  %v2313_v28 = vld [vmem:[%s3525_s1 + $0x74] ss:$8 sps:$4 sm:$0xff]  }
   0xa   :  { %v2309_v25 = vld [vmem:[%s3525_s1 + $0x464] ss:$8 sps:$4 sm:$0xff]   ;;  %v2312_v27 = vld [vmem:[%s3525_s1 + $0x460] ss:$8 sps:$4 sm:$0xff]   ;;  %v2315_v29 = vld [vmem:[%s3525_s1 + $0x474] ss:$8 sps:$4 sm:$0xff]  }
   0xb   :  { %1631 = vmatpush1.bf16.msra.mxu1 %v2287_v10  ;;  %v2317_v30 = vld [vmem:[%s3525_s1 + $0x70] ss:$8 sps:$4 sm:$0xff]   ;;  %v2319_v32 = vld [vmem:[%s3525_s1 + $0x84] ss:$8 sps:$4 sm:$0xff]   ;;  %v2323_v34 = vld [vmem:[%s3525_s1 + $0x80] ss:$8 sps:$4 sm:$0xff]  }
   0xc   :  { %1795 = vmatpush1.bf16.msra.mxu0 %v2288_v11  ;;  %1632 = vmatprep.subr.bf16.mxu1 %v2289_v12  ;;  %v2318_v31 = vld [vmem:[%s3525_s1 + $0x470] ss:$8 sps:$4 sm:$0xff]   ;;  %v2321_v33 = vld [vmem:[%s3525_s1 + $0x484] ss:$8 sps:$4 sm:$0xff]   ;;  %v2324_v35 = vld [vmem:[%s3525_s1 + $0x480] ss:$8 sps:$4 sm:$0xff]  }
   0xd   :  { %1796 = vmatprep.subr.bf16.mxu0 %v2291_v13  ;;  %v2325_v36 = vld [vmem:[%s3525_s1 + $0x94] ss:$8 sps:$4 sm:$0xff]   ;;  %v2329_v38 = vld [vmem:[%s3525_s1 + $0x90] ss:$8 sps:$4 sm:$0xff]   ;;  %v2331_v40 = vld [vmem:[%s3525_s1 + $0xa4] ss:$8 sps:$4 sm:$0xff]  }
   0xe   :  { %v2327_v37 = vld [vmem:[%s3525_s1 + $0x494] ss:$8 sps:$4 sm:$0xff]   ;;  %v2330_v39 = vld [vmem:[%s3525_s1 + $0x490] ss:$8 sps:$4 sm:$0xff]   ;;  %v2333_v41 = vld [vmem:[%s3525_s1 + $0x4a4] ss:$8 sps:$4 sm:$0xff]  }
   0xf   :  { %1633 = vmatpush1.bf16.msra.mxu1 %v2293_v14  ;;  %v2335_v42 = vld [vmem:[%s3525_s1 + $0xa0] ss:$8 sps:$4 sm:$0xff]   ;;  %v2337_v44 = vld [vmem:[%s3525_s1 + $0xb4] ss:$8 sps:$4 sm:$0xff]   ;;  %v2341_v47 = vld [vmem:[%s3525_s1 + $0xb0] ss:$8 sps:$4 sm:$0xff]  }
  0x10   :  { %1797 = vmatpush1.bf16.msra.mxu0 %v2294_v15  ;;  %1634 = vmatprep.subr.bf16.mxu1 %v2295_v16  ;;  %v2336_v43 = vld [vmem:[%s3525_s1 + $0x4a0] ss:$8 sps:$4 sm:$0xff]   ;;  %v2339_v45 = vld [vmem:[%s3525_s1 + $0x4b4] ss:$8 sps:$4 sm:$0xff]   ;;  %v2342_v49 = vld [vmem:[%s3525_s1 + $0x4b0] ss:$8 sps:$4 sm:$0xff]  }
  0x11   :  { %1798 = vmatprep.subr.bf16.mxu0 %v2297_v17  ;;  %v14_v46 = vld [vmem:[%s3526_s0] sm:$0xff]  ;;  %v2349_v56 = vld [vmem:[%s3525_s1 + $0xd4] ss:$8 sps:$4 sm:$0xff]   ;;  %v2353_v58 = vld [vmem:[%s3525_s1 + $0xd0] ss:$8 sps:$4 sm:$0xff]  }
  0x12   :  { %v1970_v48 = vcombine.high %v14_v46, %v14_v46  ;;  %v18_v50 = vld [vmem:[%s3526_s0 + $0x20] sm:$0xff]  ;;  %v2351_v57 = vld [vmem:[%s3525_s1 + $0x4d4] ss:$8 sps:$4 sm:$0xff]   ;;  %v2354_v59 = vld [vmem:[%s3525_s1 + $0x4d0] ss:$8 sps:$4 sm:$0xff]   ;;  %v1969_v6 = vcombine.low %v14_v46, %v14_v46 }
  0x13   :  { %1635 = vmatpush1.bf16.msra.mxu1 %v2299_v18  ;;  %v2343_v51 = vld [vmem:[%s3525_s1 + $0xc4] ss:$8 sps:$4 sm:$0xff]   ;;  %v1978_v53 = vcombine.high %v18_v50, %v18_v50  ;;  %v2347_v54 = vld [vmem:[%s3525_s1 + $0xc0] ss:$8 sps:$4 sm:$0xff]   ;;  %v2361_v0 = vld [vmem:[%s3525_s1 + $0xf4] ss:$8 sps:$4 sm:$0xff]   ;;  %v1977_v7 = vcombine.low %v18_v50, %v18_v50 }
  0x14   :  { %1799 = vmatpush1.bf16.msra.mxu0 %v2300_v19  ;;  %1636 = vmatprep.subr.bf16.mxu1 %v2301_v20  ;;  %v2345_v52 = vld [vmem:[%s3525_s1 + $0x4c4] ss:$8 sps:$4 sm:$0xff]   ;;  %v2348_v55 = vld [vmem:[%s3525_s1 + $0x4c0] ss:$8 sps:$4 sm:$0xff]   ;;  %v2363_v1 = vld [vmem:[%s3525_s1 + $0x4f4] ss:$8 sps:$4 sm:$0xff]  }
  0x15   :  { %1800 = vmatprep.subr.bf16.mxu0 %v2303_v21  ;;  %1658 = vmatprep.mubr.bf16.mxu1 %v1970_v48  ;;  %v2355_v60 = vld [vmem:[%s3525_s1 + $0xe4] ss:$8 sps:$4 sm:$0xff]   ;;  %v2359_v62 = vld [vmem:[%s3525_s1 + $0xe0] ss:$8 sps:$4 sm:$0xff]   ;;  %v2365_v2 = vld [vmem:[%s3525_s1 + $0xf0] ss:$8 sps:$4 sm:$0xff]  }
  0x16   :  { %1822 = vmatprep.mubr.bf16.mxu0 %v1978_v53  ;;  %v2357_v61 = vld [vmem:[%s3525_s1 + $0x4e4] ss:$8 sps:$4 sm:$0xff]   ;;  %v2360_v63 = vld [vmem:[%s3525_s1 + $0x4e0] ss:$8 sps:$4 sm:$0xff]   ;;  %v2366_v3 = vld [vmem:[%s3525_s1 + $0x4f0] ss:$8 sps:$4 sm:$0xff]  }
  0x17   :  { %1637 = vmatpush1.bf16.msra.mxu1 %v2305_v22  ;;  %v2371_v4 = vld [vmem:[%s3525_s1 + $0x104] ss:$8 sps:$4 sm:$0xff]   ;;  %v2369_v8 = vld [vmem:[%s3525_s1 + $0x100] ss:$8 sps:$4 sm:$0xff]   ;;  %v2379_v10 = vld [vmem:[%s3525_s1 + $0x114] ss:$8 sps:$4 sm:$0xff]  }
  0x18   :  { %1801 = vmatpush1.bf16.msra.mxu0 %v2306_v23  ;;  %1638 = vmatprep.subr.bf16.mxu1 %v2307_v24  ;;  %v2376_v5 = vld [vmem:[%s3525_s1 + $0x504] ss:$8 sps:$4 sm:$0xff]   ;;  %v2374_v9 = vld [vmem:[%s3525_s1 + $0x500] ss:$8 sps:$4 sm:$0xff]   ;;  %v2382_v11 = vld [vmem:[%s3525_s1 + $0x514] ss:$8 sps:$4 sm:$0xff]  }
  0x19   :  { %1802 = vmatprep.subr.bf16.mxu0 %v2309_v25  ;;  %v2377_v12 = vld [vmem:[%s3525_s1 + $0x110] ss:$8 sps:$4 sm:$0xff]   ;;  %v2385_v14 = vld [vmem:[%s3525_s1 + $0x124] ss:$8 sps:$4 sm:$0xff]   ;;  %v2383_v16 = vld [vmem:[%s3525_s1 + $0x120] ss:$8 sps:$4 sm:$0xff]  }
  0x1a   :  { %v2380_v13 = vld [vmem:[%s3525_s1 + $0x510] ss:$8 sps:$4 sm:$0xff]   ;;  %v2388_v15 = vld [vmem:[%s3525_s1 + $0x524] ss:$8 sps:$4 sm:$0xff]   ;;  %v2386_v17 = vld [vmem:[%s3525_s1 + $0x520] ss:$8 sps:$4 sm:$0xff]  }
  0x1b   :  { %1639 = vmatpush1.bf16.msra.mxu1 %v2311_v26  ;;  %v2391_v18 = vld [vmem:[%s3525_s1 + $0x134] ss:$8 sps:$4 sm:$0xff]   ;;  %v2389_v20 = vld [vmem:[%s3525_s1 + $0x130] ss:$8 sps:$4 sm:$0xff]   ;;  %v2397_v22 = vld [vmem:[%s3525_s1 + $0x144] ss:$8 sps:$4 sm:$0xff]  }
  0x1c   :  { %1803 = vmatpush1.bf16.msra.mxu0 %v2312_v27  ;;  %1640 = vmatprep.subr.bf16.mxu1 %v2313_v28  ;;  %v2394_v19 = vld [vmem:[%s3525_s1 + $0x534] ss:$8 sps:$4 sm:$0xff]   ;;  %v2392_v21 = vld [vmem:[%s3525_s1 + $0x530] ss:$8 sps:$4 sm:$0xff]   ;;  %v2400_v23 = vld [vmem:[%s3525_s1 + $0x544] ss:$8 sps:$4 sm:$0xff]  }
  0x1d   :  { %1804 = vmatprep.subr.bf16.mxu0 %v2315_v29  ;;  %v2395_v24 = vld [vmem:[%s3525_s1 + $0x140] ss:$8 sps:$4 sm:$0xff]   ;;  %v2403_v26 = vld [vmem:[%s3525_s1 + $0x154] ss:$8 sps:$4 sm:$0xff]   ;;  %v2401_v28 = vld [vmem:[%s3525_s1 + $0x150] ss:$8 sps:$4 sm:$0xff]  }
  0x1e   :  { %v2398_v25 = vld [vmem:[%s3525_s1 + $0x540] ss:$8 sps:$4 sm:$0xff]   ;;  %v2406_v27 = vld [vmem:[%s3525_s1 + $0x554] ss:$8 sps:$4 sm:$0xff]   ;;  %v2404_v29 = vld [vmem:[%s3525_s1 + $0x550] ss:$8 sps:$4 sm:$0xff]  }
  0x1f   :  { %1641 = vmatpush1.bf16.msra.mxu1 %v2317_v30  ;;  %v2409_v30 = vld [vmem:[%s3525_s1 + $0x164] ss:$8 sps:$4 sm:$0xff]   ;;  %v2427_v46 = vld [vmem:[%s3525_s1 + $0x194] ss:$8 sps:$4 sm:$0xff]   ;;  %v2425_v48 = vld [vmem:[%s3525_s1 + $0x190] ss:$8 sps:$4 sm:$0xff]  }
  0x20   :  { %1805 = vmatpush1.bf16.msra.mxu0 %v2318_v31  ;;  %1642 = vmatprep.subr.bf16.mxu1 %v2319_v32  ;;  %v2412_v31 = vld [vmem:[%s3525_s1 + $0x564] ss:$8 sps:$4 sm:$0xff]   ;;  %v2434_v53 = vld [vmem:[%s3525_s1 + $0x5a0] ss:$8 sps:$4 sm:$0xff]  }
  0x21   :  { %1806 = vmatprep.subr.bf16.mxu0 %v2321_v33  ;;  %v2970_v32 = vld [vmem:[%s3526_s0 + $0x8] sm:$0xff] }
  0x22   :  { %v2407_v33 = vld [vmem:[%s3525_s1 + $0x160] ss:$8 sps:$4 sm:$0xff]   ;;  %v2433_v50 = vld [vmem:[%s3525_s1 + $0x1a4] ss:$8 sps:$4 sm:$0xff]  }
  0x23   :  { %1643 = vmatpush1.bf16.msra.mxu1 %v2323_v34  ;;  %v2410_v34 = vld [vmem:[%s3525_s1 + $0x560] ss:$8 sps:$4 sm:$0xff]  }
  0x24   :  { %1807 = vmatpush1.bf16.msra.mxu0 %v2324_v35  ;;  %1644 = vmatprep.subr.bf16.mxu1 %v2325_v36  ;;  %v1972_v35 = vcombine.high %v2970_v32, %v2970_v32  ;;  %v2983_v36 = vld [vmem:[%s3526_s0 + $0x28] sm:$0xff] }
  0x25   :  { %1808 = vmatprep.subr.bf16.mxu0 %v2327_v37  ;;  %v2415_v37 = vld [vmem:[%s3525_s1 + $0x174] ss:$8 sps:$4 sm:$0xff]  }
  0x27   :  { %1645 = vmatpush1.bf16.msra.mxu1 %v2329_v38  ;;  %v1980_v38 = vcombine.high %v2983_v36, %v2983_v36 }
  0x28   :  { %1809 = vmatpush1.bf16.msra.mxu0 %v2330_v39  ;;  %1646 = vmatprep.subr.bf16.mxu1 %v2331_v40  ;;  %v2418_v39 = vld [vmem:[%s3525_s1 + $0x574] ss:$8 sps:$4 sm:$0xff]   ;;  %v2413_v40 = vld [vmem:[%s3525_s1 + $0x170] ss:$8 sps:$4 sm:$0xff]  }
  0x29   :  { %1810 = vmatprep.subr.bf16.mxu0 %v2333_v41  ;;  %v2416_v41 = vld [vmem:[%s3525_s1 + $0x570] ss:$8 sps:$4 sm:$0xff]  }
  0x2b   :  { %1647 = vmatpush1.bf16.msra.mxu1 %v2335_v42  ;;  %v2421_v42 = vld [vmem:[%s3525_s1 + $0x184] ss:$8 sps:$4 sm:$0xff]  }
  0x2c   :  { %1811 = vmatpush1.bf16.msra.mxu0 %v2336_v43  ;;  %1648 = vmatprep.subr.bf16.mxu1 %v2337_v44  ;;  %v2424_v43 = vld [vmem:[%s3525_s1 + $0x584] ss:$8 sps:$4 sm:$0xff]   ;;  %v2419_v44 = vld [vmem:[%s3525_s1 + $0x180] ss:$8 sps:$4 sm:$0xff]  }
  0x2d   :  { %1812 = vmatprep.subr.bf16.mxu0 %v2339_v45  ;;  %v2422_v45 = vld [vmem:[%s3525_s1 + $0x580] ss:$8 sps:$4 sm:$0xff]  }
  0x2f   :  { %1649 = vmatpush1.bf16.msra.mxu1 %v2341_v47  ;;  %v2430_v47 = vld [vmem:[%s3525_s1 + $0x594] ss:$8 sps:$4 sm:$0xff]  }
  0x30   :  { %1813 = vmatpush1.bf16.msra.mxu0 %v2342_v49  ;;  %1650 = vmatprep.subr.bf16.mxu1 %v2343_v51  ;;  %v2428_v49 = vld [vmem:[%s3525_s1 + $0x590] ss:$8 sps:$4 sm:$0xff]   ;;  %v2436_v51 = vld [vmem:[%s3525_s1 + $0x5a4] ss:$8 sps:$4 sm:$0xff]  }
  0x31   :  { %1814 = vmatprep.subr.bf16.mxu0 %v2345_v52  ;;  %v2431_v52 = vld [vmem:[%s3525_s1 + $0x1a0] ss:$8 sps:$4 sm:$0xff]  }
  0x33   :  { %1651 = vmatpush1.bf16.msra.mxu1 %v2347_v54  ;;  %v2439_v54 = vld [vmem:[%s3525_s1 + $0x1b4] ss:$8 sps:$4 sm:$0xff]  }
  0x34   :  { %1815 = vmatpush1.bf16.msra.mxu0 %v2348_v55  ;;  %1652 = vmatprep.subr.bf16.mxu1 %v2349_v56  ;;  %v2442_v55 = vld [vmem:[%s3525_s1 + $0x5b4] ss:$8 sps:$4 sm:$0xff]   ;;  %v2437_v56 = vld [vmem:[%s3525_s1 + $0x1b0] ss:$8 sps:$4 sm:$0xff]  }
  0x35   :  { %1816 = vmatprep.subr.bf16.mxu0 %v2351_v57  ;;  %v2440_v57 = vld [vmem:[%s3525_s1 + $0x5b0] ss:$8 sps:$4 sm:$0xff]  }
  0x37   :  { %1653 = vmatpush1.bf16.msra.mxu1 %v2353_v58  ;;  %v2445_v58 = vld [vmem:[%s3525_s1 + $0x1c4] ss:$8 sps:$4 sm:$0xff]  }
  0x38   :  { %1817 = vmatpush1.bf16.msra.mxu0 %v2354_v59  ;;  %1654 = vmatprep.subr.bf16.mxu1 %v2355_v60  ;;  %v2448_v59 = vld [vmem:[%s3525_s1 + $0x5c4] ss:$8 sps:$4 sm:$0xff]   ;;  %v2443_v60 = vld [vmem:[%s3525_s1 + $0x1c0] ss:$8 sps:$4 sm:$0xff]  }
  0x39   :  { %1818 = vmatprep.subr.bf16.mxu0 %v2357_v61  ;;  %v2446_v61 = vld [vmem:[%s3525_s1 + $0x5c0] ss:$8 sps:$4 sm:$0xff]  }
  0x3b   :  { %1655 = vmatpush1.bf16.msra.mxu1 %v2359_v62  ;;  %v2451_v62 = vld [vmem:[%s3525_s1 + $0x1d4] ss:$8 sps:$4 sm:$0xff]  }
  0x3c   :  { %1819 = vmatpush1.bf16.msra.mxu0 %v2360_v63  ;;  %1656 = vmatprep.subr.bf16.mxu1 %v2361_v0  ;;  %v2454_v63 = vld [vmem:[%s3525_s1 + $0x5d4] ss:$8 sps:$4 sm:$0xff]   ;;  %v2449_v0 = vld [vmem:[%s3525_s1 + $0x1d0] ss:$8 sps:$4 sm:$0xff]  }
  0x3d   :  { %1820 = vmatprep.subr.bf16.mxu0 %v2363_v1  ;;  %v2452_v1 = vld [vmem:[%s3525_s1 + $0x5d0] ss:$8 sps:$4 sm:$0xff]  }
  0x3f   :  { %1657 = vmatpush1.bf16.msra.mxu1 %v2365_v2  ;;  %v2457_v2 = vld [vmem:[%s3525_s1 + $0x1e4] ss:$8 sps:$4 sm:$0xff]  }
  0x40   :  { %1821 = vmatpush1.bf16.msra.mxu0 %v2366_v3  ;;  %1667 = vmatprep.subr.bf16.mxu1 %v2371_v4  ;;  %v2460_v3 = vld [vmem:[%s3525_s1 + $0x5e4] ss:$8 sps:$4 sm:$0xff]   ;;  %v2455_v4 = vld [vmem:[%s3525_s1 + $0x1e0] ss:$8 sps:$4 sm:$0xff]  }
  0x41   :  { %1831 = vmatprep.subr.bf16.mxu0 %v2376_v5  ;;  %v2458_v5 = vld [vmem:[%s3525_s1 + $0x5e0] ss:$8 sps:$4 sm:$0xff]  }
  0x42   :  { %1659 = vmatmul.mubr.bf16.vlgmr.msra.gmra.mrb[0].mxu1 %v1969_v6  ;;  %v2463_v6 = vld [vmem:[%s3525_s1 + $0x1f4] ss:$8 sps:$4 sm:$0xff]  }
  0x43   :  { %1823 = vmatmul.mubr.bf16.vlgmr.msra.gmra.mrb[0].mxu0 %v1977_v7  ;;  %1668 = vmatpush1.bf16.msra.mxu1 %v2369_v8  ;;  %v2466_v7 = vld [vmem:[%s3525_s1 + $0x5f4] ss:$8 sps:$4 sm:$0xff]   ;;  %v2461_v8 = vld [vmem:[%s3525_s1 + $0x1f0] ss:$8 sps:$4 sm:$0xff]  }
  0x44   :  { %1832 = vmatpush1.bf16.msra.mxu0 %v2374_v9  ;;  %1669 = vmatprep.subr.bf16.mxu1 %v2379_v10  ;;  %v2464_v9 = vld [vmem:[%s3525_s1 + $0x5f0] ss:$8 sps:$4 sm:$0xff]   ;;  %v2471_v10 = vld [vmem:[%s3525_s1 + $0x204] ss:$8 sps:$4 sm:$0xff]  }
  0x45   :  { %1833 = vmatprep.subr.bf16.mxu0 %v2382_v11  ;;  %1699 = vmatprep.mubr.bf16.mxu1 %v1972_v35  ;;  %v2476_v11 = vld [vmem:[%s3525_s1 + $0x604] ss:$8 sps:$4 sm:$0xff]   ;;  %v2498_v35 = vld [vmem:[%s3525_s1 + $0x640] ss:$8 sps:$4 sm:$0xff]  }
  0x46   :  { %1863 = vmatprep.mubr.bf16.mxu0 %v1980_v38  ;;  %v2501_v38 = vld [vmem:[%s3525_s1 + $0x250] ss:$8 sps:$4 sm:$0xff]  }
  0x47   :  { %1670 = vmatpush1.bf16.msra.mxu1 %v2377_v12  ;;  %v1971_v12 = vcombine.low %v2970_v32, %v2970_v32  ;;  %v2497_v32 = vld [vmem:[%s3525_s1 + $0x244] ss:$8 sps:$4 sm:$0xff]  }
  0x48   :  { %1834 = vmatpush1.bf16.msra.mxu0 %v2380_v13  ;;  %1671 = vmatprep.subr.bf16.mxu1 %v2385_v14  ;;  %v2469_v13 = vld [vmem:[%s3525_s1 + $0x200] ss:$8 sps:$4 sm:$0xff]   ;;  %v1979_v14 = vcombine.low %v2983_v36, %v2983_v36  ;;  %v2503_v36 = vld [vmem:[%s3525_s1 + $0x254] ss:$8 sps:$4 sm:$0xff]  }
  0x49   :  { %1835 = vmatprep.subr.bf16.mxu0 %v2388_v15  ;;  %v2474_v15 = vld [vmem:[%s3525_s1 + $0x600] ss:$8 sps:$4 sm:$0xff]  }
  0x4b   :  { %1672 = vmatpush1.bf16.msra.mxu1 %v2383_v16  ;;  %v2479_v16 = vld [vmem:[%s3525_s1 + $0x214] ss:$8 sps:$4 sm:$0xff]  }
  0x4c   :  { %1836 = vmatpush1.bf16.msra.mxu0 %v2386_v17  ;;  %1673 = vmatprep.subr.bf16.mxu1 %v2391_v18  ;;  %v2482_v17 = vld [vmem:[%s3525_s1 + $0x614] ss:$8 sps:$4 sm:$0xff]  }
  0x4d   :  { %1837 = vmatprep.subr.bf16.mxu0 %v2394_v19  ;;  %v3120_v18 = vld [vmem:[%s3526_s0 + $0x10] sm:$0xff] }
  0x4e   :  { %v1974_v19 = vcombine.high %v3120_v18, %v3120_v18 }
  0x4f   :  { %1674 = vmatpush1.bf16.msra.mxu1 %v2389_v20  ;;  %v3127_v20 = vld [vmem:[%s3526_s0 + $0x30] sm:$0xff] }
  0x50   :  { %1838 = vmatpush1.bf16.msra.mxu0 %v2392_v21  ;;  %1675 = vmatprep.subr.bf16.mxu1 %v2397_v22  ;;  %v2477_v21 = vld [vmem:[%s3525_s1 + $0x210] ss:$8 sps:$4 sm:$0xff]  }
  0x51   :  { %1839 = vmatprep.subr.bf16.mxu0 %v2400_v23  ;;  %v2480_v22 = vld [vmem:[%s3525_s1 + $0x610] ss:$8 sps:$4 sm:$0xff]   ;;  %v1982_v23 = vcombine.high %v3127_v20, %v3127_v20 }
  0x53   :  { %1676 = vmatpush1.bf16.msra.mxu1 %v2395_v24  ;;  %v2485_v24 = vld [vmem:[%s3525_s1 + $0x224] ss:$8 sps:$4 sm:$0xff]  }
  0x54   :  { %1840 = vmatpush1.bf16.msra.mxu0 %v2398_v25  ;;  %1677 = vmatprep.subr.bf16.mxu1 %v2403_v26  ;;  %v2488_v25 = vld [vmem:[%s3525_s1 + $0x624] ss:$8 sps:$4 sm:$0xff]   ;;  %v2483_v26 = vld [vmem:[%s3525_s1 + $0x220] ss:$8 sps:$4 sm:$0xff]  }
  0x55   :  { %1841 = vmatprep.subr.bf16.mxu0 %v2406_v27  ;;  %v2486_v27 = vld [vmem:[%s3525_s1 + $0x620] ss:$8 sps:$4 sm:$0xff]  }
  0x57   :  { %1678 = vmatpush1.bf16.msra.mxu1 %v2401_v28  ;;  %v2491_v28 = vld [vmem:[%s3525_s1 + $0x234] ss:$8 sps:$4 sm:$0xff]  }
  0x58   :  { %1842 = vmatpush1.bf16.msra.mxu0 %v2404_v29  ;;  %1679 = vmatprep.subr.bf16.mxu1 %v2409_v30  ;;  %v2494_v29 = vld [vmem:[%s3525_s1 + $0x634] ss:$8 sps:$4 sm:$0xff]   ;;  %v2489_v30 = vld [vmem:[%s3525_s1 + $0x230] ss:$8 sps:$4 sm:$0xff]  }
  0x59   :  { %1843 = vmatprep.subr.bf16.mxu0 %v2412_v31  ;;  %v2492_v31 = vld [vmem:[%s3525_s1 + $0x630] ss:$8 sps:$4 sm:$0xff]  }
  0x5b   :  { %1680 = vmatpush1.bf16.msra.mxu1 %v2407_v33  ;;  %v2500_v33 = vld [vmem:[%s3525_s1 + $0x644] ss:$8 sps:$4 sm:$0xff]  }
  0x5c   :  { %1844 = vmatpush1.bf16.msra.mxu0 %v2410_v34  ;;  %1681 = vmatprep.subr.bf16.mxu1 %v2415_v37  ;;  %v2495_v34 = vld [vmem:[%s3525_s1 + $0x240] ss:$8 sps:$4 sm:$0xff]   ;;  %v2506_v37 = vld [vmem:[%s3525_s1 + $0x654] ss:$8 sps:$4 sm:$0xff]  }
  0x5d   :  { %1845 = vmatprep.subr.bf16.mxu0 %v2418_v39  ;;  %v2504_v39 = vld [vmem:[%s3525_s1 + $0x650] ss:$8 sps:$4 sm:$0xff]  }
  0x5f   :  { %1682 = vmatpush1.bf16.msra.mxu1 %v2413_v40  ;;  %v2509_v40 = vld [vmem:[%s3525_s1 + $0x264] ss:$8 sps:$4 sm:$0xff]  }
  0x60   :  { %1846 = vmatpush1.bf16.msra.mxu0 %v2416_v41  ;;  %1683 = vmatprep.subr.bf16.mxu1 %v2421_v42  ;;  %v2512_v41 = vld [vmem:[%s3525_s1 + $0x664] ss:$8 sps:$4 sm:$0xff]   ;;  %v2507_v42 = vld [vmem:[%s3525_s1 + $0x260] ss:$8 sps:$4 sm:$0xff]  }
  0x61   :  { %1847 = vmatprep.subr.bf16.mxu0 %v2424_v43  ;;  %v2510_v43 = vld [vmem:[%s3525_s1 + $0x660] ss:$8 sps:$4 sm:$0xff]  }
  0x63   :  { %1684 = vmatpush1.bf16.msra.mxu1 %v2419_v44  ;;  %v2515_v44 = vld [vmem:[%s3525_s1 + $0x274] ss:$8 sps:$4 sm:$0xff]  }
  0x64   :  { %1848 = vmatpush1.bf16.msra.mxu0 %v2422_v45  ;;  %1685 = vmatprep.subr.bf16.mxu1 %v2427_v46  ;;  %v2518_v45 = vld [vmem:[%s3525_s1 + $0x674] ss:$8 sps:$4 sm:$0xff]   ;;  %v2513_v46 = vld [vmem:[%s3525_s1 + $0x270] ss:$8 sps:$4 sm:$0xff]  }
  0x65   :  { %1849 = vmatprep.subr.bf16.mxu0 %v2430_v47  ;;  %v2516_v47 = vld [vmem:[%s3525_s1 + $0x670] ss:$8 sps:$4 sm:$0xff]  }
  0x67   :  { %1686 = vmatpush1.bf16.msra.mxu1 %v2425_v48  ;;  %v2521_v48 = vld [vmem:[%s3525_s1 + $0x284] ss:$8 sps:$4 sm:$0xff]  }
  0x68   :  { %1850 = vmatpush1.bf16.msra.mxu0 %v2428_v49  ;;  %1687 = vmatprep.subr.bf16.mxu1 %v2433_v50  ;;  %v2524_v49 = vld [vmem:[%s3525_s1 + $0x684] ss:$8 sps:$4 sm:$0xff]   ;;  %v2519_v50 = vld [vmem:[%s3525_s1 + $0x280] ss:$8 sps:$4 sm:$0xff]  }
  0x69   :  { %1851 = vmatprep.subr.bf16.mxu0 %v2436_v51  ;;  %v2522_v51 = vld [vmem:[%s3525_s1 + $0x680] ss:$8 sps:$4 sm:$0xff]  }
  0x6b   :  { %1688 = vmatpush1.bf16.msra.mxu1 %v2431_v52  ;;  %v2527_v52 = vld [vmem:[%s3525_s1 + $0x294] ss:$8 sps:$4 sm:$0xff]  }
  0x6c   :  { %1852 = vmatpush1.bf16.msra.mxu0 %v2434_v53  ;;  %1689 = vmatprep.subr.bf16.mxu1 %v2439_v54  ;;  %v2530_v53 = vld [vmem:[%s3525_s1 + $0x694] ss:$8 sps:$4 sm:$0xff]   ;;  %v2525_v54 = vld [vmem:[%s3525_s1 + $0x290] ss:$8 sps:$4 sm:$0xff]  }
  0x6d   :  { %1853 = vmatprep.subr.bf16.mxu0 %v2442_v55  ;;  %v2528_v55 = vld [vmem:[%s3525_s1 + $0x690] ss:$8 sps:$4 sm:$0xff]  }
  0x6f   :  { %1690 = vmatpush1.bf16.msra.mxu1 %v2437_v56  ;;  %v2533_v56 = vld [vmem:[%s3525_s1 + $0x2a4] ss:$8 sps:$4 sm:$0xff]  }
  0x70   :  { %1854 = vmatpush1.bf16.msra.mxu0 %v2440_v57  ;;  %1691 = vmatprep.subr.bf16.mxu1 %v2445_v58  ;;  %v2536_v57 = vld [vmem:[%s3525_s1 + $0x6a4] ss:$8 sps:$4 sm:$0xff]   ;;  %v2531_v58 = vld [vmem:[%s3525_s1 + $0x2a0] ss:$8 sps:$4 sm:$0xff]  }
  0x71   :  { %1855 = vmatprep.subr.bf16.mxu0 %v2448_v59  ;;  %v2534_v59 = vld [vmem:[%s3525_s1 + $0x6a0] ss:$8 sps:$4 sm:$0xff]  }
  0x73   :  { %1692 = vmatpush1.bf16.msra.mxu1 %v2443_v60  ;;  %v2539_v60 = vld [vmem:[%s3525_s1 + $0x2b4] ss:$8 sps:$4 sm:$0xff]  }
  0x74   :  { %1856 = vmatpush1.bf16.msra.mxu0 %v2446_v61  ;;  %1693 = vmatprep.subr.bf16.mxu1 %v2451_v62  ;;  %v2542_v61 = vld [vmem:[%s3525_s1 + $0x6b4] ss:$8 sps:$4 sm:$0xff]   ;;  %v2537_v62 = vld [vmem:[%s3525_s1 + $0x2b0] ss:$8 sps:$4 sm:$0xff]  }
  0x75   :  { %1857 = vmatprep.subr.bf16.mxu0 %v2454_v63  ;;  %v2540_v63 = vld [vmem:[%s3525_s1 + $0x6b0] ss:$8 sps:$4 sm:$0xff]  }
  0x77   :  { %1694 = vmatpush1.bf16.msra.mxu1 %v2449_v0  ;;  %v2545_v0 = vld [vmem:[%s3525_s1 + $0x2c4] ss:$8 sps:$4 sm:$0xff]  }
  0x78   :  { %1858 = vmatpush1.bf16.msra.mxu0 %v2452_v1  ;;  %1695 = vmatprep.subr.bf16.mxu1 %v2457_v2  ;;  %v2548_v1 = vld [vmem:[%s3525_s1 + $0x6c4] ss:$8 sps:$4 sm:$0xff]   ;;  %v2543_v2 = vld [vmem:[%s3525_s1 + $0x2c0] ss:$8 sps:$4 sm:$0xff]  }
  0x79   :  { %1859 = vmatprep.subr.bf16.mxu0 %v2460_v3  ;;  %v2546_v3 = vld [vmem:[%s3525_s1 + $0x6c0] ss:$8 sps:$4 sm:$0xff]  }
  0x7b   :  { %1696 = vmatpush1.bf16.msra.mxu1 %v2455_v4  ;;  %v2551_v4 = vld [vmem:[%s3525_s1 + $0x2d4] ss:$8 sps:$4 sm:$0xff]  }
  0x7c   :  { %1860 = vmatpush1.bf16.msra.mxu0 %v2458_v5  ;;  %1697 = vmatprep.subr.bf16.mxu1 %v2463_v6  ;;  %v2554_v5 = vld [vmem:[%s3525_s1 + $0x6d4] ss:$8 sps:$4 sm:$0xff]   ;;  %v2549_v6 = vld [vmem:[%s3525_s1 + $0x2d0] ss:$8 sps:$4 sm:$0xff]  }
  0x7d   :  { %1861 = vmatprep.subr.bf16.mxu0 %v2466_v7  ;;  %v2552_v7 = vld [vmem:[%s3525_s1 + $0x6d0] ss:$8 sps:$4 sm:$0xff]  }
  0x7f   :  { %1698 = vmatpush1.bf16.msra.mxu1 %v2461_v8  ;;  %v2557_v8 = vld [vmem:[%s3525_s1 + $0x2e4] ss:$8 sps:$4 sm:$0xff]  }
  0x80   :  { %1862 = vmatpush1.bf16.msra.mxu0 %v2464_v9  ;;  %1708 = vmatprep.subr.bf16.mxu1 %v2471_v10  ;;  %v2560_v9 = vld [vmem:[%s3525_s1 + $0x6e4] ss:$8 sps:$4 sm:$0xff]   ;;  %v2555_v10 = vld [vmem:[%s3525_s1 + $0x2e0] ss:$8 sps:$4 sm:$0xff]  }
  0x81   :  { %1872 = vmatprep.subr.bf16.mxu0 %v2476_v11  ;;  %v2558_v11 = vld [vmem:[%s3525_s1 + $0x6e0] ss:$8 sps:$4 sm:$0xff]  }
  0x82   :  { %1700 = vmatmul.mubr.bf16.vlgmr.msra.gmra.mrb[0].mxu1 %v1971_v12  ;;  %v2563_v12 = vld [vmem:[%s3525_s1 + $0x2f4] ss:$8 sps:$4 sm:$0xff]  }
  0x83   :  { %1864 = vmatmul.mubr.bf16.vlgmr.msra.gmra.mrb[0].mxu0 %v1979_v14  ;;  %1709 = vmatpush1.bf16.msra.mxu1 %v2469_v13  ;;  %v2566_v13 = vld [vmem:[%s3525_s1 + $0x6f4] ss:$8 sps:$4 sm:$0xff]   ;;  %v2561_v14 = vld [vmem:[%s3525_s1 + $0x2f0] ss:$8 sps:$4 sm:$0xff]  }
  0x84   :  { %1873 = vmatpush1.bf16.msra.mxu0 %v2474_v15  ;;  %1710 = vmatprep.subr.bf16.mxu1 %v2479_v16  ;;  %v2564_v15 = vld [vmem:[%s3525_s1 + $0x6f0] ss:$8 sps:$4 sm:$0xff]   ;;  %v2571_v16 = vld [vmem:[%s3525_s1 + $0x304] ss:$8 sps:$4 sm:$0xff]  }
  0x85   :  { %1874 = vmatprep.subr.bf16.mxu0 %v2482_v17  ;;  %1740 = vmatprep.mubr.bf16.mxu1 %v1974_v19  ;;  %v2576_v17 = vld [vmem:[%s3525_s1 + $0x704] ss:$8 sps:$4 sm:$0xff]   ;;  %v1973_v19 = vcombine.low %v3120_v18, %v3120_v18  ;;  %v2574_v18 = vld [vmem:[%s3525_s1 + $0x700] ss:$8 sps:$4 sm:$0xff]  }
  0x86   :  { %1904 = vmatprep.mubr.bf16.mxu0 %v1982_v23  ;;  %v3323_v23 = vld [vmem:[%s3526_s0 + $0x38] sm:$0xff] }
  0x87   :  { %1711 = vmatpush1.bf16.msra.mxu1 %v2477_v21  ;;  %v1981_v21 = vcombine.low %v3127_v20, %v3127_v20  ;;  %v2579_v20 = vld [vmem:[%s3525_s1 + $0x314] ss:$8 sps:$4 sm:$0xff]  }
  0x88   :  { %1875 = vmatpush1.bf16.msra.mxu0 %v2480_v22  ;;  %1712 = vmatprep.subr.bf16.mxu1 %v2485_v24  ;;  %v3318_v22 = vld [vmem:[%s3526_s0 + $0x18] sm:$0xff]  ;;  %v2569_v24 = vld [vmem:[%s3525_s1 + $0x300] ss:$8 sps:$4 sm:$0xff]  }
  0x89   :  { %1876 = vmatprep.subr.bf16.mxu0 %v2488_v25  ;;  %v2582_v25 = vld [vmem:[%s3525_s1 + $0x714] ss:$8 sps:$4 sm:$0xff]  }
  0x8b   :  { %1713 = vmatpush1.bf16.msra.mxu1 %v2483_v26  ;;  %v1976_v26 = vcombine.high %v3318_v22, %v3318_v22 }
  0x8c   :  { %1877 = vmatpush1.bf16.msra.mxu0 %v2486_v27  ;;  %1714 = vmatprep.subr.bf16.mxu1 %v2491_v28  ;;  %v1984_v27 = vcombine.high %v3323_v23, %v3323_v23  ;;  %v2577_v28 = vld [vmem:[%s3525_s1 + $0x310] ss:$8 sps:$4 sm:$0xff]  }
  0x8d   :  { %1878 = vmatprep.subr.bf16.mxu0 %v2494_v29  ;;  %v2580_v29 = vld [vmem:[%s3525_s1 + $0x710] ss:$8 sps:$4 sm:$0xff]  }
  0x8f   :  { %1715 = vmatpush1.bf16.msra.mxu1 %v2489_v30  ;;  %v2585_v30 = vld [vmem:[%s3525_s1 + $0x324] ss:$8 sps:$4 sm:$0xff]  }
  0x90   :  { %1879 = vmatpush1.bf16.msra.mxu0 %v2492_v31  ;;  %1716 = vmatprep.subr.bf16.mxu1 %v2497_v32  ;;  %v2588_v31 = vld [vmem:[%s3525_s1 + $0x724] ss:$8 sps:$4 sm:$0xff]   ;;  %v2583_v32 = vld [vmem:[%s3525_s1 + $0x320] ss:$8 sps:$4 sm:$0xff]  }
  0x91   :  { %1880 = vmatprep.subr.bf16.mxu0 %v2500_v33  ;;  %v2586_v33 = vld [vmem:[%s3525_s1 + $0x720] ss:$8 sps:$4 sm:$0xff]  }
  0x93   :  { %1717 = vmatpush1.bf16.msra.mxu1 %v2495_v34  ;;  %v2591_v34 = vld [vmem:[%s3525_s1 + $0x334] ss:$8 sps:$4 sm:$0xff]  }
  0x94   :  { %1881 = vmatpush1.bf16.msra.mxu0 %v2498_v35  ;;  %1718 = vmatprep.subr.bf16.mxu1 %v2503_v36  ;;  %v2594_v35 = vld [vmem:[%s3525_s1 + $0x734] ss:$8 sps:$4 sm:$0xff]   ;;  %v2589_v36 = vld [vmem:[%s3525_s1 + $0x330] ss:$8 sps:$4 sm:$0xff]  }
  0x95   :  { %1882 = vmatprep.subr.bf16.mxu0 %v2506_v37  ;;  %v2592_v37 = vld [vmem:[%s3525_s1 + $0x730] ss:$8 sps:$4 sm:$0xff]  }
  0x97   :  { %1719 = vmatpush1.bf16.msra.mxu1 %v2501_v38  ;;  %v2597_v38 = vld [vmem:[%s3525_s1 + $0x344] ss:$8 sps:$4 sm:$0xff]  }
  0x98   :  { %1883 = vmatpush1.bf16.msra.mxu0 %v2504_v39  ;;  %1720 = vmatprep.subr.bf16.mxu1 %v2509_v40  ;;  %v2600_v39 = vld [vmem:[%s3525_s1 + $0x744] ss:$8 sps:$4 sm:$0xff]   ;;  %v2595_v40 = vld [vmem:[%s3525_s1 + $0x340] ss:$8 sps:$4 sm:$0xff]  }
  0x99   :  { %1884 = vmatprep.subr.bf16.mxu0 %v2512_v41  ;;  %v2598_v41 = vld [vmem:[%s3525_s1 + $0x740] ss:$8 sps:$4 sm:$0xff]  }
  0x9b   :  { %1721 = vmatpush1.bf16.msra.mxu1 %v2507_v42  ;;  %v2603_v42 = vld [vmem:[%s3525_s1 + $0x354] ss:$8 sps:$4 sm:$0xff]  }
  0x9c   :  { %1885 = vmatpush1.bf16.msra.mxu0 %v2510_v43  ;;  %1722 = vmatprep.subr.bf16.mxu1 %v2515_v44  ;;  %v2606_v43 = vld [vmem:[%s3525_s1 + $0x754] ss:$8 sps:$4 sm:$0xff]   ;;  %v2601_v44 = vld [vmem:[%s3525_s1 + $0x350] ss:$8 sps:$4 sm:$0xff]  }
  0x9d   :  { %1886 = vmatprep.subr.bf16.mxu0 %v2518_v45  ;;  %v2604_v45 = vld [vmem:[%s3525_s1 + $0x750] ss:$8 sps:$4 sm:$0xff]  }
  0x9f   :  { %1723 = vmatpush1.bf16.msra.mxu1 %v2513_v46  ;;  %v2609_v46 = vld [vmem:[%s3525_s1 + $0x364] ss:$8 sps:$4 sm:$0xff]  }
  0xa0   :  { %1887 = vmatpush1.bf16.msra.mxu0 %v2516_v47  ;;  %1724 = vmatprep.subr.bf16.mxu1 %v2521_v48  ;;  %v2612_v47 = vld [vmem:[%s3525_s1 + $0x764] ss:$8 sps:$4 sm:$0xff]   ;;  %v2607_v48 = vld [vmem:[%s3525_s1 + $0x360] ss:$8 sps:$4 sm:$0xff]  }
  0xa1   :  { %1888 = vmatprep.subr.bf16.mxu0 %v2524_v49  ;;  %v2610_v49 = vld [vmem:[%s3525_s1 + $0x760] ss:$8 sps:$4 sm:$0xff]  }
  0xa3   :  { %1725 = vmatpush1.bf16.msra.mxu1 %v2519_v50  ;;  %v2615_v50 = vld [vmem:[%s3525_s1 + $0x374] ss:$8 sps:$4 sm:$0xff]  }
  0xa4   :  { %1889 = vmatpush1.bf16.msra.mxu0 %v2522_v51  ;;  %1726 = vmatprep.subr.bf16.mxu1 %v2527_v52  ;;  %v2618_v51 = vld [vmem:[%s3525_s1 + $0x774] ss:$8 sps:$4 sm:$0xff]   ;;  %v2613_v52 = vld [vmem:[%s3525_s1 + $0x370] ss:$8 sps:$4 sm:$0xff]  }
  0xa5   :  { %1890 = vmatprep.subr.bf16.mxu0 %v2530_v53  ;;  %v2616_v53 = vld [vmem:[%s3525_s1 + $0x770] ss:$8 sps:$4 sm:$0xff]  }
  0xa7   :  { %1727 = vmatpush1.bf16.msra.mxu1 %v2525_v54  ;;  %v2621_v54 = vld [vmem:[%s3525_s1 + $0x384] ss:$8 sps:$4 sm:$0xff]  }
  0xa8   :  { %1891 = vmatpush1.bf16.msra.mxu0 %v2528_v55  ;;  %1728 = vmatprep.subr.bf16.mxu1 %v2533_v56  ;;  %v2624_v55 = vld [vmem:[%s3525_s1 + $0x784] ss:$8 sps:$4 sm:$0xff]   ;;  %v2619_v56 = vld [vmem:[%s3525_s1 + $0x380] ss:$8 sps:$4 sm:$0xff]  }
  0xa9   :  { %1892 = vmatprep.subr.bf16.mxu0 %v2536_v57  ;;  %v2622_v57 = vld [vmem:[%s3525_s1 + $0x780] ss:$8 sps:$4 sm:$0xff]  }
  0xab   :  { %1729 = vmatpush1.bf16.msra.mxu1 %v2531_v58  ;;  %v2627_v58 = vld [vmem:[%s3525_s1 + $0x394] ss:$8 sps:$4 sm:$0xff]  }
  0xac   :  { %1893 = vmatpush1.bf16.msra.mxu0 %v2534_v59  ;;  %1730 = vmatprep.subr.bf16.mxu1 %v2539_v60  ;;  %v2630_v59 = vld [vmem:[%s3525_s1 + $0x794] ss:$8 sps:$4 sm:$0xff]   ;;  %v2625_v60 = vld [vmem:[%s3525_s1 + $0x390] ss:$8 sps:$4 sm:$0xff]  }
  0xad   :  { %1894 = vmatprep.subr.bf16.mxu0 %v2542_v61  ;;  %v2628_v61 = vld [vmem:[%s3525_s1 + $0x790] ss:$8 sps:$4 sm:$0xff]  }
  0xaf   :  { %1731 = vmatpush1.bf16.msra.mxu1 %v2537_v62  ;;  %v2633_v62 = vld [vmem:[%s3525_s1 + $0x3a4] ss:$8 sps:$4 sm:$0xff]  }
  0xb0   :  { %1895 = vmatpush1.bf16.msra.mxu0 %v2540_v63  ;;  %1732 = vmatprep.subr.bf16.mxu1 %v2545_v0  ;;  %v2636_v63 = vld [vmem:[%s3525_s1 + $0x7a4] ss:$8 sps:$4 sm:$0xff]   ;;  %v2631_v0 = vld [vmem:[%s3525_s1 + $0x3a0] ss:$8 sps:$4 sm:$0xff]  }
  0xb1   :  { %1896 = vmatprep.subr.bf16.mxu0 %v2548_v1  ;;  %v2634_v1 = vld [vmem:[%s3525_s1 + $0x7a0] ss:$8 sps:$4 sm:$0xff]  }
  0xb3   :  { %1733 = vmatpush1.bf16.msra.mxu1 %v2543_v2  ;;  %v2639_v2 = vld [vmem:[%s3525_s1 + $0x3b4] ss:$8 sps:$4 sm:$0xff]  }
  0xb4   :  { %1897 = vmatpush1.bf16.msra.mxu0 %v2546_v3  ;;  %1734 = vmatprep.subr.bf16.mxu1 %v2551_v4  ;;  %v2642_v3 = vld [vmem:[%s3525_s1 + $0x7b4] ss:$8 sps:$4 sm:$0xff]   ;;  %v2637_v4 = vld [vmem:[%s3525_s1 + $0x3b0] ss:$8 sps:$4 sm:$0xff]  }
  0xb5   :  { %1898 = vmatprep.subr.bf16.mxu0 %v2554_v5  ;;  %v2640_v5 = vld [vmem:[%s3525_s1 + $0x7b0] ss:$8 sps:$4 sm:$0xff]  }
  0xb7   :  { %1735 = vmatpush1.bf16.msra.mxu1 %v2549_v6  ;;  %v2645_v6 = vld [vmem:[%s3525_s1 + $0x3c4] ss:$8 sps:$4 sm:$0xff]  }
  0xb8   :  { %1899 = vmatpush1.bf16.msra.mxu0 %v2552_v7  ;;  %1736 = vmatprep.subr.bf16.mxu1 %v2557_v8  ;;  %v2648_v7 = vld [vmem:[%s3525_s1 + $0x7c4] ss:$8 sps:$4 sm:$0xff]   ;;  %v2643_v8 = vld [vmem:[%s3525_s1 + $0x3c0] ss:$8 sps:$4 sm:$0xff]  }
  0xb9   :  { %1900 = vmatprep.subr.bf16.mxu0 %v2560_v9  ;;  %v2646_v9 = vld [vmem:[%s3525_s1 + $0x7c0] ss:$8 sps:$4 sm:$0xff]  }
  0xbb   :  { %1737 = vmatpush1.bf16.msra.mxu1 %v2555_v10  ;;  %v2651_v10 = vld [vmem:[%s3525_s1 + $0x3d4] ss:$8 sps:$4 sm:$0xff]  }
  0xbc   :  { %1901 = vmatpush1.bf16.msra.mxu0 %v2558_v11  ;;  %1738 = vmatprep.subr.bf16.mxu1 %v2563_v12  ;;  %v2654_v11 = vld [vmem:[%s3525_s1 + $0x7d4] ss:$8 sps:$4 sm:$0xff]   ;;  %v2649_v12 = vld [vmem:[%s3525_s1 + $0x3d0] ss:$8 sps:$4 sm:$0xff]  }
  0xbd   :  { %1902 = vmatprep.subr.bf16.mxu0 %v2566_v13  ;;  %v2652_v13 = vld [vmem:[%s3525_s1 + $0x7d0] ss:$8 sps:$4 sm:$0xff]  }
  0xbf   :  { %1739 = vmatpush1.bf16.msra.mxu1 %v2561_v14  ;;  %v2657_v14 = vld [vmem:[%s3525_s1 + $0x3e4] ss:$8 sps:$4 sm:$0xff]  }
  0xc0   :  { %1903 = vmatpush1.bf16.msra.mxu0 %v2564_v15  ;;  %1749 = vmatprep.subr.bf16.mxu1 %v2571_v16  ;;  %v2660_v15 = vld [vmem:[%s3525_s1 + $0x7e4] ss:$8 sps:$4 sm:$0xff]   ;;  %v2655_v16 = vld [vmem:[%s3525_s1 + $0x3e0] ss:$8 sps:$4 sm:$0xff]  }
  0xc1   :  { %1913 = vmatprep.subr.bf16.mxu0 %v2576_v17  ;;  %v2658_v17 = vld [vmem:[%s3525_s1 + $0x7e0] ss:$8 sps:$4 sm:$0xff]  }
  0xc2   :  { %1741 = vmatmul.mubr.bf16.vlgmr.msra.gmra.mrb[0].mxu1 %v1973_v19  ;;  %v2663_v19 = vld [vmem:[%s3525_s1 + $0x3f4] ss:$8 sps:$4 sm:$0xff]  }
  0xc3   :  { %1905 = vmatmul.mubr.bf16.vlgmr.msra.gmra.mrb[0].mxu0 %v1981_v21  ;;  %1750 = vmatpush1.bf16.msra.mxu1 %v2569_v24  ;;  %v2666_v21 = vld [vmem:[%s3525_s1 + $0x7f4] ss:$8 sps:$4 sm:$0xff]   ;;  %v2661_v24 = vld [vmem:[%s3525_s1 + $0x3f0] ss:$8 sps:$4 sm:$0xff]  }
  0xc4   :  { %1914 = vmatpush1.bf16.msra.mxu0 %v2574_v18  ;;  %1751 = vmatprep.subr.bf16.mxu1 %v2579_v20  ;;  %v2664_v18 = vld [vmem:[%s3525_s1 + $0x7f0] ss:$8 sps:$4 sm:$0xff]   ;;  %v1975_v20 = vcombine.low %v3318_v22, %v3318_v22 }
  0xc5   :  { %1915 = vmatprep.subr.bf16.mxu0 %v2582_v25  ;;  %1781 = vmatprep.mubr.bf16.mxu1 %v1976_v26  ;;  %v1983_v25 = vcombine.low %v3323_v23, %v3323_v23  ;;  %v280_v26 = vlaneseq }
  0xc6   :  { %1945 = vmatprep.mubr.bf16.mxu0 %v1984_v27 }
  0xc7   :  { %1752 = vmatpush1.bf16.msra.mxu1 %v2577_v28  ;;  %v281_v27 = vshrl.u32 %v280_v26, 7 }
  0xc8   :  { %1916 = vmatpush1.bf16.msra.mxu0 %v2580_v29  ;;  %1753 = vmatprep.subr.bf16.mxu1 %v2585_v30  ;;  %v278_v29 = vld [vmem:[%s3527_s2] sm:$0x3] }
  0xc9   :  { %1917 = vmatprep.subr.bf16.mxu0 %v2588_v31  ;;  %v282_v28 = vsub.s32 0, %v281_v27  ;;  %v286_v30 = vsub.s32 1, %v281_v27 }
  0xcb   :  { %1754 = vmatpush1.bf16.msra.mxu1 %v2583_v32  ;;  %v283_v31 = vrot.slane %v278_v29, %v282_v28  ;;  %v287_v32 = vrot.slane %v278_v29, %v286_v30 }
  0xcc   :  { %1918 = vmatpush1.bf16.msra.mxu0 %v2586_v33  ;;  %1755 = vmatprep.subr.bf16.mxu1 %v2591_v34 }
  0xcd   :  { %1919 = vmatprep.subr.bf16.mxu0 %v2594_v35 }
  0xcf   :  { %1756 = vmatpush1.bf16.msra.mxu1 %v2589_v36 }
  0xd0   :  { %1920 = vmatpush1.bf16.msra.mxu0 %v2592_v37  ;;  %1757 = vmatprep.subr.bf16.mxu1 %v2597_v38 }
  0xd1   :  { %1921 = vmatprep.subr.bf16.mxu0 %v2600_v39 }
  0xd3   :  { %1758 = vmatpush1.bf16.msra.mxu1 %v2595_v40 }
  0xd4   :  { %1922 = vmatpush1.bf16.msra.mxu0 %v2598_v41  ;;  %1759 = vmatprep.subr.bf16.mxu1 %v2603_v42 }
  0xd5   :  { %1923 = vmatprep.subr.bf16.mxu0 %v2606_v43 }
  0xd7   :  { %1760 = vmatpush1.bf16.msra.mxu1 %v2601_v44 }
  0xd8   :  { %1924 = vmatpush1.bf16.msra.mxu0 %v2604_v45  ;;  %1761 = vmatprep.subr.bf16.mxu1 %v2609_v46 }
  0xd9   :  { %1925 = vmatprep.subr.bf16.mxu0 %v2612_v47 }
  0xdb   :  { %1762 = vmatpush1.bf16.msra.mxu1 %v2607_v48 }
  0xdc   :  { %1926 = vmatpush1.bf16.msra.mxu0 %v2610_v49  ;;  %1763 = vmatprep.subr.bf16.mxu1 %v2615_v50 }
  0xdd   :  { %1927 = vmatprep.subr.bf16.mxu0 %v2618_v51 }
  0xdf   :  { %1764 = vmatpush1.bf16.msra.mxu1 %v2613_v52 }
  0xe0   :  { %1928 = vmatpush1.bf16.msra.mxu0 %v2616_v53  ;;  %1765 = vmatprep.subr.bf16.mxu1 %v2621_v54 }
  0xe1   :  { %1929 = vmatprep.subr.bf16.mxu0 %v2624_v55 }
  0xe3   :  { %1766 = vmatpush1.bf16.msra.mxu1 %v2619_v56 }
  0xe4   :  { %1930 = vmatpush1.bf16.msra.mxu0 %v2622_v57  ;;  %1767 = vmatprep.subr.bf16.mxu1 %v2627_v58 }
  0xe5   :  { %1931 = vmatprep.subr.bf16.mxu0 %v2630_v59 }
  0xe7   :  { %1768 = vmatpush1.bf16.msra.mxu1 %v2625_v60 }
  0xe8   :  { %1932 = vmatpush1.bf16.msra.mxu0 %v2628_v61  ;;  %1769 = vmatprep.subr.bf16.mxu1 %v2633_v62 }
  0xe9   :  { %1933 = vmatprep.subr.bf16.mxu0 %v2636_v63 }
  0xeb   :  { %1770 = vmatpush1.bf16.msra.mxu1 %v2631_v0 }
  0xec   :  { %1934 = vmatpush1.bf16.msra.mxu0 %v2634_v1  ;;  %1771 = vmatprep.subr.bf16.mxu1 %v2639_v2 }
  0xed   :  { %1935 = vmatprep.subr.bf16.mxu0 %v2642_v3 }
  0xef   :  { %1772 = vmatpush1.bf16.msra.mxu1 %v2637_v4 }
  0xf0   :  { %1936 = vmatpush1.bf16.msra.mxu0 %v2640_v5  ;;  %1773 = vmatprep.subr.bf16.mxu1 %v2645_v6 }
  0xf1   :  { %1937 = vmatprep.subr.bf16.mxu0 %v2648_v7 }
  0xf3   :  { %1774 = vmatpush1.bf16.msra.mxu1 %v2643_v8 }
  0xf4   :  { %1938 = vmatpush1.bf16.msra.mxu0 %v2646_v9  ;;  %1775 = vmatprep.subr.bf16.mxu1 %v2651_v10 }
  0xf5   :  { %1939 = vmatprep.subr.bf16.mxu0 %v2654_v11 }
  0xf7   :  { %1776 = vmatpush1.bf16.msra.mxu1 %v2649_v12 }
  0xf8   :  { %1940 = vmatpush1.bf16.msra.mxu0 %v2652_v13  ;;  %1777 = vmatprep.subr.bf16.mxu1 %v2657_v14 }
  0xf9   :  { %1941 = vmatprep.subr.bf16.mxu0 %v2660_v15 }
  0xfb   :  { %1778 = vmatpush1.bf16.msra.mxu1 %v2655_v16 }
  0xfc   :  { %1942 = vmatpush1.bf16.msra.mxu0 %v2658_v17  ;;  %1779 = vmatprep.subr.bf16.mxu1 %v2663_v19 }
  0xfd   :  { %1943 = vmatprep.subr.bf16.mxu0 %v2666_v21 }
  0xff   :  { %1780 = vmatpush1.bf16.msra.mxu1 %v2661_v24 }
 0x100   :  { %1944 = vmatpush1.bf16.msra.mxu0 %v2664_v18 }
 0x102   :  { %1782 = vmatmul.mubr.bf16.vlgmr.msra.gmra.mrb[0].mxu1 %v1975_v20 }
 0x103   :  { %1946 = vmatmul.mubr.bf16.vlgmr.msra.gmra.mrb[0].mxu0 %v1983_v25 }
 0x1d5   :  { %v1783_v33 = vpop.f32.mrb[0].mxu1 }
 0x1d6   :  { %v1947_v34 = vpop.f32.mrb[0].mxu0  ;;  %v2243_v22 = vadd.f32 %v1783_v33, %v283_v31  ;;  %v1785_v35 = vpop.f32.mrb[1].mxu1 }
 0x1d7   :  { %v1949_v36 = vpop.f32.mrb[1].mxu0  ;;  %v2245_v23 = vadd.f32 %v1785_v35, %v287_v32  ;;  %v1787_v37 = vpop.f32.mrb[2].mxu1 }
 0x1d8   :  { %v1951_v38 = vpop.f32.mrb[2].mxu0  ;;  %v2244_v39 = vadd.f32 %v2243_v22, %v1947_v34  ;;  %v1788_v40 = vpop.f32.mrb[3].mxu1 }
 0x1d9   :  { %v1952_v41 = vpop.f32.mrb[3].mxu0  ;;  %v2246_v42 = vadd.f32 %v2245_v23, %v1949_v36 }
 0x1da   :  { %v1954_v43 = vmax.f32 %v2244_v39, 0.0 }
 0x1db   :  { %v1955_v44 = vmax.f32 %v2246_v42, 0.0 }
 0x1dd   :  { %v2242_v45 = vpack.c.bf16 %v1955_v44, %v1954_v43 }
 0x1df   :  { %1964 = vst [vmem:[%s3528_s3] sm:$0xff] %v2242_v45 }

// kernel: enhanced_vqvae_forward.13
= control target key start
LH: loop header
LB: loop body
LE: loop exit
PB: predicated region body
PF: predicated region fallthrough
CT: control target
= control target key end

     0   :  { %v111_v51 = vlaneseq  ;;  %vm138_vm1 = vcmask 7168   ;;  %s289_s1 = inlined_call_operand.vmem [shape: f32[256,128], index: 1, kind: input, shape index: {}]   ;;  %s290_s0 = inlined_call_operand.vmem [shape: f32[8,128], index: 0, kind: input, shape index: {}]   ;;  %s291_s2 = inlined_call_operand.vmem [shape: f32[1,256], index: 2, kind: input, shape index: {}]   ;;  %s292_s3 = inlined_call_operand.vmem [shape: s32[8,1], index: 3, kind: output, shape index: {}]  }
   0x1   :  { %v36_v0 = vld [vmem:[%s289_s1 + $0x80] sm:$0xff]  ;;  %v37_v1 = vld [vmem:[%s289_s1 + $0x88] sm:$0xff]  ;;  %v38_v5 = vld [vmem:[%s289_s1 + $0x90] sm:$0xff] }
   0x2   :  { %v20_v2 = vld [vmem:[%s289_s1] sm:$0xff]  ;;  %v60_v3 = vpack.c.bf16 %v37_v1, %v36_v0  ;;  %v21_v4 = vld [vmem:[%s289_s1 + $0x8] sm:$0xff]  ;;  %v39_v6 = vld [vmem:[%s289_s1 + $0x98] sm:$0xff]  ;;  %v112_v52 = vshrl.u32 %v111_v51, 7  ;;  %v128_v60 = vand.u32 127, %v111_v51 }
   0x3   :  { %v52_v7 = vpack.c.bf16 %v21_v4, %v20_v2  ;;  %v61_v8 = vpack.c.bf16 %v39_v6, %v38_v5  ;;  %v22_v9 = vld [vmem:[%s289_s1 + $0x10] sm:$0xff]  ;;  %v23_v10 = vld [vmem:[%s289_s1 + $0x18] sm:$0xff]  ;;  %v40_v11 = vld [vmem:[%s289_s1 + $0xa0] sm:$0xff] }
   0x4   :  { %144 = vmatprep.subr.bf16.mxu0 %v60_v3  ;;  %v41_v12 = vld [vmem:[%s289_s1 + $0xa8] sm:$0xff]  ;;  %v53_v13 = vpack.c.bf16 %v23_v10, %v22_v9  ;;  %v15_v15 = vld [vmem:[%s290_s0] sm:$0xff]  ;;  %v42_v20 = vld [vmem:[%s289_s1 + $0xb0] sm:$0xff]  ;;  %v113_v53 = vsub.s32 0, %v112_v52  ;;  %v117_v55 = vsub.s32 1, %v112_v52  ;;  %v129_v5 = vadd.s32 128, %v128_v60 }
   0x5   :  { %145 = vmatpush3.bf16.xpose.msra.mxu0 %v52_v7  ;;  %v62_v14 = vpack.c.bf16 %v41_v12, %v40_v11  ;;  %v19_v16 = vpack.c.bf16 %v15_v15, %v15_v15  ;;  %v16_v17 = vmul.f32 %v15_v15, %v15_v15  ;;  %v24_v18 = vld [vmem:[%s289_s1 + $0x20] sm:$0xff]  ;;  %v25_v19 = vld [vmem:[%s289_s1 + $0x28] sm:$0xff]  ;;  %v43_v21 = vld [vmem:[%s289_s1 + $0xb8] sm:$0xff] }
   0x6   :  { %146 = vmatprep.subr.bf16.mxu0 %v61_v8  ;;  %v54_v22 = vpack.c.bf16 %v25_v19, %v24_v18  ;;  %v63_v23 = vpack.c.bf16 %v43_v21, %v42_v20  ;;  %v26_v24 = vld [vmem:[%s289_s1 + $0x30] sm:$0xff]  ;;  %v27_v25 = vld [vmem:[%s289_s1 + $0x38] sm:$0xff]  ;;  %v44_v26 = vld [vmem:[%s289_s1 + $0xc0] sm:$0xff] }
   0x7   :  { %160 = vmatprep.mubr.bf16.mxu0 %v19_v16  ;;  %17 = vadd.xlane.f32.xlu0 %v16_v17  ;;  %v45_v27 = vld [vmem:[%s289_s1 + $0xc8] sm:$0xff]  ;;  %v55_v28 = vpack.c.bf16 %v27_v25, %v26_v24  ;;  %v28_v30 = vld [vmem:[%s289_s1 + $0x40] sm:$0xff]  ;;  %v46_v32 = vld [vmem:[%s289_s1 + $0xd0] sm:$0xff] }
   0x8   :  { %v64_v29 = vpack.c.bf16 %v45_v27, %v44_v26  ;;  %v29_v31 = vld [vmem:[%s289_s1 + $0x48] sm:$0xff]  ;;  %v47_v33 = vld [vmem:[%s289_s1 + $0xd8] sm:$0xff]  ;;  %v30_v36 = vld [vmem:[%s289_s1 + $0x50] sm:$0xff] }
   0x9   :  { %v56_v34 = vpack.c.bf16 %v29_v31, %v28_v30  ;;  %v65_v35 = vpack.c.bf16 %v47_v33, %v46_v32  ;;  %v31_v37 = vld [vmem:[%s289_s1 + $0x58] sm:$0xff]  ;;  %v48_v38 = vld [vmem:[%s289_s1 + $0xe0] sm:$0xff]  ;;  %v49_v39 = vld [vmem:[%s289_s1 + $0xe8] sm:$0xff] }
   0xa   :  { %v57_v40 = vpack.c.bf16 %v31_v37, %v30_v36  ;;  %v66_v41 = vpack.c.bf16 %v49_v39, %v48_v38  ;;  %v32_v42 = vld [vmem:[%s289_s1 + $0x60] sm:$0xff]  ;;  %v33_v43 = vld [vmem:[%s289_s1 + $0x68] sm:$0xff]  ;;  %v50_v44 = vld [vmem:[%s289_s1 + $0xf0] sm:$0xff] }
   0xb   :  { %v51_v45 = vld [vmem:[%s289_s1 + $0xf8] sm:$0xff]  ;;  %v58_v46 = vpack.c.bf16 %v33_v43, %v32_v42  ;;  %v34_v48 = vld [vmem:[%s289_s1 + $0x70] sm:$0xff]  ;;  %v109_v54 = vld [vmem:[%s291_s2] sm:$0x3] }
   0xc   :  { %v67_v47 = vpack.c.bf16 %v51_v45, %v50_v44  ;;  %v35_v49 = vld [vmem:[%s289_s1 + $0x78] sm:$0xff]  ;;  %v114_v56 = vrot.slane %v109_v54, %v113_v53  ;;  %v118_v57 = vrot.slane %v109_v54, %v117_v55 }
   0xd   :  { %147 = vmatpush3.bf16.xpose.msra.mxu0 %v53_v13  ;;  %v59_v50 = vpack.c.bf16 %v35_v49, %v34_v48 }
   0xe   :  { %148 = vmatprep.subr.bf16.mxu0 %v62_v14 }
  0x15   :  { %149 = vmatpush3.bf16.xpose.msra.mxu0 %v54_v22 }
  0x16   :  { %150 = vmatprep.subr.bf16.mxu0 %v63_v23 }
  0x1d   :  { %151 = vmatpush3.bf16.xpose.msra.mxu0 %v55_v28 }
  0x1e   :  { %152 = vmatprep.subr.bf16.mxu0 %v64_v29 }
  0x25   :  { %153 = vmatpush3.bf16.xpose.msra.mxu0 %v56_v34 }
  0x26   :  { %154 = vmatprep.subr.bf16.mxu0 %v65_v35 }
  0x2d   :  { %155 = vmatpush3.bf16.xpose.msra.mxu0 %v57_v40 }
  0x2e   :  { %156 = vmatprep.subr.bf16.mxu0 %v66_v41 }
  0x35   :  { %157 = vmatpush3.bf16.xpose.msra.mxu0 %v58_v46 }
  0x36   :  { %158 = vmatprep.subr.bf16.mxu0 %v67_v47 }
  0x3d   :  { %159 = vmatpush3.bf16.xpose.msra.mxu0 %v59_v50 }
  0x44   :  { %161 = vmatmul.mubr.bf16.vlgmr.msra.gmra.mrb[0].mxu0 %v19_v16 }
  0x94   :  { %v18_v58 = vpop.xlane.xlu0 %17 }
  0x95   :  { %v121_v59 = vadd.f32 %v114_v56, %v18_v58  ;;  %v122_v62 = vadd.f32 %v118_v57, %v18_v58 }
 0x117   :  { %v102_v61 = vpop.f32.mrb[0].mxu0 }
 0x118   :  { %v123_v63 = vmul.f32 2.0, %v102_v61  ;;  %v104_v0 = vpop.f32.mrb[1].mxu0 }
 0x119   :  { %v124_v1 = vmul.f32 2.0, %v104_v0  ;;  %v106_v2 = vpop.f32.mrb[2].mxu0 }
 0x11a   :  { %v125_v3 = vsub.f32 %v121_v59, %v123_v63  ;;  %v107_v4 = vpop.f32.mrb[3].mxu0 }
 0x11b   :  { %v126_v6 = vsub.f32 %v122_v62, %v124_v1 }
 0x11d   :  { %vm130_vm0 = vcmp.le.f32.partialorder %v125_v3, %v126_v6 }
 0x11e   :  { %v131_v7 = vsel %vm130_vm0, %v125_v3, %v126_v6  ;;  %v132_v8 = vsel %vm130_vm0, %v128_v60, %v129_v5 }
 0x11f   :  { %133 = vmin.index.xlane.f32.xlu0 %v131_v7 }
 0x1ac   :  { %v134_v9 = vpop.xlane.xlu0 %133 }
 0x1ad   :  { %163 = vset.pattern.permute.xlu0 %v134_v9  ;;  %162 = vset.pattern.permute.xlu1 %v134_v9 }
 0x1b1   :  { %136 = vperm.xlu1 %162, %v132_v8  }
 0x230   :  { %v137_v10 = vpop.permute.xlu1 %136 }
 0x231   :  { %139 = vst.msk [vmem:[%s292_s3] sm:$0xff] %vm138_vm1, %v137_v10 }

// kernel: enhanced_vqvae_forward.14
= control target key start
LH: loop header
LB: loop body
LE: loop exit
PB: predicated region body
PF: predicated region fallthrough
CT: control target
= control target key end

     0   :  { %s6972_s1 = inlined_call_operand.vmem [shape: bf16[1152,1024], index: 1, kind: input, shape index: {}]   ;;  %s6973_s0 = inlined_call_operand.vmem [shape: bf16[8,1152], index: 0, kind: input, shape index: {}]   ;;  %s6974_s2 = inlined_call_operand.vmem [shape: f32[1,1024], index: 2, kind: input, shape index: {}]   ;;  %s6975_s3 = inlined_call_operand.vmem [shape: bf16[8,1024], index: 3, kind: output, shape index: {}]  }
   0x1   :  { %v20_v0 = vld [vmem:[%s6972_s1] sm:$0xff]  ;;  %v21_v2 = vld [vmem:[%s6972_s1 + $0x8] sm:$0xff] }
   0x2   :  { %v24_v1 = vld [vmem:[%s6972_s1 + $0x20] sm:$0xff]  ;;  %v25_v4 = vld [vmem:[%s6972_s1 + $0x28] sm:$0xff] }
   0x3   :  { %v4428_v3 = vcombine.high %v20_v0, %v24_v1  ;;  %v4427_v5 = vcombine.low %v20_v0, %v24_v1  ;;  %v28_v6 = vld [vmem:[%s6972_s1 + $0x40] sm:$0xff]  ;;  %v4430_v8 = vcombine.high %v21_v2, %v25_v4  ;;  %v4429_v9 = vcombine.low %v21_v2, %v25_v4  ;;  %v29_v11 = vld [vmem:[%s6972_s1 + $0x48] sm:$0xff] }
   0x4   :  { %v32_v7 = vld [vmem:[%s6972_s1 + $0x60] sm:$0xff]  ;;  %v33_v12 = vld [vmem:[%s6972_s1 + $0x68] sm:$0xff] }
   0x5   :  { %v4436_v10 = vcombine.high %v28_v6, %v32_v7  ;;  %v36_v13 = vld [vmem:[%s6972_s1 + $0x80] sm:$0xff]  ;;  %3550 = vmatprep.subr.bf16.mxu0 %v4428_v3  ;;  %v4438_v14 = vcombine.high %v29_v11, %v33_v12  ;;  %v37_v16 = vld [vmem:[%s6972_s1 + $0x88] sm:$0xff]  ;;  %3755 = vmatprep.subr.bf16.mxu1 %v4430_v8  ;;  %v4435_v18 = vcombine.low %v28_v6, %v32_v7 }
   0x6   :  { %v40_v15 = vld [vmem:[%s6972_s1 + $0xa0] sm:$0xff]  ;;  %v41_v17 = vld [vmem:[%s6972_s1 + $0xa8] sm:$0xff]  ;;  %3551 = vmatpush1.bf16.msra.mxu0 %v4427_v5  ;;  %3756 = vmatpush1.bf16.msra.mxu1 %v4429_v9  ;;  %v4437_v19 = vcombine.low %v29_v11, %v33_v12 }
   0x7   :  { %3552 = vmatprep.subr.bf16.mxu0 %v4436_v10  ;;  %v4444_v20 = vcombine.high %v36_v13, %v40_v15  ;;  %3757 = vmatprep.subr.bf16.mxu1 %v4438_v14  ;;  %v4446_v21 = vcombine.high %v37_v16, %v41_v17  ;;  %v44_v22 = vld [vmem:[%s6972_s1 + $0xc0] sm:$0xff]  ;;  %v45_v24 = vld [vmem:[%s6972_s1 + $0xc8] sm:$0xff]  ;;  %v4443_v26 = vcombine.low %v36_v13, %v40_v15 }
   0x8   :  { %v48_v23 = vld [vmem:[%s6972_s1 + $0xe0] sm:$0xff]  ;;  %v49_v25 = vld [vmem:[%s6972_s1 + $0xe8] sm:$0xff]  ;;  %v4445_v27 = vcombine.low %v37_v16, %v41_v17 }
   0x9   :  { %v4452_v28 = vcombine.high %v44_v22, %v48_v23  ;;  %v4454_v29 = vcombine.high %v45_v24, %v49_v25  ;;  %v52_v30 = vld [vmem:[%s6972_s1 + $0x100] sm:$0xff]  ;;  %v53_v32 = vld [vmem:[%s6972_s1 + $0x108] sm:$0xff]  ;;  %v4451_v34 = vcombine.low %v44_v22, %v48_v23  ;;  %v4453_v35 = vcombine.low %v45_v24, %v49_v25 }
   0xa   :  { %3553 = vmatpush1.bf16.msra.mxu0 %v4435_v18  ;;  %3758 = vmatpush1.bf16.msra.mxu1 %v4437_v19  ;;  %v56_v31 = vld [vmem:[%s6972_s1 + $0x120] sm:$0xff]  ;;  %v57_v33 = vld [vmem:[%s6972_s1 + $0x128] sm:$0xff] }
   0xb   :  { %3554 = vmatprep.subr.bf16.mxu0 %v4444_v20  ;;  %3759 = vmatprep.subr.bf16.mxu1 %v4446_v21  ;;  %v4460_v36 = vcombine.high %v52_v30, %v56_v31  ;;  %v4462_v37 = vcombine.high %v53_v32, %v57_v33  ;;  %v60_v38 = vld [vmem:[%s6972_s1 + $0x140] sm:$0xff]  ;;  %v61_v40 = vld [vmem:[%s6972_s1 + $0x148] sm:$0xff]  ;;  %v4459_v42 = vcombine.low %v52_v30, %v56_v31 }
   0xc   :  { %v64_v39 = vld [vmem:[%s6972_s1 + $0x160] sm:$0xff]  ;;  %v65_v41 = vld [vmem:[%s6972_s1 + $0x168] sm:$0xff]  ;;  %v4461_v43 = vcombine.low %v53_v32, %v57_v33 }
   0xd   :  { %v4468_v44 = vcombine.high %v60_v38, %v64_v39  ;;  %v4470_v45 = vcombine.high %v61_v40, %v65_v41  ;;  %v68_v46 = vld [vmem:[%s6972_s1 + $0x180] sm:$0xff]  ;;  %v69_v48 = vld [vmem:[%s6972_s1 + $0x188] sm:$0xff]  ;;  %v4467_v50 = vcombine.low %v60_v38, %v64_v39  ;;  %v4469_v51 = vcombine.low %v61_v40, %v65_v41 }
   0xe   :  { %3555 = vmatpush1.bf16.msra.mxu0 %v4443_v26  ;;  %3760 = vmatpush1.bf16.msra.mxu1 %v4445_v27  ;;  %v72_v47 = vld [vmem:[%s6972_s1 + $0x1a0] sm:$0xff]  ;;  %v73_v49 = vld [vmem:[%s6972_s1 + $0x1a8] sm:$0xff] }
   0xf   :  { %3556 = vmatprep.subr.bf16.mxu0 %v4452_v28  ;;  %3761 = vmatprep.subr.bf16.mxu1 %v4454_v29  ;;  %v4476_v52 = vcombine.high %v68_v46, %v72_v47  ;;  %v5202_v53 = vld [vmem:[%s6973_s0] sm:$0xff]  ;;  %v4478_v54 = vcombine.high %v69_v48, %v73_v49  ;;  %v77_v58 = vld [vmem:[%s6972_s1 + $0x1c8] sm:$0xff]  ;;  %v4475_v60 = vcombine.low %v68_v46, %v72_v47 }
  0x10   :  { %v76_v55 = vld [vmem:[%s6972_s1 + $0x1c0] sm:$0xff]  ;;  %v5212_v57 = vcombine.high %v5202_v53, %v5202_v53  ;;  %v81_v59 = vld [vmem:[%s6972_s1 + $0x1e8] sm:$0xff]  ;;  %v4477_v61 = vcombine.low %v69_v48, %v73_v49 }
  0x11   :  { %v80_v56 = vld [vmem:[%s6972_s1 + $0x1e0] sm:$0xff]  ;;  %v4486_v63 = vcombine.high %v77_v58, %v81_v59  ;;  %v85_v2 = vld [vmem:[%s6972_s1 + $0x208] sm:$0xff]  ;;  %v4485_v5 = vcombine.low %v77_v58, %v81_v59 }
  0x12   :  { %3557 = vmatpush1.bf16.msra.mxu0 %v4451_v34  ;;  %3762 = vmatpush1.bf16.msra.mxu1 %v4453_v35  ;;  %v4484_v62 = vcombine.high %v76_v55, %v80_v56  ;;  %v84_v0 = vld [vmem:[%s6972_s1 + $0x200] sm:$0xff]  ;;  %v89_v3 = vld [vmem:[%s6972_s1 + $0x228] sm:$0xff]  ;;  %v4483_v4 = vcombine.low %v76_v55, %v80_v56 }
  0x13   :  { %3558 = vmatprep.subr.bf16.mxu0 %v4460_v36  ;;  %3763 = vmatprep.subr.bf16.mxu1 %v4462_v37  ;;  %v88_v1 = vld [vmem:[%s6972_s1 + $0x220] sm:$0xff]  ;;  %v4494_v7 = vcombine.high %v85_v2, %v89_v3  ;;  %v93_v10 = vld [vmem:[%s6972_s1 + $0x248] sm:$0xff]  ;;  %v4493_v13 = vcombine.low %v85_v2, %v89_v3 }
  0x14   :  { %3582 = vmatprep.mubr.bf16.mxu0 %v5212_v57  ;;  %3787 = vmatprep.mubr.bf16.mxu1 %v5212_v57  ;;  %v4492_v6 = vcombine.high %v84_v0, %v88_v1  ;;  %v92_v8 = vld [vmem:[%s6972_s1 + $0x240] sm:$0xff]  ;;  %v97_v11 = vld [vmem:[%s6972_s1 + $0x268] sm:$0xff]  ;;  %v4491_v12 = vcombine.low %v84_v0, %v88_v1 }
  0x15   :  { %v96_v9 = vld [vmem:[%s6972_s1 + $0x260] sm:$0xff]  ;;  %v4502_v15 = vcombine.high %v93_v10, %v97_v11  ;;  %v101_v18 = vld [vmem:[%s6972_s1 + $0x288] sm:$0xff]  ;;  %v4501_v21 = vcombine.low %v93_v10, %v97_v11 }
  0x16   :  { %3559 = vmatpush1.bf16.msra.mxu0 %v4459_v42  ;;  %3764 = vmatpush1.bf16.msra.mxu1 %v4461_v43  ;;  %v4500_v14 = vcombine.high %v92_v8, %v96_v9  ;;  %v100_v16 = vld [vmem:[%s6972_s1 + $0x280] sm:$0xff]  ;;  %v105_v19 = vld [vmem:[%s6972_s1 + $0x2a8] sm:$0xff]  ;;  %v4499_v20 = vcombine.low %v92_v8, %v96_v9 }
  0x17   :  { %3560 = vmatprep.subr.bf16.mxu0 %v4468_v44  ;;  %3765 = vmatprep.subr.bf16.mxu1 %v4470_v45  ;;  %v104_v17 = vld [vmem:[%s6972_s1 + $0x2a0] sm:$0xff]  ;;  %v4510_v23 = vcombine.high %v101_v18, %v105_v19  ;;  %v109_v26 = vld [vmem:[%s6972_s1 + $0x2c8] sm:$0xff]  ;;  %v4509_v29 = vcombine.low %v101_v18, %v105_v19 }
  0x18   :  { %v4508_v22 = vcombine.high %v100_v16, %v104_v17  ;;  %v108_v24 = vld [vmem:[%s6972_s1 + $0x2c0] sm:$0xff]  ;;  %v113_v27 = vld [vmem:[%s6972_s1 + $0x2e8] sm:$0xff]  ;;  %v4507_v28 = vcombine.low %v100_v16, %v104_v17 }
  0x19   :  { %v112_v25 = vld [vmem:[%s6972_s1 + $0x2e0] sm:$0xff]  ;;  %v4518_v31 = vcombine.high %v109_v26, %v113_v27  ;;  %v117_v34 = vld [vmem:[%s6972_s1 + $0x308] sm:$0xff]  ;;  %v4517_v37 = vcombine.low %v109_v26, %v113_v27 }
  0x1a   :  { %3561 = vmatpush1.bf16.msra.mxu0 %v4467_v50  ;;  %3766 = vmatpush1.bf16.msra.mxu1 %v4469_v51  ;;  %v4516_v30 = vcombine.high %v108_v24, %v112_v25  ;;  %v116_v32 = vld [vmem:[%s6972_s1 + $0x300] sm:$0xff]  ;;  %v121_v35 = vld [vmem:[%s6972_s1 + $0x328] sm:$0xff]  ;;  %v4515_v36 = vcombine.low %v108_v24, %v112_v25 }
  0x1b   :  { %3562 = vmatprep.subr.bf16.mxu0 %v4476_v52  ;;  %3767 = vmatprep.subr.bf16.mxu1 %v4478_v54  ;;  %v120_v33 = vld [vmem:[%s6972_s1 + $0x320] sm:$0xff]  ;;  %v4526_v39 = vcombine.high %v117_v34, %v121_v35  ;;  %v125_v42 = vld [vmem:[%s6972_s1 + $0x348] sm:$0xff]  ;;  %v4525_v45 = vcombine.low %v117_v34, %v121_v35 }
  0x1c   :  { %v4524_v38 = vcombine.high %v116_v32, %v120_v33  ;;  %v124_v40 = vld [vmem:[%s6972_s1 + $0x340] sm:$0xff]  ;;  %v129_v43 = vld [vmem:[%s6972_s1 + $0x368] sm:$0xff]  ;;  %v4523_v44 = vcombine.low %v116_v32, %v120_v33 }
  0x1d   :  { %v128_v41 = vld [vmem:[%s6972_s1 + $0x360] sm:$0xff]  ;;  %v4534_v47 = vcombine.high %v125_v42, %v129_v43  ;;  %v133_v50 = vld [vmem:[%s6972_s1 + $0x388] sm:$0xff]  ;;  %v4533_v54 = vcombine.low %v125_v42, %v129_v43 }
  0x1e   :  { %3563 = vmatpush1.bf16.msra.mxu0 %v4475_v60  ;;  %3768 = vmatpush1.bf16.msra.mxu1 %v4477_v61  ;;  %v4532_v46 = vcombine.high %v124_v40, %v128_v41  ;;  %v132_v48 = vld [vmem:[%s6972_s1 + $0x380] sm:$0xff]  ;;  %v137_v51 = vld [vmem:[%s6972_s1 + $0x3a8] sm:$0xff]  ;;  %v4531_v52 = vcombine.low %v124_v40, %v128_v41 }
  0x1f   :  { %3564 = vmatprep.subr.bf16.mxu0 %v4484_v62  ;;  %3769 = vmatprep.subr.bf16.mxu1 %v4486_v63  ;;  %v136_v49 = vld [vmem:[%s6972_s1 + $0x3a0] sm:$0xff]  ;;  %v4542_v56 = vcombine.high %v133_v50, %v137_v51  ;;  %v141_v60 = vld [vmem:[%s6972_s1 + $0x3c8] sm:$0xff]  ;;  %v4541_v63 = vcombine.low %v133_v50, %v137_v51 }
  0x20   :  { %v4540_v55 = vcombine.high %v132_v48, %v136_v49  ;;  %v140_v58 = vld [vmem:[%s6972_s1 + $0x3c0] sm:$0xff]  ;;  %v145_v61 = vld [vmem:[%s6972_s1 + $0x3e8] sm:$0xff]  ;;  %v4539_v62 = vcombine.low %v132_v48, %v136_v49 }
  0x21   :  { %v144_v59 = vld [vmem:[%s6972_s1 + $0x3e0] sm:$0xff]  ;;  %v4550_v1 = vcombine.high %v141_v60, %v145_v61 }
  0x22   :  { %3565 = vmatpush1.bf16.msra.mxu0 %v4483_v4  ;;  %3770 = vmatpush1.bf16.msra.mxu1 %v4485_v5  ;;  %v4548_v0 = vcombine.high %v140_v58, %v144_v59  ;;  %v148_v2 = vld [vmem:[%s6972_s1 + $0x400] sm:$0xff]  ;;  %v149_v4 = vld [vmem:[%s6972_s1 + $0x408] sm:$0xff] }
  0x23   :  { %3566 = vmatprep.subr.bf16.mxu0 %v4492_v6  ;;  %3771 = vmatprep.subr.bf16.mxu1 %v4494_v7  ;;  %v152_v3 = vld [vmem:[%s6972_s1 + $0x420] sm:$0xff]  ;;  %v153_v5 = vld [vmem:[%s6972_s1 + $0x428] sm:$0xff]  ;;  %v4547_v6 = vcombine.low %v140_v58, %v144_v59  ;;  %v4549_v7 = vcombine.low %v141_v60, %v145_v61 }
  0x24   :  { %v4556_v8 = vcombine.high %v148_v2, %v152_v3  ;;  %v4558_v9 = vcombine.high %v149_v4, %v153_v5  ;;  %v156_v10 = vld [vmem:[%s6972_s1 + $0x440] sm:$0xff]  ;;  %v4555_v16 = vcombine.low %v148_v2, %v152_v3  ;;  %v4557_v17 = vcombine.low %v149_v4, %v153_v5 }
  0x25   :  { %v160_v11 = vld [vmem:[%s6972_s1 + $0x460] sm:$0xff] }
  0x26   :  { %3567 = vmatpush1.bf16.msra.mxu0 %v4491_v12  ;;  %3772 = vmatpush1.bf16.msra.mxu1 %v4493_v13  ;;  %v5338_v12 = vcombine.low %v5202_v53, %v5202_v53  ;;  %v157_v13 = vld [vmem:[%s6972_s1 + $0x448] sm:$0xff]  ;;  %v4564_v53 = vcombine.high %v156_v10, %v160_v11  ;;  %v164_v19 = vld [vmem:[%s6972_s1 + $0x480] sm:$0xff]  ;;  %v4563_v24 = vcombine.low %v156_v10, %v160_v11 }
  0x27   :  { %3568 = vmatprep.subr.bf16.mxu0 %v4500_v14  ;;  %3773 = vmatprep.subr.bf16.mxu1 %v4502_v15  ;;  %v161_v14 = vld [vmem:[%s6972_s1 + $0x468] sm:$0xff] }
  0x28   :  { %v5349_v15 = vld [vmem:[%s6973_s0 + $0x8] sm:$0xff]  ;;  %v4566_v18 = vcombine.high %v157_v13, %v161_v14  ;;  %v4565_v25 = vcombine.low %v157_v13, %v161_v14 }
  0x2a   :  { %3569 = vmatpush1.bf16.msra.mxu0 %v4499_v20  ;;  %3774 = vmatpush1.bf16.msra.mxu1 %v4501_v21  ;;  %v168_v20 = vld [vmem:[%s6972_s1 + $0x4a0] sm:$0xff]  ;;  %v5359_v21 = vcombine.high %v5349_v15, %v5349_v15 }
  0x2b   :  { %3570 = vmatprep.subr.bf16.mxu0 %v4508_v22  ;;  %3775 = vmatprep.subr.bf16.mxu1 %v4510_v23  ;;  %v165_v22 = vld [vmem:[%s6972_s1 + $0x488] sm:$0xff]  ;;  %v4572_v26 = vcombine.high %v164_v19, %v168_v20  ;;  %v4571_v32 = vcombine.low %v164_v19, %v168_v20 }
  0x2c   :  { %v169_v23 = vld [vmem:[%s6972_s1 + $0x4a8] sm:$0xff] }
  0x2d   :  { %v4574_v27 = vcombine.high %v165_v22, %v169_v23  ;;  %v4573_v33 = vcombine.low %v165_v22, %v169_v23 }
  0x2e   :  { %3571 = vmatpush1.bf16.msra.mxu0 %v4507_v28  ;;  %3776 = vmatpush1.bf16.msra.mxu1 %v4509_v29  ;;  %v172_v28 = vld [vmem:[%s6972_s1 + $0x4c0] sm:$0xff] }
  0x2f   :  { %3572 = vmatprep.subr.bf16.mxu0 %v4516_v30  ;;  %3777 = vmatprep.subr.bf16.mxu1 %v4518_v31  ;;  %v176_v29 = vld [vmem:[%s6972_s1 + $0x4e0] sm:$0xff]  ;;  %v173_v30 = vld [vmem:[%s6972_s1 + $0x4c8] sm:$0xff] }
  0x30   :  { %v177_v31 = vld [vmem:[%s6972_s1 + $0x4e8] sm:$0xff]  ;;  %v4580_v34 = vcombine.high %v172_v28, %v176_v29  ;;  %v4579_v40 = vcombine.low %v172_v28, %v176_v29 }
  0x31   :  { %v4582_v35 = vcombine.high %v173_v30, %v177_v31  ;;  %v4581_v41 = vcombine.low %v173_v30, %v177_v31 }
  0x32   :  { %3573 = vmatpush1.bf16.msra.mxu0 %v4515_v36  ;;  %3778 = vmatpush1.bf16.msra.mxu1 %v4517_v37  ;;  %v180_v36 = vld [vmem:[%s6972_s1 + $0x500] sm:$0xff] }
  0x33   :  { %3574 = vmatprep.subr.bf16.mxu0 %v4524_v38  ;;  %3779 = vmatprep.subr.bf16.mxu1 %v4526_v39  ;;  %v184_v37 = vld [vmem:[%s6972_s1 + $0x520] sm:$0xff]  ;;  %v181_v38 = vld [vmem:[%s6972_s1 + $0x508] sm:$0xff] }
  0x34   :  { %v185_v39 = vld [vmem:[%s6972_s1 + $0x528] sm:$0xff]  ;;  %v4588_v42 = vcombine.high %v180_v36, %v184_v37  ;;  %v4587_v48 = vcombine.low %v180_v36, %v184_v37 }
  0x35   :  { %v4590_v43 = vcombine.high %v181_v38, %v185_v39  ;;  %v4589_v49 = vcombine.low %v181_v38, %v185_v39 }
  0x36   :  { %3575 = vmatpush1.bf16.msra.mxu0 %v4523_v44  ;;  %3780 = vmatpush1.bf16.msra.mxu1 %v4525_v45  ;;  %v188_v44 = vld [vmem:[%s6972_s1 + $0x540] sm:$0xff] }
  0x37   :  { %3576 = vmatprep.subr.bf16.mxu0 %v4532_v46  ;;  %3781 = vmatprep.subr.bf16.mxu1 %v4534_v47  ;;  %v192_v45 = vld [vmem:[%s6972_s1 + $0x560] sm:$0xff]  ;;  %v189_v46 = vld [vmem:[%s6972_s1 + $0x548] sm:$0xff] }
  0x38   :  { %v193_v47 = vld [vmem:[%s6972_s1 + $0x568] sm:$0xff]  ;;  %v4596_v50 = vcombine.high %v188_v44, %v192_v45  ;;  %v4595_v58 = vcombine.low %v188_v44, %v192_v45 }
  0x39   :  { %v4598_v51 = vcombine.high %v189_v46, %v193_v47  ;;  %v4597_v59 = vcombine.low %v189_v46, %v193_v47 }
  0x3a   :  { %3577 = vmatpush1.bf16.msra.mxu0 %v4531_v52  ;;  %3782 = vmatpush1.bf16.msra.mxu1 %v4533_v54  ;;  %v196_v52 = vld [vmem:[%s6972_s1 + $0x580] sm:$0xff] }
  0x3b   :  { %3578 = vmatprep.subr.bf16.mxu0 %v4540_v55  ;;  %3783 = vmatprep.subr.bf16.mxu1 %v4542_v56  ;;  %v200_v54 = vld [vmem:[%s6972_s1 + $0x5a0] sm:$0xff]  ;;  %v197_v55 = vld [vmem:[%s6972_s1 + $0x588] sm:$0xff] }
  0x3c   :  { %v201_v56 = vld [vmem:[%s6972_s1 + $0x5a8] sm:$0xff]  ;;  %v4604_v60 = vcombine.high %v196_v52, %v200_v54  ;;  %v4603_v2 = vcombine.low %v196_v52, %v200_v54 }
  0x3d   :  { %v4606_v61 = vcombine.high %v197_v55, %v201_v56  ;;  %v4605_v3 = vcombine.low %v197_v55, %v201_v56 }
  0x3e   :  { %3579 = vmatpush1.bf16.msra.mxu0 %v4539_v62  ;;  %3784 = vmatpush1.bf16.msra.mxu1 %v4541_v63  ;;  %v204_v62 = vld [vmem:[%s6972_s1 + $0x5c0] sm:$0xff] }
  0x3f   :  { %3580 = vmatprep.subr.bf16.mxu0 %v4548_v0  ;;  %3785 = vmatprep.subr.bf16.mxu1 %v4550_v1  ;;  %v208_v63 = vld [vmem:[%s6972_s1 + $0x5e0] sm:$0xff]  ;;  %v205_v0 = vld [vmem:[%s6972_s1 + $0x5c8] sm:$0xff] }
  0x40   :  { %v209_v1 = vld [vmem:[%s6972_s1 + $0x5e8] sm:$0xff]  ;;  %v4612_v4 = vcombine.high %v204_v62, %v208_v63  ;;  %v4611_v10 = vcombine.low %v204_v62, %v208_v63 }
  0x41   :  { %v4614_v5 = vcombine.high %v205_v0, %v209_v1  ;;  %v4613_v11 = vcombine.low %v205_v0, %v209_v1 }
  0x42   :  { %3581 = vmatpush1.bf16.msra.mxu0 %v4547_v6  ;;  %3786 = vmatpush1.bf16.msra.mxu1 %v4549_v7  ;;  %v212_v6 = vld [vmem:[%s6972_s1 + $0x600] sm:$0xff] }
  0x43   :  { %3591 = vmatprep.subr.bf16.mxu0 %v4556_v8  ;;  %3796 = vmatprep.subr.bf16.mxu1 %v4558_v9  ;;  %v216_v7 = vld [vmem:[%s6972_s1 + $0x620] sm:$0xff]  ;;  %v213_v8 = vld [vmem:[%s6972_s1 + $0x608] sm:$0xff] }
  0x44   :  { %v217_v9 = vld [vmem:[%s6972_s1 + $0x628] sm:$0xff]  ;;  %v4620_v13 = vcombine.high %v212_v6, %v216_v7  ;;  %v4619_v19 = vcombine.low %v212_v6, %v216_v7 }
  0x45   :  { %3583 = vmatmul.mubr.bf16.vlgmr.msra.gmra.mrb[0].mxu0 %v5338_v12  ;;  %3788 = vmatmul.mubr.bf16.vlgmr.msra.gmra.mrb[0].mxu1 %v5338_v12  ;;  %v4622_v14 = vcombine.high %v213_v8, %v217_v9  ;;  %v4621_v20 = vcombine.low %v213_v8, %v217_v9 }
  0x46   :  { %3592 = vmatpush1.bf16.msra.mxu0 %v4555_v16  ;;  %3797 = vmatpush1.bf16.msra.mxu1 %v4557_v17  ;;  %v220_v16 = vld [vmem:[%s6972_s1 + $0x640] sm:$0xff] }
  0x47   :  { %3593 = vmatprep.subr.bf16.mxu0 %v4564_v53  ;;  %3798 = vmatprep.subr.bf16.mxu1 %v4566_v18  ;;  %v224_v17 = vld [vmem:[%s6972_s1 + $0x660] sm:$0xff]  ;;  %v221_v53 = vld [vmem:[%s6972_s1 + $0x648] sm:$0xff] }
  0x48   :  { %3623 = vmatprep.mubr.bf16.mxu0 %v5359_v21  ;;  %3828 = vmatprep.mubr.bf16.mxu1 %v5359_v21  ;;  %v225_v18 = vld [vmem:[%s6972_s1 + $0x668] sm:$0xff]  ;;  %v4628_v22 = vcombine.high %v220_v16, %v224_v17  ;;  %v4627_v28 = vcombine.low %v220_v16, %v224_v17 }
  0x49   :  { %v4630_v23 = vcombine.high %v221_v53, %v225_v18  ;;  %v4629_v29 = vcombine.low %v221_v53, %v225_v18 }
  0x4a   :  { %3594 = vmatpush1.bf16.msra.mxu0 %v4563_v24  ;;  %3799 = vmatpush1.bf16.msra.mxu1 %v4565_v25  ;;  %v228_v24 = vld [vmem:[%s6972_s1 + $0x680] sm:$0xff] }
  0x4b   :  { %3595 = vmatprep.subr.bf16.mxu0 %v4572_v26  ;;  %3800 = vmatprep.subr.bf16.mxu1 %v4574_v27  ;;  %v232_v25 = vld [vmem:[%s6972_s1 + $0x6a0] sm:$0xff]  ;;  %v229_v26 = vld [vmem:[%s6972_s1 + $0x688] sm:$0xff] }
  0x4c   :  { %v233_v27 = vld [vmem:[%s6972_s1 + $0x6a8] sm:$0xff]  ;;  %v4636_v30 = vcombine.high %v228_v24, %v232_v25  ;;  %v4635_v36 = vcombine.low %v228_v24, %v232_v25  ;;  %v5558_v25 = vld [vmem:[%s6973_s0 + $0x10] sm:$0xff] }
  0x4d   :  { %v4638_v31 = vcombine.high %v229_v26, %v233_v27  ;;  %v4637_v37 = vcombine.low %v229_v26, %v233_v27  ;;  %v289_v24 = vld [vmem:[%s6972_s1 + $0x868] sm:$0xff] }
  0x4e   :  { %3596 = vmatpush1.bf16.msra.mxu0 %v4571_v32  ;;  %3801 = vmatpush1.bf16.msra.mxu1 %v4573_v33  ;;  %v236_v32 = vld [vmem:[%s6972_s1 + $0x6c0] sm:$0xff] }
  0x4f   :  { %3597 = vmatprep.subr.bf16.mxu0 %v4580_v34  ;;  %3802 = vmatprep.subr.bf16.mxu1 %v4582_v35  ;;  %v240_v33 = vld [vmem:[%s6972_s1 + $0x6e0] sm:$0xff]  ;;  %v237_v34 = vld [vmem:[%s6972_s1 + $0x6c8] sm:$0xff] }
  0x50   :  { %v241_v35 = vld [vmem:[%s6972_s1 + $0x6e8] sm:$0xff]  ;;  %v4644_v38 = vcombine.high %v236_v32, %v240_v33  ;;  %v4643_v44 = vcombine.low %v236_v32, %v240_v33 }
  0x51   :  { %v4646_v39 = vcombine.high %v237_v34, %v241_v35  ;;  %v4645_v45 = vcombine.low %v237_v34, %v241_v35  ;;  %v293_v32 = vld [vmem:[%s6972_s1 + $0x888] sm:$0xff] }
  0x52   :  { %3598 = vmatpush1.bf16.msra.mxu0 %v4579_v40  ;;  %3803 = vmatpush1.bf16.msra.mxu1 %v4581_v41  ;;  %v244_v40 = vld [vmem:[%s6972_s1 + $0x700] sm:$0xff]  ;;  %v297_v33 = vld [vmem:[%s6972_s1 + $0x8a8] sm:$0xff] }
  0x53   :  { %3599 = vmatprep.subr.bf16.mxu0 %v4588_v42  ;;  %3804 = vmatprep.subr.bf16.mxu1 %v4590_v43  ;;  %v248_v41 = vld [vmem:[%s6972_s1 + $0x720] sm:$0xff]  ;;  %v245_v42 = vld [vmem:[%s6972_s1 + $0x708] sm:$0xff] }
  0x54   :  { %v249_v43 = vld [vmem:[%s6972_s1 + $0x728] sm:$0xff]  ;;  %v4652_v46 = vcombine.high %v244_v40, %v248_v41  ;;  %v4651_v52 = vcombine.low %v244_v40, %v248_v41 }
  0x55   :  { %v4654_v47 = vcombine.high %v245_v42, %v249_v43  ;;  %v4653_v54 = vcombine.low %v245_v42, %v249_v43  ;;  %v301_v40 = vld [vmem:[%s6972_s1 + $0x8c8] sm:$0xff]  ;;  %v4701_v43 = vcombine.low %v293_v32, %v297_v33 }
  0x56   :  { %3600 = vmatpush1.bf16.msra.mxu0 %v4587_v48  ;;  %3805 = vmatpush1.bf16.msra.mxu1 %v4589_v49  ;;  %v252_v48 = vld [vmem:[%s6972_s1 + $0x740] sm:$0xff]  ;;  %v305_v41 = vld [vmem:[%s6972_s1 + $0x8e8] sm:$0xff] }
  0x57   :  { %3601 = vmatprep.subr.bf16.mxu0 %v4596_v50  ;;  %3806 = vmatprep.subr.bf16.mxu1 %v4598_v51  ;;  %v256_v49 = vld [vmem:[%s6972_s1 + $0x760] sm:$0xff]  ;;  %v253_v50 = vld [vmem:[%s6972_s1 + $0x748] sm:$0xff] }
  0x58   :  { %v257_v51 = vld [vmem:[%s6972_s1 + $0x768] sm:$0xff]  ;;  %v4660_v55 = vcombine.high %v252_v48, %v256_v49  ;;  %v4659_v62 = vcombine.low %v252_v48, %v256_v49 }
  0x59   :  { %v4662_v56 = vcombine.high %v253_v50, %v257_v51  ;;  %v4661_v63 = vcombine.low %v253_v50, %v257_v51  ;;  %v309_v48 = vld [vmem:[%s6972_s1 + $0x908] sm:$0xff]  ;;  %v4709_v51 = vcombine.low %v301_v40, %v305_v41 }
  0x5a   :  { %3602 = vmatpush1.bf16.msra.mxu0 %v4595_v58  ;;  %3807 = vmatpush1.bf16.msra.mxu1 %v4597_v59  ;;  %v260_v58 = vld [vmem:[%s6972_s1 + $0x780] sm:$0xff]  ;;  %v313_v49 = vld [vmem:[%s6972_s1 + $0x928] sm:$0xff] }
  0x5b   :  { %3603 = vmatprep.subr.bf16.mxu0 %v4604_v60  ;;  %3808 = vmatprep.subr.bf16.mxu1 %v4606_v61  ;;  %v264_v59 = vld [vmem:[%s6972_s1 + $0x7a0] sm:$0xff]  ;;  %v261_v60 = vld [vmem:[%s6972_s1 + $0x788] sm:$0xff] }
  0x5c   :  { %v265_v61 = vld [vmem:[%s6972_s1 + $0x7a8] sm:$0xff]  ;;  %v4668_v0 = vcombine.high %v260_v58, %v264_v59  ;;  %v4667_v6 = vcombine.low %v260_v58, %v264_v59 }
  0x5d   :  { %v4670_v1 = vcombine.high %v261_v60, %v265_v61  ;;  %v4669_v7 = vcombine.low %v261_v60, %v265_v61  ;;  %v317_v58 = vld [vmem:[%s6972_s1 + $0x948] sm:$0xff]  ;;  %v4717_v61 = vcombine.low %v309_v48, %v313_v49 }
  0x5e   :  { %3604 = vmatpush1.bf16.msra.mxu0 %v4603_v2  ;;  %3809 = vmatpush1.bf16.msra.mxu1 %v4605_v3  ;;  %v268_v2 = vld [vmem:[%s6972_s1 + $0x7c0] sm:$0xff]  ;;  %v321_v59 = vld [vmem:[%s6972_s1 + $0x968] sm:$0xff] }
  0x5f   :  { %3605 = vmatprep.subr.bf16.mxu0 %v4612_v4  ;;  %3810 = vmatprep.subr.bf16.mxu1 %v4614_v5  ;;  %v272_v3 = vld [vmem:[%s6972_s1 + $0x7e0] sm:$0xff]  ;;  %v269_v4 = vld [vmem:[%s6972_s1 + $0x7c8] sm:$0xff] }
  0x60   :  { %v273_v5 = vld [vmem:[%s6972_s1 + $0x7e8] sm:$0xff]  ;;  %v4676_v8 = vcombine.high %v268_v2, %v272_v3  ;;  %v4675_v16 = vcombine.low %v268_v2, %v272_v3 }
  0x61   :  { %v4678_v9 = vcombine.high %v269_v4, %v273_v5  ;;  %v4677_v17 = vcombine.low %v269_v4, %v273_v5  ;;  %v325_v2 = vld [vmem:[%s6972_s1 + $0x988] sm:$0xff]  ;;  %v4725_v5 = vcombine.low %v317_v58, %v321_v59 }
  0x62   :  { %3606 = vmatpush1.bf16.msra.mxu0 %v4611_v10  ;;  %3811 = vmatpush1.bf16.msra.mxu1 %v4613_v11  ;;  %v276_v10 = vld [vmem:[%s6972_s1 + $0x800] sm:$0xff]  ;;  %v329_v3 = vld [vmem:[%s6972_s1 + $0x9a8] sm:$0xff] }
  0x63   :  { %3607 = vmatprep.subr.bf16.mxu0 %v4620_v13  ;;  %3812 = vmatprep.subr.bf16.mxu1 %v4622_v14  ;;  %v280_v11 = vld [vmem:[%s6972_s1 + $0x820] sm:$0xff]  ;;  %v277_v13 = vld [vmem:[%s6972_s1 + $0x808] sm:$0xff] }
  0x64   :  { %v281_v14 = vld [vmem:[%s6972_s1 + $0x828] sm:$0xff]  ;;  %v4684_v53 = vcombine.high %v276_v10, %v280_v11  ;;  %v4683_v26 = vcombine.low %v276_v10, %v280_v11 }
  0x65   :  { %v4686_v18 = vcombine.high %v277_v13, %v281_v14  ;;  %v4685_v27 = vcombine.low %v277_v13, %v281_v14  ;;  %v333_v10 = vld [vmem:[%s6972_s1 + $0x9c8] sm:$0xff]  ;;  %v4733_v14 = vcombine.low %v325_v2, %v329_v3 }
  0x66   :  { %3608 = vmatpush1.bf16.msra.mxu0 %v4619_v19  ;;  %3813 = vmatpush1.bf16.msra.mxu1 %v4621_v20  ;;  %v284_v19 = vld [vmem:[%s6972_s1 + $0x840] sm:$0xff]  ;;  %v337_v11 = vld [vmem:[%s6972_s1 + $0x9e8] sm:$0xff] }
  0x67   :  { %3609 = vmatprep.subr.bf16.mxu0 %v4628_v22  ;;  %3814 = vmatprep.subr.bf16.mxu1 %v4630_v23  ;;  %v288_v20 = vld [vmem:[%s6972_s1 + $0x860] sm:$0xff]  ;;  %v5547_v22 = vcombine.low %v5349_v15, %v5349_v15  ;;  %v285_v23 = vld [vmem:[%s6972_s1 + $0x848] sm:$0xff] }
  0x68   :  { %v4692_v15 = vcombine.high %v284_v19, %v288_v20  ;;  %v4691_v34 = vcombine.low %v284_v19, %v288_v20  ;;  %v4693_v35 = vcombine.low %v285_v23, %v289_v24  ;;  %v341_v19 = vld [vmem:[%s6972_s1 + $0xa08] sm:$0xff] }
  0x69   :  { %v345_v20 = vld [vmem:[%s6972_s1 + $0xa28] sm:$0xff] }
  0x6a   :  { %3610 = vmatpush1.bf16.msra.mxu0 %v4627_v28  ;;  %3815 = vmatpush1.bf16.msra.mxu1 %v4629_v29  ;;  %v4694_v28 = vcombine.high %v285_v23, %v289_v24  ;;  %v292_v29 = vld [vmem:[%s6972_s1 + $0x880] sm:$0xff]  ;;  %v4741_v24 = vcombine.low %v333_v10, %v337_v11 }
  0x6b   :  { %3611 = vmatprep.subr.bf16.mxu0 %v4636_v30  ;;  %3816 = vmatprep.subr.bf16.mxu1 %v4638_v31  ;;  %v296_v30 = vld [vmem:[%s6972_s1 + $0x8a0] sm:$0xff]  ;;  %v5568_v31 = vcombine.high %v5558_v25, %v5558_v25 }
  0x6c   :  { %v4699_v42 = vcombine.low %v292_v29, %v296_v30 }
  0x6e   :  { %3612 = vmatpush1.bf16.msra.mxu0 %v4635_v36  ;;  %3817 = vmatpush1.bf16.msra.mxu1 %v4637_v37  ;;  %v4700_v36 = vcombine.high %v292_v29, %v296_v30  ;;  %v4702_v37 = vcombine.high %v293_v32, %v297_v33  ;;  %v349_v29 = vld [vmem:[%s6972_s1 + $0xa48] sm:$0xff]  ;;  %v4749_v33 = vcombine.low %v341_v19, %v345_v20 }
  0x6f   :  { %3613 = vmatprep.subr.bf16.mxu0 %v4644_v38  ;;  %3818 = vmatprep.subr.bf16.mxu1 %v4646_v39  ;;  %v300_v38 = vld [vmem:[%s6972_s1 + $0x8c0] sm:$0xff]  ;;  %v353_v30 = vld [vmem:[%s6972_s1 + $0xa68] sm:$0xff] }
  0x70   :  { %v304_v39 = vld [vmem:[%s6972_s1 + $0x8e0] sm:$0xff] }
  0x71   :  { %v4707_v50 = vcombine.low %v300_v38, %v304_v39 }
  0x72   :  { %3614 = vmatpush1.bf16.msra.mxu0 %v4643_v44  ;;  %3819 = vmatpush1.bf16.msra.mxu1 %v4645_v45  ;;  %v4708_v44 = vcombine.high %v300_v38, %v304_v39  ;;  %v4710_v45 = vcombine.high %v301_v40, %v305_v41  ;;  %v357_v38 = vld [vmem:[%s6972_s1 + $0xa88] sm:$0xff]  ;;  %v4757_v41 = vcombine.low %v349_v29, %v353_v30 }
  0x73   :  { %3615 = vmatprep.subr.bf16.mxu0 %v4652_v46  ;;  %3820 = vmatprep.subr.bf16.mxu1 %v4654_v47  ;;  %v308_v46 = vld [vmem:[%s6972_s1 + $0x900] sm:$0xff]  ;;  %v361_v39 = vld [vmem:[%s6972_s1 + $0xaa8] sm:$0xff] }
  0x74   :  { %v312_v47 = vld [vmem:[%s6972_s1 + $0x920] sm:$0xff] }
  0x75   :  { %v4715_v60 = vcombine.low %v308_v46, %v312_v47 }
  0x76   :  { %3616 = vmatpush1.bf16.msra.mxu0 %v4651_v52  ;;  %3821 = vmatpush1.bf16.msra.mxu1 %v4653_v54  ;;  %v4716_v52 = vcombine.high %v308_v46, %v312_v47  ;;  %v4718_v54 = vcombine.high %v309_v48, %v313_v49  ;;  %v365_v46 = vld [vmem:[%s6972_s1 + $0xac8] sm:$0xff]  ;;  %v4765_v49 = vcombine.low %v357_v38, %v361_v39 }
  0x77   :  { %3617 = vmatprep.subr.bf16.mxu0 %v4660_v55  ;;  %3822 = vmatprep.subr.bf16.mxu1 %v4662_v56  ;;  %v316_v55 = vld [vmem:[%s6972_s1 + $0x940] sm:$0xff]  ;;  %v369_v47 = vld [vmem:[%s6972_s1 + $0xae8] sm:$0xff] }
  0x78   :  { %v320_v56 = vld [vmem:[%s6972_s1 + $0x960] sm:$0xff] }
  0x79   :  { %v4723_v4 = vcombine.low %v316_v55, %v320_v56 }
  0x7a   :  { %3618 = vmatpush1.bf16.msra.mxu0 %v4659_v62  ;;  %3823 = vmatpush1.bf16.msra.mxu1 %v4661_v63  ;;  %v4724_v62 = vcombine.high %v316_v55, %v320_v56  ;;  %v4726_v63 = vcombine.high %v317_v58, %v321_v59  ;;  %v373_v55 = vld [vmem:[%s6972_s1 + $0xb08] sm:$0xff]  ;;  %v4773_v59 = vcombine.low %v365_v46, %v369_v47 }
  0x7b   :  { %3619 = vmatprep.subr.bf16.mxu0 %v4668_v0  ;;  %3824 = vmatprep.subr.bf16.mxu1 %v4670_v1  ;;  %v324_v0 = vld [vmem:[%s6972_s1 + $0x980] sm:$0xff]  ;;  %v377_v56 = vld [vmem:[%s6972_s1 + $0xb28] sm:$0xff] }
  0x7c   :  { %v328_v1 = vld [vmem:[%s6972_s1 + $0x9a0] sm:$0xff] }
  0x7d   :  { %v4731_v13 = vcombine.low %v324_v0, %v328_v1 }
  0x7e   :  { %3620 = vmatpush1.bf16.msra.mxu0 %v4667_v6  ;;  %3825 = vmatpush1.bf16.msra.mxu1 %v4669_v7  ;;  %v4732_v6 = vcombine.high %v324_v0, %v328_v1  ;;  %v4734_v7 = vcombine.high %v325_v2, %v329_v3  ;;  %v381_v0 = vld [vmem:[%s6972_s1 + $0xb48] sm:$0xff]  ;;  %v4781_v3 = vcombine.low %v373_v55, %v377_v56 }
  0x7f   :  { %3621 = vmatprep.subr.bf16.mxu0 %v4676_v8  ;;  %3826 = vmatprep.subr.bf16.mxu1 %v4678_v9  ;;  %v332_v8 = vld [vmem:[%s6972_s1 + $0x9c0] sm:$0xff]  ;;  %v385_v1 = vld [vmem:[%s6972_s1 + $0xb68] sm:$0xff] }
  0x80   :  { %v336_v9 = vld [vmem:[%s6972_s1 + $0x9e0] sm:$0xff] }
  0x81   :  { %v4739_v23 = vcombine.low %v332_v8, %v336_v9 }
  0x82   :  { %3622 = vmatpush1.bf16.msra.mxu0 %v4675_v16  ;;  %3827 = vmatpush1.bf16.msra.mxu1 %v4677_v17  ;;  %v4740_v16 = vcombine.high %v332_v8, %v336_v9  ;;  %v4742_v17 = vcombine.high %v333_v10, %v337_v11  ;;  %v389_v8 = vld [vmem:[%s6972_s1 + $0xb88] sm:$0xff]  ;;  %v4789_v11 = vcombine.low %v381_v0, %v385_v1 }
  0x83   :  { %3632 = vmatprep.subr.bf16.mxu0 %v4684_v53  ;;  %3837 = vmatprep.subr.bf16.mxu1 %v4686_v18  ;;  %v340_v53 = vld [vmem:[%s6972_s1 + $0xa00] sm:$0xff]  ;;  %v393_v9 = vld [vmem:[%s6972_s1 + $0xba8] sm:$0xff] }
  0x84   :  { %v344_v18 = vld [vmem:[%s6972_s1 + $0xa20] sm:$0xff] }
  0x85   :  { %3624 = vmatmul.mubr.bf16.vlgmr.msra.gmra.mrb[0].mxu0 %v5547_v22  ;;  %3829 = vmatmul.mubr.bf16.vlgmr.msra.gmra.mrb[0].mxu1 %v5547_v22  ;;  %v4747_v32 = vcombine.low %v340_v53, %v344_v18 }
  0x86   :  { %3633 = vmatpush1.bf16.msra.mxu0 %v4683_v26  ;;  %3838 = vmatpush1.bf16.msra.mxu1 %v4685_v27  ;;  %v4748_v26 = vcombine.high %v340_v53, %v344_v18  ;;  %v4750_v27 = vcombine.high %v341_v19, %v345_v20  ;;  %v397_v53 = vld [vmem:[%s6972_s1 + $0xbc8] sm:$0xff]  ;;  %v4797_v20 = vcombine.low %v389_v8, %v393_v9 }
  0x87   :  { %3634 = vmatprep.subr.bf16.mxu0 %v4692_v15  ;;  %3839 = vmatprep.subr.bf16.mxu1 %v4694_v28  ;;  %v348_v15 = vld [vmem:[%s6972_s1 + $0xa40] sm:$0xff]  ;;  %v401_v18 = vld [vmem:[%s6972_s1 + $0xbe8] sm:$0xff] }
  0x88   :  { %3664 = vmatprep.mubr.bf16.mxu0 %v5568_v31  ;;  %3869 = vmatprep.mubr.bf16.mxu1 %v5568_v31  ;;  %v352_v28 = vld [vmem:[%s6972_s1 + $0xa60] sm:$0xff] }
  0x89   :  { %v4755_v40 = vcombine.low %v348_v15, %v352_v28 }
  0x8a   :  { %3635 = vmatpush1.bf16.msra.mxu0 %v4691_v34  ;;  %3840 = vmatpush1.bf16.msra.mxu1 %v4693_v35  ;;  %v4756_v34 = vcombine.high %v348_v15, %v352_v28  ;;  %v4758_v35 = vcombine.high %v349_v29, %v353_v30  ;;  %v405_v15 = vld [vmem:[%s6972_s1 + $0xc08] sm:$0xff]  ;;  %v4805_v30 = vcombine.low %v397_v53, %v401_v18 }
  0x8b   :  { %3636 = vmatprep.subr.bf16.mxu0 %v4700_v36  ;;  %3841 = vmatprep.subr.bf16.mxu1 %v4702_v37  ;;  %v356_v36 = vld [vmem:[%s6972_s1 + $0xa80] sm:$0xff]  ;;  %v409_v28 = vld [vmem:[%s6972_s1 + $0xc28] sm:$0xff] }
  0x8c   :  { %v360_v37 = vld [vmem:[%s6972_s1 + $0xaa0] sm:$0xff] }
  0x8d   :  { %v4763_v48 = vcombine.low %v356_v36, %v360_v37 }
  0x8e   :  { %3637 = vmatpush1.bf16.msra.mxu0 %v4699_v42  ;;  %3842 = vmatpush1.bf16.msra.mxu1 %v4701_v43  ;;  %v4764_v42 = vcombine.high %v356_v36, %v360_v37  ;;  %v4766_v43 = vcombine.high %v357_v38, %v361_v39  ;;  %v5756_v36 = vcombine.low %v5558_v25, %v5558_v25  ;;  %v413_v37 = vld [vmem:[%s6972_s1 + $0xc48] sm:$0xff]  ;;  %v5767_v39 = vld [vmem:[%s6973_s0 + $0x18] sm:$0xff] }
  0x8f   :  { %3638 = vmatprep.subr.bf16.mxu0 %v4708_v44  ;;  %3843 = vmatprep.subr.bf16.mxu1 %v4710_v45  ;;  %v364_v44 = vld [vmem:[%s6972_s1 + $0xac0] sm:$0xff]  ;;  %v417_v38 = vld [vmem:[%s6972_s1 + $0xc68] sm:$0xff] }
  0x90   :  { %v368_v45 = vld [vmem:[%s6972_s1 + $0xae0] sm:$0xff] }
  0x91   :  { %v4771_v58 = vcombine.low %v364_v44, %v368_v45 }
  0x92   :  { %3639 = vmatpush1.bf16.msra.mxu0 %v4707_v50  ;;  %3844 = vmatpush1.bf16.msra.mxu1 %v4709_v51  ;;  %v4772_v50 = vcombine.high %v364_v44, %v368_v45  ;;  %v4774_v51 = vcombine.high %v365_v46, %v369_v47  ;;  %v424_v44 = vld [vmem:[%s6972_s1 + $0xca0] sm:$0xff]  ;;  %v5777_v45 = vcombine.high %v5767_v39, %v5767_v39  ;;  %v421_v46 = vld [vmem:[%s6972_s1 + $0xc88] sm:$0xff] }
  0x93   :  { %3640 = vmatprep.subr.bf16.mxu0 %v4716_v52  ;;  %3845 = vmatprep.subr.bf16.mxu1 %v4718_v54  ;;  %v372_v52 = vld [vmem:[%s6972_s1 + $0xb00] sm:$0xff]  ;;  %v425_v47 = vld [vmem:[%s6972_s1 + $0xca8] sm:$0xff] }
  0x94   :  { %v376_v54 = vld [vmem:[%s6972_s1 + $0xb20] sm:$0xff] }
  0x95   :  { %v4779_v2 = vcombine.low %v372_v52, %v376_v54 }
  0x96   :  { %3641 = vmatpush1.bf16.msra.mxu0 %v4715_v60  ;;  %3846 = vmatpush1.bf16.msra.mxu1 %v4717_v61  ;;  %v4780_v60 = vcombine.high %v372_v52, %v376_v54  ;;  %v4782_v61 = vcombine.high %v373_v55, %v377_v56  ;;  %v428_v52 = vld [vmem:[%s6972_s1 + $0xcc0] sm:$0xff]  ;;  %v429_v55 = vld [vmem:[%s6972_s1 + $0xcc8] sm:$0xff] }
  0x97   :  { %3642 = vmatprep.subr.bf16.mxu0 %v4724_v62  ;;  %3847 = vmatprep.subr.bf16.mxu1 %v4726_v63  ;;  %v380_v62 = vld [vmem:[%s6972_s1 + $0xb40] sm:$0xff]  ;;  %v433_v56 = vld [vmem:[%s6972_s1 + $0xce8] sm:$0xff] }
  0x98   :  { %v384_v63 = vld [vmem:[%s6972_s1 + $0xb60] sm:$0xff] }
  0x99   :  { %v4787_v10 = vcombine.low %v380_v62, %v384_v63  ;;  %v432_v54 = vld [vmem:[%s6972_s1 + $0xce0] sm:$0xff] }
  0x9a   :  { %3643 = vmatpush1.bf16.msra.mxu0 %v4723_v4  ;;  %3848 = vmatpush1.bf16.msra.mxu1 %v4725_v5  ;;  %v4788_v4 = vcombine.high %v380_v62, %v384_v63  ;;  %v4790_v5 = vcombine.high %v381_v0, %v385_v1  ;;  %v436_v62 = vld [vmem:[%s6972_s1 + $0xd00] sm:$0xff]  ;;  %v437_v0 = vld [vmem:[%s6972_s1 + $0xd08] sm:$0xff] }
  0x9b   :  { %3644 = vmatprep.subr.bf16.mxu0 %v4732_v6  ;;  %3849 = vmatprep.subr.bf16.mxu1 %v4734_v7  ;;  %v388_v6 = vld [vmem:[%s6972_s1 + $0xb80] sm:$0xff]  ;;  %v441_v1 = vld [vmem:[%s6972_s1 + $0xd28] sm:$0xff] }
  0x9c   :  { %v392_v7 = vld [vmem:[%s6972_s1 + $0xba0] sm:$0xff] }
  0x9d   :  { %v4795_v19 = vcombine.low %v388_v6, %v392_v7  ;;  %v440_v63 = vld [vmem:[%s6972_s1 + $0xd20] sm:$0xff] }
  0x9e   :  { %3645 = vmatpush1.bf16.msra.mxu0 %v4731_v13  ;;  %3850 = vmatpush1.bf16.msra.mxu1 %v4733_v14  ;;  %v4796_v13 = vcombine.high %v388_v6, %v392_v7  ;;  %v4798_v14 = vcombine.high %v389_v8, %v393_v9  ;;  %v444_v6 = vld [vmem:[%s6972_s1 + $0xd40] sm:$0xff]  ;;  %v445_v8 = vld [vmem:[%s6972_s1 + $0xd48] sm:$0xff] }
  0x9f   :  { %3646 = vmatprep.subr.bf16.mxu0 %v4740_v16  ;;  %3851 = vmatprep.subr.bf16.mxu1 %v4742_v17  ;;  %v396_v16 = vld [vmem:[%s6972_s1 + $0xbc0] sm:$0xff]  ;;  %v449_v9 = vld [vmem:[%s6972_s1 + $0xd68] sm:$0xff] }
  0xa0   :  { %v400_v17 = vld [vmem:[%s6972_s1 + $0xbe0] sm:$0xff] }
  0xa1   :  { %v4803_v29 = vcombine.low %v396_v16, %v400_v17  ;;  %v448_v7 = vld [vmem:[%s6972_s1 + $0xd60] sm:$0xff] }
  0xa2   :  { %3647 = vmatpush1.bf16.msra.mxu0 %v4739_v23  ;;  %3852 = vmatpush1.bf16.msra.mxu1 %v4741_v24  ;;  %v4804_v23 = vcombine.high %v396_v16, %v400_v17  ;;  %v4806_v24 = vcombine.high %v397_v53, %v401_v18  ;;  %v452_v16 = vld [vmem:[%s6972_s1 + $0xd80] sm:$0xff]  ;;  %v453_v53 = vld [vmem:[%s6972_s1 + $0xd88] sm:$0xff] }
  0xa3   :  { %3648 = vmatprep.subr.bf16.mxu0 %v4748_v26  ;;  %3853 = vmatprep.subr.bf16.mxu1 %v4750_v27  ;;  %v404_v26 = vld [vmem:[%s6972_s1 + $0xc00] sm:$0xff]  ;;  %v457_v18 = vld [vmem:[%s6972_s1 + $0xda8] sm:$0xff] }
  0xa4   :  { %v408_v27 = vld [vmem:[%s6972_s1 + $0xc20] sm:$0xff] }
  0xa5   :  { %v456_v17 = vld [vmem:[%s6972_s1 + $0xda0] sm:$0xff] }
  0xa6   :  { %3649 = vmatpush1.bf16.msra.mxu0 %v4747_v32  ;;  %3854 = vmatpush1.bf16.msra.mxu1 %v4749_v33  ;;  %v4812_v32 = vcombine.high %v404_v26, %v408_v27  ;;  %v4814_v33 = vcombine.high %v405_v15, %v409_v28 }
  0xa7   :  { %3650 = vmatprep.subr.bf16.mxu0 %v4756_v34  ;;  %3855 = vmatprep.subr.bf16.mxu1 %v4758_v35  ;;  %v412_v34 = vld [vmem:[%s6972_s1 + $0xc40] sm:$0xff] }
  0xa8   :  { %v416_v35 = vld [vmem:[%s6972_s1 + $0xc60] sm:$0xff] }
  0xa9   :  { %v4820_v25 = vcombine.high %v412_v34, %v416_v35 }
  0xaa   :  { %3651 = vmatpush1.bf16.msra.mxu0 %v4755_v40  ;;  %3856 = vmatpush1.bf16.msra.mxu1 %v4757_v41  ;;  %v4811_v40 = vcombine.low %v404_v26, %v408_v27  ;;  %v4813_v41 = vcombine.low %v405_v15, %v409_v28  ;;  %v460_v26 = vld [vmem:[%s6972_s1 + $0xdc0] sm:$0xff]  ;;  %v461_v15 = vld [vmem:[%s6972_s1 + $0xdc8] sm:$0xff] }
  0xab   :  { %3652 = vmatprep.subr.bf16.mxu0 %v4764_v42  ;;  %3857 = vmatprep.subr.bf16.mxu1 %v4766_v43  ;;  %v4822_v42 = vcombine.high %v413_v37, %v417_v38  ;;  %v420_v43 = vld [vmem:[%s6972_s1 + $0xc80] sm:$0xff]  ;;  %v465_v28 = vld [vmem:[%s6972_s1 + $0xde8] sm:$0xff] }
  0xac   :  { %v464_v27 = vld [vmem:[%s6972_s1 + $0xde0] sm:$0xff] }
  0xae   :  { %3653 = vmatpush1.bf16.msra.mxu0 %v4763_v48  ;;  %3858 = vmatpush1.bf16.msra.mxu1 %v4765_v49  ;;  %v4819_v48 = vcombine.low %v412_v34, %v416_v35  ;;  %v4821_v49 = vcombine.low %v413_v37, %v417_v38  ;;  %v468_v34 = vld [vmem:[%s6972_s1 + $0xe00] sm:$0xff]  ;;  %v469_v37 = vld [vmem:[%s6972_s1 + $0xe08] sm:$0xff] }
  0xaf   :  { %3654 = vmatprep.subr.bf16.mxu0 %v4772_v50  ;;  %3859 = vmatprep.subr.bf16.mxu1 %v4774_v51  ;;  %v4828_v50 = vcombine.high %v420_v43, %v424_v44  ;;  %v4830_v51 = vcombine.high %v421_v46, %v425_v47  ;;  %v472_v35 = vld [vmem:[%s6972_s1 + $0xe20] sm:$0xff]  ;;  %v473_v38 = vld [vmem:[%s6972_s1 + $0xe28] sm:$0xff] }
  0xb2   :  { %3655 = vmatpush1.bf16.msra.mxu0 %v4771_v58  ;;  %3860 = vmatpush1.bf16.msra.mxu1 %v4773_v59  ;;  %v4827_v58 = vcombine.low %v420_v43, %v424_v44  ;;  %v4829_v59 = vcombine.low %v421_v46, %v425_v47  ;;  %v476_v43 = vld [vmem:[%s6972_s1 + $0xe40] sm:$0xff]  ;;  %v477_v46 = vld [vmem:[%s6972_s1 + $0xe48] sm:$0xff] }
  0xb3   :  { %3656 = vmatprep.subr.bf16.mxu0 %v4780_v60  ;;  %3861 = vmatprep.subr.bf16.mxu1 %v4782_v61  ;;  %v4836_v60 = vcombine.high %v428_v52, %v432_v54  ;;  %v4838_v61 = vcombine.high %v429_v55, %v433_v56  ;;  %v480_v44 = vld [vmem:[%s6972_s1 + $0xe60] sm:$0xff]  ;;  %v481_v47 = vld [vmem:[%s6972_s1 + $0xe68] sm:$0xff] }
  0xb6   :  { %3657 = vmatpush1.bf16.msra.mxu0 %v4779_v2  ;;  %3862 = vmatpush1.bf16.msra.mxu1 %v4781_v3  ;;  %v4835_v2 = vcombine.low %v428_v52, %v432_v54  ;;  %v4837_v3 = vcombine.low %v429_v55, %v433_v56  ;;  %v484_v52 = vld [vmem:[%s6972_s1 + $0xe80] sm:$0xff]  ;;  %v485_v55 = vld [vmem:[%s6972_s1 + $0xe88] sm:$0xff] }
  0xb7   :  { %3658 = vmatprep.subr.bf16.mxu0 %v4788_v4  ;;  %3863 = vmatprep.subr.bf16.mxu1 %v4790_v5  ;;  %v4844_v4 = vcombine.high %v436_v62, %v440_v63  ;;  %v4846_v5 = vcombine.high %v437_v0, %v441_v1  ;;  %v488_v54 = vld [vmem:[%s6972_s1 + $0xea0] sm:$0xff]  ;;  %v489_v56 = vld [vmem:[%s6972_s1 + $0xea8] sm:$0xff] }
  0xba   :  { %3659 = vmatpush1.bf16.msra.mxu0 %v4787_v10  ;;  %3864 = vmatpush1.bf16.msra.mxu1 %v4789_v11  ;;  %v4843_v10 = vcombine.low %v436_v62, %v440_v63  ;;  %v4845_v11 = vcombine.low %v437_v0, %v441_v1  ;;  %v492_v62 = vld [vmem:[%s6972_s1 + $0xec0] sm:$0xff]  ;;  %v493_v0 = vld [vmem:[%s6972_s1 + $0xec8] sm:$0xff] }
  0xbb   :  { %3660 = vmatprep.subr.bf16.mxu0 %v4796_v13  ;;  %3865 = vmatprep.subr.bf16.mxu1 %v4798_v14  ;;  %v4852_v13 = vcombine.high %v444_v6, %v448_v7  ;;  %v4854_v14 = vcombine.high %v445_v8, %v449_v9  ;;  %v496_v63 = vld [vmem:[%s6972_s1 + $0xee0] sm:$0xff]  ;;  %v497_v1 = vld [vmem:[%s6972_s1 + $0xee8] sm:$0xff] }
  0xbe   :  { %3661 = vmatpush1.bf16.msra.mxu0 %v4795_v19  ;;  %3866 = vmatpush1.bf16.msra.mxu1 %v4797_v20  ;;  %v4851_v19 = vcombine.low %v444_v6, %v448_v7  ;;  %v4853_v20 = vcombine.low %v445_v8, %v449_v9  ;;  %v500_v6 = vld [vmem:[%s6972_s1 + $0xf00] sm:$0xff]  ;;  %v501_v8 = vld [vmem:[%s6972_s1 + $0xf08] sm:$0xff] }
  0xbf   :  { %3662 = vmatprep.subr.bf16.mxu0 %v4804_v23  ;;  %3867 = vmatprep.subr.bf16.mxu1 %v4806_v24  ;;  %v4860_v23 = vcombine.high %v452_v16, %v456_v17  ;;  %v4862_v24 = vcombine.high %v453_v53, %v457_v18  ;;  %v504_v7 = vld [vmem:[%s6972_s1 + $0xf20] sm:$0xff]  ;;  %v505_v9 = vld [vmem:[%s6972_s1 + $0xf28] sm:$0xff] }
  0xc2   :  { %3663 = vmatpush1.bf16.msra.mxu0 %v4803_v29  ;;  %3868 = vmatpush1.bf16.msra.mxu1 %v4805_v30  ;;  %v4859_v29 = vcombine.low %v452_v16, %v456_v17  ;;  %v4861_v30 = vcombine.low %v453_v53, %v457_v18  ;;  %v508_v16 = vld [vmem:[%s6972_s1 + $0xf40] sm:$0xff]  ;;  %v509_v53 = vld [vmem:[%s6972_s1 + $0xf48] sm:$0xff] }
  0xc3   :  { %3673 = vmatprep.subr.bf16.mxu0 %v4812_v32  ;;  %3878 = vmatprep.subr.bf16.mxu1 %v4814_v33  ;;  %v4868_v32 = vcombine.high %v460_v26, %v464_v27  ;;  %v4870_v33 = vcombine.high %v461_v15, %v465_v28  ;;  %v512_v17 = vld [vmem:[%s6972_s1 + $0xf60] sm:$0xff]  ;;  %v513_v18 = vld [vmem:[%s6972_s1 + $0xf68] sm:$0xff] }
  0xc5   :  { %3665 = vmatmul.mubr.bf16.vlgmr.msra.gmra.mrb[0].mxu0 %v5756_v36  ;;  %3870 = vmatmul.mubr.bf16.vlgmr.msra.gmra.mrb[0].mxu1 %v5756_v36 }
  0xc6   :  { %3674 = vmatpush1.bf16.msra.mxu0 %v4811_v40  ;;  %3879 = vmatpush1.bf16.msra.mxu1 %v4813_v41  ;;  %v4867_v40 = vcombine.low %v460_v26, %v464_v27  ;;  %v4869_v41 = vcombine.low %v461_v15, %v465_v28  ;;  %v516_v26 = vld [vmem:[%s6972_s1 + $0xf80] sm:$0xff]  ;;  %v517_v15 = vld [vmem:[%s6972_s1 + $0xf88] sm:$0xff] }
  0xc7   :  { %3675 = vmatprep.subr.bf16.mxu0 %v4820_v25  ;;  %3880 = vmatprep.subr.bf16.mxu1 %v4822_v42  ;;  %v4876_v25 = vcombine.high %v468_v34, %v472_v35  ;;  %v4878_v42 = vcombine.high %v469_v37, %v473_v38  ;;  %v520_v27 = vld [vmem:[%s6972_s1 + $0xfa0] sm:$0xff]  ;;  %v521_v28 = vld [vmem:[%s6972_s1 + $0xfa8] sm:$0xff] }
  0xc8   :  { %3705 = vmatprep.mubr.bf16.mxu0 %v5777_v45  ;;  %3910 = vmatprep.mubr.bf16.mxu1 %v5777_v45 }
  0xca   :  { %3676 = vmatpush1.bf16.msra.mxu0 %v4819_v48  ;;  %3881 = vmatpush1.bf16.msra.mxu1 %v4821_v49  ;;  %v4875_v48 = vcombine.low %v468_v34, %v472_v35  ;;  %v4877_v49 = vcombine.low %v469_v37, %v473_v38  ;;  %v524_v34 = vld [vmem:[%s6972_s1 + $0xfc0] sm:$0xff]  ;;  %v525_v37 = vld [vmem:[%s6972_s1 + $0xfc8] sm:$0xff] }
  0xcb   :  { %3677 = vmatprep.subr.bf16.mxu0 %v4828_v50  ;;  %3882 = vmatprep.subr.bf16.mxu1 %v4830_v51  ;;  %v4884_v50 = vcombine.high %v476_v43, %v480_v44  ;;  %v4886_v51 = vcombine.high %v477_v46, %v481_v47  ;;  %v528_v35 = vld [vmem:[%s6972_s1 + $0xfe0] sm:$0xff]  ;;  %v529_v38 = vld [vmem:[%s6972_s1 + $0xfe8] sm:$0xff] }
  0xce   :  { %3678 = vmatpush1.bf16.msra.mxu0 %v4827_v58  ;;  %3883 = vmatpush1.bf16.msra.mxu1 %v4829_v59  ;;  %v4883_v58 = vcombine.low %v476_v43, %v480_v44  ;;  %v4885_v59 = vcombine.low %v477_v46, %v481_v47  ;;  %v532_v43 = vld [vmem:[%s6972_s1 + $0x1000] sm:$0xff]  ;;  %v533_v46 = vld [vmem:[%s6972_s1 + $0x1008] sm:$0xff] }
  0xcf   :  { %3679 = vmatprep.subr.bf16.mxu0 %v4836_v60  ;;  %3884 = vmatprep.subr.bf16.mxu1 %v4838_v61  ;;  %v4892_v60 = vcombine.high %v484_v52, %v488_v54  ;;  %v4894_v61 = vcombine.high %v485_v55, %v489_v56  ;;  %v536_v44 = vld [vmem:[%s6972_s1 + $0x1020] sm:$0xff]  ;;  %v537_v47 = vld [vmem:[%s6972_s1 + $0x1028] sm:$0xff] }
  0xd2   :  { %3680 = vmatpush1.bf16.msra.mxu0 %v4835_v2  ;;  %3885 = vmatpush1.bf16.msra.mxu1 %v4837_v3  ;;  %v4891_v2 = vcombine.low %v484_v52, %v488_v54  ;;  %v4893_v3 = vcombine.low %v485_v55, %v489_v56  ;;  %v540_v52 = vld [vmem:[%s6972_s1 + $0x1040] sm:$0xff]  ;;  %v5965_v55 = vcombine.low %v5767_v39, %v5767_v39  ;;  %v541_v56 = vld [vmem:[%s6972_s1 + $0x1048] sm:$0xff] }
  0xd3   :  { %3681 = vmatprep.subr.bf16.mxu0 %v4844_v4  ;;  %3886 = vmatprep.subr.bf16.mxu1 %v4846_v5  ;;  %v4900_v4 = vcombine.high %v492_v62, %v496_v63  ;;  %v4902_v5 = vcombine.high %v493_v0, %v497_v1  ;;  %v544_v54 = vld [vmem:[%s6972_s1 + $0x1060] sm:$0xff] }
  0xd4   :  { %v548_v39 = vld [vmem:[%s6972_s1 + $0x1080] sm:$0xff] }
  0xd6   :  { %3682 = vmatpush1.bf16.msra.mxu0 %v4843_v10  ;;  %3887 = vmatpush1.bf16.msra.mxu1 %v4845_v11  ;;  %v4899_v10 = vcombine.low %v492_v62, %v496_v63  ;;  %v4901_v11 = vcombine.low %v493_v0, %v497_v1  ;;  %v552_v63 = vld [vmem:[%s6972_s1 + $0x10a0] sm:$0xff]  ;;  %v549_v0 = vld [vmem:[%s6972_s1 + $0x1088] sm:$0xff] }
  0xd7   :  { %3683 = vmatprep.subr.bf16.mxu0 %v4852_v13  ;;  %3888 = vmatprep.subr.bf16.mxu1 %v4854_v14  ;;  %v4908_v13 = vcombine.high %v500_v6, %v504_v7  ;;  %v4910_v14 = vcombine.high %v501_v8, %v505_v9  ;;  %v553_v1 = vld [vmem:[%s6972_s1 + $0x10a8] sm:$0xff] }
  0xda   :  { %3684 = vmatpush1.bf16.msra.mxu0 %v4851_v19  ;;  %3889 = vmatpush1.bf16.msra.mxu1 %v4853_v20  ;;  %v4907_v19 = vcombine.low %v500_v6, %v504_v7  ;;  %v4909_v20 = vcombine.low %v501_v8, %v505_v9  ;;  %v556_v6 = vld [vmem:[%s6972_s1 + $0x10c0] sm:$0xff]  ;;  %v5094_v8 = vmov 0   ;;  %v557_v9 = vld [vmem:[%s6972_s1 + $0x10c8] sm:$0xff] }
  0xdb   :  { %3685 = vmatprep.subr.bf16.mxu0 %v4860_v23  ;;  %3890 = vmatprep.subr.bf16.mxu1 %v4862_v24  ;;  %v4916_v23 = vcombine.high %v508_v16, %v512_v17  ;;  %v4918_v24 = vcombine.high %v509_v53, %v513_v18  ;;  %v560_v7 = vld [vmem:[%s6972_s1 + $0x10e0] sm:$0xff] }
  0xde   :  { %3686 = vmatpush1.bf16.msra.mxu0 %v4859_v29  ;;  %3891 = vmatpush1.bf16.msra.mxu1 %v4861_v30  ;;  %v4915_v29 = vcombine.low %v508_v16, %v512_v17  ;;  %v4917_v30 = vcombine.low %v509_v53, %v513_v18  ;;  %v564_v17 = vld [vmem:[%s6972_s1 + $0x1100] sm:$0xff]  ;;  %v565_v18 = vld [vmem:[%s6972_s1 + $0x1108] sm:$0xff] }
  0xdf   :  { %3687 = vmatprep.subr.bf16.mxu0 %v4868_v32  ;;  %3892 = vmatprep.subr.bf16.mxu1 %v4870_v33  ;;  %v4924_v32 = vcombine.high %v516_v26, %v520_v27  ;;  %v4926_v33 = vcombine.high %v517_v15, %v521_v28  ;;  %v568_v53 = vld [vmem:[%s6972_s1 + $0x1120] sm:$0xff] }
  0xe2   :  { %3688 = vmatpush1.bf16.msra.mxu0 %v4867_v40  ;;  %3893 = vmatpush1.bf16.msra.mxu1 %v4869_v41  ;;  %v4923_v40 = vcombine.low %v516_v26, %v520_v27  ;;  %v4925_v41 = vcombine.low %v517_v15, %v521_v28  ;;  %v572_v27 = vld [vmem:[%s6972_s1 + $0x1140] sm:$0xff]  ;;  %v573_v28 = vld [vmem:[%s6972_s1 + $0x1148] sm:$0xff] }
  0xe3   :  { %3689 = vmatprep.subr.bf16.mxu0 %v4876_v25  ;;  %3894 = vmatprep.subr.bf16.mxu1 %v4878_v42  ;;  %v4932_v25 = vcombine.high %v524_v34, %v528_v35  ;;  %v4934_v42 = vcombine.high %v525_v37, %v529_v38  ;;  %v576_v15 = vld [vmem:[%s6972_s1 + $0x1160] sm:$0xff] }
  0xe6   :  { %3690 = vmatpush1.bf16.msra.mxu0 %v4875_v48  ;;  %3895 = vmatpush1.bf16.msra.mxu1 %v4877_v49  ;;  %v4931_v48 = vcombine.low %v524_v34, %v528_v35  ;;  %v4933_v49 = vcombine.low %v525_v37, %v529_v38  ;;  %v580_v35 = vld [vmem:[%s6972_s1 + $0x1180] sm:$0xff]  ;;  %v581_v38 = vld [vmem:[%s6972_s1 + $0x1188] sm:$0xff] }
  0xe7   :  { %3691 = vmatprep.subr.bf16.mxu0 %v4884_v50  ;;  %3896 = vmatprep.subr.bf16.mxu1 %v4886_v51  ;;  %v4940_v50 = vcombine.high %v532_v43, %v536_v44  ;;  %v4942_v51 = vcombine.high %v533_v46, %v537_v47  ;;  %v584_v37 = vld [vmem:[%s6972_s1 + $0x11a0] sm:$0xff] }
  0xea   :  { %3692 = vmatpush1.bf16.msra.mxu0 %v4883_v58  ;;  %3897 = vmatpush1.bf16.msra.mxu1 %v4885_v59  ;;  %v545_v58 = vld [vmem:[%s6972_s1 + $0x1068] sm:$0xff]  ;;  %v4939_v59 = vcombine.low %v532_v43, %v536_v44  ;;  %v588_v44 = vld [vmem:[%s6972_s1 + $0x11c0] sm:$0xff] }
  0xeb   :  { %3693 = vmatprep.subr.bf16.mxu0 %v4892_v60  ;;  %3898 = vmatprep.subr.bf16.mxu1 %v4894_v61  ;;  %v4941_v60 = vcombine.low %v533_v46, %v537_v47  ;;  %v4948_v61 = vcombine.high %v540_v52, %v544_v54  ;;  %v4950_v62 = vcombine.high %v541_v56, %v545_v58  ;;  %v592_v46 = vld [vmem:[%s6972_s1 + $0x11e0] sm:$0xff]  ;;  %v589_v47 = vld [vmem:[%s6972_s1 + $0x11c8] sm:$0xff] }
  0xee   :  { %3694 = vmatpush1.bf16.msra.mxu0 %v4891_v2  ;;  %3899 = vmatpush1.bf16.msra.mxu1 %v4893_v3  ;;  %v4947_v2 = vcombine.low %v540_v52, %v544_v54  ;;  %v4949_v3 = vcombine.low %v541_v56, %v545_v58  ;;  %v22_v54 = vld [vmem:[%s6972_s1 + $0x10] sm:$0xff]  ;;  %v23_v58 = vld [vmem:[%s6972_s1 + $0x18] sm:$0xff] }
  0xef   :  { %3695 = vmatprep.subr.bf16.mxu0 %v4900_v4  ;;  %3900 = vmatprep.subr.bf16.mxu1 %v4902_v5  ;;  %v4956_v4 = vcombine.high %v548_v39, %v552_v63  ;;  %v4958_v5 = vcombine.high %v549_v0, %v553_v1  ;;  %v26_v56 = vld [vmem:[%s6972_s1 + $0x30] sm:$0xff] }
  0xf2   :  { %3696 = vmatpush1.bf16.msra.mxu0 %v4899_v10  ;;  %3901 = vmatpush1.bf16.msra.mxu1 %v4901_v11  ;;  %v561_v10 = vld [vmem:[%s6972_s1 + $0x10e8] sm:$0xff]  ;;  %v4955_v11 = vcombine.low %v548_v39, %v552_v63  ;;  %v30_v63 = vld [vmem:[%s6972_s1 + $0x50] sm:$0xff] }
  0xf3   :  { %3697 = vmatprep.subr.bf16.mxu0 %v4908_v13  ;;  %3902 = vmatprep.subr.bf16.mxu1 %v4910_v14  ;;  %v4957_v13 = vcombine.low %v549_v0, %v553_v1  ;;  %v4964_v14 = vcombine.high %v556_v6, %v560_v7  ;;  %v4966_v16 = vcombine.high %v557_v9, %v561_v10  ;;  %v34_v0 = vld [vmem:[%s6972_s1 + $0x70] sm:$0xff]  ;;  %v5092_v1 = vld [vmem:[%s6973_s0 + $0x20] ss:$0 sps:$4 sm:$0xff]  }
  0xf6   :  { %3698 = vmatpush1.bf16.msra.mxu0 %v4907_v19  ;;  %3903 = vmatpush1.bf16.msra.mxu1 %v4909_v20  ;;  %v569_v19 = vld [vmem:[%s6972_s1 + $0x1128] sm:$0xff]  ;;  %v4963_v20 = vcombine.low %v556_v6, %v560_v7  ;;  %v4440_v6 = vcombine.high %v30_v63, %v34_v0 }
  0xf7   :  { %3699 = vmatprep.subr.bf16.mxu0 %v4916_v23  ;;  %3904 = vmatprep.subr.bf16.mxu1 %v4918_v24  ;;  %v4965_v23 = vcombine.low %v557_v9, %v561_v10  ;;  %v4972_v24 = vcombine.high %v564_v17, %v568_v53  ;;  %v4974_v26 = vcombine.high %v565_v18, %v569_v19  ;;  %v38_v9 = vld [vmem:[%s6972_s1 + $0x90] sm:$0xff] }
  0xf8   :  { %v42_v10 = vld [vmem:[%s6972_s1 + $0xb0] sm:$0xff] }
  0xfa   :  { %3700 = vmatpush1.bf16.msra.mxu0 %v4915_v29  ;;  %3905 = vmatpush1.bf16.msra.mxu1 %v4917_v30  ;;  %v577_v29 = vld [vmem:[%s6972_s1 + $0x1168] sm:$0xff]  ;;  %v4971_v30 = vcombine.low %v564_v17, %v568_v53  ;;  %v4448_v17 = vcombine.high %v38_v9, %v42_v10 }
  0xfb   :  { %3701 = vmatprep.subr.bf16.mxu0 %v4924_v32  ;;  %3906 = vmatprep.subr.bf16.mxu1 %v4926_v33  ;;  %v4973_v32 = vcombine.low %v565_v18, %v569_v19  ;;  %v4980_v33 = vcombine.high %v572_v27, %v576_v15  ;;  %v4982_v34 = vcombine.high %v573_v28, %v577_v29  ;;  %v46_v18 = vld [vmem:[%s6972_s1 + $0xd0] sm:$0xff] }
  0xfc   :  { %v50_v19 = vld [vmem:[%s6972_s1 + $0xf0] sm:$0xff] }
  0xfe   :  { %3702 = vmatpush1.bf16.msra.mxu0 %v4923_v40  ;;  %3907 = vmatpush1.bf16.msra.mxu1 %v4925_v41  ;;  %v585_v40 = vld [vmem:[%s6972_s1 + $0x11a8] sm:$0xff]  ;;  %v4979_v41 = vcombine.low %v572_v27, %v576_v15  ;;  %v4456_v27 = vcombine.high %v46_v18, %v50_v19 }
  0xff   :  { %3703 = vmatprep.subr.bf16.mxu0 %v4932_v25  ;;  %3908 = vmatprep.subr.bf16.mxu1 %v4934_v42  ;;  %v4981_v25 = vcombine.low %v573_v28, %v577_v29  ;;  %v4988_v42 = vcombine.high %v580_v35, %v584_v37  ;;  %v4990_v43 = vcombine.high %v581_v38, %v585_v40  ;;  %v54_v28 = vld [vmem:[%s6972_s1 + $0x110] sm:$0xff] }
 0x100   :  { %v58_v29 = vld [vmem:[%s6972_s1 + $0x130] sm:$0xff] }
 0x102   :  { %3704 = vmatpush1.bf16.msra.mxu0 %v4931_v48  ;;  %3909 = vmatpush1.bf16.msra.mxu1 %v4933_v49  ;;  %v593_v48 = vld [vmem:[%s6972_s1 + $0x11e8] sm:$0xff]  ;;  %v4987_v49 = vcombine.low %v580_v35, %v584_v37  ;;  %v62_v37 = vld [vmem:[%s6972_s1 + $0x150] sm:$0xff] }
 0x103   :  { %3714 = vmatprep.subr.bf16.mxu0 %v4940_v50  ;;  %3919 = vmatprep.subr.bf16.mxu1 %v4942_v51  ;;  %v4989_v50 = vcombine.low %v581_v38, %v585_v40  ;;  %v4996_v51 = vcombine.high %v588_v44, %v592_v46  ;;  %v4998_v52 = vcombine.high %v589_v47, %v593_v48  ;;  %v66_v38 = vld [vmem:[%s6972_s1 + $0x170] sm:$0xff]  ;;  %v63_v40 = vld [vmem:[%s6972_s1 + $0x158] sm:$0xff] }
 0x105   :  { %3706 = vmatmul.mubr.bf16.vlgmr.msra.gmra.mrb[0].mxu0 %v5965_v55  ;;  %3911 = vmatmul.mubr.bf16.vlgmr.msra.gmra.mrb[0].mxu1 %v5965_v55 }
 0x106   :  { %3715 = vmatpush1.bf16.msra.mxu0 %v4939_v59  ;;  %3920 = vmatpush1.bf16.msra.mxu1 %v4941_v60  ;;  %v27_v59 = vld [vmem:[%s6972_s1 + $0x38] sm:$0xff]  ;;  %v4995_v60 = vcombine.low %v588_v44, %v592_v46  ;;  %v70_v46 = vld [vmem:[%s6972_s1 + $0x190] sm:$0xff] }
 0x107   :  { %3716 = vmatprep.subr.bf16.mxu0 %v4948_v61  ;;  %3921 = vmatprep.subr.bf16.mxu1 %v4950_v62  ;;  %v4997_v61 = vcombine.low %v589_v47, %v593_v48  ;;  %v4432_v62 = vcombine.high %v22_v54, %v26_v56  ;;  %v4434_v39 = vcombine.high %v23_v58, %v27_v59  ;;  %v74_v47 = vld [vmem:[%s6972_s1 + $0x1b0] sm:$0xff]  ;;  %v71_v48 = vld [vmem:[%s6972_s1 + $0x198] sm:$0xff] }
 0x108   :  { %3746 = vmatprep.mubr.bf16.mxu0 %v5094_v8  ;;  %3951 = vmatprep.mubr.bf16.mxu1 %v5094_v8 }
 0x10a   :  { %3717 = vmatpush1.bf16.msra.mxu0 %v4947_v2  ;;  %3922 = vmatpush1.bf16.msra.mxu1 %v4949_v3  ;;  %v31_v2 = vld [vmem:[%s6972_s1 + $0x58] sm:$0xff] }
 0x10b   :  { %3718 = vmatprep.subr.bf16.mxu0 %v4956_v4  ;;  %3923 = vmatprep.subr.bf16.mxu1 %v4958_v5  ;;  %v35_v3 = vld [vmem:[%s6972_s1 + $0x78] sm:$0xff]  ;;  %v4431_v4 = vcombine.low %v22_v54, %v26_v56  ;;  %v4433_v5 = vcombine.low %v23_v58, %v27_v59  ;;  %v78_v56 = vld [vmem:[%s6972_s1 + $0x1d0] sm:$0xff] }
 0x10c   :  { %v4442_v7 = vcombine.high %v31_v2, %v35_v3  ;;  %v82_v58 = vld [vmem:[%s6972_s1 + $0x1f0] sm:$0xff]  ;;  %v79_v59 = vld [vmem:[%s6972_s1 + $0x1d8] sm:$0xff] }
 0x10e   :  { %3719 = vmatpush1.bf16.msra.mxu0 %v4955_v11  ;;  %3924 = vmatpush1.bf16.msra.mxu1 %v4957_v13  ;;  %v39_v11 = vld [vmem:[%s6972_s1 + $0x98] sm:$0xff] }
 0x10f   :  { %3720 = vmatprep.subr.bf16.mxu0 %v4964_v14  ;;  %3925 = vmatprep.subr.bf16.mxu1 %v4966_v16  ;;  %v43_v13 = vld [vmem:[%s6972_s1 + $0xb8] sm:$0xff]  ;;  %v4439_v14 = vcombine.low %v30_v63, %v34_v0  ;;  %v4441_v16 = vcombine.low %v31_v2, %v35_v3  ;;  %v86_v0 = vld [vmem:[%s6972_s1 + $0x210] sm:$0xff] }
 0x110   :  { %v4450_v53 = vcombine.high %v39_v11, %v43_v13  ;;  %v87_v2 = vld [vmem:[%s6972_s1 + $0x218] sm:$0xff] }
 0x111   :  { %v91_v3 = vld [vmem:[%s6972_s1 + $0x238] sm:$0xff] }
 0x112   :  { %3721 = vmatpush1.bf16.msra.mxu0 %v4963_v20  ;;  %3926 = vmatpush1.bf16.msra.mxu1 %v4965_v23  ;;  %v47_v20 = vld [vmem:[%s6972_s1 + $0xd8] sm:$0xff] }
 0x113   :  { %3722 = vmatprep.subr.bf16.mxu0 %v4972_v24  ;;  %3927 = vmatprep.subr.bf16.mxu1 %v4974_v26  ;;  %v51_v23 = vld [vmem:[%s6972_s1 + $0xf8] sm:$0xff]  ;;  %v4447_v24 = vcombine.low %v38_v9, %v42_v10  ;;  %v4449_v26 = vcombine.low %v39_v11, %v43_v13  ;;  %v94_v9 = vld [vmem:[%s6972_s1 + $0x250] sm:$0xff] }
 0x114   :  { %v4458_v15 = vcombine.high %v47_v20, %v51_v23  ;;  %v98_v10 = vld [vmem:[%s6972_s1 + $0x270] sm:$0xff]  ;;  %v95_v11 = vld [vmem:[%s6972_s1 + $0x258] sm:$0xff] }
 0x115   :  { %v99_v13 = vld [vmem:[%s6972_s1 + $0x278] sm:$0xff] }
 0x116   :  { %3723 = vmatpush1.bf16.msra.mxu0 %v4971_v30  ;;  %3928 = vmatpush1.bf16.msra.mxu1 %v4973_v32  ;;  %v59_v30 = vld [vmem:[%s6972_s1 + $0x138] sm:$0xff]  ;;  %v4455_v32 = vcombine.low %v46_v18, %v50_v19  ;;  %v102_v18 = vld [vmem:[%s6972_s1 + $0x290] sm:$0xff] }
 0x117   :  { %3724 = vmatprep.subr.bf16.mxu0 %v4980_v33  ;;  %3929 = vmatprep.subr.bf16.mxu1 %v4982_v34  ;;  %v4457_v33 = vcombine.low %v47_v20, %v51_v23  ;;  %v4464_v34 = vcombine.high %v54_v28, %v58_v29  ;;  %v106_v19 = vld [vmem:[%s6972_s1 + $0x2b0] sm:$0xff]  ;;  %v103_v20 = vld [vmem:[%s6972_s1 + $0x298] sm:$0xff] }
 0x118   :  { %v107_v23 = vld [vmem:[%s6972_s1 + $0x2b8] sm:$0xff] }
 0x11a   :  { %3725 = vmatpush1.bf16.msra.mxu0 %v4979_v41  ;;  %3930 = vmatpush1.bf16.msra.mxu1 %v4981_v25  ;;  %v67_v41 = vld [vmem:[%s6972_s1 + $0x178] sm:$0xff]  ;;  %v4463_v25 = vcombine.low %v54_v28, %v58_v29  ;;  %v110_v28 = vld [vmem:[%s6972_s1 + $0x2d0] sm:$0xff] }
 0x11b   :  { %3726 = vmatprep.subr.bf16.mxu0 %v4988_v42  ;;  %3931 = vmatprep.subr.bf16.mxu1 %v4990_v43  ;;  %v4472_v43 = vcombine.high %v62_v37, %v66_v38  ;;  %v4474_v44 = vcombine.high %v63_v40, %v67_v41  ;;  %v114_v29 = vld [vmem:[%s6972_s1 + $0x2f0] sm:$0xff] }
 0x11e   :  { %3727 = vmatpush1.bf16.msra.mxu0 %v4987_v49  ;;  %3932 = vmatpush1.bf16.msra.mxu1 %v4989_v50  ;;  %v75_v49 = vld [vmem:[%s6972_s1 + $0x1b8] sm:$0xff]  ;;  %v4471_v50 = vcombine.low %v62_v37, %v66_v38  ;;  %v118_v37 = vld [vmem:[%s6972_s1 + $0x310] sm:$0xff] }
 0x11f   :  { %3728 = vmatprep.subr.bf16.mxu0 %v4996_v51  ;;  %3933 = vmatprep.subr.bf16.mxu1 %v4998_v52  ;;  %v4473_v51 = vcombine.low %v63_v40, %v67_v41  ;;  %v4480_v52 = vcombine.high %v70_v46, %v74_v47  ;;  %v4482_v54 = vcombine.high %v71_v48, %v75_v49  ;;  %v122_v38 = vld [vmem:[%s6972_s1 + $0x330] sm:$0xff]  ;;  %v119_v40 = vld [vmem:[%s6972_s1 + $0x318] sm:$0xff] }
 0x120   :  { %v123_v41 = vld [vmem:[%s6972_s1 + $0x338] sm:$0xff] }
 0x122   :  { %3729 = vmatpush1.bf16.msra.mxu0 %v4995_v60  ;;  %3934 = vmatpush1.bf16.msra.mxu1 %v4997_v61  ;;  %v83_v60 = vld [vmem:[%s6972_s1 + $0x1f8] sm:$0xff]  ;;  %v4479_v61 = vcombine.low %v70_v46, %v74_v47  ;;  %v126_v46 = vld [vmem:[%s6972_s1 + $0x350] sm:$0xff] }
 0x123   :  { %3960 = vmatprep.subr.bf16.mxu0 %v4432_v62  ;;  %4165 = vmatprep.subr.bf16.mxu1 %v4434_v39  ;;  %v4481_v62 = vcombine.low %v71_v48, %v75_v49  ;;  %v4488_v39 = vcombine.high %v78_v56, %v82_v58  ;;  %v4490_v63 = vcombine.high %v79_v59, %v83_v60  ;;  %v130_v47 = vld [vmem:[%s6972_s1 + $0x370] sm:$0xff]  ;;  %v127_v48 = vld [vmem:[%s6972_s1 + $0x358] sm:$0xff] }
 0x124   :  { %v131_v49 = vld [vmem:[%s6972_s1 + $0x378] sm:$0xff] }
 0x125   :  { %3747 = vmatmul.mubr.bf16.vlgmr.msra.gmra.mrb[0].mxu0 %v5092_v1  ;;  %3952 = vmatmul.mubr.bf16.vlgmr.msra.gmra.mrb[0].mxu1 %v5092_v1  ;;  %v90_v1 = vld [vmem:[%s6972_s1 + $0x230] sm:$0xff] }
 0x126   :  { %3961 = vmatpush1.bf16.msra.mxu0 %v4431_v4  ;;  %4166 = vmatpush1.bf16.msra.mxu1 %v4433_v5  ;;  %v4487_v4 = vcombine.low %v78_v56, %v82_v58  ;;  %v4489_v5 = vcombine.low %v79_v59, %v83_v60  ;;  %v134_v56 = vld [vmem:[%s6972_s1 + $0x390] sm:$0xff]  ;;  %v135_v59 = vld [vmem:[%s6972_s1 + $0x398] sm:$0xff] }
 0x127   :  { %3962 = vmatprep.subr.bf16.mxu0 %v4440_v6  ;;  %4167 = vmatprep.subr.bf16.mxu1 %v4442_v7  ;;  %v4496_v6 = vcombine.high %v86_v0, %v90_v1  ;;  %v4498_v7 = vcombine.high %v87_v2, %v91_v3  ;;  %v138_v58 = vld [vmem:[%s6972_s1 + $0x3b0] sm:$0xff]  ;;  %v139_v60 = vld [vmem:[%s6972_s1 + $0x3b8] sm:$0xff] }
 0x128   :  { %3992 = vmatprep.mubr.bf16.mxu0 %v5212_v57  ;;  %4197 = vmatprep.mubr.bf16.mxu1 %v5212_v57  ;;  %v55_v57 = vld [vmem:[%s6972_s1 + $0x118] sm:$0xff] }
 0x129   :  { %v4466_v35 = vcombine.high %v55_v57, %v59_v30  ;;  %v4465_v42 = vcombine.low %v55_v57, %v59_v30  ;;  %v111_v57 = vld [vmem:[%s6972_s1 + $0x2d8] sm:$0xff] }
 0x12a   :  { %3963 = vmatpush1.bf16.msra.mxu0 %v4439_v14  ;;  %4168 = vmatpush1.bf16.msra.mxu1 %v4441_v16  ;;  %v4495_v14 = vcombine.low %v86_v0, %v90_v1  ;;  %v4497_v16 = vcombine.low %v87_v2, %v91_v3  ;;  %v115_v30 = vld [vmem:[%s6972_s1 + $0x2f8] sm:$0xff]  ;;  %v142_v0 = vld [vmem:[%s6972_s1 + $0x3d0] sm:$0xff] }
 0x12b   :  { %3964 = vmatprep.subr.bf16.mxu0 %v4448_v17  ;;  %4169 = vmatprep.subr.bf16.mxu1 %v4450_v53  ;;  %v4504_v17 = vcombine.high %v94_v9, %v98_v10  ;;  %v4506_v53 = vcombine.high %v95_v11, %v99_v13  ;;  %v146_v1 = vld [vmem:[%s6972_s1 + $0x3f0] sm:$0xff]  ;;  %v143_v2 = vld [vmem:[%s6972_s1 + $0x3d8] sm:$0xff] }
 0x12c   :  { %v147_v3 = vld [vmem:[%s6972_s1 + $0x3f8] sm:$0xff] }
 0x12e   :  { %3965 = vmatpush1.bf16.msra.mxu0 %v4447_v24  ;;  %4170 = vmatpush1.bf16.msra.mxu1 %v4449_v26  ;;  %v4503_v24 = vcombine.low %v94_v9, %v98_v10  ;;  %v4505_v26 = vcombine.low %v95_v11, %v99_v13  ;;  %v150_v9 = vld [vmem:[%s6972_s1 + $0x410] sm:$0xff]  ;;  %v151_v11 = vld [vmem:[%s6972_s1 + $0x418] sm:$0xff] }
 0x12f   :  { %3966 = vmatprep.subr.bf16.mxu0 %v4456_v27  ;;  %4171 = vmatprep.subr.bf16.mxu1 %v4458_v15  ;;  %v4512_v27 = vcombine.high %v102_v18, %v106_v19  ;;  %v4514_v15 = vcombine.high %v103_v20, %v107_v23  ;;  %v154_v10 = vld [vmem:[%s6972_s1 + $0x430] sm:$0xff]  ;;  %v155_v13 = vld [vmem:[%s6972_s1 + $0x438] sm:$0xff] }
 0x132   :  { %3967 = vmatpush1.bf16.msra.mxu0 %v4455_v32  ;;  %4172 = vmatpush1.bf16.msra.mxu1 %v4457_v33  ;;  %v4511_v32 = vcombine.low %v102_v18, %v106_v19  ;;  %v4513_v33 = vcombine.low %v103_v20, %v107_v23  ;;  %v158_v18 = vld [vmem:[%s6972_s1 + $0x450] sm:$0xff]  ;;  %v159_v20 = vld [vmem:[%s6972_s1 + $0x458] sm:$0xff] }
 0x133   :  { %3968 = vmatprep.subr.bf16.mxu0 %v4464_v34  ;;  %4173 = vmatprep.subr.bf16.mxu1 %v4466_v35  ;;  %v4520_v34 = vcombine.high %v110_v28, %v114_v29  ;;  %v4522_v35 = vcombine.high %v111_v57, %v115_v30  ;;  %v162_v19 = vld [vmem:[%s6972_s1 + $0x470] sm:$0xff]  ;;  %v163_v23 = vld [vmem:[%s6972_s1 + $0x478] sm:$0xff] }
 0x136   :  { %3969 = vmatpush1.bf16.msra.mxu0 %v4463_v25  ;;  %4174 = vmatpush1.bf16.msra.mxu1 %v4465_v42  ;;  %v4519_v25 = vcombine.low %v110_v28, %v114_v29  ;;  %v4521_v42 = vcombine.low %v111_v57, %v115_v30  ;;  %v166_v28 = vld [vmem:[%s6972_s1 + $0x490] sm:$0xff]  ;;  %v167_v57 = vld [vmem:[%s6972_s1 + $0x498] sm:$0xff] }
 0x137   :  { %3970 = vmatprep.subr.bf16.mxu0 %v4472_v43  ;;  %4175 = vmatprep.subr.bf16.mxu1 %v4474_v44  ;;  %v4528_v43 = vcombine.high %v118_v37, %v122_v38  ;;  %v4530_v44 = vcombine.high %v119_v40, %v123_v41  ;;  %v170_v29 = vld [vmem:[%s6972_s1 + $0x4b0] sm:$0xff]  ;;  %v171_v30 = vld [vmem:[%s6972_s1 + $0x4b8] sm:$0xff] }
 0x13a   :  { %3971 = vmatpush1.bf16.msra.mxu0 %v4471_v50  ;;  %4176 = vmatpush1.bf16.msra.mxu1 %v4473_v51  ;;  %v4527_v50 = vcombine.low %v118_v37, %v122_v38  ;;  %v4529_v51 = vcombine.low %v119_v40, %v123_v41  ;;  %v174_v37 = vld [vmem:[%s6972_s1 + $0x4d0] sm:$0xff]  ;;  %v179_v40 = vld [vmem:[%s6972_s1 + $0x4f8] sm:$0xff]  ;;  %v4575_v41 = vcombine.low %v166_v28, %v170_v29 }
 0x13b   :  { %3972 = vmatprep.subr.bf16.mxu0 %v4480_v52  ;;  %4177 = vmatprep.subr.bf16.mxu1 %v4482_v54  ;;  %v4536_v52 = vcombine.high %v126_v46, %v130_v47  ;;  %v4538_v54 = vcombine.high %v127_v48, %v131_v49  ;;  %v178_v38 = vld [vmem:[%s6972_s1 + $0x4f0] sm:$0xff] }
 0x13e   :  { %3973 = vmatpush1.bf16.msra.mxu0 %v4479_v61  ;;  %4178 = vmatpush1.bf16.msra.mxu1 %v4481_v62  ;;  %v4535_v61 = vcombine.low %v126_v46, %v130_v47  ;;  %v4537_v62 = vcombine.low %v127_v48, %v131_v49  ;;  %v186_v46 = vld [vmem:[%s6972_s1 + $0x530] sm:$0xff]  ;;  %v187_v47 = vld [vmem:[%s6972_s1 + $0x538] sm:$0xff]  ;;  %v4583_v48 = vcombine.low %v174_v37, %v178_v38 }
 0x13f   :  { %3974 = vmatprep.subr.bf16.mxu0 %v4488_v39  ;;  %4179 = vmatprep.subr.bf16.mxu1 %v4490_v63  ;;  %v4544_v39 = vcombine.high %v134_v56, %v138_v58  ;;  %v4546_v63 = vcombine.high %v135_v59, %v139_v60 }
 0x142   :  { %3975 = vmatpush1.bf16.msra.mxu0 %v4487_v4  ;;  %4180 = vmatpush1.bf16.msra.mxu1 %v4489_v5  ;;  %v4543_v4 = vcombine.low %v134_v56, %v138_v58  ;;  %v4545_v5 = vcombine.low %v135_v59, %v139_v60  ;;  %v191_v56 = vld [vmem:[%s6972_s1 + $0x558] sm:$0xff] }
 0x143   :  { %3976 = vmatprep.subr.bf16.mxu0 %v4496_v6  ;;  %4181 = vmatprep.subr.bf16.mxu1 %v4498_v7  ;;  %v4552_v6 = vcombine.high %v142_v0, %v146_v1  ;;  %v4554_v7 = vcombine.high %v143_v2, %v147_v3  ;;  %v195_v58 = vld [vmem:[%s6972_s1 + $0x578] sm:$0xff] }
 0x146   :  { %3977 = vmatpush1.bf16.msra.mxu0 %v4495_v14  ;;  %4182 = vmatpush1.bf16.msra.mxu1 %v4497_v16  ;;  %v4551_v14 = vcombine.low %v142_v0, %v146_v1  ;;  %v4553_v16 = vcombine.low %v143_v2, %v147_v3  ;;  %v199_v0 = vld [vmem:[%s6972_s1 + $0x598] sm:$0xff]  ;;  %v4601_v3 = vcombine.low %v191_v56, %v195_v58 }
 0x147   :  { %3978 = vmatprep.subr.bf16.mxu0 %v4504_v17  ;;  %4183 = vmatprep.subr.bf16.mxu1 %v4506_v53  ;;  %v4560_v17 = vcombine.high %v150_v9, %v154_v10  ;;  %v4562_v53 = vcombine.high %v151_v11, %v155_v13  ;;  %v203_v1 = vld [vmem:[%s6972_s1 + $0x5b8] sm:$0xff] }
 0x14a   :  { %3979 = vmatpush1.bf16.msra.mxu0 %v4503_v24  ;;  %4184 = vmatpush1.bf16.msra.mxu1 %v4505_v26  ;;  %v4559_v24 = vcombine.low %v150_v9, %v154_v10  ;;  %v4561_v26 = vcombine.low %v151_v11, %v155_v13  ;;  %v207_v9 = vld [vmem:[%s6972_s1 + $0x5d8] sm:$0xff]  ;;  %v4609_v13 = vcombine.low %v199_v0, %v203_v1 }
 0x14b   :  { %3980 = vmatprep.subr.bf16.mxu0 %v4512_v27  ;;  %4185 = vmatprep.subr.bf16.mxu1 %v4514_v15  ;;  %v4568_v27 = vcombine.high %v158_v18, %v162_v19  ;;  %v4570_v15 = vcombine.high %v159_v20, %v163_v23  ;;  %v211_v10 = vld [vmem:[%s6972_s1 + $0x5f8] sm:$0xff] }
 0x14e   :  { %3981 = vmatpush1.bf16.msra.mxu0 %v4511_v32  ;;  %4186 = vmatpush1.bf16.msra.mxu1 %v4513_v33  ;;  %v4567_v32 = vcombine.low %v158_v18, %v162_v19  ;;  %v4569_v33 = vcombine.low %v159_v20, %v163_v23  ;;  %v215_v18 = vld [vmem:[%s6972_s1 + $0x618] sm:$0xff]  ;;  %v4617_v23 = vcombine.low %v207_v9, %v211_v10 }
 0x14f   :  { %3982 = vmatprep.subr.bf16.mxu0 %v4520_v34  ;;  %4187 = vmatprep.subr.bf16.mxu1 %v4522_v35  ;;  %v4576_v34 = vcombine.high %v166_v28, %v170_v29  ;;  %v4578_v35 = vcombine.high %v167_v57, %v171_v30  ;;  %v219_v19 = vld [vmem:[%s6972_s1 + $0x638] sm:$0xff] }
 0x150   :  { %v223_v28 = vld [vmem:[%s6972_s1 + $0x658] sm:$0xff] }
 0x151   :  { %v227_v29 = vld [vmem:[%s6972_s1 + $0x678] sm:$0xff] }
 0x152   :  { %3983 = vmatpush1.bf16.msra.mxu0 %v4519_v25  ;;  %4188 = vmatpush1.bf16.msra.mxu1 %v4521_v42  ;;  %v4577_v25 = vcombine.low %v167_v57, %v171_v30  ;;  %v4584_v42 = vcombine.high %v174_v37, %v178_v38  ;;  %v4625_v30 = vcombine.low %v215_v18, %v219_v19  ;;  %v231_v37 = vld [vmem:[%s6972_s1 + $0x698] sm:$0xff] }
 0x153   :  { %3984 = vmatprep.subr.bf16.mxu0 %v4528_v43  ;;  %4189 = vmatprep.subr.bf16.mxu1 %v4530_v44  ;;  %v182_v44 = vld [vmem:[%s6972_s1 + $0x510] sm:$0xff]  ;;  %v235_v38 = vld [vmem:[%s6972_s1 + $0x6b8] sm:$0xff] }
 0x154   :  { %v4591_v59 = vcombine.low %v182_v44, %v186_v46 }
 0x156   :  { %3985 = vmatpush1.bf16.msra.mxu0 %v4527_v50  ;;  %4190 = vmatpush1.bf16.msra.mxu1 %v4529_v51  ;;  %v4592_v50 = vcombine.high %v182_v44, %v186_v46  ;;  %v239_v44 = vld [vmem:[%s6972_s1 + $0x6d8] sm:$0xff] }
 0x157   :  { %3986 = vmatprep.subr.bf16.mxu0 %v4536_v52  ;;  %4191 = vmatprep.subr.bf16.mxu1 %v4538_v54  ;;  %v190_v52 = vld [vmem:[%s6972_s1 + $0x550] sm:$0xff]  ;;  %v243_v46 = vld [vmem:[%s6972_s1 + $0x6f8] sm:$0xff] }
 0x158   :  { %v194_v54 = vld [vmem:[%s6972_s1 + $0x570] sm:$0xff] }
 0x159   :  { %v4599_v2 = vcombine.low %v190_v52, %v194_v54 }
 0x15a   :  { %3987 = vmatpush1.bf16.msra.mxu0 %v4535_v61  ;;  %4192 = vmatpush1.bf16.msra.mxu1 %v4537_v62  ;;  %v4600_v61 = vcombine.high %v190_v52, %v194_v54  ;;  %v4602_v62 = vcombine.high %v191_v56, %v195_v58  ;;  %v247_v52 = vld [vmem:[%s6972_s1 + $0x718] sm:$0xff]  ;;  %v4649_v58 = vcombine.low %v239_v44, %v243_v46 }
 0x15b   :  { %3988 = vmatprep.subr.bf16.mxu0 %v4544_v39  ;;  %4193 = vmatprep.subr.bf16.mxu1 %v4546_v63  ;;  %v198_v39 = vld [vmem:[%s6972_s1 + $0x590] sm:$0xff]  ;;  %v251_v54 = vld [vmem:[%s6972_s1 + $0x738] sm:$0xff] }
 0x15c   :  { %v202_v63 = vld [vmem:[%s6972_s1 + $0x5b0] sm:$0xff] }
 0x15d   :  { %v4607_v11 = vcombine.low %v198_v39, %v202_v63 }
 0x15e   :  { %3989 = vmatpush1.bf16.msra.mxu0 %v4543_v4  ;;  %4194 = vmatpush1.bf16.msra.mxu1 %v4545_v5  ;;  %v4608_v4 = vcombine.high %v198_v39, %v202_v63  ;;  %v4610_v5 = vcombine.high %v199_v0, %v203_v1  ;;  %v255_v39 = vld [vmem:[%s6972_s1 + $0x758] sm:$0xff]  ;;  %v4657_v1 = vcombine.low %v247_v52, %v251_v54 }
 0x15f   :  { %3990 = vmatprep.subr.bf16.mxu0 %v4552_v6  ;;  %4195 = vmatprep.subr.bf16.mxu1 %v4554_v7  ;;  %v206_v6 = vld [vmem:[%s6972_s1 + $0x5d0] sm:$0xff]  ;;  %v259_v63 = vld [vmem:[%s6972_s1 + $0x778] sm:$0xff] }
 0x160   :  { %v210_v7 = vld [vmem:[%s6972_s1 + $0x5f0] sm:$0xff] }
 0x161   :  { %v4615_v20 = vcombine.low %v206_v6, %v210_v7 }
 0x162   :  { %3991 = vmatpush1.bf16.msra.mxu0 %v4551_v14  ;;  %4196 = vmatpush1.bf16.msra.mxu1 %v4553_v16  ;;  %v4616_v14 = vcombine.high %v206_v6, %v210_v7  ;;  %v4618_v16 = vcombine.high %v207_v9, %v211_v10  ;;  %v263_v6 = vld [vmem:[%s6972_s1 + $0x798] sm:$0xff]  ;;  %v4665_v10 = vcombine.low %v255_v39, %v259_v63 }
 0x163   :  { %4001 = vmatprep.subr.bf16.mxu0 %v4560_v17  ;;  %4206 = vmatprep.subr.bf16.mxu1 %v4562_v53  ;;  %v214_v17 = vld [vmem:[%s6972_s1 + $0x610] sm:$0xff]  ;;  %v267_v7 = vld [vmem:[%s6972_s1 + $0x7b8] sm:$0xff] }
 0x164   :  { %v218_v53 = vld [vmem:[%s6972_s1 + $0x630] sm:$0xff] }
 0x165   :  { %3993 = vmatmul.mubr.bf16.vlgmr.msra.gmra.mrb[4].mxu0 %v5338_v12  ;;  %4198 = vmatmul.mubr.bf16.vlgmr.msra.gmra.mrb[4].mxu1 %v5338_v12  ;;  %v175_v12 = vld [vmem:[%s6972_s1 + $0x4d8] sm:$0xff]  ;;  %v4623_v57 = vcombine.low %v214_v17, %v218_v53 }
 0x166   :  { %4002 = vmatpush1.bf16.msra.mxu0 %v4559_v24  ;;  %4207 = vmatpush1.bf16.msra.mxu1 %v4561_v26  ;;  %v4586_v43 = vcombine.high %v175_v12, %v179_v40  ;;  %v4585_v49 = vcombine.low %v175_v12, %v179_v40  ;;  %v4624_v24 = vcombine.high %v214_v17, %v218_v53  ;;  %v271_v17 = vld [vmem:[%s6972_s1 + $0x7d8] sm:$0xff] }
 0x167   :  { %4003 = vmatprep.subr.bf16.mxu0 %v4568_v27  ;;  %4208 = vmatprep.subr.bf16.mxu1 %v4570_v15  ;;  %v4626_v26 = vcombine.high %v215_v18, %v219_v19  ;;  %v222_v27 = vld [vmem:[%s6972_s1 + $0x650] sm:$0xff]  ;;  %v4633_v40 = vcombine.low %v223_v28, %v227_v29  ;;  %v275_v53 = vld [vmem:[%s6972_s1 + $0x7f8] sm:$0xff]  ;;  %v4673_v19 = vcombine.low %v263_v6, %v267_v7 }
 0x168   :  { %4033 = vmatprep.mubr.bf16.mxu0 %v5359_v21  ;;  %4238 = vmatprep.mubr.bf16.mxu1 %v5359_v21  ;;  %v183_v21 = vld [vmem:[%s6972_s1 + $0x518] sm:$0xff]  ;;  %v226_v15 = vld [vmem:[%s6972_s1 + $0x670] sm:$0xff] }
 0x169   :  { %v4594_v51 = vcombine.high %v183_v21, %v187_v47  ;;  %v4593_v60 = vcombine.low %v183_v21, %v187_v47  ;;  %v4631_v12 = vcombine.low %v222_v27, %v226_v15  ;;  %v4641_v47 = vcombine.low %v231_v37, %v235_v38 }
 0x16a   :  { %4004 = vmatpush1.bf16.msra.mxu0 %v4567_v32  ;;  %4209 = vmatpush1.bf16.msra.mxu1 %v4569_v33  ;;  %v4632_v32 = vcombine.high %v222_v27, %v226_v15  ;;  %v4634_v33 = vcombine.high %v223_v28, %v227_v29  ;;  %v279_v27 = vld [vmem:[%s6972_s1 + $0x818] sm:$0xff]  ;;  %v4681_v29 = vcombine.low %v271_v17, %v275_v53 }
 0x16b   :  { %4005 = vmatprep.subr.bf16.mxu0 %v4576_v34  ;;  %4210 = vmatprep.subr.bf16.mxu1 %v4578_v35  ;;  %v230_v34 = vld [vmem:[%s6972_s1 + $0x690] sm:$0xff]  ;;  %v283_v15 = vld [vmem:[%s6972_s1 + $0x838] sm:$0xff] }
 0x16c   :  { %v234_v35 = vld [vmem:[%s6972_s1 + $0x6b0] sm:$0xff] }
 0x16d   :  { %v4639_v21 = vcombine.low %v230_v34, %v234_v35 }
 0x16e   :  { %4006 = vmatpush1.bf16.msra.mxu0 %v4575_v41  ;;  %4211 = vmatpush1.bf16.msra.mxu1 %v4577_v25  ;;  %v4640_v41 = vcombine.high %v230_v34, %v234_v35  ;;  %v4642_v25 = vcombine.high %v231_v37, %v235_v38  ;;  %v287_v34 = vld [vmem:[%s6972_s1 + $0x858] sm:$0xff]  ;;  %v4689_v38 = vcombine.low %v279_v27, %v283_v15 }
 0x16f   :  { %4007 = vmatprep.subr.bf16.mxu0 %v4584_v42  ;;  %4212 = vmatprep.subr.bf16.mxu1 %v4586_v43  ;;  %v238_v42 = vld [vmem:[%s6972_s1 + $0x6d0] sm:$0xff]  ;;  %v291_v35 = vld [vmem:[%s6972_s1 + $0x878] sm:$0xff] }
 0x170   :  { %v242_v43 = vld [vmem:[%s6972_s1 + $0x6f0] sm:$0xff] }
 0x171   :  { %v4647_v56 = vcombine.low %v238_v42, %v242_v43 }
 0x172   :  { %4008 = vmatpush1.bf16.msra.mxu0 %v4583_v48  ;;  %4213 = vmatpush1.bf16.msra.mxu1 %v4585_v49  ;;  %v4648_v48 = vcombine.high %v238_v42, %v242_v43  ;;  %v4650_v49 = vcombine.high %v239_v44, %v243_v46  ;;  %v295_v42 = vld [vmem:[%s6972_s1 + $0x898] sm:$0xff]  ;;  %v4697_v46 = vcombine.low %v287_v34, %v291_v35 }
 0x173   :  { %4009 = vmatprep.subr.bf16.mxu0 %v4592_v50  ;;  %4214 = vmatprep.subr.bf16.mxu1 %v4594_v51  ;;  %v246_v50 = vld [vmem:[%s6972_s1 + $0x710] sm:$0xff]  ;;  %v299_v43 = vld [vmem:[%s6972_s1 + $0x8b8] sm:$0xff] }
 0x174   :  { %v250_v51 = vld [vmem:[%s6972_s1 + $0x730] sm:$0xff] }
 0x175   :  { %v4655_v0 = vcombine.low %v246_v50, %v250_v51 }
 0x176   :  { %4010 = vmatpush1.bf16.msra.mxu0 %v4591_v59  ;;  %4215 = vmatpush1.bf16.msra.mxu1 %v4593_v60  ;;  %v4656_v59 = vcombine.high %v246_v50, %v250_v51  ;;  %v4658_v60 = vcombine.high %v247_v52, %v251_v54  ;;  %v307_v50 = vld [vmem:[%s6972_s1 + $0x8f8] sm:$0xff]  ;;  %v4705_v52 = vcombine.low %v295_v42, %v299_v43 }
 0x177   :  { %4011 = vmatprep.subr.bf16.mxu0 %v4600_v61  ;;  %4216 = vmatprep.subr.bf16.mxu1 %v4602_v62  ;;  %v254_v61 = vld [vmem:[%s6972_s1 + $0x750] sm:$0xff] }
 0x178   :  { %v258_v62 = vld [vmem:[%s6972_s1 + $0x770] sm:$0xff] }
 0x179   :  { %v4663_v9 = vcombine.low %v254_v61, %v258_v62 }
 0x17a   :  { %4012 = vmatpush1.bf16.msra.mxu0 %v4599_v2  ;;  %4217 = vmatpush1.bf16.msra.mxu1 %v4601_v3  ;;  %v4664_v2 = vcombine.high %v254_v61, %v258_v62  ;;  %v4666_v3 = vcombine.high %v255_v39, %v259_v63 }
 0x17b   :  { %4013 = vmatprep.subr.bf16.mxu0 %v4608_v4  ;;  %4218 = vmatprep.subr.bf16.mxu1 %v4610_v5  ;;  %v262_v4 = vld [vmem:[%s6972_s1 + $0x790] sm:$0xff] }
 0x17c   :  { %v266_v5 = vld [vmem:[%s6972_s1 + $0x7b0] sm:$0xff] }
 0x17d   :  { %v4671_v18 = vcombine.low %v262_v4, %v266_v5 }
 0x17e   :  { %4014 = vmatpush1.bf16.msra.mxu0 %v4607_v11  ;;  %4219 = vmatpush1.bf16.msra.mxu1 %v4609_v13  ;;  %v4672_v11 = vcombine.high %v262_v4, %v266_v5  ;;  %v4674_v13 = vcombine.high %v263_v6, %v267_v7 }
 0x17f   :  { %4015 = vmatprep.subr.bf16.mxu0 %v4616_v14  ;;  %4220 = vmatprep.subr.bf16.mxu1 %v4618_v16  ;;  %v270_v14 = vld [vmem:[%s6972_s1 + $0x7d0] sm:$0xff] }
 0x180   :  { %v274_v16 = vld [vmem:[%s6972_s1 + $0x7f0] sm:$0xff] }
 0x181   :  { %v4679_v28 = vcombine.low %v270_v14, %v274_v16 }
 0x182   :  { %4016 = vmatpush1.bf16.msra.mxu0 %v4615_v20  ;;  %4221 = vmatpush1.bf16.msra.mxu1 %v4617_v23  ;;  %v4680_v20 = vcombine.high %v270_v14, %v274_v16  ;;  %v4682_v23 = vcombine.high %v271_v17, %v275_v53 }
 0x183   :  { %4017 = vmatprep.subr.bf16.mxu0 %v4624_v24  ;;  %4222 = vmatprep.subr.bf16.mxu1 %v4626_v26  ;;  %v278_v24 = vld [vmem:[%s6972_s1 + $0x810] sm:$0xff] }
 0x184   :  { %v282_v26 = vld [vmem:[%s6972_s1 + $0x830] sm:$0xff] }
 0x185   :  { %v4687_v37 = vcombine.low %v278_v24, %v282_v26 }
 0x186   :  { %4018 = vmatpush1.bf16.msra.mxu0 %v4623_v57  ;;  %4223 = vmatpush1.bf16.msra.mxu1 %v4625_v30  ;;  %v4688_v57 = vcombine.high %v278_v24, %v282_v26  ;;  %v4690_v30 = vcombine.high %v279_v27, %v283_v15 }
 0x187   :  { %4019 = vmatprep.subr.bf16.mxu0 %v4632_v32  ;;  %4224 = vmatprep.subr.bf16.mxu1 %v4634_v33  ;;  %v286_v32 = vld [vmem:[%s6972_s1 + $0x850] sm:$0xff] }
 0x188   :  { %v290_v33 = vld [vmem:[%s6972_s1 + $0x870] sm:$0xff] }
 0x189   :  { %v4695_v44 = vcombine.low %v286_v32, %v290_v33 }
 0x18a   :  { %4020 = vmatpush1.bf16.msra.mxu0 %v4631_v12  ;;  %4225 = vmatpush1.bf16.msra.mxu1 %v4633_v40  ;;  %v4696_v12 = vcombine.high %v286_v32, %v290_v33  ;;  %v4698_v40 = vcombine.high %v287_v34, %v291_v35 }
 0x18b   :  { %4021 = vmatprep.subr.bf16.mxu0 %v4640_v41  ;;  %4226 = vmatprep.subr.bf16.mxu1 %v4642_v25  ;;  %v294_v41 = vld [vmem:[%s6972_s1 + $0x890] sm:$0xff] }
 0x18c   :  { %v298_v25 = vld [vmem:[%s6972_s1 + $0x8b0] sm:$0xff] }
 0x18d   :  { %v4703_v51 = vcombine.low %v294_v41, %v298_v25 }
 0x18e   :  { %4022 = vmatpush1.bf16.msra.mxu0 %v4639_v21  ;;  %4227 = vmatpush1.bf16.msra.mxu1 %v4641_v47  ;;  %v4704_v21 = vcombine.high %v294_v41, %v298_v25  ;;  %v4706_v47 = vcombine.high %v295_v42, %v299_v43 }
 0x18f   :  { %4023 = vmatprep.subr.bf16.mxu0 %v4648_v48  ;;  %4228 = vmatprep.subr.bf16.mxu1 %v4650_v49  ;;  %v302_v48 = vld [vmem:[%s6972_s1 + $0x8d0] sm:$0xff] }
 0x190   :  { %v306_v49 = vld [vmem:[%s6972_s1 + $0x8f0] sm:$0xff] }
 0x191   :  { %v4712_v54 = vcombine.high %v302_v48, %v306_v49  ;;  %v4711_v61 = vcombine.low %v302_v48, %v306_v49 }
 0x192   :  { %4024 = vmatpush1.bf16.msra.mxu0 %v4647_v56  ;;  %4229 = vmatpush1.bf16.msra.mxu1 %v4649_v58  ;;  %v310_v58 = vld [vmem:[%s6972_s1 + $0x910] sm:$0xff] }
 0x193   :  { %4025 = vmatprep.subr.bf16.mxu0 %v4656_v59  ;;  %4230 = vmatprep.subr.bf16.mxu1 %v4658_v60  ;;  %v314_v59 = vld [vmem:[%s6972_s1 + $0x930] sm:$0xff]  ;;  %v315_v60 = vld [vmem:[%s6972_s1 + $0x938] sm:$0xff] }
 0x194   :  { %v4720_v39 = vcombine.high %v310_v58, %v314_v59  ;;  %v4719_v4 = vcombine.low %v310_v58, %v314_v59 }
 0x196   :  { %4026 = vmatpush1.bf16.msra.mxu0 %v4655_v0  ;;  %4231 = vmatpush1.bf16.msra.mxu1 %v4657_v1  ;;  %v318_v0 = vld [vmem:[%s6972_s1 + $0x950] sm:$0xff] }
 0x197   :  { %4027 = vmatprep.subr.bf16.mxu0 %v4664_v2  ;;  %4232 = vmatprep.subr.bf16.mxu1 %v4666_v3  ;;  %v322_v1 = vld [vmem:[%s6972_s1 + $0x970] sm:$0xff]  ;;  %v319_v2 = vld [vmem:[%s6972_s1 + $0x958] sm:$0xff] }
 0x198   :  { %v323_v3 = vld [vmem:[%s6972_s1 + $0x978] sm:$0xff]  ;;  %v4728_v6 = vcombine.high %v318_v0, %v322_v1  ;;  %v4727_v14 = vcombine.low %v318_v0, %v322_v1 }
 0x199   :  { %v4730_v7 = vcombine.high %v319_v2, %v323_v3  ;;  %v4729_v16 = vcombine.low %v319_v2, %v323_v3 }
 0x19a   :  { %4028 = vmatpush1.bf16.msra.mxu0 %v4663_v9  ;;  %4233 = vmatpush1.bf16.msra.mxu1 %v4665_v10  ;;  %v326_v9 = vld [vmem:[%s6972_s1 + $0x990] sm:$0xff] }
 0x19b   :  { %4029 = vmatprep.subr.bf16.mxu0 %v4672_v11  ;;  %4234 = vmatprep.subr.bf16.mxu1 %v4674_v13  ;;  %v330_v10 = vld [vmem:[%s6972_s1 + $0x9b0] sm:$0xff]  ;;  %v327_v11 = vld [vmem:[%s6972_s1 + $0x998] sm:$0xff] }
 0x19c   :  { %v331_v13 = vld [vmem:[%s6972_s1 + $0x9b8] sm:$0xff]  ;;  %v4736_v17 = vcombine.high %v326_v9, %v330_v10  ;;  %v4735_v24 = vcombine.low %v326_v9, %v330_v10 }
 0x19d   :  { %v4738_v53 = vcombine.high %v327_v11, %v331_v13  ;;  %v4737_v26 = vcombine.low %v327_v11, %v331_v13 }
 0x19e   :  { %4030 = vmatpush1.bf16.msra.mxu0 %v4671_v18  ;;  %4235 = vmatpush1.bf16.msra.mxu1 %v4673_v19  ;;  %v334_v18 = vld [vmem:[%s6972_s1 + $0x9d0] sm:$0xff] }
 0x19f   :  { %4031 = vmatprep.subr.bf16.mxu0 %v4680_v20  ;;  %4236 = vmatprep.subr.bf16.mxu1 %v4682_v23  ;;  %v338_v19 = vld [vmem:[%s6972_s1 + $0x9f0] sm:$0xff]  ;;  %v335_v20 = vld [vmem:[%s6972_s1 + $0x9d8] sm:$0xff] }
 0x1a0   :  { %v339_v23 = vld [vmem:[%s6972_s1 + $0x9f8] sm:$0xff]  ;;  %v4744_v27 = vcombine.high %v334_v18, %v338_v19  ;;  %v4743_v32 = vcombine.low %v334_v18, %v338_v19 }
 0x1a1   :  { %v4746_v15 = vcombine.high %v335_v20, %v339_v23  ;;  %v4745_v33 = vcombine.low %v335_v20, %v339_v23 }
 0x1a2   :  { %4032 = vmatpush1.bf16.msra.mxu0 %v4679_v28  ;;  %4237 = vmatpush1.bf16.msra.mxu1 %v4681_v29  ;;  %v342_v28 = vld [vmem:[%s6972_s1 + $0xa10] sm:$0xff] }
 0x1a3   :  { %4042 = vmatprep.subr.bf16.mxu0 %v4688_v57  ;;  %4247 = vmatprep.subr.bf16.mxu1 %v4690_v30  ;;  %v346_v29 = vld [vmem:[%s6972_s1 + $0xa30] sm:$0xff]  ;;  %v343_v57 = vld [vmem:[%s6972_s1 + $0xa18] sm:$0xff] }
 0x1a4   :  { %v347_v30 = vld [vmem:[%s6972_s1 + $0xa38] sm:$0xff]  ;;  %v4752_v34 = vcombine.high %v342_v28, %v346_v29  ;;  %v4751_v41 = vcombine.low %v342_v28, %v346_v29 }
 0x1a5   :  { %4034 = vmatmul.mubr.bf16.vlgmr.msra.gmra.mrb[4].mxu0 %v5547_v22  ;;  %4239 = vmatmul.mubr.bf16.vlgmr.msra.gmra.mrb[4].mxu1 %v5547_v22  ;;  %v303_v22 = vld [vmem:[%s6972_s1 + $0x8d8] sm:$0xff]  ;;  %v4754_v35 = vcombine.high %v343_v57, %v347_v30  ;;  %v4753_v25 = vcombine.low %v343_v57, %v347_v30 }
 0x1a6   :  { %4043 = vmatpush1.bf16.msra.mxu0 %v4687_v37  ;;  %4248 = vmatpush1.bf16.msra.mxu1 %v4689_v38  ;;  %v4714_v56 = vcombine.high %v303_v22, %v307_v50  ;;  %v4713_v62 = vcombine.low %v303_v22, %v307_v50  ;;  %v350_v37 = vld [vmem:[%s6972_s1 + $0xa50] sm:$0xff] }
 0x1a7   :  { %4044 = vmatprep.subr.bf16.mxu0 %v4696_v12  ;;  %4249 = vmatprep.subr.bf16.mxu1 %v4698_v40  ;;  %v354_v38 = vld [vmem:[%s6972_s1 + $0xa70] sm:$0xff]  ;;  %v351_v12 = vld [vmem:[%s6972_s1 + $0xa58] sm:$0xff] }
 0x1a8   :  { %4074 = vmatprep.mubr.bf16.mxu0 %v5568_v31  ;;  %4279 = vmatprep.mubr.bf16.mxu1 %v5568_v31  ;;  %v311_v31 = vld [vmem:[%s6972_s1 + $0x918] sm:$0xff]  ;;  %v4760_v42 = vcombine.high %v350_v37, %v354_v38  ;;  %v4759_v48 = vcombine.low %v350_v37, %v354_v38 }
 0x1a9   :  { %v4722_v63 = vcombine.high %v311_v31, %v315_v60  ;;  %v4721_v5 = vcombine.low %v311_v31, %v315_v60  ;;  %v355_v40 = vld [vmem:[%s6972_s1 + $0xa78] sm:$0xff] }
 0x1aa   :  { %4045 = vmatpush1.bf16.msra.mxu0 %v4695_v44  ;;  %4250 = vmatpush1.bf16.msra.mxu1 %v4697_v46  ;;  %v4762_v43 = vcombine.high %v351_v12, %v355_v40  ;;  %v358_v44 = vld [vmem:[%s6972_s1 + $0xa90] sm:$0xff]  ;;  %v4761_v49 = vcombine.low %v351_v12, %v355_v40 }
 0x1ab   :  { %4046 = vmatprep.subr.bf16.mxu0 %v4704_v21  ;;  %4251 = vmatprep.subr.bf16.mxu1 %v4706_v47  ;;  %v362_v46 = vld [vmem:[%s6972_s1 + $0xab0] sm:$0xff]  ;;  %v359_v21 = vld [vmem:[%s6972_s1 + $0xa98] sm:$0xff] }
 0x1ac   :  { %v363_v47 = vld [vmem:[%s6972_s1 + $0xab8] sm:$0xff]  ;;  %v4768_v22 = vcombine.high %v358_v44, %v362_v46  ;;  %v4767_v58 = vcombine.low %v358_v44, %v362_v46 }
 0x1ad   :  { %v4770_v50 = vcombine.high %v359_v21, %v363_v47  ;;  %v4769_v59 = vcombine.low %v359_v21, %v363_v47 }
 0x1ae   :  { %4047 = vmatpush1.bf16.msra.mxu0 %v4703_v51  ;;  %4252 = vmatpush1.bf16.msra.mxu1 %v4705_v52  ;;  %v366_v51 = vld [vmem:[%s6972_s1 + $0xad0] sm:$0xff] }
 0x1af   :  { %4048 = vmatprep.subr.bf16.mxu0 %v4712_v54  ;;  %4253 = vmatprep.subr.bf16.mxu1 %v4714_v56  ;;  %v370_v52 = vld [vmem:[%s6972_s1 + $0xaf0] sm:$0xff]  ;;  %v367_v54 = vld [vmem:[%s6972_s1 + $0xad8] sm:$0xff] }
 0x1b0   :  { %v371_v56 = vld [vmem:[%s6972_s1 + $0xaf8] sm:$0xff]  ;;  %v4776_v31 = vcombine.high %v366_v51, %v370_v52  ;;  %v4775_v0 = vcombine.low %v366_v51, %v370_v52 }
 0x1b1   :  { %v4778_v60 = vcombine.high %v367_v54, %v371_v56  ;;  %v4777_v1 = vcombine.low %v367_v54, %v371_v56 }
 0x1b2   :  { %4049 = vmatpush1.bf16.msra.mxu0 %v4711_v61  ;;  %4254 = vmatpush1.bf16.msra.mxu1 %v4713_v62  ;;  %v374_v61 = vld [vmem:[%s6972_s1 + $0xb10] sm:$0xff] }
 0x1b3   :  { %4050 = vmatprep.subr.bf16.mxu0 %v4720_v39  ;;  %4255 = vmatprep.subr.bf16.mxu1 %v4722_v63  ;;  %v378_v62 = vld [vmem:[%s6972_s1 + $0xb30] sm:$0xff]  ;;  %v375_v39 = vld [vmem:[%s6972_s1 + $0xb18] sm:$0xff] }
 0x1b4   :  { %v379_v63 = vld [vmem:[%s6972_s1 + $0xb38] sm:$0xff]  ;;  %v4784_v2 = vcombine.high %v374_v61, %v378_v62  ;;  %v4783_v9 = vcombine.low %v374_v61, %v378_v62 }
 0x1b5   :  { %v4786_v3 = vcombine.high %v375_v39, %v379_v63  ;;  %v4785_v10 = vcombine.low %v375_v39, %v379_v63 }
 0x1b6   :  { %4051 = vmatpush1.bf16.msra.mxu0 %v4719_v4  ;;  %4256 = vmatpush1.bf16.msra.mxu1 %v4721_v5  ;;  %v382_v4 = vld [vmem:[%s6972_s1 + $0xb50] sm:$0xff] }
 0x1b7   :  { %4052 = vmatprep.subr.bf16.mxu0 %v4728_v6  ;;  %4257 = vmatprep.subr.bf16.mxu1 %v4730_v7  ;;  %v386_v5 = vld [vmem:[%s6972_s1 + $0xb70] sm:$0xff]  ;;  %v383_v6 = vld [vmem:[%s6972_s1 + $0xb58] sm:$0xff] }
 0x1b8   :  { %v387_v7 = vld [vmem:[%s6972_s1 + $0xb78] sm:$0xff]  ;;  %v4792_v11 = vcombine.high %v382_v4, %v386_v5  ;;  %v4791_v18 = vcombine.low %v382_v4, %v386_v5 }
 0x1b9   :  { %v4794_v13 = vcombine.high %v383_v6, %v387_v7  ;;  %v4793_v19 = vcombine.low %v383_v6, %v387_v7 }
 0x1ba   :  { %4053 = vmatpush1.bf16.msra.mxu0 %v4727_v14  ;;  %4258 = vmatpush1.bf16.msra.mxu1 %v4729_v16  ;;  %v390_v14 = vld [vmem:[%s6972_s1 + $0xb90] sm:$0xff] }
 0x1bb   :  { %4054 = vmatprep.subr.bf16.mxu0 %v4736_v17  ;;  %4259 = vmatprep.subr.bf16.mxu1 %v4738_v53  ;;  %v394_v16 = vld [vmem:[%s6972_s1 + $0xbb0] sm:$0xff]  ;;  %v391_v17 = vld [vmem:[%s6972_s1 + $0xb98] sm:$0xff] }
 0x1bc   :  { %v395_v53 = vld [vmem:[%s6972_s1 + $0xbb8] sm:$0xff]  ;;  %v4800_v20 = vcombine.high %v390_v14, %v394_v16  ;;  %v4799_v28 = vcombine.low %v390_v14, %v394_v16 }
 0x1bd   :  { %v4802_v23 = vcombine.high %v391_v17, %v395_v53  ;;  %v4801_v29 = vcombine.low %v391_v17, %v395_v53  ;;  %v451_v14 = vld [vmem:[%s6972_s1 + $0xd78] sm:$0xff]  ;;  %v6720_v17 = vld [vmem:[%s6974_s2] sm:$0xff] }
 0x1be   :  { %4055 = vmatpush1.bf16.msra.mxu0 %v4735_v24  ;;  %4260 = vmatpush1.bf16.msra.mxu1 %v4737_v26  ;;  %v398_v24 = vld [vmem:[%s6972_s1 + $0xbd0] sm:$0xff] }
 0x1bf   :  { %4056 = vmatprep.subr.bf16.mxu0 %v4744_v27  ;;  %4261 = vmatprep.subr.bf16.mxu1 %v4746_v15  ;;  %v402_v26 = vld [vmem:[%s6972_s1 + $0xbf0] sm:$0xff]  ;;  %v399_v27 = vld [vmem:[%s6972_s1 + $0xbd8] sm:$0xff] }
 0x1c0   :  { %v403_v15 = vld [vmem:[%s6972_s1 + $0xbf8] sm:$0xff]  ;;  %v4808_v57 = vcombine.high %v398_v24, %v402_v26  ;;  %v4807_v37 = vcombine.low %v398_v24, %v402_v26  ;;  %v454_v26 = vld [vmem:[%s6972_s1 + $0xd90] sm:$0xff] }
 0x1c1   :  { %v4810_v30 = vcombine.high %v399_v27, %v403_v15  ;;  %v4809_v38 = vcombine.low %v399_v27, %v403_v15  ;;  %v458_v27 = vld [vmem:[%s6972_s1 + $0xdb0] sm:$0xff] }
 0x1c2   :  { %4057 = vmatpush1.bf16.msra.mxu0 %v4743_v32  ;;  %4262 = vmatpush1.bf16.msra.mxu1 %v4745_v33  ;;  %v406_v32 = vld [vmem:[%s6972_s1 + $0xc10] sm:$0xff] }
 0x1c3   :  { %4058 = vmatprep.subr.bf16.mxu0 %v4752_v34  ;;  %4263 = vmatprep.subr.bf16.mxu1 %v4754_v35  ;;  %v410_v33 = vld [vmem:[%s6972_s1 + $0xc30] sm:$0xff]  ;;  %v407_v34 = vld [vmem:[%s6972_s1 + $0xc18] sm:$0xff] }
 0x1c4   :  { %v411_v35 = vld [vmem:[%s6972_s1 + $0xc38] sm:$0xff]  ;;  %v4816_v12 = vcombine.high %v406_v32, %v410_v33  ;;  %v4815_v44 = vcombine.low %v406_v32, %v410_v33 }
 0x1c5   :  { %v4818_v40 = vcombine.high %v407_v34, %v411_v35  ;;  %v4817_v46 = vcombine.low %v407_v34, %v411_v35  ;;  %v4864_v35 = vcombine.high %v454_v26, %v458_v27 }
 0x1c6   :  { %4059 = vmatpush1.bf16.msra.mxu0 %v4751_v41  ;;  %4264 = vmatpush1.bf16.msra.mxu1 %v4753_v25  ;;  %v414_v41 = vld [vmem:[%s6972_s1 + $0xc50] sm:$0xff] }
 0x1c7   :  { %4060 = vmatprep.subr.bf16.mxu0 %v4760_v42  ;;  %4265 = vmatprep.subr.bf16.mxu1 %v4762_v43  ;;  %v418_v25 = vld [vmem:[%s6972_s1 + $0xc70] sm:$0xff]  ;;  %v415_v42 = vld [vmem:[%s6972_s1 + $0xc58] sm:$0xff] }
 0x1c8   :  { %v419_v43 = vld [vmem:[%s6972_s1 + $0xc78] sm:$0xff]  ;;  %v4824_v21 = vcombine.high %v414_v41, %v418_v25  ;;  %v4823_v51 = vcombine.low %v414_v41, %v418_v25 }
 0x1c9   :  { %v4826_v47 = vcombine.high %v415_v42, %v419_v43  ;;  %v4825_v52 = vcombine.low %v415_v42, %v419_v43  ;;  %v463_v43 = vld [vmem:[%s6972_s1 + $0xdd8] sm:$0xff] }
 0x1ca   :  { %4061 = vmatpush1.bf16.msra.mxu0 %v4759_v48  ;;  %4266 = vmatpush1.bf16.msra.mxu1 %v4761_v49  ;;  %v422_v48 = vld [vmem:[%s6972_s1 + $0xc90] sm:$0xff] }
 0x1cb   :  { %4062 = vmatprep.subr.bf16.mxu0 %v4768_v22  ;;  %4267 = vmatprep.subr.bf16.mxu1 %v4770_v50  ;;  %v426_v49 = vld [vmem:[%s6972_s1 + $0xcb0] sm:$0xff]  ;;  %v423_v22 = vld [vmem:[%s6972_s1 + $0xc98] sm:$0xff] }
 0x1cc   :  { %v427_v50 = vld [vmem:[%s6972_s1 + $0xcb8] sm:$0xff]  ;;  %v4832_v54 = vcombine.high %v422_v48, %v426_v49  ;;  %v4831_v61 = vcombine.low %v422_v48, %v426_v49  ;;  %v4863_v49 = vcombine.low %v454_v26, %v458_v27 }
 0x1cd   :  { %v4834_v56 = vcombine.high %v423_v22, %v427_v50  ;;  %v4833_v62 = vcombine.low %v423_v22, %v427_v50 }
 0x1ce   :  { %4063 = vmatpush1.bf16.msra.mxu0 %v4767_v58  ;;  %4268 = vmatpush1.bf16.msra.mxu1 %v4769_v59  ;;  %v430_v58 = vld [vmem:[%s6972_s1 + $0xcd0] sm:$0xff] }
 0x1cf   :  { %4064 = vmatprep.subr.bf16.mxu0 %v4776_v31  ;;  %4269 = vmatprep.subr.bf16.mxu1 %v4778_v60  ;;  %v434_v59 = vld [vmem:[%s6972_s1 + $0xcf0] sm:$0xff]  ;;  %v435_v31 = vld [vmem:[%s6972_s1 + $0xcf8] sm:$0xff]  ;;  %v598_v60 = vlaneseq }
 0x1d0   :  { %v4840_v39 = vcombine.high %v430_v58, %v434_v59  ;;  %v4839_v4 = vcombine.low %v430_v58, %v434_v59 }
 0x1d2   :  { %4065 = vmatpush1.bf16.msra.mxu0 %v4775_v0  ;;  %4270 = vmatpush1.bf16.msra.mxu1 %v4777_v1  ;;  %v438_v0 = vld [vmem:[%s6972_s1 + $0xd10] sm:$0xff] }
 0x1d3   :  { %4066 = vmatprep.subr.bf16.mxu0 %v4784_v2  ;;  %4271 = vmatprep.subr.bf16.mxu1 %v4786_v3  ;;  %v442_v1 = vld [vmem:[%s6972_s1 + $0xd30] sm:$0xff]  ;;  %v443_v2 = vld [vmem:[%s6972_s1 + $0xd38] sm:$0xff]  ;;  %v6702_v3 = vshrl.u32 %v598_v60, 7 }
 0x1d4   :  { %v4848_v6 = vcombine.high %v438_v0, %v442_v1  ;;  %v4847_v16 = vcombine.low %v438_v0, %v442_v1  ;;  %v470_v60 = vld [vmem:[%s6972_s1 + $0xe10] sm:$0xff] }
 0x1d5   :  { %v608_v53 = vsub.s32 2, %v6702_v3 }
 0x1d6   :  { %4067 = vmatpush1.bf16.msra.mxu0 %v4783_v9  ;;  %4272 = vmatpush1.bf16.msra.mxu1 %v4785_v10  ;;  %v446_v9 = vld [vmem:[%s6972_s1 + $0xd50] sm:$0xff] }
 0x1d7   :  { %4068 = vmatprep.subr.bf16.mxu0 %v4792_v11  ;;  %4273 = vmatprep.subr.bf16.mxu1 %v4794_v13  ;;  %v450_v10 = vld [vmem:[%s6972_s1 + $0xd70] sm:$0xff]  ;;  %v600_v11 = vsub.s32 0, %v6702_v3  ;;  %v447_v13 = vld [vmem:[%s6972_s1 + $0xd58] sm:$0xff] }
 0x1d8   :  { %v4858_v24 = vcombine.high %v447_v13, %v451_v14  ;;  %v4855_v32 = vcombine.low %v446_v9, %v450_v10  ;;  %v4857_v34 = vcombine.low %v447_v13, %v451_v14 }
 0x1d9   :  { %v601_v15 = vrot.slane %v6720_v17, %v600_v11 }
 0x1da   :  { %4069 = vmatpush1.bf16.msra.mxu0 %v4791_v18  ;;  %4274 = vmatpush1.bf16.msra.mxu1 %v4793_v19  ;;  %v604_v18 = vsub.s32 1, %v6702_v3 }
 0x1db   :  { %4070 = vmatprep.subr.bf16.mxu0 %v4800_v20  ;;  %4275 = vmatprep.subr.bf16.mxu1 %v4802_v23  ;;  %v612_v20 = vsub.s32 3, %v6702_v3  ;;  %v4856_v23 = vcombine.high %v446_v9, %v450_v10  ;;  %v479_v9 = vld [vmem:[%s6972_s1 + $0xe58] sm:$0xff] }
 0x1dc   :  { %v483_v10 = vld [vmem:[%s6972_s1 + $0xe78] sm:$0xff] }
 0x1dd   :  { %v613_v33 = vrot.slane %v6720_v17, %v612_v20  ;;  %v491_v20 = vld [vmem:[%s6972_s1 + $0xeb8] sm:$0xff] }
 0x1de   :  { %4071 = vmatpush1.bf16.msra.mxu0 %v4799_v28  ;;  %4276 = vmatpush1.bf16.msra.mxu1 %v4801_v29  ;;  %v455_v28 = vld [vmem:[%s6972_s1 + $0xd98] sm:$0xff] }
 0x1df   :  { %4072 = vmatprep.subr.bf16.mxu0 %v4808_v57  ;;  %4277 = vmatprep.subr.bf16.mxu1 %v4810_v30  ;;  %v459_v29 = vld [vmem:[%s6972_s1 + $0xdb8] sm:$0xff]  ;;  %v609_v57 = vrot.slane %v6720_v17, %v608_v53  ;;  %v605_v30 = vrot.slane %v6720_v17, %v604_v18  ;;  %v486_v53 = vld [vmem:[%s6972_s1 + $0xe90] sm:$0xff] }
 0x1e0   :  { %v490_v18 = vld [vmem:[%s6972_s1 + $0xeb0] sm:$0xff] }
 0x1e1   :  { %v4896_v26 = vcombine.high %v486_v53, %v490_v18 }
 0x1e2   :  { %4073 = vmatpush1.bf16.msra.mxu0 %v4807_v37  ;;  %4278 = vmatpush1.bf16.msra.mxu1 %v4809_v38  ;;  %v4866_v38 = vcombine.high %v455_v28, %v459_v29 }
 0x1e3   :  { %4083 = vmatprep.subr.bf16.mxu0 %v4816_v12  ;;  %4288 = vmatprep.subr.bf16.mxu1 %v4818_v40  ;;  %v462_v12 = vld [vmem:[%s6972_s1 + $0xdd0] sm:$0xff] }
 0x1e4   :  { %v466_v40 = vld [vmem:[%s6972_s1 + $0xdf0] sm:$0xff] }
 0x1e5   :  { %4075 = vmatmul.mubr.bf16.vlgmr.msra.gmra.mrb[4].mxu0 %v5756_v36  ;;  %4280 = vmatmul.mubr.bf16.vlgmr.msra.gmra.mrb[4].mxu1 %v5756_v36  ;;  %v431_v36 = vld [vmem:[%s6972_s1 + $0xcd8] sm:$0xff]  ;;  %v4871_v1 = vcombine.low %v462_v12, %v466_v40 }
 0x1e6   :  { %4084 = vmatpush1.bf16.msra.mxu0 %v4815_v44  ;;  %4289 = vmatpush1.bf16.msra.mxu1 %v4817_v46  ;;  %v4842_v63 = vcombine.high %v431_v36, %v435_v31  ;;  %v4841_v5 = vcombine.low %v431_v36, %v435_v31  ;;  %v467_v44 = vld [vmem:[%s6972_s1 + $0xdf8] sm:$0xff] }
 0x1e7   :  { %4085 = vmatprep.subr.bf16.mxu0 %v4824_v21  ;;  %4290 = vmatprep.subr.bf16.mxu1 %v4826_v47  ;;  %v4874_v31 = vcombine.high %v463_v43, %v467_v44 }
 0x1e8   :  { %4115 = vmatprep.mubr.bf16.mxu0 %v5777_v45  ;;  %4320 = vmatprep.mubr.bf16.mxu1 %v5777_v45  ;;  %v439_v45 = vld [vmem:[%s6972_s1 + $0xd18] sm:$0xff] }
 0x1e9   :  { %v4850_v7 = vcombine.high %v439_v45, %v443_v2  ;;  %v4849_v19 = vcombine.low %v439_v45, %v443_v2  ;;  %v4873_v2 = vcombine.low %v463_v43, %v467_v44  ;;  %v510_v43 = vld [vmem:[%s6972_s1 + $0xf50] sm:$0xff] }
 0x1ea   :  { %4086 = vmatpush1.bf16.msra.mxu0 %v4823_v51  ;;  %4291 = vmatpush1.bf16.msra.mxu1 %v4825_v52  ;;  %v514_v44 = vld [vmem:[%s6972_s1 + $0xf70] sm:$0xff] }
 0x1eb   :  { %4087 = vmatprep.subr.bf16.mxu0 %v4832_v54  ;;  %4292 = vmatprep.subr.bf16.mxu1 %v4834_v56  ;;  %v4865_v54 = vcombine.low %v455_v28, %v459_v29  ;;  %v4872_v56 = vcombine.high %v462_v12, %v466_v40  ;;  %v498_v28 = vld [vmem:[%s6972_s1 + $0xef0] sm:$0xff]  ;;  %v495_v29 = vld [vmem:[%s6972_s1 + $0xed8] sm:$0xff] }
 0x1ec   :  { %v507_v12 = vld [vmem:[%s6972_s1 + $0xf38] sm:$0xff] }
 0x1ee   :  { %4088 = vmatpush1.bf16.msra.mxu0 %v4831_v61  ;;  %4293 = vmatpush1.bf16.msra.mxu1 %v4833_v62  ;;  %v474_v61 = vld [vmem:[%s6972_s1 + $0xe30] sm:$0xff] }
 0x1ef   :  { %4089 = vmatprep.subr.bf16.mxu0 %v4840_v39  ;;  %4294 = vmatprep.subr.bf16.mxu1 %v4842_v63  ;;  %v471_v39 = vld [vmem:[%s6972_s1 + $0xe18] sm:$0xff]  ;;  %v4879_v11 = vcombine.low %v470_v60, %v474_v61 }
 0x1f0   :  { %v475_v63 = vld [vmem:[%s6972_s1 + $0xe38] sm:$0xff] }
 0x1f1   :  { %v4881_v13 = vcombine.low %v471_v39, %v475_v63 }
 0x1f2   :  { %4090 = vmatpush1.bf16.msra.mxu0 %v4839_v4  ;;  %4295 = vmatpush1.bf16.msra.mxu1 %v4841_v5  ;;  %v4880_v4 = vcombine.high %v470_v60, %v474_v61  ;;  %v4882_v5 = vcombine.high %v471_v39, %v475_v63  ;;  %v530_v60 = vld [vmem:[%s6972_s1 + $0xff0] sm:$0xff]  ;;  %v527_v61 = vld [vmem:[%s6972_s1 + $0xfd8] sm:$0xff] }
 0x1f3   :  { %4091 = vmatprep.subr.bf16.mxu0 %v4848_v6  ;;  %4296 = vmatprep.subr.bf16.mxu1 %v4850_v7  ;;  %v478_v6 = vld [vmem:[%s6972_s1 + $0xe50] sm:$0xff] }
 0x1f4   :  { %v482_v7 = vld [vmem:[%s6972_s1 + $0xe70] sm:$0xff] }
 0x1f5   :  { %v4888_v14 = vcombine.high %v478_v6, %v482_v7 }
 0x1f6   :  { %4092 = vmatpush1.bf16.msra.mxu0 %v4847_v16  ;;  %4297 = vmatpush1.bf16.msra.mxu1 %v4849_v19  ;;  %v4890_v16 = vcombine.high %v479_v9, %v483_v10  ;;  %v487_v19 = vld [vmem:[%s6972_s1 + $0xe98] sm:$0xff] }
 0x1f7   :  { %4093 = vmatprep.subr.bf16.mxu0 %v4856_v23  ;;  %4298 = vmatprep.subr.bf16.mxu1 %v4858_v24  ;;  %v4887_v23 = vcombine.low %v478_v6, %v482_v7  ;;  %v4889_v24 = vcombine.low %v479_v9, %v483_v10  ;;  %v4898_v27 = vcombine.high %v487_v19, %v491_v20 }
 0x1f8   :  { %v3748_v37 = vpop.f32.mrb[0].mxu0  ;;  %v3953_v25 = vpop.f32.mrb[0].mxu1 }
 0x1f9   :  { %v5011_v41 = vadd.f32 %v3748_v37, %v601_v15  ;;  %v3750_v42 = vpop.f32.mrb[1].mxu0  ;;  %v5013_v46 = vadd.f32 %v3953_v25, %v609_v57  ;;  %v3955_v47 = vpop.f32.mrb[1].mxu1  ;;  %v494_v15 = vld [vmem:[%s6972_s1 + $0xed0] sm:$0xff]  ;;  %v499_v57 = vld [vmem:[%s6972_s1 + $0xef8] sm:$0xff] }
 0x1fa   :  { %v5012_v21 = vadd.f32 %v3750_v42, %v605_v30  ;;  %v3752_v48 = vpop.f32.mrb[2].mxu0  ;;  %4094 = vmatpush1.bf16.msra.mxu0 %v4855_v32  ;;  %v5014_v50 = vadd.f32 %v3955_v47, %v613_v33  ;;  %v3957_v51 = vpop.f32.mrb[2].mxu1  ;;  %4299 = vmatpush1.bf16.msra.mxu1 %v4857_v34  ;;  %v4895_v30 = vcombine.low %v486_v53, %v490_v18  ;;  %v506_v37 = vld [vmem:[%s6972_s1 + $0xf30] sm:$0xff] }
 0x1fb   :  { %v4370_v22 = vmax.f32 %v5011_v41, 0.0  ;;  %v3753_v52 = vpop.f32.mrb[3].mxu0  ;;  %4095 = vmatprep.subr.bf16.mxu0 %v4864_v35  ;;  %v4372_v58 = vmax.f32 %v5013_v46, 0.0  ;;  %v3958_v36 = vpop.f32.mrb[3].mxu1  ;;  %4300 = vmatprep.subr.bf16.mxu1 %v4866_v38  ;;  %v4897_v32 = vcombine.low %v487_v19, %v491_v20  ;;  %v4904_v33 = vcombine.high %v494_v15, %v498_v28  ;;  %v502_v35 = vld [vmem:[%s6972_s1 + $0xf10] sm:$0xff]  ;;  %v503_v38 = vld [vmem:[%s6972_s1 + $0xf18] sm:$0xff] }
 0x1fc   :  { %v4371_v59 = vmax.f32 %v5012_v21, 0.0  ;;  %v4373_v62 = vmax.f32 %v5014_v50, 0.0  ;;  %v4906_v34 = vcombine.high %v495_v29, %v499_v57  ;;  %v4903_v40 = vcombine.low %v494_v15, %v498_v28  ;;  %v511_v46 = vld [vmem:[%s6972_s1 + $0xf58] sm:$0xff]  ;;  %v518_v50 = vld [vmem:[%s6972_s1 + $0xf90] sm:$0xff] }
 0x1fd   :  { %v4905_v41 = vcombine.low %v495_v29, %v499_v57  ;;  %v4912_v25 = vcombine.high %v502_v35, %v506_v37  ;;  %v4914_v42 = vcombine.high %v503_v38, %v507_v12  ;;  %v515_v21 = vld [vmem:[%s6972_s1 + $0xf78] sm:$0xff]  ;;  %v4911_v47 = vcombine.low %v502_v35, %v506_v37  ;;  %v522_v51 = vld [vmem:[%s6972_s1 + $0xfb0] sm:$0xff] }
 0x1fe   :  { %v5007_v0 = vpack.c.bf16 %v4371_v59, %v4370_v22  ;;  %4096 = vmatpush1.bf16.msra.mxu0 %v4863_v49  ;;  %v5008_v45 = vpack.c.bf16 %v4373_v62, %v4372_v58  ;;  %4301 = vmatpush1.bf16.msra.mxu1 %v4865_v54  ;;  %v4913_v48 = vcombine.low %v503_v38, %v507_v12  ;;  %v519_v52 = vld [vmem:[%s6972_s1 + $0xf98] sm:$0xff]  ;;  %v566_v12 = vld [vmem:[%s6972_s1 + $0x1110] sm:$0xff] }
 0x1ff   :  { %4097 = vmatprep.subr.bf16.mxu0 %v4872_v56  ;;  %4302 = vmatprep.subr.bf16.mxu1 %v4874_v31  ;;  %v4920_v49 = vcombine.high %v510_v43, %v514_v44  ;;  %v4922_v22 = vcombine.high %v511_v46, %v515_v21  ;;  %v523_v54 = vld [vmem:[%s6972_s1 + $0xfb8] sm:$0xff]  ;;  %v4919_v56 = vcombine.low %v510_v43, %v514_v44  ;;  %v526_v31 = vld [vmem:[%s6972_s1 + $0xfd0] sm:$0xff] }
 0x200   :  { %4410 = vst [vmem:[%s6975_s3] sm:$0xff] %v5007_v0  ;;  %4411 = vst [vmem:[%s6975_s3 + $0x8] sm:$0xff] %v5008_v45  ;;  %v4921_v58 = vcombine.low %v511_v46, %v515_v21  ;;  %v4928_v59 = vcombine.high %v518_v50, %v522_v51  ;;  %v4930_v36 = vcombine.high %v519_v52, %v523_v54  ;;  %v531_v62 = vld [vmem:[%s6972_s1 + $0xff8] sm:$0xff]  ;;  %v534_v45 = vld [vmem:[%s6972_s1 + $0x1010] sm:$0xff] }
 0x201   :  { %v4927_v39 = vcombine.low %v518_v50, %v522_v51  ;;  %v4929_v63 = vcombine.low %v519_v52, %v523_v54  ;;  %v4936_v0 = vcombine.high %v526_v31, %v530_v60  ;;  %v4935_v6 = vcombine.low %v526_v31, %v530_v60  ;;  %v574_v46 = vld [vmem:[%s6972_s1 + $0x1150] sm:$0xff] }
 0x202   :  { %4098 = vmatpush1.bf16.msra.mxu0 %v4871_v1  ;;  %4303 = vmatpush1.bf16.msra.mxu1 %v4873_v2  ;;  %v4938_v1 = vcombine.high %v527_v61, %v531_v62  ;;  %v538_v2 = vld [vmem:[%s6972_s1 + $0x1030] sm:$0xff]  ;;  %v4937_v7 = vcombine.low %v527_v61, %v531_v62 }
 0x203   :  { %4099 = vmatprep.subr.bf16.mxu0 %v4880_v4  ;;  %4304 = vmatprep.subr.bf16.mxu1 %v4882_v5  ;;  %v535_v4 = vld [vmem:[%s6972_s1 + $0x1018] sm:$0xff]  ;;  %v4944_v9 = vcombine.high %v534_v45, %v538_v2  ;;  %v4943_v53 = vcombine.low %v534_v45, %v538_v2  ;;  %v578_v21 = vld [vmem:[%s6972_s1 + $0x1170] sm:$0xff] }
 0x204   :  { %v539_v5 = vld [vmem:[%s6972_s1 + $0x1038] sm:$0xff]  ;;  %v4984_v50 = vcombine.high %v574_v46, %v578_v21  ;;  %v582_v52 = vld [vmem:[%s6972_s1 + $0x1190] sm:$0xff] }
 0x205   :  { %v4946_v10 = vcombine.high %v535_v4, %v539_v5  ;;  %v4945_v18 = vcombine.low %v535_v4, %v539_v5  ;;  %v586_v54 = vld [vmem:[%s6972_s1 + $0x11b0] sm:$0xff] }
 0x206   :  { %4100 = vmatpush1.bf16.msra.mxu0 %v4879_v11  ;;  %4305 = vmatpush1.bf16.msra.mxu1 %v4881_v13  ;;  %v542_v11 = vld [vmem:[%s6972_s1 + $0x1050] sm:$0xff]  ;;  %v4992_v31 = vcombine.high %v582_v52, %v586_v54 }
 0x207   :  { %4101 = vmatprep.subr.bf16.mxu0 %v4888_v14  ;;  %4306 = vmatprep.subr.bf16.mxu1 %v4890_v16  ;;  %v546_v13 = vld [vmem:[%s6972_s1 + $0x1070] sm:$0xff]  ;;  %v543_v14 = vld [vmem:[%s6972_s1 + $0x1058] sm:$0xff] }
 0x208   :  { %v547_v16 = vld [vmem:[%s6972_s1 + $0x1078] sm:$0xff]  ;;  %v4952_v19 = vcombine.high %v542_v11, %v546_v13  ;;  %v4951_v15 = vcombine.low %v542_v11, %v546_v13  ;;  %v590_v61 = vld [vmem:[%s6972_s1 + $0x11d0] sm:$0xff]  ;;  %v628_v11 = vsub.s32 7, %v6702_v3 }
 0x209   :  { %v4954_v20 = vcombine.high %v543_v14, %v547_v16  ;;  %v4953_v28 = vcombine.low %v543_v14, %v547_v16  ;;  %v594_v62 = vld [vmem:[%s6972_s1 + $0x11f0] sm:$0xff] }
 0x20a   :  { %4102 = vmatpush1.bf16.msra.mxu0 %v4887_v23  ;;  %4307 = vmatpush1.bf16.msra.mxu1 %v4889_v24  ;;  %v550_v23 = vld [vmem:[%s6972_s1 + $0x1090] sm:$0xff]  ;;  %v5000_v45 = vcombine.high %v590_v61, %v594_v62  ;;  %v4999_v4 = vcombine.low %v590_v61, %v594_v62 }
 0x20b   :  { %4103 = vmatprep.subr.bf16.mxu0 %v4896_v26  ;;  %4308 = vmatprep.subr.bf16.mxu1 %v4898_v27  ;;  %v554_v24 = vld [vmem:[%s6972_s1 + $0x10b0] sm:$0xff]  ;;  %v551_v26 = vld [vmem:[%s6972_s1 + $0x1098] sm:$0xff] }
 0x20c   :  { %v555_v27 = vld [vmem:[%s6972_s1 + $0x10b8] sm:$0xff]  ;;  %v4960_v29 = vcombine.high %v550_v23, %v554_v24 }
 0x20d   :  { %v4962_v57 = vcombine.high %v551_v26, %v555_v27  ;;  %v4961_v35 = vcombine.low %v551_v26, %v555_v27 }
 0x20e   :  { %4104 = vmatpush1.bf16.msra.mxu0 %v4895_v30  ;;  %4309 = vmatpush1.bf16.msra.mxu1 %v4897_v32  ;;  %v558_v30 = vld [vmem:[%s6972_s1 + $0x10d0] sm:$0xff] }
 0x20f   :  { %4105 = vmatprep.subr.bf16.mxu0 %v4904_v33  ;;  %4310 = vmatprep.subr.bf16.mxu1 %v4906_v34  ;;  %v562_v32 = vld [vmem:[%s6972_s1 + $0x10f0] sm:$0xff]  ;;  %v563_v33 = vld [vmem:[%s6972_s1 + $0x10f8] sm:$0xff]  ;;  %v4959_v34 = vcombine.low %v550_v23, %v554_v24 }
 0x210   :  { %v4968_v37 = vcombine.high %v558_v30, %v562_v32 }
 0x212   :  { %4106 = vmatpush1.bf16.msra.mxu0 %v4903_v40  ;;  %4311 = vmatpush1.bf16.msra.mxu1 %v4905_v41  ;;  %v570_v40 = vld [vmem:[%s6972_s1 + $0x1130] sm:$0xff]  ;;  %v571_v41 = vld [vmem:[%s6972_s1 + $0x1138] sm:$0xff] }
 0x213   :  { %4107 = vmatprep.subr.bf16.mxu0 %v4912_v25  ;;  %4312 = vmatprep.subr.bf16.mxu1 %v4914_v42  ;;  %v4967_v25 = vcombine.low %v558_v30, %v562_v32  ;;  %v4976_v43 = vcombine.high %v566_v12, %v570_v40 }
 0x216   :  { %4108 = vmatpush1.bf16.msra.mxu0 %v4911_v47  ;;  %4313 = vmatpush1.bf16.msra.mxu1 %v4913_v48  ;;  %v575_v47 = vld [vmem:[%s6972_s1 + $0x1158] sm:$0xff] }
 0x217   :  { %4109 = vmatprep.subr.bf16.mxu0 %v4920_v49  ;;  %4314 = vmatprep.subr.bf16.mxu1 %v4922_v22  ;;  %v579_v48 = vld [vmem:[%s6972_s1 + $0x1178] sm:$0xff]  ;;  %v4975_v49 = vcombine.low %v566_v12, %v570_v40 }
 0x218   :  { %v4986_v51 = vcombine.high %v575_v47, %v579_v48 }
 0x21a   :  { %4110 = vmatpush1.bf16.msra.mxu0 %v4919_v56  ;;  %4315 = vmatpush1.bf16.msra.mxu1 %v4921_v58  ;;  %v583_v56 = vld [vmem:[%s6972_s1 + $0x1198] sm:$0xff] }
 0x21b   :  { %4111 = vmatprep.subr.bf16.mxu0 %v4928_v59  ;;  %4316 = vmatprep.subr.bf16.mxu1 %v4930_v36  ;;  %v587_v58 = vld [vmem:[%s6972_s1 + $0x11b8] sm:$0xff]  ;;  %v4983_v59 = vcombine.low %v574_v46, %v578_v21  ;;  %v4985_v36 = vcombine.low %v575_v47, %v579_v48 }
 0x21c   :  { %v4994_v60 = vcombine.high %v583_v56, %v587_v58 }
 0x21e   :  { %4112 = vmatpush1.bf16.msra.mxu0 %v4927_v39  ;;  %4317 = vmatpush1.bf16.msra.mxu1 %v4929_v63  ;;  %v591_v39 = vld [vmem:[%s6972_s1 + $0x11d8] sm:$0xff] }
 0x21f   :  { %4113 = vmatprep.subr.bf16.mxu0 %v4936_v0  ;;  %4318 = vmatprep.subr.bf16.mxu1 %v4938_v1  ;;  %v595_v63 = vld [vmem:[%s6972_s1 + $0x11f8] sm:$0xff]  ;;  %v4991_v0 = vcombine.low %v582_v52, %v586_v54  ;;  %v4993_v1 = vcombine.low %v583_v56, %v587_v58 }
 0x220   :  { %v5002_v2 = vcombine.high %v591_v39, %v595_v63  ;;  %v5001_v5 = vcombine.low %v591_v39, %v595_v63 }
 0x222   :  { %4114 = vmatpush1.bf16.msra.mxu0 %v4935_v6  ;;  %4319 = vmatpush1.bf16.msra.mxu1 %v4937_v7  ;;  %v5093_v6 = vld [vmem:[%s6973_s0 + $0x20] ss:$0 sps:$4 sm:$0xff]   ;;  %v616_v7 = vsub.s32 4, %v6702_v3 }
 0x223   :  { %4124 = vmatprep.subr.bf16.mxu0 %v4944_v9  ;;  %4329 = vmatprep.subr.bf16.mxu1 %v4946_v10  ;;  %v624_v9 = vsub.s32 6, %v6702_v3  ;;  %v620_v10 = vsub.s32 5, %v6702_v3 }
 0x224   :  { %v617_v13 = vrot.slane %v6720_v17, %v616_v7 }
 0x225   :  { %4116 = vmatmul.mubr.bf16.vlgmr.msra.gmra.mrb[4].mxu0 %v5965_v55  ;;  %4321 = vmatmul.mubr.bf16.vlgmr.msra.gmra.mrb[4].mxu1 %v5965_v55  ;;  %v559_v55 = vld [vmem:[%s6972_s1 + $0x10d8] sm:$0xff]  ;;  %v625_v14 = vrot.slane %v6720_v17, %v624_v9  ;;  %v621_v16 = vrot.slane %v6720_v17, %v620_v10 }
 0x226   :  { %4125 = vmatpush1.bf16.msra.mxu0 %v4943_v53  ;;  %4330 = vmatpush1.bf16.msra.mxu1 %v4945_v18  ;;  %v4970_v38 = vcombine.high %v559_v55, %v563_v33  ;;  %v4969_v42 = vcombine.low %v559_v55, %v563_v33  ;;  %v629_v53 = vrot.slane %v6720_v17, %v628_v11 }
 0x227   :  { %4126 = vmatprep.subr.bf16.mxu0 %v4952_v19  ;;  %4331 = vmatprep.subr.bf16.mxu1 %v4954_v20 }
 0x228   :  { %4156 = vmatprep.mubr.bf16.mxu0 %v5094_v8  ;;  %4361 = vmatprep.mubr.bf16.mxu1 %v5094_v8  ;;  %v567_v8 = vld [vmem:[%s6972_s1 + $0x1118] sm:$0xff] }
 0x229   :  { %v4978_v44 = vcombine.high %v567_v8, %v571_v41  ;;  %v4977_v22 = vcombine.low %v567_v8, %v571_v41 }
 0x22a   :  { %4127 = vmatpush1.bf16.msra.mxu0 %v4951_v15  ;;  %4332 = vmatpush1.bf16.msra.mxu1 %v4953_v28 }
 0x22b   :  { %4128 = vmatprep.subr.bf16.mxu0 %v4960_v29  ;;  %4333 = vmatprep.subr.bf16.mxu1 %v4962_v57 }
 0x22e   :  { %4129 = vmatpush1.bf16.msra.mxu0 %v4959_v34  ;;  %4334 = vmatpush1.bf16.msra.mxu1 %v4961_v35 }
 0x22f   :  { %4130 = vmatprep.subr.bf16.mxu0 %v4968_v37  ;;  %4335 = vmatprep.subr.bf16.mxu1 %v4970_v38 }
 0x232   :  { %4131 = vmatpush1.bf16.msra.mxu0 %v4967_v25  ;;  %4336 = vmatpush1.bf16.msra.mxu1 %v4969_v42 }
 0x233   :  { %4132 = vmatprep.subr.bf16.mxu0 %v4976_v43  ;;  %4337 = vmatprep.subr.bf16.mxu1 %v4978_v44 }
 0x236   :  { %4133 = vmatpush1.bf16.msra.mxu0 %v4975_v49  ;;  %4338 = vmatpush1.bf16.msra.mxu1 %v4977_v22 }
 0x237   :  { %4134 = vmatprep.subr.bf16.mxu0 %v4984_v50  ;;  %4339 = vmatprep.subr.bf16.mxu1 %v4986_v51 }
 0x23a   :  { %4135 = vmatpush1.bf16.msra.mxu0 %v4983_v59  ;;  %4340 = vmatpush1.bf16.msra.mxu1 %v4985_v36 }
 0x23b   :  { %4136 = vmatprep.subr.bf16.mxu0 %v4992_v31  ;;  %4341 = vmatprep.subr.bf16.mxu1 %v4994_v60 }
 0x23e   :  { %4137 = vmatpush1.bf16.msra.mxu0 %v4991_v0  ;;  %4342 = vmatpush1.bf16.msra.mxu1 %v4993_v1 }
 0x23f   :  { %4138 = vmatprep.subr.bf16.mxu0 %v5000_v45  ;;  %4343 = vmatprep.subr.bf16.mxu1 %v5002_v2 }
 0x242   :  { %4139 = vmatpush1.bf16.msra.mxu0 %v4999_v4  ;;  %4344 = vmatpush1.bf16.msra.mxu1 %v5001_v5 }
 0x245   :  { %4157 = vmatmul.mubr.bf16.vlgmr.msra.gmra.mrb[4].mxu0 %v5093_v6  ;;  %4362 = vmatmul.mubr.bf16.vlgmr.msra.gmra.mrb[4].mxu1 %v5093_v6 }
 0x318   :  { %v4158_v18 = vpop.f32.mrb[4].mxu0  ;;  %v4363_v20 = vpop.f32.mrb[4].mxu1 }
 0x319   :  { %v5015_v19 = vadd.f32 %v4158_v18, %v617_v13  ;;  %v4160_v23 = vpop.f32.mrb[5].mxu0  ;;  %v5017_v24 = vadd.f32 %v4363_v20, %v625_v14  ;;  %v4365_v27 = vpop.f32.mrb[5].mxu1 }
 0x31a   :  { %v5016_v26 = vadd.f32 %v4160_v23, %v621_v16  ;;  %v4162_v15 = vpop.f32.mrb[6].mxu0  ;;  %v5018_v29 = vadd.f32 %v4365_v27, %v629_v53  ;;  %v4367_v57 = vpop.f32.mrb[6].mxu1 }
 0x31b   :  { %v4374_v28 = vmax.f32 %v5015_v19, 0.0  ;;  %v4163_v3 = vpop.f32.mrb[7].mxu0  ;;  %v4376_v30 = vmax.f32 %v5017_v24, 0.0  ;;  %v4368_v55 = vpop.f32.mrb[7].mxu1 }
 0x31c   :  { %v4375_v32 = vmax.f32 %v5016_v26, 0.0  ;;  %v4377_v33 = vmax.f32 %v5018_v29, 0.0 }
 0x31e   :  { %v5009_v34 = vpack.c.bf16 %v4375_v32, %v4374_v28  ;;  %v5010_v35 = vpack.c.bf16 %v4377_v33, %v4376_v30 }
 0x320   :  { %4412 = vst [vmem:[%s6975_s3 + $0x10] sm:$0xff] %v5009_v34  ;;  %4413 = vst [vmem:[%s6975_s3 + $0x18] sm:$0xff] %v5010_v35 }

// kernel: enhanced_vqvae_forward.16
= control target key start
LH: loop header
LB: loop body
LE: loop exit
PB: predicated region body
PF: predicated region fallthrough
CT: control target
= control target key end

     0   :  { %s3784_s1 = inlined_call_operand.vmem [shape: bf16[1152,256], index: 1, kind: input, shape index: {}]   ;;  %s3785_s0 = inlined_call_operand.vmem [shape: bf16[128,1152], index: 0, kind: input, shape index: {}]   ;;  %s3786_s2 = inlined_call_operand.vmem [shape: f32[1,256], index: 2, kind: input, shape index: {}]   ;;  %s3787_s3 = inlined_call_operand.vmem [shape: bf16[128,256], index: 3, kind: output, shape index: {}]  }
   0x1   :  { %v2461_v0 = vld [vmem:[%s3784_s1 + $0x4] ss:$8 sps:$4 sm:$0xff]   ;;  %v2465_v2 = vld [vmem:[%s3784_s1] ss:$8 sps:$4 sm:$0xff]   ;;  %v2467_v4 = vld [vmem:[%s3784_s1 + $0x14] ss:$8 sps:$4 sm:$0xff]  }
   0x2   :  { %v2463_v1 = vld [vmem:[%s3784_s1 + $0x204] ss:$8 sps:$4 sm:$0xff]   ;;  %1339 = vmatprep.subr.bf16.mxu1 %v2461_v0  ;;  %v2466_v3 = vld [vmem:[%s3784_s1 + $0x200] ss:$8 sps:$4 sm:$0xff]   ;;  %v2469_v5 = vld [vmem:[%s3784_s1 + $0x214] ss:$8 sps:$4 sm:$0xff]  }
   0x3   :  { %1565 = vmatprep.subr.bf16.mxu0 %v2463_v1  ;;  %1340 = vmatpush1.bf16.msra.mxu1 %v2465_v2  ;;  %v2471_v6 = vld [vmem:[%s3784_s1 + $0x10] ss:$8 sps:$4 sm:$0xff]   ;;  %v2473_v8 = vld [vmem:[%s3784_s1 + $0x24] ss:$8 sps:$4 sm:$0xff]   ;;  %v2477_v10 = vld [vmem:[%s3784_s1 + $0x20] ss:$8 sps:$4 sm:$0xff]  }
   0x4   :  { %1566 = vmatpush1.bf16.msra.mxu0 %v2466_v3  ;;  %1341 = vmatprep.subr.bf16.mxu1 %v2467_v4  ;;  %v2472_v7 = vld [vmem:[%s3784_s1 + $0x210] ss:$8 sps:$4 sm:$0xff]   ;;  %v2475_v9 = vld [vmem:[%s3784_s1 + $0x224] ss:$8 sps:$4 sm:$0xff]   ;;  %v2478_v11 = vld [vmem:[%s3784_s1 + $0x220] ss:$8 sps:$4 sm:$0xff]  }
   0x5   :  { %1567 = vmatprep.subr.bf16.mxu0 %v2469_v5  ;;  %v2479_v12 = vld [vmem:[%s3784_s1 + $0x34] ss:$8 sps:$4 sm:$0xff]   ;;  %v2483_v14 = vld [vmem:[%s3784_s1 + $0x30] ss:$8 sps:$4 sm:$0xff]   ;;  %v2485_v16 = vld [vmem:[%s3784_s1 + $0x44] ss:$8 sps:$4 sm:$0xff]  }
   0x6   :  { %v2481_v13 = vld [vmem:[%s3784_s1 + $0x234] ss:$8 sps:$4 sm:$0xff]   ;;  %v2484_v15 = vld [vmem:[%s3784_s1 + $0x230] ss:$8 sps:$4 sm:$0xff]   ;;  %v2487_v17 = vld [vmem:[%s3784_s1 + $0x244] ss:$8 sps:$4 sm:$0xff]  }
   0x7   :  { %1342 = vmatpush1.bf16.msra.mxu1 %v2471_v6  ;;  %v2489_v18 = vld [vmem:[%s3784_s1 + $0x40] ss:$8 sps:$4 sm:$0xff]   ;;  %v2491_v20 = vld [vmem:[%s3784_s1 + $0x54] ss:$8 sps:$4 sm:$0xff]   ;;  %v2495_v22 = vld [vmem:[%s3784_s1 + $0x50] ss:$8 sps:$4 sm:$0xff]  }
   0x8   :  { %1568 = vmatpush1.bf16.msra.mxu0 %v2472_v7  ;;  %1343 = vmatprep.subr.bf16.mxu1 %v2473_v8  ;;  %v2490_v19 = vld [vmem:[%s3784_s1 + $0x240] ss:$8 sps:$4 sm:$0xff]   ;;  %v2493_v21 = vld [vmem:[%s3784_s1 + $0x254] ss:$8 sps:$4 sm:$0xff]   ;;  %v2496_v23 = vld [vmem:[%s3784_s1 + $0x250] ss:$8 sps:$4 sm:$0xff]  }
   0x9   :  { %1569 = vmatprep.subr.bf16.mxu0 %v2475_v9  ;;  %v2497_v24 = vld [vmem:[%s3784_s1 + $0x64] ss:$8 sps:$4 sm:$0xff]   ;;  %v2501_v26 = vld [vmem:[%s3784_s1 + $0x60] ss:$8 sps:$4 sm:$0xff]   ;;  %v2503_v28 = vld [vmem:[%s3784_s1 + $0x74] ss:$8 sps:$4 sm:$0xff]  }
   0xa   :  { %v2499_v25 = vld [vmem:[%s3784_s1 + $0x264] ss:$8 sps:$4 sm:$0xff]   ;;  %v2502_v27 = vld [vmem:[%s3784_s1 + $0x260] ss:$8 sps:$4 sm:$0xff]   ;;  %v2505_v29 = vld [vmem:[%s3784_s1 + $0x274] ss:$8 sps:$4 sm:$0xff]  }
   0xb   :  { %1344 = vmatpush1.bf16.msra.mxu1 %v2477_v10  ;;  %v2507_v30 = vld [vmem:[%s3784_s1 + $0x70] ss:$8 sps:$4 sm:$0xff]   ;;  %v2509_v32 = vld [vmem:[%s3784_s1 + $0x84] ss:$8 sps:$4 sm:$0xff]   ;;  %v2513_v34 = vld [vmem:[%s3784_s1 + $0x80] ss:$8 sps:$4 sm:$0xff]  }
   0xc   :  { %1570 = vmatpush1.bf16.msra.mxu0 %v2478_v11  ;;  %1345 = vmatprep.subr.bf16.mxu1 %v2479_v12  ;;  %v2508_v31 = vld [vmem:[%s3784_s1 + $0x270] ss:$8 sps:$4 sm:$0xff]   ;;  %v2511_v33 = vld [vmem:[%s3784_s1 + $0x284] ss:$8 sps:$4 sm:$0xff]   ;;  %v2514_v35 = vld [vmem:[%s3784_s1 + $0x280] ss:$8 sps:$4 sm:$0xff]  }
   0xd   :  { %1571 = vmatprep.subr.bf16.mxu0 %v2481_v13  ;;  %v2515_v36 = vld [vmem:[%s3784_s1 + $0x94] ss:$8 sps:$4 sm:$0xff]   ;;  %v2519_v38 = vld [vmem:[%s3784_s1 + $0x90] ss:$8 sps:$4 sm:$0xff]   ;;  %v2521_v40 = vld [vmem:[%s3784_s1 + $0xa4] ss:$8 sps:$4 sm:$0xff]  }
   0xe   :  { %v2517_v37 = vld [vmem:[%s3784_s1 + $0x294] ss:$8 sps:$4 sm:$0xff]   ;;  %v2520_v39 = vld [vmem:[%s3784_s1 + $0x290] ss:$8 sps:$4 sm:$0xff]   ;;  %v2523_v41 = vld [vmem:[%s3784_s1 + $0x2a4] ss:$8 sps:$4 sm:$0xff]  }
   0xf   :  { %1346 = vmatpush1.bf16.msra.mxu1 %v2483_v14  ;;  %v2525_v42 = vld [vmem:[%s3784_s1 + $0xa0] ss:$8 sps:$4 sm:$0xff]   ;;  %v2527_v44 = vld [vmem:[%s3784_s1 + $0xb4] ss:$8 sps:$4 sm:$0xff]   ;;  %v2531_v46 = vld [vmem:[%s3784_s1 + $0xb0] ss:$8 sps:$4 sm:$0xff]  }
  0x10   :  { %1572 = vmatpush1.bf16.msra.mxu0 %v2484_v15  ;;  %1347 = vmatprep.subr.bf16.mxu1 %v2485_v16  ;;  %v2526_v43 = vld [vmem:[%s3784_s1 + $0x2a0] ss:$8 sps:$4 sm:$0xff]   ;;  %v2529_v45 = vld [vmem:[%s3784_s1 + $0x2b4] ss:$8 sps:$4 sm:$0xff]   ;;  %v2532_v47 = vld [vmem:[%s3784_s1 + $0x2b0] ss:$8 sps:$4 sm:$0xff]  }
  0x11   :  { %1573 = vmatprep.subr.bf16.mxu0 %v2487_v17  ;;  %v2533_v48 = vld [vmem:[%s3784_s1 + $0xc4] ss:$8 sps:$4 sm:$0xff]   ;;  %v2562_v51 = vld [vmem:[%s3785_s0 + $0x14] ss:$36 sps:$4 sm:$0xff]   ;;  %v2537_v52 = vld [vmem:[%s3784_s1 + $0xc0] ss:$8 sps:$4 sm:$0xff]  }
  0x12   :  { %v2559_v49 = vld [vmem:[%s3785_s0 + $0x4] ss:$36 sps:$4 sm:$0xff]   ;;  %1597 = vmatprep.mubr.bf16.mxu0 %v2562_v51  ;;  %v2539_v54 = vld [vmem:[%s3784_s1 + $0xd4] ss:$8 sps:$4 sm:$0xff]   ;;  %v2543_v56 = vld [vmem:[%s3784_s1 + $0xd0] ss:$8 sps:$4 sm:$0xff]  }
  0x13   :  { %1348 = vmatpush1.bf16.msra.mxu1 %v2489_v18  ;;  %v2535_v50 = vld [vmem:[%s3784_s1 + $0x2c4] ss:$8 sps:$4 sm:$0xff]   ;;  %1371 = vmatprep.mubr.bf16.mxu1 %v2559_v49  ;;  %v2538_v53 = vld [vmem:[%s3784_s1 + $0x2c0] ss:$8 sps:$4 sm:$0xff]   ;;  %v2541_v55 = vld [vmem:[%s3784_s1 + $0x2d4] ss:$8 sps:$4 sm:$0xff]  }
  0x14   :  { %1574 = vmatpush1.bf16.msra.mxu0 %v2490_v19  ;;  %1349 = vmatprep.subr.bf16.mxu1 %v2491_v20  ;;  %v2544_v57 = vld [vmem:[%s3784_s1 + $0x2d0] ss:$8 sps:$4 sm:$0xff]   ;;  %v2545_v58 = vld [vmem:[%s3784_s1 + $0xe4] ss:$8 sps:$4 sm:$0xff]   ;;  %v2549_v60 = vld [vmem:[%s3784_s1 + $0xe0] ss:$8 sps:$4 sm:$0xff]  }
  0x15   :  { %1575 = vmatprep.subr.bf16.mxu0 %v2493_v21  ;;  %v2547_v59 = vld [vmem:[%s3784_s1 + $0x2e4] ss:$8 sps:$4 sm:$0xff]   ;;  %v2550_v61 = vld [vmem:[%s3784_s1 + $0x2e0] ss:$8 sps:$4 sm:$0xff]   ;;  %v2551_v62 = vld [vmem:[%s3784_s1 + $0xf4] ss:$8 sps:$4 sm:$0xff]  }
  0x16   :  { %v2553_v63 = vld [vmem:[%s3784_s1 + $0x2f4] ss:$8 sps:$4 sm:$0xff]   ;;  %v2555_v0 = vld [vmem:[%s3784_s1 + $0xf0] ss:$8 sps:$4 sm:$0xff]   ;;  %v2565_v2 = vld [vmem:[%s3784_s1 + $0x104] ss:$8 sps:$4 sm:$0xff]  }
  0x17   :  { %1350 = vmatpush1.bf16.msra.mxu1 %v2495_v22  ;;  %v2556_v1 = vld [vmem:[%s3784_s1 + $0x2f0] ss:$8 sps:$4 sm:$0xff]   ;;  %v3006_v3 = vld [vmem:[%s3784_s1 + $0x304] ss:$8 sps:$4 sm:$0xff]   ;;  %v2563_v6 = vld [vmem:[%s3784_s1 + $0x100] ss:$8 sps:$4 sm:$0xff]  }
  0x18   :  { %1576 = vmatpush1.bf16.msra.mxu0 %v2496_v23  ;;  %1351 = vmatprep.subr.bf16.mxu1 %v2497_v24  ;;  %v2557_v4 = vld [vmem:[%s3785_s0] ss:$36 sps:$4 sm:$0xff]   ;;  %v2560_v5 = vld [vmem:[%s3785_s0 + $0x10] ss:$36 sps:$4 sm:$0xff]   ;;  %v2579_v16 = vld [vmem:[%s3785_s0 + $0x48] ss:$36 sps:$4 sm:$0xff]  }
  0x19   :  { %1577 = vmatprep.subr.bf16.mxu0 %v2499_v25  ;;  %v3020_v7 = vld [vmem:[%s3784_s1 + $0x300] ss:$8 sps:$4 sm:$0xff]   ;;  %v2571_v8 = vld [vmem:[%s3784_s1 + $0x114] ss:$8 sps:$4 sm:$0xff]   ;;  %v2575_v10 = vld [vmem:[%s3785_s0 + $0x4c] ss:$36 sps:$4 sm:$0xff]  }
  0x1a   :  { %v3029_v9 = vld [vmem:[%s3784_s1 + $0x314] ss:$8 sps:$4 sm:$0xff]   ;;  %v2569_v12 = vld [vmem:[%s3784_s1 + $0x110] ss:$8 sps:$4 sm:$0xff]   ;;  %v2582_v14 = vld [vmem:[%s3784_s1 + $0x124] ss:$8 sps:$4 sm:$0xff]  }
  0x1b   :  { %1352 = vmatpush1.bf16.msra.mxu1 %v2501_v26  ;;  %v2577_v11 = vld [vmem:[%s3785_s0 + $0x5c] ss:$36 sps:$4 sm:$0xff]   ;;  %v3044_v13 = vld [vmem:[%s3784_s1 + $0x310] ss:$8 sps:$4 sm:$0xff]   ;;  %v3053_v15 = vld [vmem:[%s3784_s1 + $0x324] ss:$8 sps:$4 sm:$0xff]  }
  0x1c   :  { %1578 = vmatpush1.bf16.msra.mxu0 %v2502_v27  ;;  %1353 = vmatprep.subr.bf16.mxu1 %v2503_v28  ;;  %v2580_v17 = vld [vmem:[%s3784_s1 + $0x120] ss:$8 sps:$4 sm:$0xff]   ;;  %v2583_v18 = vld [vmem:[%s3785_s0 + $0x58] ss:$36 sps:$4 sm:$0xff]   ;;  %v2600_v26 = vld [vmem:[%s3784_s1 + $0x144] ss:$8 sps:$4 sm:$0xff]  }
  0x1d   :  { %1579 = vmatprep.subr.bf16.mxu0 %v2505_v29  ;;  %v3067_v19 = vld [vmem:[%s3784_s1 + $0x320] ss:$8 sps:$4 sm:$0xff]   ;;  %v2589_v20 = vld [vmem:[%s3784_s1 + $0x134] ss:$8 sps:$4 sm:$0xff]   ;;  %v2587_v24 = vld [vmem:[%s3784_s1 + $0x130] ss:$8 sps:$4 sm:$0xff]  }
  0x1e   :  { %v3077_v21 = vld [vmem:[%s3784_s1 + $0x334] ss:$8 sps:$4 sm:$0xff]   ;;  %v2595_v23 = vld [vmem:[%s3785_s0 + $0xa4] ss:$36 sps:$4 sm:$0xff]   ;;  %v3092_v25 = vld [vmem:[%s3784_s1 + $0x330] ss:$8 sps:$4 sm:$0xff]  }
  0x1f   :  { %1354 = vmatpush1.bf16.msra.mxu1 %v2507_v30  ;;  %v2593_v22 = vld [vmem:[%s3785_s0 + $0x94] ss:$36 sps:$4 sm:$0xff]   ;;  %v3101_v27 = vld [vmem:[%s3784_s1 + $0x344] ss:$8 sps:$4 sm:$0xff]   ;;  %v2598_v29 = vld [vmem:[%s3784_s1 + $0x140] ss:$8 sps:$4 sm:$0xff]  }
  0x20   :  { %1580 = vmatpush1.bf16.msra.mxu0 %v2508_v31  ;;  %1355 = vmatprep.subr.bf16.mxu1 %v2509_v32  ;;  %v2597_v28 = vld [vmem:[%s3785_s0 + $0x90] ss:$36 sps:$4 sm:$0xff]   ;;  %v2601_v30 = vld [vmem:[%s3785_s0 + $0xa0] ss:$36 sps:$4 sm:$0xff]  }
  0x21   :  { %1581 = vmatprep.subr.bf16.mxu0 %v2511_v33  ;;  %v3115_v31 = vld [vmem:[%s3784_s1 + $0x340] ss:$8 sps:$4 sm:$0xff]   ;;  %v2607_v32 = vld [vmem:[%s3784_s1 + $0x154] ss:$8 sps:$4 sm:$0xff]   ;;  %v3188_v49 = vld [vmem:[%s3784_s1 + $0x370] ss:$8 sps:$4 sm:$0xff]  }
  0x22   :  { %v3125_v33 = vld [vmem:[%s3784_s1 + $0x354] ss:$8 sps:$4 sm:$0xff]   ;;  %v3197_v51 = vld [vmem:[%s3784_s1 + $0x384] ss:$8 sps:$4 sm:$0xff]  }
  0x23   :  { %1356 = vmatpush1.bf16.msra.mxu1 %v2513_v34  ;;  %v2611_v34 = vld [vmem:[%s3785_s0 + $0xdc] ss:$36 sps:$4 sm:$0xff]  }
  0x24   :  { %1582 = vmatpush1.bf16.msra.mxu0 %v2514_v35  ;;  %1357 = vmatprep.subr.bf16.mxu1 %v2515_v36  ;;  %v2613_v35 = vld [vmem:[%s3785_s0 + $0xec] ss:$36 sps:$4 sm:$0xff]  }
  0x25   :  { %1583 = vmatprep.subr.bf16.mxu0 %v2517_v37  ;;  %v2605_v36 = vld [vmem:[%s3784_s1 + $0x150] ss:$8 sps:$4 sm:$0xff]  }
  0x26   :  { %v3140_v37 = vld [vmem:[%s3784_s1 + $0x350] ss:$8 sps:$4 sm:$0xff]  }
  0x27   :  { %1358 = vmatpush1.bf16.msra.mxu1 %v2519_v38  ;;  %v2618_v38 = vld [vmem:[%s3784_s1 + $0x164] ss:$8 sps:$4 sm:$0xff]  }
  0x28   :  { %1584 = vmatpush1.bf16.msra.mxu0 %v2520_v39  ;;  %1359 = vmatprep.subr.bf16.mxu1 %v2521_v40  ;;  %v3149_v39 = vld [vmem:[%s3784_s1 + $0x364] ss:$8 sps:$4 sm:$0xff]   ;;  %v2615_v40 = vld [vmem:[%s3785_s0 + $0xd8] ss:$36 sps:$4 sm:$0xff]  }
  0x29   :  { %1585 = vmatprep.subr.bf16.mxu0 %v2523_v41  ;;  %v2616_v41 = vld [vmem:[%s3784_s1 + $0x160] ss:$8 sps:$4 sm:$0xff]  }
  0x2b   :  { %1360 = vmatpush1.bf16.msra.mxu1 %v2525_v42  ;;  %v2619_v42 = vld [vmem:[%s3785_s0 + $0xe8] ss:$36 sps:$4 sm:$0xff]  }
  0x2c   :  { %1586 = vmatpush1.bf16.msra.mxu0 %v2526_v43  ;;  %1361 = vmatprep.subr.bf16.mxu1 %v2527_v44  ;;  %v3163_v43 = vld [vmem:[%s3784_s1 + $0x360] ss:$8 sps:$4 sm:$0xff]   ;;  %v2625_v44 = vld [vmem:[%s3784_s1 + $0x174] ss:$8 sps:$4 sm:$0xff]  }
  0x2d   :  { %1587 = vmatprep.subr.bf16.mxu0 %v2529_v45  ;;  %v3173_v45 = vld [vmem:[%s3784_s1 + $0x374] ss:$8 sps:$4 sm:$0xff]  }
  0x2f   :  { %1362 = vmatpush1.bf16.msra.mxu1 %v2531_v46  ;;  %v2629_v46 = vld [vmem:[%s3785_s0 + $0x124] ss:$36 sps:$4 sm:$0xff]  }
  0x30   :  { %1588 = vmatpush1.bf16.msra.mxu0 %v2532_v47  ;;  %1363 = vmatprep.subr.bf16.mxu1 %v2533_v48  ;;  %v2631_v47 = vld [vmem:[%s3785_s0 + $0x134] ss:$36 sps:$4 sm:$0xff]  }
  0x31   :  { %1589 = vmatprep.subr.bf16.mxu0 %v2535_v50  ;;  %v2623_v48 = vld [vmem:[%s3784_s1 + $0x170] ss:$8 sps:$4 sm:$0xff]   ;;  %v2636_v50 = vld [vmem:[%s3784_s1 + $0x184] ss:$8 sps:$4 sm:$0xff]  }
  0x33   :  { %1364 = vmatpush1.bf16.msra.mxu1 %v2537_v52  ;;  %v2633_v52 = vld [vmem:[%s3785_s0 + $0x120] ss:$36 sps:$4 sm:$0xff]  }
  0x34   :  { %1590 = vmatpush1.bf16.msra.mxu0 %v2538_v53  ;;  %1365 = vmatprep.subr.bf16.mxu1 %v2539_v54  ;;  %v2634_v53 = vld [vmem:[%s3784_s1 + $0x180] ss:$8 sps:$4 sm:$0xff]   ;;  %v2637_v54 = vld [vmem:[%s3785_s0 + $0x130] ss:$36 sps:$4 sm:$0xff]  }
  0x35   :  { %1591 = vmatprep.subr.bf16.mxu0 %v2541_v55  ;;  %v3211_v55 = vld [vmem:[%s3784_s1 + $0x380] ss:$8 sps:$4 sm:$0xff]  }
  0x37   :  { %1366 = vmatpush1.bf16.msra.mxu1 %v2543_v56  ;;  %v2643_v56 = vld [vmem:[%s3784_s1 + $0x194] ss:$8 sps:$4 sm:$0xff]  }
  0x38   :  { %1592 = vmatpush1.bf16.msra.mxu0 %v2544_v57  ;;  %1367 = vmatprep.subr.bf16.mxu1 %v2545_v58  ;;  %v3221_v57 = vld [vmem:[%s3784_s1 + $0x394] ss:$8 sps:$4 sm:$0xff]   ;;  %v2647_v58 = vld [vmem:[%s3785_s0 + $0x16c] ss:$36 sps:$4 sm:$0xff]  }
  0x39   :  { %1593 = vmatprep.subr.bf16.mxu0 %v2547_v59  ;;  %v2649_v59 = vld [vmem:[%s3785_s0 + $0x17c] ss:$36 sps:$4 sm:$0xff]  }
  0x3b   :  { %1368 = vmatpush1.bf16.msra.mxu1 %v2549_v60  ;;  %v2641_v60 = vld [vmem:[%s3784_s1 + $0x190] ss:$8 sps:$4 sm:$0xff]  }
  0x3c   :  { %1594 = vmatpush1.bf16.msra.mxu0 %v2550_v61  ;;  %1369 = vmatprep.subr.bf16.mxu1 %v2551_v62  ;;  %v3236_v61 = vld [vmem:[%s3784_s1 + $0x390] ss:$8 sps:$4 sm:$0xff]   ;;  %v2654_v62 = vld [vmem:[%s3784_s1 + $0x1a4] ss:$8 sps:$4 sm:$0xff]  }
  0x3d   :  { %1595 = vmatprep.subr.bf16.mxu0 %v2553_v63  ;;  %v3245_v63 = vld [vmem:[%s3784_s1 + $0x3a4] ss:$8 sps:$4 sm:$0xff]  }
  0x3f   :  { %1370 = vmatpush1.bf16.msra.mxu1 %v2555_v0  ;;  %v2651_v0 = vld [vmem:[%s3785_s0 + $0x168] ss:$36 sps:$4 sm:$0xff]  }
  0x40   :  { %1596 = vmatpush1.bf16.msra.mxu0 %v2556_v1  ;;  %1452 = vmatprep.subr.bf16.mxu1 %v2565_v2  ;;  %v2652_v1 = vld [vmem:[%s3784_s1 + $0x1a0] ss:$8 sps:$4 sm:$0xff]   ;;  %v2655_v2 = vld [vmem:[%s3785_s0 + $0x178] ss:$36 sps:$4 sm:$0xff]  }
  0x41   :  { %1678 = vmatprep.subr.bf16.mxu0 %v3006_v3 }
  0x42   :  { %1372 = vmatmul.mubr.bf16.vlgmr.msra.gmra.mrb[0].mxu1 %v2557_v4  ;;  %v3259_v4 = vld [vmem:[%s3784_s1 + $0x3a0] ss:$8 sps:$4 sm:$0xff]  }
  0x43   :  { %1598 = vmatmul.mubr.bf16.vlgmr.msra.gmra.mrb[0].mxu0 %v2560_v5  ;;  %1453 = vmatpush1.bf16.msra.mxu1 %v2563_v6  ;;  %v2661_v5 = vld [vmem:[%s3784_s1 + $0x1b4] ss:$8 sps:$4 sm:$0xff]  }
  0x44   :  { %1679 = vmatpush1.bf16.msra.mxu0 %v3020_v7  ;;  %1454 = vmatprep.subr.bf16.mxu1 %v2571_v8  ;;  %v3269_v6 = vld [vmem:[%s3784_s1 + $0x3b4] ss:$8 sps:$4 sm:$0xff]  }
  0x45   :  { %1680 = vmatprep.subr.bf16.mxu0 %v3029_v9  ;;  %1381 = vmatprep.mubr.bf16.mxu1 %v2575_v10  ;;  %v2665_v8 = vld [vmem:[%s3785_s0 + $0x1b4] ss:$36 sps:$4 sm:$0xff]   ;;  %v2667_v10 = vld [vmem:[%s3785_s0 + $0x1c4] ss:$36 sps:$4 sm:$0xff]  }
  0x46   :  { %1607 = vmatprep.mubr.bf16.mxu0 %v2577_v11  ;;  %v2659_v11 = vld [vmem:[%s3784_s1 + $0x1b0] ss:$8 sps:$4 sm:$0xff]  }
  0x47   :  { %1455 = vmatpush1.bf16.msra.mxu1 %v2569_v12  ;;  %v3283_v12 = vld [vmem:[%s3784_s1 + $0x3b0] ss:$8 sps:$4 sm:$0xff]  }
  0x48   :  { %1681 = vmatpush1.bf16.msra.mxu0 %v3044_v13  ;;  %1456 = vmatprep.subr.bf16.mxu1 %v2582_v14  ;;  %v2672_v14 = vld [vmem:[%s3784_s1 + $0x1c4] ss:$8 sps:$4 sm:$0xff]  }
  0x49   :  { %1682 = vmatprep.subr.bf16.mxu0 %v3053_v15 }
  0x4a   :  { %1382 = vmatmul.mubr.bf16.gmra.mrb[4].mxu1 %v2579_v16  ;;  %v3293_v16 = vld [vmem:[%s3784_s1 + $0x3c4] ss:$8 sps:$4 sm:$0xff]  }
  0x4b   :  { %1608 = vmatmul.mubr.bf16.gmra.mrb[4].mxu0 %v2583_v18  ;;  %1457 = vmatpush1.bf16.msra.mxu1 %v2580_v17  ;;  %v2669_v17 = vld [vmem:[%s3785_s0 + $0x1b0] ss:$36 sps:$4 sm:$0xff]   ;;  %v2670_v18 = vld [vmem:[%s3784_s1 + $0x1c0] ss:$8 sps:$4 sm:$0xff]  }
  0x4c   :  { %1683 = vmatpush1.bf16.msra.mxu0 %v3067_v19  ;;  %1458 = vmatprep.subr.bf16.mxu1 %v2589_v20  ;;  %v2673_v20 = vld [vmem:[%s3785_s0 + $0x1c0] ss:$36 sps:$4 sm:$0xff]  }
  0x4d   :  { %1684 = vmatprep.subr.bf16.mxu0 %v3077_v21  ;;  %1391 = vmatprep.mubr.bf16.mxu1 %v2593_v22  ;;  %v3307_v22 = vld [vmem:[%s3784_s1 + $0x3c0] ss:$8 sps:$4 sm:$0xff]  }
  0x4e   :  { %1617 = vmatprep.mubr.bf16.mxu0 %v2595_v23  ;;  %v2679_v23 = vld [vmem:[%s3784_s1 + $0x1d4] ss:$8 sps:$4 sm:$0xff]  }
  0x4f   :  { %1459 = vmatpush1.bf16.msra.mxu1 %v2587_v24  ;;  %v3317_v24 = vld [vmem:[%s3784_s1 + $0x3d4] ss:$8 sps:$4 sm:$0xff]  }
  0x50   :  { %1685 = vmatpush1.bf16.msra.mxu0 %v3092_v25  ;;  %1460 = vmatprep.subr.bf16.mxu1 %v2600_v26  ;;  %v2683_v26 = vld [vmem:[%s3785_s0 + $0x1fc] ss:$36 sps:$4 sm:$0xff]  }
  0x51   :  { %1686 = vmatprep.subr.bf16.mxu0 %v3101_v27 }
  0x52   :  { %1392 = vmatmul.mubr.bf16.gmra.mrb[8].mxu1 %v2597_v28  ;;  %v2685_v28 = vld [vmem:[%s3785_s0 + $0x20c] ss:$36 sps:$4 sm:$0xff]  }
  0x53   :  { %1618 = vmatmul.mubr.bf16.gmra.mrb[8].mxu0 %v2601_v30  ;;  %1461 = vmatpush1.bf16.msra.mxu1 %v2598_v29  ;;  %v2677_v29 = vld [vmem:[%s3784_s1 + $0x1d0] ss:$8 sps:$4 sm:$0xff]  }
  0x54   :  { %1687 = vmatpush1.bf16.msra.mxu0 %v3115_v31  ;;  %1462 = vmatprep.subr.bf16.mxu1 %v2607_v32  ;;  %v3331_v30 = vld [vmem:[%s3784_s1 + $0x3d0] ss:$8 sps:$4 sm:$0xff]   ;;  %v2690_v32 = vld [vmem:[%s3784_s1 + $0x1e4] ss:$8 sps:$4 sm:$0xff]  }
  0x55   :  { %1688 = vmatprep.subr.bf16.mxu0 %v3125_v33  ;;  %1401 = vmatprep.mubr.bf16.mxu1 %v2611_v34  ;;  %v3341_v34 = vld [vmem:[%s3784_s1 + $0x3e4] ss:$8 sps:$4 sm:$0xff]  }
  0x56   :  { %1627 = vmatprep.mubr.bf16.mxu0 %v2613_v35  ;;  %v2687_v35 = vld [vmem:[%s3785_s0 + $0x1f8] ss:$36 sps:$4 sm:$0xff]  }
  0x57   :  { %1463 = vmatpush1.bf16.msra.mxu1 %v2605_v36  ;;  %v2688_v36 = vld [vmem:[%s3784_s1 + $0x1e0] ss:$8 sps:$4 sm:$0xff]  }
  0x58   :  { %1689 = vmatpush1.bf16.msra.mxu0 %v3140_v37  ;;  %1464 = vmatprep.subr.bf16.mxu1 %v2618_v38  ;;  %v2691_v38 = vld [vmem:[%s3785_s0 + $0x208] ss:$36 sps:$4 sm:$0xff]  }
  0x59   :  { %1690 = vmatprep.subr.bf16.mxu0 %v3149_v39 }
  0x5a   :  { %1402 = vmatmul.mubr.bf16.gmra.mrb[12].mxu1 %v2615_v40  ;;  %v3355_v40 = vld [vmem:[%s3784_s1 + $0x3e0] ss:$8 sps:$4 sm:$0xff]  }
  0x5b   :  { %1628 = vmatmul.mubr.bf16.gmra.mrb[12].mxu0 %v2619_v42  ;;  %1465 = vmatpush1.bf16.msra.mxu1 %v2616_v41  ;;  %v2697_v41 = vld [vmem:[%s3784_s1 + $0x1f4] ss:$8 sps:$4 sm:$0xff]  }
  0x5c   :  { %1691 = vmatpush1.bf16.msra.mxu0 %v3163_v43  ;;  %1466 = vmatprep.subr.bf16.mxu1 %v2625_v44  ;;  %v3365_v42 = vld [vmem:[%s3784_s1 + $0x3f4] ss:$8 sps:$4 sm:$0xff]   ;;  %v2703_v44 = vld [vmem:[%s3785_s0 + $0xc] ss:$36 sps:$4 sm:$0xff]  }
  0x5d   :  { %1692 = vmatprep.subr.bf16.mxu0 %v3173_v45  ;;  %1411 = vmatprep.mubr.bf16.mxu1 %v2629_v46  ;;  %v2706_v46 = vld [vmem:[%s3785_s0 + $0x1c] ss:$36 sps:$4 sm:$0xff]  }
  0x5e   :  { %1637 = vmatprep.mubr.bf16.mxu0 %v2631_v47  ;;  %v2695_v47 = vld [vmem:[%s3784_s1 + $0x1f0] ss:$8 sps:$4 sm:$0xff]  }
  0x5f   :  { %1467 = vmatpush1.bf16.msra.mxu1 %v2623_v48  ;;  %v3380_v48 = vld [vmem:[%s3784_s1 + $0x3f0] ss:$8 sps:$4 sm:$0xff]  }
  0x60   :  { %1693 = vmatpush1.bf16.msra.mxu0 %v3188_v49  ;;  %1468 = vmatprep.subr.bf16.mxu1 %v2636_v50  ;;  %v2709_v50 = vld [vmem:[%s3784_s1 + $0x404] ss:$8 sps:$4 sm:$0xff]  }
  0x61   :  { %1694 = vmatprep.subr.bf16.mxu0 %v3197_v51 }
  0x62   :  { %1412 = vmatmul.mubr.bf16.gmra.mrb[16].mxu1 %v2633_v52  ;;  %v2701_v52 = vld [vmem:[%s3785_s0 + $0x8] ss:$36 sps:$4 sm:$0xff]  }
  0x63   :  { %1638 = vmatmul.mubr.bf16.gmra.mrb[16].mxu0 %v2637_v54  ;;  %1469 = vmatpush1.bf16.msra.mxu1 %v2634_v53  ;;  %v2704_v53 = vld [vmem:[%s3785_s0 + $0x18] ss:$36 sps:$4 sm:$0xff]   ;;  %v2707_v54 = vld [vmem:[%s3784_s1 + $0x400] ss:$8 sps:$4 sm:$0xff]  }
  0x64   :  { %1695 = vmatpush1.bf16.msra.mxu0 %v3211_v55  ;;  %1470 = vmatprep.subr.bf16.mxu1 %v2643_v56  ;;  %v2712_v56 = vld [vmem:[%s3784_s1 + $0x414] ss:$8 sps:$4 sm:$0xff]  }
  0x65   :  { %1696 = vmatprep.subr.bf16.mxu0 %v3221_v57  ;;  %1421 = vmatprep.mubr.bf16.mxu1 %v2647_v58  ;;  %v2713_v58 = vld [vmem:[%s3785_s0 + $0x54] ss:$36 sps:$4 sm:$0xff]  }
  0x66   :  { %1647 = vmatprep.mubr.bf16.mxu0 %v2649_v59  ;;  %v2715_v59 = vld [vmem:[%s3785_s0 + $0x64] ss:$36 sps:$4 sm:$0xff]  }
  0x67   :  { %1471 = vmatpush1.bf16.msra.mxu1 %v2641_v60  ;;  %v2710_v60 = vld [vmem:[%s3784_s1 + $0x410] ss:$8 sps:$4 sm:$0xff]  }
  0x68   :  { %1697 = vmatpush1.bf16.msra.mxu0 %v3236_v61  ;;  %1472 = vmatprep.subr.bf16.mxu1 %v2654_v62  ;;  %v2717_v62 = vld [vmem:[%s3785_s0 + $0x50] ss:$36 sps:$4 sm:$0xff]  }
  0x69   :  { %1698 = vmatprep.subr.bf16.mxu0 %v3245_v63 }
  0x6a   :  { %1422 = vmatmul.mubr.bf16.gmra.mrb[20].mxu1 %v2651_v0  ;;  %v2724_v0 = vld [vmem:[%s3784_s1 + $0x434] ss:$8 sps:$4 sm:$0xff]  }
  0x6b   :  { %1648 = vmatmul.mubr.bf16.gmra.mrb[20].mxu0 %v2655_v2  ;;  %1473 = vmatpush1.bf16.msra.mxu1 %v2652_v1  ;;  %v2725_v1 = vld [vmem:[%s3785_s0 + $0x9c] ss:$36 sps:$4 sm:$0xff]   ;;  %v2733_v2 = vld [vmem:[%s3784_s1 + $0x444] ss:$8 sps:$4 sm:$0xff]  }
  0x6c   :  { %1699 = vmatpush1.bf16.msra.mxu0 %v3259_v4  ;;  %1474 = vmatprep.subr.bf16.mxu1 %v2661_v5  ;;  %v2729_v5 = vld [vmem:[%s3785_s0 + $0x98] ss:$36 sps:$4 sm:$0xff]  }
  0x6d   :  { %1700 = vmatprep.subr.bf16.mxu0 %v3269_v6  ;;  %1431 = vmatprep.mubr.bf16.mxu1 %v2665_v8  ;;  %v2736_v8 = vld [vmem:[%s3784_s1 + $0x454] ss:$8 sps:$4 sm:$0xff]  }
  0x6e   :  { %1657 = vmatprep.mubr.bf16.mxu0 %v2667_v10  ;;  %v2737_v10 = vld [vmem:[%s3785_s0 + $0xe4] ss:$36 sps:$4 sm:$0xff]  }
  0x6f   :  { %1475 = vmatpush1.bf16.msra.mxu1 %v2659_v11  ;;  %v2745_v11 = vld [vmem:[%s3784_s1 + $0x464] ss:$8 sps:$4 sm:$0xff]  }
  0x70   :  { %1701 = vmatpush1.bf16.msra.mxu0 %v3283_v12  ;;  %1476 = vmatprep.subr.bf16.mxu1 %v2672_v14  ;;  %v2741_v14 = vld [vmem:[%s3785_s0 + $0xe0] ss:$36 sps:$4 sm:$0xff]  }
  0x71   :  { %1702 = vmatprep.subr.bf16.mxu0 %v3293_v16 }
  0x72   :  { %1432 = vmatmul.mubr.bf16.gmra.mrb[24].mxu1 %v2669_v17  ;;  %v2748_v17 = vld [vmem:[%s3784_s1 + $0x474] ss:$8 sps:$4 sm:$0xff]  }
  0x73   :  { %1658 = vmatmul.mubr.bf16.gmra.mrb[24].mxu0 %v2673_v20  ;;  %1477 = vmatpush1.bf16.msra.mxu1 %v2670_v18  ;;  %v2749_v18 = vld [vmem:[%s3785_s0 + $0x12c] ss:$36 sps:$4 sm:$0xff]  }
  0x74   :  { %1703 = vmatpush1.bf16.msra.mxu0 %v3307_v22  ;;  %1478 = vmatprep.subr.bf16.mxu1 %v2679_v23  ;;  %v2751_v20 = vld [vmem:[%s3785_s0 + $0x128] ss:$36 sps:$4 sm:$0xff]  }
  0x75   :  { %1704 = vmatprep.subr.bf16.mxu0 %v3317_v24  ;;  %1441 = vmatprep.mubr.bf16.mxu1 %v2683_v26  ;;  %v2756_v23 = vld [vmem:[%s3785_s0 + $0x68] ss:$36 sps:$4 sm:$0xff]  }
  0x76   :  { %1667 = vmatprep.mubr.bf16.mxu0 %v2685_v28  ;;  %v2772_v26 = vld [vmem:[%s3785_s0 + $0x188] ss:$36 sps:$4 sm:$0xff]  }
  0x77   :  { %1479 = vmatpush1.bf16.msra.mxu1 %v2677_v29  ;;  %v2773_v28 = vld [vmem:[%s3785_s0 + $0x1cc] ss:$36 sps:$4 sm:$0xff]  }
  0x78   :  { %1705 = vmatpush1.bf16.msra.mxu0 %v3331_v30  ;;  %1480 = vmatprep.subr.bf16.mxu1 %v2690_v32  ;;  %v2775_v29 = vld [vmem:[%s3785_s0 + $0x1c8] ss:$36 sps:$4 sm:$0xff]   ;;  %v2777_v32 = vld [vmem:[%s3785_s0 + $0x214] ss:$36 sps:$4 sm:$0xff]  }
  0x79   :  { %1706 = vmatprep.subr.bf16.mxu0 %v3341_v34 }
  0x7a   :  { %1442 = vmatmul.mubr.bf16.gmra.mrb[28].mxu1 %v2687_v35  ;;  %v2780_v35 = vld [vmem:[%s3785_s0 + $0x218] ss:$36 sps:$4 sm:$0xff]  }
  0x7b   :  { %1668 = vmatmul.mubr.bf16.gmra.mrb[28].mxu0 %v2691_v38  ;;  %1481 = vmatpush1.bf16.msra.mxu1 %v2688_v36 }
  0x7c   :  { %1707 = vmatpush1.bf16.msra.mxu0 %v3355_v40  ;;  %1482 = vmatprep.subr.bf16.mxu1 %v2697_v41 }
  0x7d   :  { %1708 = vmatprep.subr.bf16.mxu0 %v3365_v42  ;;  %1484 = vmatprep.mubr.bf16.mxu1 %v2703_v44 }
  0x7e   :  { %1710 = vmatprep.mubr.bf16.mxu0 %v2706_v46 }
  0x7f   :  { %1483 = vmatpush1.bf16.msra.mxu1 %v2695_v47 }
  0x80   :  { %1709 = vmatpush1.bf16.msra.mxu0 %v3380_v48  ;;  %2268 = vmatprep.subr.bf16.mxu1 %v3006_v3  ;;  %v2721_v3 = vld [vmem:[%s3784_s1 + $0x424] ss:$8 sps:$4 sm:$0xff]  }
  0x81   :  { %1791 = vmatprep.subr.bf16.mxu0 %v2709_v50 }
  0x82   :  { %1485 = vmatmul.mubr.bf16.vlgmr.msra.gmra.mrb[0].mxu1 %v2701_v52 }
  0x83   :  { %1711 = vmatmul.mubr.bf16.vlgmr.msra.gmra.mrb[0].mxu0 %v2704_v53  ;;  %2284 = vmatpush1.bf16.msra.mxu1 %v3020_v7  ;;  %v2718_v7 = vld [vmem:[%s3785_s0 + $0x60] ss:$36 sps:$4 sm:$0xff]  }
  0x84   :  { %1792 = vmatpush1.bf16.msra.mxu0 %v2707_v54  ;;  %2269 = vmatprep.subr.bf16.mxu1 %v3029_v9  ;;  %v2719_v9 = vld [vmem:[%s3784_s1 + $0x420] ss:$8 sps:$4 sm:$0xff]  }
  0x85   :  { %1793 = vmatprep.subr.bf16.mxu0 %v2712_v56  ;;  %1494 = vmatprep.mubr.bf16.mxu1 %v2713_v58 }
  0x86   :  { %1720 = vmatprep.mubr.bf16.mxu0 %v2715_v59 }
  0x87   :  { %2285 = vmatpush1.bf16.msra.mxu1 %v3044_v13  ;;  %v2727_v13 = vld [vmem:[%s3785_s0 + $0xac] ss:$36 sps:$4 sm:$0xff]  }
  0x88   :  { %1794 = vmatpush1.bf16.msra.mxu0 %v2710_v60  ;;  %2270 = vmatprep.subr.bf16.mxu1 %v3053_v15  ;;  %v2722_v15 = vld [vmem:[%s3784_s1 + $0x430] ss:$8 sps:$4 sm:$0xff]  }
  0x89   :  { %1795 = vmatprep.subr.bf16.mxu0 %v2721_v3 }
  0x8a   :  { %1495 = vmatmul.mubr.bf16.gmra.mrb[4].mxu1 %v2717_v62 }
  0x8b   :  { %1721 = vmatmul.mubr.bf16.gmra.mrb[4].mxu0 %v2718_v7  ;;  %2286 = vmatpush1.bf16.msra.mxu1 %v3067_v19  ;;  %v2730_v19 = vld [vmem:[%s3785_s0 + $0xa8] ss:$36 sps:$4 sm:$0xff]  }
  0x8c   :  { %1796 = vmatpush1.bf16.msra.mxu0 %v2719_v9  ;;  %2271 = vmatprep.subr.bf16.mxu1 %v3077_v21  ;;  %v2731_v21 = vld [vmem:[%s3784_s1 + $0x440] ss:$8 sps:$4 sm:$0xff]  }
  0x8d   :  { %1797 = vmatprep.subr.bf16.mxu0 %v2724_v0  ;;  %1504 = vmatprep.mubr.bf16.mxu1 %v2725_v1 }
  0x8e   :  { %1730 = vmatprep.mubr.bf16.mxu0 %v2727_v13 }
  0x8f   :  { %2287 = vmatpush1.bf16.msra.mxu1 %v3092_v25  ;;  %v2739_v25 = vld [vmem:[%s3785_s0 + $0xf4] ss:$36 sps:$4 sm:$0xff]  }
  0x90   :  { %1798 = vmatpush1.bf16.msra.mxu0 %v2722_v15  ;;  %2272 = vmatprep.subr.bf16.mxu1 %v3101_v27  ;;  %v2734_v27 = vld [vmem:[%s3784_s1 + $0x450] ss:$8 sps:$4 sm:$0xff]   ;;  %v241_v15 = vlaneseq }
  0x91   :  { %1799 = vmatprep.subr.bf16.mxu0 %v2733_v2 }
  0x92   :  { %1505 = vmatmul.mubr.bf16.gmra.mrb[8].mxu1 %v2729_v5 }
  0x93   :  { %1731 = vmatmul.mubr.bf16.gmra.mrb[8].mxu0 %v2730_v19  ;;  %2288 = vmatpush1.bf16.msra.mxu1 %v3115_v31  ;;  %v2742_v31 = vld [vmem:[%s3785_s0 + $0xf0] ss:$36 sps:$4 sm:$0xff]  }
  0x94   :  { %1800 = vmatpush1.bf16.msra.mxu0 %v2731_v21  ;;  %2273 = vmatprep.subr.bf16.mxu1 %v3125_v33  ;;  %v2743_v33 = vld [vmem:[%s3784_s1 + $0x460] ss:$8 sps:$4 sm:$0xff]   ;;  %v242_v21 = vshrl.u32 %v241_v15, 7 }
  0x95   :  { %1801 = vmatprep.subr.bf16.mxu0 %v2736_v8  ;;  %1514 = vmatprep.mubr.bf16.mxu1 %v2737_v10 }
  0x96   :  { %1740 = vmatprep.mubr.bf16.mxu0 %v2739_v25  ;;  %v243_v10 = vsub.s32 0, %v242_v21  ;;  %v239_v25 = vld [vmem:[%s3786_s2] sm:$0x3] }
  0x97   :  { %2289 = vmatpush1.bf16.msra.mxu1 %v3140_v37  ;;  %v2746_v37 = vld [vmem:[%s3784_s1 + $0x470] ss:$8 sps:$4 sm:$0xff]  }
  0x98   :  { %1802 = vmatpush1.bf16.msra.mxu0 %v2734_v27  ;;  %2274 = vmatprep.subr.bf16.mxu1 %v3149_v39  ;;  %v2781_v39 = vmov 0   ;;  %v247_v27 = vsub.s32 1, %v242_v21 }
  0x99   :  { %1803 = vmatprep.subr.bf16.mxu0 %v2745_v11 }
  0x9a   :  { %1515 = vmatmul.mubr.bf16.gmra.mrb[12].mxu1 %v2741_v14 }
  0x9b   :  { %1741 = vmatmul.mubr.bf16.gmra.mrb[12].mxu0 %v2742_v31  ;;  %2290 = vmatpush1.bf16.msra.mxu1 %v3163_v43  ;;  %v2752_v43 = vld [vmem:[%s3785_s0 + $0x20] ss:$36 sps:$4 sm:$0xff]  }
  0x9c   :  { %1804 = vmatpush1.bf16.msra.mxu0 %v2743_v33  ;;  %2275 = vmatprep.subr.bf16.mxu1 %v3173_v45  ;;  %v2753_v45 = vld [vmem:[%s3785_s0 + $0x174] ss:$36 sps:$4 sm:$0xff]   ;;  %v3629_v33 = vrot.slane %v239_v25, %v243_v10 }
  0x9d   :  { %1805 = vmatprep.subr.bf16.mxu0 %v2748_v17  ;;  %1524 = vmatprep.mubr.bf16.mxu1 %v2749_v18  ;;  %v3633_v18 = vrot.slane %v239_v25, %v247_v27 }
  0x9e   :  { %1823 = vmatprep.mubr.bf16.mxu0 %v2781_v39 }
  0x9f   :  { %2291 = vmatpush1.bf16.msra.mxu1 %v3188_v49  ;;  %v2755_v49 = vld [vmem:[%s3785_s0 + $0x170] ss:$36 sps:$4 sm:$0xff]  }
  0xa0   :  { %1806 = vmatpush1.bf16.msra.mxu0 %v2746_v37  ;;  %2276 = vmatprep.subr.bf16.mxu1 %v3197_v51  ;;  %v2757_v51 = vld [vmem:[%s3785_s0 + $0x1bc] ss:$36 sps:$4 sm:$0xff]  }
  0xa2   :  { %1525 = vmatmul.mubr.bf16.gmra.mrb[16].mxu1 %v2751_v20 }
  0xa3   :  { %1824 = vmatmul.mubr.bf16.vlgmr.msra.gmra.mrb[0].mxu0 %v2752_v43  ;;  %2292 = vmatpush1.bf16.msra.mxu1 %v3211_v55  ;;  %v2759_v55 = vld [vmem:[%s3785_s0 + $0x1b8] ss:$36 sps:$4 sm:$0xff]  }
  0xa4   :  { %1534 = vmatprep.mubr.bf16.mxu1 %v2753_v45  ;;  %2277 = vmatprep.subr.bf16.mxu1 %v3221_v57  ;;  %v2760_v57 = vld [vmem:[%s3785_s0 + $0xb0] ss:$36 sps:$4 sm:$0xff]  }
  0xa5   :  { %1833 = vmatprep.mubr.bf16.mxu0 %v2781_v39 }
  0xa7   :  { %2293 = vmatpush1.bf16.msra.mxu1 %v3236_v61  ;;  %v2761_v61 = vld [vmem:[%s3785_s0 + $0x204] ss:$36 sps:$4 sm:$0xff]  }
  0xa8   :  { %2278 = vmatprep.subr.bf16.mxu1 %v3245_v63  ;;  %v2763_v63 = vld [vmem:[%s3785_s0 + $0x200] ss:$36 sps:$4 sm:$0xff]  }
  0xaa   :  { %1535 = vmatmul.mubr.bf16.gmra.mrb[20].mxu1 %v2755_v49 }
  0xab   :  { %1834 = vmatmul.mubr.bf16.gmra.mrb[4].mxu0 %v2756_v23  ;;  %2294 = vmatpush1.bf16.msra.mxu1 %v3259_v4  ;;  %v2764_v4 = vld [vmem:[%s3785_s0 + $0xf8] ss:$36 sps:$4 sm:$0xff]  }
  0xac   :  { %1544 = vmatprep.mubr.bf16.mxu1 %v2757_v51  ;;  %2279 = vmatprep.subr.bf16.mxu1 %v3269_v6  ;;  %v2767_v6 = vld [vmem:[%s3785_s0 + $0x13c] ss:$36 sps:$4 sm:$0xff]  }
  0xad   :  { %1843 = vmatprep.mubr.bf16.mxu0 %v2781_v39 }
  0xaf   :  { %2295 = vmatpush1.bf16.msra.mxu1 %v3283_v12  ;;  %v2765_v12 = vld [vmem:[%s3785_s0 + $0x138] ss:$36 sps:$4 sm:$0xff]  }
  0xb0   :  { %2280 = vmatprep.subr.bf16.mxu1 %v3293_v16  ;;  %v2768_v16 = vld [vmem:[%s3785_s0 + $0x140] ss:$36 sps:$4 sm:$0xff]  }
  0xb2   :  { %1545 = vmatmul.mubr.bf16.gmra.mrb[24].mxu1 %v2759_v55 }
  0xb3   :  { %1844 = vmatmul.mubr.bf16.gmra.mrb[8].mxu0 %v2760_v57  ;;  %2296 = vmatpush1.bf16.msra.mxu1 %v3307_v22  ;;  %v2769_v22 = vld [vmem:[%s3785_s0 + $0x184] ss:$36 sps:$4 sm:$0xff]  }
  0xb4   :  { %1554 = vmatprep.mubr.bf16.mxu1 %v2761_v61  ;;  %2281 = vmatprep.subr.bf16.mxu1 %v3317_v24  ;;  %v2771_v24 = vld [vmem:[%s3785_s0 + $0x180] ss:$36 sps:$4 sm:$0xff]  }
  0xb5   :  { %1853 = vmatprep.mubr.bf16.mxu0 %v2781_v39 }
  0xb7   :  { %2297 = vmatpush1.bf16.msra.mxu1 %v3331_v30  ;;  %v2776_v30 = vld [vmem:[%s3785_s0 + $0x1d0] ss:$36 sps:$4 sm:$0xff]  }
  0xb8   :  { %2282 = vmatprep.subr.bf16.mxu1 %v3341_v34  ;;  %v2779_v34 = vld [vmem:[%s3785_s0 + $0x210] ss:$36 sps:$4 sm:$0xff]  }
  0xba   :  { %1555 = vmatmul.mubr.bf16.gmra.mrb[28].mxu1 %v2763_v63 }
  0xbb   :  { %1854 = vmatmul.mubr.bf16.gmra.mrb[12].mxu0 %v2764_v4  ;;  %2298 = vmatpush1.bf16.msra.mxu1 %v3355_v40 }
  0xbc   :  { %1750 = vmatprep.mubr.bf16.mxu1 %v2767_v6  ;;  %2283 = vmatprep.subr.bf16.mxu1 %v3365_v42 }
  0xbd   :  { %1863 = vmatprep.mubr.bf16.mxu0 %v2781_v39 }
  0xbf   :  { %2299 = vmatpush1.bf16.msra.mxu1 %v3380_v48 }
  0xc2   :  { %1751 = vmatmul.mubr.bf16.vlgmr.msra.gmra.mrb[32].mxu1 %v2765_v12 }
  0xc3   :  { %1864 = vmatmul.mubr.bf16.gmra.mrb[32].mxu0 %v2768_v16  ;;  %1760 = vmatprep.mubr.bf16.mxu1 %v2769_v22 }
  0xc4   :  { %1873 = vmatprep.mubr.bf16.mxu0 %v2781_v39 }
  0xca   :  { %1761 = vmatmul.mubr.bf16.gmra.mrb[36].mxu1 %v2771_v24 }
  0xcb   :  { %1874 = vmatmul.mubr.bf16.gmra.mrb[36].mxu0 %v2772_v26  ;;  %1770 = vmatprep.mubr.bf16.mxu1 %v2773_v28 }
  0xcc   :  { %1883 = vmatprep.mubr.bf16.mxu0 %v2781_v39 }
  0xd2   :  { %1771 = vmatmul.mubr.bf16.gmra.mrb[40].mxu1 %v2775_v29 }
  0xd3   :  { %1884 = vmatmul.mubr.bf16.gmra.mrb[40].mxu0 %v2776_v30  ;;  %1780 = vmatprep.mubr.bf16.mxu1 %v2777_v32 }
  0xd4   :  { %1893 = vmatprep.mubr.bf16.mxu0 %v2781_v39 }
  0xda   :  { %1781 = vmatmul.mubr.bf16.gmra.mrb[44].mxu1 %v2779_v34 }
  0xdb   :  { %1894 = vmatmul.mubr.bf16.gmra.mrb[44].mxu0 %v2780_v35 }
 0x136   :  { %v1639_v36 = vpop.f32.mrb[16].mxu0 }
 0x137   :  { %v1641_v38 = vpop.f32.mrb[17].mxu0 }
 0x138   :  { %v1643_v40 = vpop.f32.mrb[18].mxu0 }
 0x139   :  { %v3586_v41 = vpop.f32.mrb[19].mxu0 }
 0x13e   :  { %v3588_v42 = vpop.f32.mrb[20].mxu0 }
 0x13f   :  { %v3590_v44 = vpop.f32.mrb[21].mxu0 }
 0x140   :  { %v3592_v46 = vpop.f32.mrb[22].mxu0 }
 0x141   :  { %v3594_v47 = vpop.f32.mrb[23].mxu0 }
 0x146   :  { %v3596_v48 = vpop.f32.mrb[24].mxu0 }
 0x147   :  { %v3598_v50 = vpop.f32.mrb[25].mxu0 }
 0x148   :  { %v3600_v52 = vpop.f32.mrb[26].mxu0 }
 0x149   :  { %v3602_v53 = vpop.f32.mrb[27].mxu0 }
 0x14e   :  { %v3604_v54 = vpop.f32.mrb[28].mxu0 }
 0x14f   :  { %v3606_v56 = vpop.f32.mrb[29].mxu0 }
 0x150   :  { %v3608_v58 = vpop.f32.mrb[30].mxu0 }
 0x151   :  { %v3610_v59 = vpop.f32.mrb[31].mxu0 }
 0x155   :  { %v1486_v60 = vpop.f32.mrb[0].mxu1 }
 0x156   :  { %v1488_v3 = vpop.f32.mrb[1].mxu1  ;;  %v2300_v37 = vadd.f32 %v1486_v60, %v3629_v33 }
 0x157   :  { %v1490_v62 = vpop.f32.mrb[2].mxu1  ;;  %v2302_v39 = vadd.f32 %v1488_v3, %v3633_v18 }
 0x158   :  { %v1492_v7 = vpop.f32.mrb[3].mxu1  ;;  %v2304_v45 = vadd.f32 %v1490_v62, %v3629_v33 }
 0x159   :  { %v2306_v57 = vadd.f32 %v1492_v7, %v3633_v18 }
 0x15d   :  { %v1496_v9 = vpop.f32.mrb[4].mxu1 }
 0x15e   :  { %v1498_v0 = vpop.f32.mrb[5].mxu1  ;;  %v2308_v3 = vadd.f32 %v1496_v9, %v3629_v33 }
 0x15f   :  { %v1500_v1 = vpop.f32.mrb[6].mxu1 }
 0x160   :  { %v1502_v13 = vpop.f32.mrb[7].mxu1 }
 0x165   :  { %v3612_v2 = vpop.f32.mrb[8].mxu1 }
 0x166   :  { %v3614_v5 = vpop.f32.mrb[9].mxu1 }
 0x167   :  { %v3616_v19 = vpop.f32.mrb[10].mxu1 }
 0x168   :  { %v3618_v8 = vpop.f32.mrb[11].mxu1 }
 0x16d   :  { %v3623_v11 = vpop.f32.mrb[12].mxu1 }
 0x16e   :  { %v3625_v14 = vpop.f32.mrb[13].mxu1 }
 0x16f   :  { %v3627_v31 = vpop.f32.mrb[14].mxu1 }
 0x170   :  { %v3631_v17 = vpop.f32.mrb[15].mxu1 }
 0x175   :  { %v1526_v20 = vpop.f32.mrb[16].mxu1 }
 0x176   :  { %v1825_v43 = vpop.f32.mrb[0].mxu0  ;;  %v2332_v49 = vadd.f32 %v1526_v20, %v3629_v33  ;;  %v1528_v51 = vpop.f32.mrb[17].mxu1 }
 0x177   :  { %v2301_v23 = vadd.f32 %v2300_v37, %v1825_v43  ;;  %v1827_v55 = vpop.f32.mrb[1].mxu0  ;;  %v2336_v61 = vadd.f32 %v1528_v51, %v3633_v18  ;;  %v1530_v4 = vpop.f32.mrb[18].mxu1 }
 0x178   :  { %v2303_v63 = vadd.f32 %v2302_v39, %v1827_v55  ;;  %v1829_v6 = vpop.f32.mrb[2].mxu0  ;;  %v2340_v12 = vadd.f32 %v1530_v4, %v3629_v33  ;;  %v1532_v22 = vpop.f32.mrb[19].mxu1  ;;  %v3642_v26 = vadd.f32 %v2332_v49, %v1639_v36  ;;  %v2310_v36 = vadd.f32 %v1498_v0, %v3633_v18 }
 0x179   :  { %v2305_v16 = vadd.f32 %v2304_v45, %v1829_v6  ;;  %v1831_v24 = vpop.f32.mrb[3].mxu0  ;;  %v2344_v29 = vadd.f32 %v1532_v22, %v3633_v18  ;;  %v3645_v32 = vadd.f32 %v2336_v61, %v1641_v38  ;;  %v2318_v61 = vadd.f32 %v3614_v5, %v3633_v18 }
 0x17a   :  { %v2252_v28 = vpack.c.bf16 %v2303_v63, %v2301_v23  ;;  %v2307_v30 = vadd.f32 %v2306_v57, %v1831_v24  ;;  %v3647_v34 = vadd.f32 %v2340_v12, %v1643_v40  ;;  %v2312_v40 = vadd.f32 %v1500_v1, %v3629_v33 }
 0x17b   :  { %v3653_v60 = vadd.f32 %v2344_v29, %v3586_v41  ;;  %v2314_v41 = vadd.f32 %v1502_v13, %v3633_v18  ;;  %v2320_v63 = vadd.f32 %v3616_v19, %v3629_v33 }
 0x17c   :  { %2000 = vst [vmem:[%s3787_s3] sm:$0xff] %v2252_v28  ;;  %v2253_v35 = vpack.c.bf16 %v2307_v30, %v2305_v16 }
 0x17d   :  { %v1536_v38 = vpop.f32.mrb[20].mxu1 }
 0x17e   :  { %2001 = vst [vmem:[%s3787_s3 + $0x8] sm:$0xff] %v2253_v35  ;;  %v1835_v62 = vpop.f32.mrb[4].mxu0  ;;  %v2348_v7 = vadd.f32 %v1536_v38, %v3629_v33  ;;  %v1538_v21 = vpop.f32.mrb[21].mxu1 }
 0x17f   :  { %v2309_v15 = vadd.f32 %v2308_v3, %v1835_v62  ;;  %v1837_v10 = vpop.f32.mrb[5].mxu0  ;;  %v2352_v25 = vadd.f32 %v1538_v21, %v3633_v18  ;;  %v1540_v27 = vpop.f32.mrb[22].mxu1  ;;  %v2328_v21 = vadd.f32 %v3627_v31, %v3629_v33 }
 0x180   :  { %v2311_v9 = vadd.f32 %v2310_v36, %v1837_v10  ;;  %v1839_v0 = vpop.f32.mrb[6].mxu0  ;;  %v2356_v37 = vadd.f32 %v1540_v27, %v3629_v33  ;;  %v1542_v20 = vpop.f32.mrb[23].mxu1  ;;  %v3666_v45 = vadd.f32 %v2348_v7, %v3588_v42  ;;  %v2316_v42 = vadd.f32 %v3612_v2, %v3629_v33 }
 0x181   :  { %v2313_v39 = vadd.f32 %v2312_v40, %v1839_v0  ;;  %v1841_v43 = vpop.f32.mrb[7].mxu0  ;;  %v2360_v49 = vadd.f32 %v1542_v20, %v3633_v18  ;;  %v3670_v51 = vadd.f32 %v2352_v25, %v3590_v44  ;;  %v2322_v2 = vadd.f32 %v3618_v8, %v3633_v18 }
 0x182   :  { %v2254_v1 = vpack.c.bf16 %v2311_v9, %v2309_v15  ;;  %v2315_v23 = vadd.f32 %v2314_v41, %v1841_v43  ;;  %v3673_v13 = vadd.f32 %v2356_v37, %v3592_v46  ;;  %v2326_v15 = vadd.f32 %v3625_v14, %v3633_v18 }
 0x183   :  { %v3679_v57 = vadd.f32 %v2360_v49, %v3594_v47 }
 0x184   :  { %2002 = vst [vmem:[%s3787_s3 + $0x10] sm:$0xff] %v2254_v1  ;;  %v2255_v55 = vpack.c.bf16 %v2315_v23, %v2313_v39 }
 0x185   :  { %v1546_v44 = vpop.f32.mrb[24].mxu1 }
 0x186   :  { %2003 = vst [vmem:[%s3787_s3 + $0x18] sm:$0xff] %v2255_v55  ;;  %v1845_v46 = vpop.f32.mrb[8].mxu0  ;;  %v2364_v4 = vadd.f32 %v1546_v44, %v3629_v33  ;;  %v1548_v47 = vpop.f32.mrb[25].mxu1 }
 0x187   :  { %v2317_v6 = vadd.f32 %v2316_v42, %v1845_v46  ;;  %v1847_v12 = vpop.f32.mrb[9].mxu0  ;;  %v2368_v16 = vadd.f32 %v1548_v47, %v3633_v18  ;;  %v1550_v22 = vpop.f32.mrb[26].mxu1 }
 0x188   :  { %v2319_v5 = vadd.f32 %v2318_v61, %v1847_v12  ;;  %v1849_v24 = vpop.f32.mrb[10].mxu0  ;;  %v2372_v28 = vadd.f32 %v1550_v22, %v3629_v33  ;;  %v1552_v30 = vpop.f32.mrb[27].mxu1  ;;  %v3696_v19 = vadd.f32 %v2364_v4, %v3596_v48  ;;  %v2324_v48 = vadd.f32 %v3623_v11, %v3629_v33 }
 0x189   :  { %v2321_v29 = vadd.f32 %v2320_v63, %v1849_v24  ;;  %v1851_v35 = vpop.f32.mrb[11].mxu0  ;;  %v2376_v36 = vadd.f32 %v1552_v30, %v3633_v18  ;;  %v3700_v62 = vadd.f32 %v2368_v16, %v3598_v50  ;;  %v2330_v11 = vadd.f32 %v3631_v17, %v3633_v18 }
 0x18a   :  { %v2256_v3 = vpack.c.bf16 %v2319_v5, %v2317_v6  ;;  %v2323_v38 = vadd.f32 %v2322_v2, %v1851_v35  ;;  %v3703_v8 = vadd.f32 %v2372_v28, %v3600_v52 }
 0x18b   :  { %v3709_v7 = vadd.f32 %v2376_v36, %v3602_v53 }
 0x18c   :  { %2004 = vst [vmem:[%s3787_s3 + $0x20] sm:$0xff] %v2256_v3  ;;  %v2257_v40 = vpack.c.bf16 %v2323_v38, %v2321_v29 }
 0x18d   :  { %v1556_v50 = vpop.f32.mrb[28].mxu1 }
 0x18e   :  { %2005 = vst [vmem:[%s3787_s3 + $0x28] sm:$0xff] %v2257_v40  ;;  %v1855_v52 = vpop.f32.mrb[12].mxu0  ;;  %v2380_v10 = vadd.f32 %v1556_v50, %v3629_v33  ;;  %v1558_v53 = vpop.f32.mrb[29].mxu1 }
 0x18f   :  { %v2325_v41 = vadd.f32 %v2324_v48, %v1855_v52  ;;  %v1857_v25 = vpop.f32.mrb[13].mxu0  ;;  %v2384_v9 = vadd.f32 %v1558_v53, %v3633_v18  ;;  %v1560_v27 = vpop.f32.mrb[30].mxu1 }
 0x190   :  { %v2327_v14 = vadd.f32 %v2326_v15, %v1857_v25  ;;  %v1859_v0 = vpop.f32.mrb[14].mxu0  ;;  %v2388_v37 = vadd.f32 %v1560_v27, %v3629_v33  ;;  %v1562_v20 = vpop.f32.mrb[31].mxu1  ;;  %v3726_v31 = vadd.f32 %v2380_v10, %v3604_v54 }
 0x191   :  { %v2329_v39 = vadd.f32 %v2328_v21, %v1859_v0  ;;  %v1861_v43 = vpop.f32.mrb[15].mxu0  ;;  %v2392_v49 = vadd.f32 %v1562_v20, %v3633_v18  ;;  %v3730_v55 = vadd.f32 %v2384_v9, %v3606_v56 }
 0x192   :  { %v2258_v1 = vpack.c.bf16 %v2327_v14, %v2325_v41  ;;  %v2331_v23 = vadd.f32 %v2330_v11, %v1861_v43  ;;  %v3733_v17 = vadd.f32 %v2388_v37, %v3608_v58 }
 0x193   :  { %v3739_v42 = vadd.f32 %v2392_v49, %v3610_v59 }
 0x194   :  { %2006 = vst [vmem:[%s3787_s3 + $0x30] sm:$0xff] %v2258_v1  ;;  %v2259_v33 = vpack.c.bf16 %v2331_v23, %v2329_v39 }
 0x195   :  { %v1752_v54 = vpop.f32.mrb[32].mxu1 }
 0x196   :  { %2007 = vst [vmem:[%s3787_s3 + $0x38] sm:$0xff] %v2259_v33  ;;  %v1865_v18 = vpop.f32.mrb[32].mxu0  ;;  %v2334_v56 = vadd.f32 %v3642_v26, %v1752_v54  ;;  %v1754_v61 = vpop.f32.mrb[33].mxu1 }
 0x197   :  { %v1867_v44 = vpop.f32.mrb[33].mxu0  ;;  %v2338_v58 = vadd.f32 %v3645_v32, %v1754_v61  ;;  %v1756_v46 = vpop.f32.mrb[34].mxu1 }
 0x198   :  { %v1869_v63 = vpop.f32.mrb[34].mxu0  ;;  %v2335_v4 = vadd.f32 %v2334_v56, %v1865_v18  ;;  %v2342_v6 = vadd.f32 %v3647_v34, %v1756_v46  ;;  %v1758_v47 = vpop.f32.mrb[35].mxu1 }
 0x199   :  { %v1871_v59 = vpop.f32.mrb[35].mxu0  ;;  %v2339_v12 = vadd.f32 %v2338_v58, %v1867_v44  ;;  %v2346_v2 = vadd.f32 %v3653_v60, %v1758_v47 }
 0x19a   :  { %v2343_v16 = vadd.f32 %v2342_v6, %v1869_v63 }
 0x19b   :  { %v2260_v5 = vpack.c.bf16 %v2339_v12, %v2335_v4  ;;  %v2347_v22 = vadd.f32 %v2346_v2, %v1871_v59 }
 0x19d   :  { %2008 = vst [vmem:[%s3787_s3 + $0x40] sm:$0xff] %v2260_v5  ;;  %v2261_v26 = vpack.c.bf16 %v2347_v22, %v2343_v16  ;;  %v1762_v24 = vpop.f32.mrb[36].mxu1 }
 0x19e   :  { %v1875_v32 = vpop.f32.mrb[36].mxu0  ;;  %v2350_v28 = vadd.f32 %v3666_v45, %v1762_v24  ;;  %v1764_v29 = vpop.f32.mrb[37].mxu1 }
 0x19f   :  { %v1877_v30 = vpop.f32.mrb[37].mxu0  ;;  %2009 = vst [vmem:[%s3787_s3 + $0x48] sm:$0xff] %v2261_v26  ;;  %v2354_v34 = vadd.f32 %v3670_v51, %v1764_v29  ;;  %v1766_v60 = vpop.f32.mrb[38].mxu1 }
 0x1a0   :  { %v1879_v35 = vpop.f32.mrb[38].mxu0  ;;  %v2351_v3 = vadd.f32 %v2350_v28, %v1875_v32  ;;  %v2358_v36 = vadd.f32 %v3673_v13, %v1766_v60  ;;  %v1768_v38 = vpop.f32.mrb[39].mxu1 }
 0x1a1   :  { %v1881_v40 = vpop.f32.mrb[39].mxu0  ;;  %v2355_v48 = vadd.f32 %v2354_v34, %v1877_v30  ;;  %v2362_v15 = vadd.f32 %v3679_v57, %v1768_v38 }
 0x1a2   :  { %v2359_v50 = vadd.f32 %v2358_v36, %v1879_v35 }
 0x1a3   :  { %v2262_v45 = vpack.c.bf16 %v2355_v48, %v2351_v3  ;;  %v2363_v52 = vadd.f32 %v2362_v15, %v1881_v40 }
 0x1a5   :  { %2010 = vst [vmem:[%s3787_s3 + $0x50] sm:$0xff] %v2262_v45  ;;  %v2263_v21 = vpack.c.bf16 %v2363_v52, %v2359_v50  ;;  %v1772_v10 = vpop.f32.mrb[40].mxu1 }
 0x1a6   :  { %v1885_v51 = vpop.f32.mrb[40].mxu0  ;;  %v2366_v41 = vadd.f32 %v3696_v19, %v1772_v10  ;;  %v1774_v53 = vpop.f32.mrb[41].mxu1 }
 0x1a7   :  { %v1887_v25 = vpop.f32.mrb[41].mxu0  ;;  %2011 = vst [vmem:[%s3787_s3 + $0x58] sm:$0xff] %v2263_v21  ;;  %v2370_v13 = vadd.f32 %v3700_v62, %v1774_v53  ;;  %v1776_v57 = vpop.f32.mrb[42].mxu1 }
 0x1a8   :  { %v1889_v11 = vpop.f32.mrb[42].mxu0  ;;  %v2367_v9 = vadd.f32 %v2366_v41, %v1885_v51  ;;  %v2374_v14 = vadd.f32 %v3703_v8, %v1776_v57  ;;  %v1778_v27 = vpop.f32.mrb[43].mxu1 }
 0x1a9   :  { %v1891_v0 = vpop.f32.mrb[43].mxu0  ;;  %v2371_v37 = vadd.f32 %v2370_v13, %v1887_v25  ;;  %v2378_v39 = vadd.f32 %v3709_v7, %v1778_v27 }
 0x1aa   :  { %v2375_v20 = vadd.f32 %v2374_v14, %v1889_v11 }
 0x1ab   :  { %v2264_v19 = vpack.c.bf16 %v2371_v37, %v2367_v9  ;;  %v2379_v43 = vadd.f32 %v2378_v39, %v1891_v0 }
 0x1ad   :  { %2012 = vst [vmem:[%s3787_s3 + $0x60] sm:$0xff] %v2264_v19  ;;  %v2265_v1 = vpack.c.bf16 %v2379_v43, %v2375_v20  ;;  %v1782_v49 = vpop.f32.mrb[44].mxu1 }
 0x1ae   :  { %v1895_v62 = vpop.f32.mrb[44].mxu0  ;;  %v2382_v23 = vadd.f32 %v3726_v31, %v1782_v49  ;;  %v1784_v33 = vpop.f32.mrb[45].mxu1 }
 0x1af   :  { %v1897_v54 = vpop.f32.mrb[45].mxu0  ;;  %2013 = vst [vmem:[%s3787_s3 + $0x68] sm:$0xff] %v2265_v1  ;;  %v2386_v8 = vadd.f32 %v3730_v55, %v1784_v33  ;;  %v1786_v7 = vpop.f32.mrb[46].mxu1 }
 0x1b0   :  { %v1899_v18 = vpop.f32.mrb[46].mxu0  ;;  %v2383_v56 = vadd.f32 %v2382_v23, %v1895_v62  ;;  %v2390_v61 = vadd.f32 %v3733_v17, %v1786_v7  ;;  %v1788_v44 = vpop.f32.mrb[47].mxu1 }
 0x1b1   :  { %v1901_v58 = vpop.f32.mrb[47].mxu0  ;;  %v2387_v46 = vadd.f32 %v2386_v8, %v1897_v54  ;;  %v2394_v63 = vadd.f32 %v3739_v42, %v1788_v44 }
 0x1b2   :  { %v2391_v4 = vadd.f32 %v2390_v61, %v1899_v18 }
 0x1b3   :  { %v2266_v31 = vpack.c.bf16 %v2387_v46, %v2383_v56  ;;  %v2395_v6 = vadd.f32 %v2394_v63, %v1901_v58 }
 0x1b5   :  { %2014 = vst [vmem:[%s3787_s3 + $0x70] sm:$0xff] %v2266_v31  ;;  %v2267_v47 = vpack.c.bf16 %v2395_v6, %v2391_v4 }
 0x1b7   :  { %2015 = vst [vmem:[%s3787_s3 + $0x78] sm:$0xff] %v2267_v47 }

// kernel: enhanced_vqvae_forward.15
= control target key start
LH: loop header
LB: loop body
LE: loop exit
PB: predicated region body
PF: predicated region fallthrough
CT: control target
= control target key end

     0   :  { %s8311_s1 = inlined_call_operand.vmem [shape: bf16[2304,512], index: 1, kind: input, shape index: {}]   ;;  %s8312_s0 = inlined_call_operand.vmem [shape: bf16[32,2304], index: 0, kind: input, shape index: {}]   ;;  %s8313_s2 = inlined_call_operand.vmem [shape: f32[1,512], index: 2, kind: input, shape index: {}]   ;;  %s8314_s3 = inlined_call_operand.vmem [shape: bf16[32,512], index: 3, kind: output, shape index: {}]  }
   0x1   :  { %v5510_v0 = vld [vmem:[%s8311_s1 + $0x4] ss:$16 sps:$4 sm:$0xff]   ;;  %v5512_v1 = vld [vmem:[%s8311_s1 + $0xc] ss:$16 sps:$4 sm:$0xff]   ;;  %v5514_v2 = vld [vmem:[%s8311_s1] ss:$16 sps:$4 sm:$0xff]  }
   0x2   :  { %3708 = vmatprep.subr.bf16.mxu0 %v5510_v0  ;;  %v5515_v3 = vld [vmem:[%s8311_s1 + $0x8] ss:$16 sps:$4 sm:$0xff]   ;;  %4185 = vmatprep.subr.bf16.mxu1 %v5512_v1  ;;  %v5516_v4 = vld [vmem:[%s8311_s1 + $0x24] ss:$16 sps:$4 sm:$0xff]   ;;  %v5518_v5 = vld [vmem:[%s8311_s1 + $0x2c] ss:$16 sps:$4 sm:$0xff]  }
   0x3   :  { %3709 = vmatpush1.bf16.msra.mxu0 %v5514_v2  ;;  %4186 = vmatpush1.bf16.msra.mxu1 %v5515_v3  ;;  %v5520_v6 = vld [vmem:[%s8311_s1 + $0x20] ss:$16 sps:$4 sm:$0xff]   ;;  %v5521_v7 = vld [vmem:[%s8311_s1 + $0x28] ss:$16 sps:$4 sm:$0xff]   ;;  %v5522_v8 = vld [vmem:[%s8311_s1 + $0x44] ss:$16 sps:$4 sm:$0xff]  }
   0x4   :  { %3710 = vmatprep.subr.bf16.mxu0 %v5516_v4  ;;  %4187 = vmatprep.subr.bf16.mxu1 %v5518_v5  ;;  %v5524_v9 = vld [vmem:[%s8311_s1 + $0x4c] ss:$16 sps:$4 sm:$0xff]   ;;  %v5526_v10 = vld [vmem:[%s8311_s1 + $0x40] ss:$16 sps:$4 sm:$0xff]   ;;  %v5527_v11 = vld [vmem:[%s8311_s1 + $0x48] ss:$16 sps:$4 sm:$0xff]  }
   0x5   :  { %v5528_v12 = vld [vmem:[%s8311_s1 + $0x64] ss:$16 sps:$4 sm:$0xff]   ;;  %v5530_v13 = vld [vmem:[%s8311_s1 + $0x6c] ss:$16 sps:$4 sm:$0xff]   ;;  %v5532_v14 = vld [vmem:[%s8311_s1 + $0x60] ss:$16 sps:$4 sm:$0xff]  }
   0x6   :  { %v5533_v15 = vld [vmem:[%s8311_s1 + $0x68] ss:$16 sps:$4 sm:$0xff]   ;;  %v5534_v16 = vld [vmem:[%s8311_s1 + $0x84] ss:$16 sps:$4 sm:$0xff]   ;;  %v5536_v17 = vld [vmem:[%s8311_s1 + $0x8c] ss:$16 sps:$4 sm:$0xff]  }
   0x7   :  { %3711 = vmatpush1.bf16.msra.mxu0 %v5520_v6  ;;  %4188 = vmatpush1.bf16.msra.mxu1 %v5521_v7  ;;  %v5538_v18 = vld [vmem:[%s8311_s1 + $0x80] ss:$16 sps:$4 sm:$0xff]   ;;  %v5539_v19 = vld [vmem:[%s8311_s1 + $0x88] ss:$16 sps:$4 sm:$0xff]   ;;  %v5540_v20 = vld [vmem:[%s8311_s1 + $0xa4] ss:$16 sps:$4 sm:$0xff]  }
   0x8   :  { %3712 = vmatprep.subr.bf16.mxu0 %v5522_v8  ;;  %4189 = vmatprep.subr.bf16.mxu1 %v5524_v9  ;;  %v5542_v21 = vld [vmem:[%s8311_s1 + $0xac] ss:$16 sps:$4 sm:$0xff]   ;;  %v5544_v22 = vld [vmem:[%s8311_s1 + $0xa0] ss:$16 sps:$4 sm:$0xff]   ;;  %v5545_v23 = vld [vmem:[%s8311_s1 + $0xa8] ss:$16 sps:$4 sm:$0xff]  }
   0x9   :  { %v5546_v24 = vld [vmem:[%s8311_s1 + $0xc4] ss:$16 sps:$4 sm:$0xff]   ;;  %v5548_v25 = vld [vmem:[%s8311_s1 + $0xcc] ss:$16 sps:$4 sm:$0xff]   ;;  %v5550_v26 = vld [vmem:[%s8311_s1 + $0xc0] ss:$16 sps:$4 sm:$0xff]  }
   0xa   :  { %v5551_v27 = vld [vmem:[%s8311_s1 + $0xc8] ss:$16 sps:$4 sm:$0xff]   ;;  %v5552_v28 = vld [vmem:[%s8311_s1 + $0xe4] ss:$16 sps:$4 sm:$0xff]   ;;  %v5554_v29 = vld [vmem:[%s8311_s1 + $0xec] ss:$16 sps:$4 sm:$0xff]  }
   0xb   :  { %3713 = vmatpush1.bf16.msra.mxu0 %v5526_v10  ;;  %4190 = vmatpush1.bf16.msra.mxu1 %v5527_v11  ;;  %v5556_v30 = vld [vmem:[%s8311_s1 + $0xe0] ss:$16 sps:$4 sm:$0xff]   ;;  %v5557_v31 = vld [vmem:[%s8311_s1 + $0xe8] ss:$16 sps:$4 sm:$0xff]   ;;  %v5558_v32 = vld [vmem:[%s8311_s1 + $0x104] ss:$16 sps:$4 sm:$0xff]  }
   0xc   :  { %3714 = vmatprep.subr.bf16.mxu0 %v5528_v12  ;;  %4191 = vmatprep.subr.bf16.mxu1 %v5530_v13  ;;  %v5560_v33 = vld [vmem:[%s8311_s1 + $0x10c] ss:$16 sps:$4 sm:$0xff]   ;;  %v5562_v34 = vld [vmem:[%s8311_s1 + $0x100] ss:$16 sps:$4 sm:$0xff]   ;;  %v5563_v35 = vld [vmem:[%s8311_s1 + $0x108] ss:$16 sps:$4 sm:$0xff]  }
   0xd   :  { %v5564_v36 = vld [vmem:[%s8311_s1 + $0x124] ss:$16 sps:$4 sm:$0xff]   ;;  %v5566_v37 = vld [vmem:[%s8311_s1 + $0x12c] ss:$16 sps:$4 sm:$0xff]   ;;  %v5568_v38 = vld [vmem:[%s8311_s1 + $0x120] ss:$16 sps:$4 sm:$0xff]  }
   0xe   :  { %v5569_v39 = vld [vmem:[%s8311_s1 + $0x128] ss:$16 sps:$4 sm:$0xff]   ;;  %v5570_v40 = vld [vmem:[%s8311_s1 + $0x144] ss:$16 sps:$4 sm:$0xff]   ;;  %v5572_v41 = vld [vmem:[%s8311_s1 + $0x14c] ss:$16 sps:$4 sm:$0xff]  }
   0xf   :  { %3715 = vmatpush1.bf16.msra.mxu0 %v5532_v14  ;;  %4192 = vmatpush1.bf16.msra.mxu1 %v5533_v15  ;;  %v5574_v42 = vld [vmem:[%s8311_s1 + $0x140] ss:$16 sps:$4 sm:$0xff]   ;;  %v5575_v43 = vld [vmem:[%s8311_s1 + $0x148] ss:$16 sps:$4 sm:$0xff]   ;;  %v5576_v44 = vld [vmem:[%s8311_s1 + $0x164] ss:$16 sps:$4 sm:$0xff]  }
  0x10   :  { %3716 = vmatprep.subr.bf16.mxu0 %v5534_v16  ;;  %4193 = vmatprep.subr.bf16.mxu1 %v5536_v17  ;;  %v5578_v45 = vld [vmem:[%s8311_s1 + $0x16c] ss:$16 sps:$4 sm:$0xff]   ;;  %v5580_v46 = vld [vmem:[%s8311_s1 + $0x160] ss:$16 sps:$4 sm:$0xff]   ;;  %v5581_v47 = vld [vmem:[%s8311_s1 + $0x168] ss:$16 sps:$4 sm:$0xff]  }
  0x11   :  { %v5608_v48 = vld [vmem:[%s8312_s0 + $0x4] ss:$72 sps:$4 sm:$0xff]   ;;  %v5586_v51 = vld [vmem:[%s8311_s1 + $0x180] ss:$16 sps:$4 sm:$0xff]   ;;  %v5587_v52 = vld [vmem:[%s8311_s1 + $0x188] ss:$16 sps:$4 sm:$0xff]  }
  0x12   :  { %v5582_v49 = vld [vmem:[%s8311_s1 + $0x184] ss:$16 sps:$4 sm:$0xff]   ;;  %v5584_v50 = vld [vmem:[%s8311_s1 + $0x18c] ss:$16 sps:$4 sm:$0xff]   ;;  %3740 = vmatprep.mubr.bf16.mxu0 %v5608_v48  ;;  %4217 = vmatprep.mubr.bf16.mxu1 %v5608_v48  ;;  %v5592_v55 = vld [vmem:[%s8311_s1 + $0x1a0] ss:$16 sps:$4 sm:$0xff]  }
  0x13   :  { %3717 = vmatpush1.bf16.msra.mxu0 %v5538_v18  ;;  %4194 = vmatpush1.bf16.msra.mxu1 %v5539_v19  ;;  %v5588_v53 = vld [vmem:[%s8311_s1 + $0x1a4] ss:$16 sps:$4 sm:$0xff]   ;;  %v5590_v54 = vld [vmem:[%s8311_s1 + $0x1ac] ss:$16 sps:$4 sm:$0xff]   ;;  %v5593_v56 = vld [vmem:[%s8311_s1 + $0x1a8] ss:$16 sps:$4 sm:$0xff]  }
  0x14   :  { %3718 = vmatprep.subr.bf16.mxu0 %v5540_v20  ;;  %4195 = vmatprep.subr.bf16.mxu1 %v5542_v21  ;;  %v5594_v57 = vld [vmem:[%s8311_s1 + $0x1c4] ss:$16 sps:$4 sm:$0xff]   ;;  %v5596_v58 = vld [vmem:[%s8311_s1 + $0x1cc] ss:$16 sps:$4 sm:$0xff]   ;;  %v5598_v59 = vld [vmem:[%s8311_s1 + $0x1c0] ss:$16 sps:$4 sm:$0xff]  }
  0x15   :  { %v5599_v60 = vld [vmem:[%s8311_s1 + $0x1c8] ss:$16 sps:$4 sm:$0xff]   ;;  %v5600_v61 = vld [vmem:[%s8311_s1 + $0x1e4] ss:$16 sps:$4 sm:$0xff]   ;;  %v5602_v62 = vld [vmem:[%s8311_s1 + $0x1ec] ss:$16 sps:$4 sm:$0xff]  }
  0x16   :  { %v5604_v63 = vld [vmem:[%s8311_s1 + $0x1e0] ss:$16 sps:$4 sm:$0xff]   ;;  %v5605_v0 = vld [vmem:[%s8311_s1 + $0x1e8] ss:$16 sps:$4 sm:$0xff]   ;;  %v5611_v1 = vld [vmem:[%s8311_s1 + $0x204] ss:$16 sps:$4 sm:$0xff]  }
  0x17   :  { %3719 = vmatpush1.bf16.msra.mxu0 %v5544_v22  ;;  %4196 = vmatpush1.bf16.msra.mxu1 %v5545_v23  ;;  %v5614_v2 = vld [vmem:[%s8311_s1 + $0x20c] ss:$16 sps:$4 sm:$0xff]   ;;  %v5606_v3 = vld [vmem:[%s8312_s0] ss:$72 sps:$4 sm:$0xff]   ;;  %v5617_v6 = vld [vmem:[%s8311_s1 + $0x224] ss:$16 sps:$4 sm:$0xff]  }
  0x18   :  { %3720 = vmatprep.subr.bf16.mxu0 %v5546_v24  ;;  %4197 = vmatprep.subr.bf16.mxu1 %v5548_v25  ;;  %v5609_v4 = vld [vmem:[%s8311_s1 + $0x200] ss:$16 sps:$4 sm:$0xff]   ;;  %v5612_v5 = vld [vmem:[%s8311_s1 + $0x208] ss:$16 sps:$4 sm:$0xff]   ;;  %v5620_v7 = vld [vmem:[%s8311_s1 + $0x22c] ss:$16 sps:$4 sm:$0xff]  }
  0x19   :  { %v5615_v8 = vld [vmem:[%s8311_s1 + $0x220] ss:$16 sps:$4 sm:$0xff]   ;;  %v5618_v9 = vld [vmem:[%s8311_s1 + $0x228] ss:$16 sps:$4 sm:$0xff]   ;;  %v5623_v10 = vld [vmem:[%s8311_s1 + $0x244] ss:$16 sps:$4 sm:$0xff]  }
  0x1a   :  { %v5626_v11 = vld [vmem:[%s8311_s1 + $0x24c] ss:$16 sps:$4 sm:$0xff]   ;;  %v5621_v12 = vld [vmem:[%s8311_s1 + $0x240] ss:$16 sps:$4 sm:$0xff]   ;;  %v5624_v13 = vld [vmem:[%s8311_s1 + $0x248] ss:$16 sps:$4 sm:$0xff]  }
  0x1b   :  { %3721 = vmatpush1.bf16.msra.mxu0 %v5550_v26  ;;  %4198 = vmatpush1.bf16.msra.mxu1 %v5551_v27  ;;  %v5629_v14 = vld [vmem:[%s8311_s1 + $0x264] ss:$16 sps:$4 sm:$0xff]   ;;  %v5632_v15 = vld [vmem:[%s8311_s1 + $0x26c] ss:$16 sps:$4 sm:$0xff]   ;;  %v5627_v16 = vld [vmem:[%s8311_s1 + $0x260] ss:$16 sps:$4 sm:$0xff]  }
  0x1c   :  { %3722 = vmatprep.subr.bf16.mxu0 %v5552_v28  ;;  %4199 = vmatprep.subr.bf16.mxu1 %v5554_v29  ;;  %v5630_v17 = vld [vmem:[%s8311_s1 + $0x268] ss:$16 sps:$4 sm:$0xff]   ;;  %v5635_v18 = vld [vmem:[%s8311_s1 + $0x284] ss:$16 sps:$4 sm:$0xff]   ;;  %v5638_v19 = vld [vmem:[%s8311_s1 + $0x28c] ss:$16 sps:$4 sm:$0xff]  }
  0x1d   :  { %v5633_v20 = vld [vmem:[%s8311_s1 + $0x280] ss:$16 sps:$4 sm:$0xff]   ;;  %v5636_v21 = vld [vmem:[%s8311_s1 + $0x288] ss:$16 sps:$4 sm:$0xff]   ;;  %v5641_v22 = vld [vmem:[%s8311_s1 + $0x2a4] ss:$16 sps:$4 sm:$0xff]  }
  0x1e   :  { %v5644_v23 = vld [vmem:[%s8311_s1 + $0x2ac] ss:$16 sps:$4 sm:$0xff]   ;;  %v5639_v25 = vld [vmem:[%s8311_s1 + $0x2a0] ss:$16 sps:$4 sm:$0xff]   ;;  %v5642_v26 = vld [vmem:[%s8311_s1 + $0x2a8] ss:$16 sps:$4 sm:$0xff]  }
  0x1f   :  { %3723 = vmatpush1.bf16.msra.mxu0 %v5556_v30  ;;  %4200 = vmatpush1.bf16.msra.mxu1 %v5557_v31  ;;  %v5693_v24 = vld [vmem:[%s8312_s0 + $0x94] ss:$72 sps:$4 sm:$0xff]   ;;  %v5701_v29 = vld [vmem:[%s8312_s0 + $0x90] ss:$72 sps:$4 sm:$0xff]  }
  0x20   :  { %3724 = vmatprep.subr.bf16.mxu0 %v5558_v32  ;;  %4201 = vmatprep.subr.bf16.mxu1 %v5560_v33  ;;  %v5647_v27 = vld [vmem:[%s8311_s1 + $0x2c4] ss:$16 sps:$4 sm:$0xff]   ;;  %v5650_v28 = vld [vmem:[%s8311_s1 + $0x2cc] ss:$16 sps:$4 sm:$0xff]   ;;  %v5645_v30 = vld [vmem:[%s8311_s1 + $0x2c0] ss:$16 sps:$4 sm:$0xff]  }
  0x21   :  { %v5648_v31 = vld [vmem:[%s8311_s1 + $0x2c8] ss:$16 sps:$4 sm:$0xff]   ;;  %v5653_v32 = vld [vmem:[%s8311_s1 + $0x2e4] ss:$16 sps:$4 sm:$0xff]   ;;  %v5656_v33 = vld [vmem:[%s8311_s1 + $0x2ec] ss:$16 sps:$4 sm:$0xff]  }
  0x22   :  { %v5672_v48 = vld [vmem:[%s8311_s1 + $0x348] ss:$16 sps:$4 sm:$0xff]  }
  0x23   :  { %3725 = vmatpush1.bf16.msra.mxu0 %v5562_v34  ;;  %4202 = vmatpush1.bf16.msra.mxu1 %v5563_v35  ;;  %v5710_v34 = vld [vmem:[%s8312_s0 + $0xc] ss:$72 sps:$4 sm:$0xff]   ;;  %v5651_v35 = vld [vmem:[%s8311_s1 + $0x2e0] ss:$16 sps:$4 sm:$0xff]  }
  0x24   :  { %3726 = vmatprep.subr.bf16.mxu0 %v5564_v36  ;;  %4203 = vmatprep.subr.bf16.mxu1 %v5566_v37  ;;  %v5654_v36 = vld [vmem:[%s8311_s1 + $0x2e8] ss:$16 sps:$4 sm:$0xff]   ;;  %v5659_v37 = vld [vmem:[%s8311_s1 + $0x304] ss:$16 sps:$4 sm:$0xff]  }
  0x27   :  { %3727 = vmatpush1.bf16.msra.mxu0 %v5568_v38  ;;  %4204 = vmatpush1.bf16.msra.mxu1 %v5569_v39  ;;  %v5662_v38 = vld [vmem:[%s8311_s1 + $0x30c] ss:$16 sps:$4 sm:$0xff]   ;;  %v5657_v39 = vld [vmem:[%s8311_s1 + $0x300] ss:$16 sps:$4 sm:$0xff]  }
  0x28   :  { %3728 = vmatprep.subr.bf16.mxu0 %v5570_v40  ;;  %4205 = vmatprep.subr.bf16.mxu1 %v5572_v41  ;;  %v5660_v40 = vld [vmem:[%s8311_s1 + $0x308] ss:$16 sps:$4 sm:$0xff]   ;;  %v5665_v41 = vld [vmem:[%s8311_s1 + $0x324] ss:$16 sps:$4 sm:$0xff]  }
  0x2b   :  { %3729 = vmatpush1.bf16.msra.mxu0 %v5574_v42  ;;  %4206 = vmatpush1.bf16.msra.mxu1 %v5575_v43  ;;  %v5668_v42 = vld [vmem:[%s8311_s1 + $0x32c] ss:$16 sps:$4 sm:$0xff]   ;;  %v5663_v43 = vld [vmem:[%s8311_s1 + $0x320] ss:$16 sps:$4 sm:$0xff]  }
  0x2c   :  { %3730 = vmatprep.subr.bf16.mxu0 %v5576_v44  ;;  %4207 = vmatprep.subr.bf16.mxu1 %v5578_v45  ;;  %v5666_v44 = vld [vmem:[%s8311_s1 + $0x328] ss:$16 sps:$4 sm:$0xff]   ;;  %v5671_v45 = vld [vmem:[%s8311_s1 + $0x344] ss:$16 sps:$4 sm:$0xff]  }
  0x2f   :  { %3731 = vmatpush1.bf16.msra.mxu0 %v5580_v46  ;;  %4208 = vmatpush1.bf16.msra.mxu1 %v5581_v47  ;;  %v5674_v46 = vld [vmem:[%s8311_s1 + $0x34c] ss:$16 sps:$4 sm:$0xff]   ;;  %v5669_v47 = vld [vmem:[%s8311_s1 + $0x340] ss:$16 sps:$4 sm:$0xff]  }
  0x30   :  { %3732 = vmatprep.subr.bf16.mxu0 %v5582_v49  ;;  %4209 = vmatprep.subr.bf16.mxu1 %v5584_v50  ;;  %v5677_v49 = vld [vmem:[%s8311_s1 + $0x364] ss:$16 sps:$4 sm:$0xff]   ;;  %v5680_v50 = vld [vmem:[%s8311_s1 + $0x36c] ss:$16 sps:$4 sm:$0xff]  }
  0x33   :  { %3733 = vmatpush1.bf16.msra.mxu0 %v5586_v51  ;;  %4210 = vmatpush1.bf16.msra.mxu1 %v5587_v52  ;;  %v5675_v51 = vld [vmem:[%s8311_s1 + $0x360] ss:$16 sps:$4 sm:$0xff]   ;;  %v5678_v52 = vld [vmem:[%s8311_s1 + $0x368] ss:$16 sps:$4 sm:$0xff]  }
  0x34   :  { %3734 = vmatprep.subr.bf16.mxu0 %v5588_v53  ;;  %4211 = vmatprep.subr.bf16.mxu1 %v5590_v54  ;;  %v5683_v53 = vld [vmem:[%s8311_s1 + $0x384] ss:$16 sps:$4 sm:$0xff]   ;;  %v5686_v54 = vld [vmem:[%s8311_s1 + $0x38c] ss:$16 sps:$4 sm:$0xff]  }
  0x37   :  { %3735 = vmatpush1.bf16.msra.mxu0 %v5592_v55  ;;  %4212 = vmatpush1.bf16.msra.mxu1 %v5593_v56  ;;  %v5681_v55 = vld [vmem:[%s8311_s1 + $0x380] ss:$16 sps:$4 sm:$0xff]   ;;  %v5684_v56 = vld [vmem:[%s8311_s1 + $0x388] ss:$16 sps:$4 sm:$0xff]  }
  0x38   :  { %3736 = vmatprep.subr.bf16.mxu0 %v5594_v57  ;;  %4213 = vmatprep.subr.bf16.mxu1 %v5596_v58  ;;  %v5689_v57 = vld [vmem:[%s8311_s1 + $0x3a4] ss:$16 sps:$4 sm:$0xff]   ;;  %v5692_v58 = vld [vmem:[%s8311_s1 + $0x3ac] ss:$16 sps:$4 sm:$0xff]  }
  0x3b   :  { %3737 = vmatpush1.bf16.msra.mxu0 %v5598_v59  ;;  %4214 = vmatpush1.bf16.msra.mxu1 %v5599_v60  ;;  %v5687_v59 = vld [vmem:[%s8311_s1 + $0x3a0] ss:$16 sps:$4 sm:$0xff]   ;;  %v5690_v60 = vld [vmem:[%s8311_s1 + $0x3a8] ss:$16 sps:$4 sm:$0xff]  }
  0x3c   :  { %3738 = vmatprep.subr.bf16.mxu0 %v5600_v61  ;;  %4215 = vmatprep.subr.bf16.mxu1 %v5602_v62  ;;  %v5697_v61 = vld [vmem:[%s8311_s1 + $0x3c4] ss:$16 sps:$4 sm:$0xff]   ;;  %v5700_v62 = vld [vmem:[%s8311_s1 + $0x3cc] ss:$16 sps:$4 sm:$0xff]  }
  0x3f   :  { %3739 = vmatpush1.bf16.msra.mxu0 %v5604_v63  ;;  %4216 = vmatpush1.bf16.msra.mxu1 %v5605_v0  ;;  %v5695_v63 = vld [vmem:[%s8311_s1 + $0x3c0] ss:$16 sps:$4 sm:$0xff]   ;;  %v5698_v0 = vld [vmem:[%s8311_s1 + $0x3c8] ss:$16 sps:$4 sm:$0xff]  }
  0x40   :  { %3761 = vmatprep.subr.bf16.mxu0 %v5611_v1  ;;  %4238 = vmatprep.subr.bf16.mxu1 %v5614_v2  ;;  %v5704_v1 = vld [vmem:[%s8311_s1 + $0x3e4] ss:$16 sps:$4 sm:$0xff]   ;;  %v5707_v2 = vld [vmem:[%s8311_s1 + $0x3ec] ss:$16 sps:$4 sm:$0xff]  }
  0x42   :  { %3741 = vmatmul.mubr.bf16.vlgmr.msra.gmra.mrb[0].mxu0 %v5606_v3  ;;  %4218 = vmatmul.mubr.bf16.vlgmr.msra.gmra.mrb[0].mxu1 %v5606_v3  ;;  %v5702_v3 = vld [vmem:[%s8311_s1 + $0x3e0] ss:$16 sps:$4 sm:$0xff]  }
  0x43   :  { %3762 = vmatpush1.bf16.msra.mxu0 %v5609_v4  ;;  %4239 = vmatpush1.bf16.msra.mxu1 %v5612_v5  ;;  %v5705_v4 = vld [vmem:[%s8311_s1 + $0x3e8] ss:$16 sps:$4 sm:$0xff]   ;;  %v5713_v5 = vld [vmem:[%s8311_s1 + $0x404] ss:$16 sps:$4 sm:$0xff]  }
  0x44   :  { %3763 = vmatprep.subr.bf16.mxu0 %v5617_v6  ;;  %4240 = vmatprep.subr.bf16.mxu1 %v5620_v7  ;;  %v5716_v6 = vld [vmem:[%s8311_s1 + $0x40c] ss:$16 sps:$4 sm:$0xff]   ;;  %v5708_v7 = vld [vmem:[%s8312_s0 + $0x8] ss:$72 sps:$4 sm:$0xff]  }
  0x45   :  { %3750 = vmatprep.mubr.bf16.mxu0 %v5693_v24  ;;  %4227 = vmatprep.mubr.bf16.mxu1 %v5693_v24  ;;  %v5732_v24 = vld [vmem:[%s8311_s1 + $0x468] ss:$16 sps:$4 sm:$0xff]  }
  0x47   :  { %3764 = vmatpush1.bf16.msra.mxu0 %v5615_v8  ;;  %4241 = vmatpush1.bf16.msra.mxu1 %v5618_v9  ;;  %v5711_v8 = vld [vmem:[%s8311_s1 + $0x400] ss:$16 sps:$4 sm:$0xff]   ;;  %v5714_v9 = vld [vmem:[%s8311_s1 + $0x408] ss:$16 sps:$4 sm:$0xff]  }
  0x48   :  { %3765 = vmatprep.subr.bf16.mxu0 %v5623_v10  ;;  %4242 = vmatprep.subr.bf16.mxu1 %v5626_v11  ;;  %v5719_v10 = vld [vmem:[%s8311_s1 + $0x424] ss:$16 sps:$4 sm:$0xff]   ;;  %v5722_v11 = vld [vmem:[%s8311_s1 + $0x42c] ss:$16 sps:$4 sm:$0xff]  }
  0x4a   :  { %3751 = vmatmul.mubr.bf16.gmra.mrb[4].mxu0 %v5701_v29  ;;  %4228 = vmatmul.mubr.bf16.gmra.mrb[4].mxu1 %v5701_v29  ;;  %v5743_v29 = vld [vmem:[%s8311_s1 + $0x4a4] ss:$16 sps:$4 sm:$0xff]  }
  0x4b   :  { %3766 = vmatpush1.bf16.msra.mxu0 %v5621_v12  ;;  %4243 = vmatpush1.bf16.msra.mxu1 %v5624_v13  ;;  %v5795_v12 = vld [vmem:[%s8312_s0 + $0x9c] ss:$72 sps:$4 sm:$0xff]   ;;  %v5717_v13 = vld [vmem:[%s8311_s1 + $0x420] ss:$16 sps:$4 sm:$0xff]  }
  0x4c   :  { %3767 = vmatprep.subr.bf16.mxu0 %v5629_v14  ;;  %4244 = vmatprep.subr.bf16.mxu1 %v5632_v15  ;;  %v5720_v14 = vld [vmem:[%s8311_s1 + $0x428] ss:$16 sps:$4 sm:$0xff]   ;;  %v5725_v15 = vld [vmem:[%s8311_s1 + $0x444] ss:$16 sps:$4 sm:$0xff]  }
  0x4d   :  { %3793 = vmatprep.mubr.bf16.mxu0 %v5710_v34  ;;  %4270 = vmatprep.mubr.bf16.mxu1 %v5710_v34  ;;  %v5752_v34 = vld [vmem:[%s8311_s1 + $0x4cc] ss:$16 sps:$4 sm:$0xff]  }
  0x4f   :  { %3768 = vmatpush1.bf16.msra.mxu0 %v5627_v16  ;;  %4245 = vmatpush1.bf16.msra.mxu1 %v5630_v17  ;;  %v5728_v16 = vld [vmem:[%s8311_s1 + $0x44c] ss:$16 sps:$4 sm:$0xff]   ;;  %v5723_v17 = vld [vmem:[%s8311_s1 + $0x440] ss:$16 sps:$4 sm:$0xff]  }
  0x50   :  { %3769 = vmatprep.subr.bf16.mxu0 %v5635_v18  ;;  %4246 = vmatprep.subr.bf16.mxu1 %v5638_v19  ;;  %v5726_v18 = vld [vmem:[%s8311_s1 + $0x448] ss:$16 sps:$4 sm:$0xff]  }
  0x51   :  { %v5803_v19 = vld [vmem:[%s8312_s0 + $0x98] ss:$72 sps:$4 sm:$0xff]  }
  0x53   :  { %3770 = vmatpush1.bf16.msra.mxu0 %v5633_v20  ;;  %4247 = vmatpush1.bf16.msra.mxu1 %v5636_v21  ;;  %v5731_v20 = vld [vmem:[%s8311_s1 + $0x464] ss:$16 sps:$4 sm:$0xff]   ;;  %v5734_v21 = vld [vmem:[%s8311_s1 + $0x46c] ss:$16 sps:$4 sm:$0xff]  }
  0x54   :  { %3771 = vmatprep.subr.bf16.mxu0 %v5641_v22  ;;  %4248 = vmatprep.subr.bf16.mxu1 %v5644_v23  ;;  %v5812_v22 = vld [vmem:[%s8312_s0 + $0x14] ss:$72 sps:$4 sm:$0xff]   ;;  %v5729_v23 = vld [vmem:[%s8311_s1 + $0x460] ss:$16 sps:$4 sm:$0xff]  }
  0x57   :  { %3772 = vmatpush1.bf16.msra.mxu0 %v5639_v25  ;;  %4249 = vmatpush1.bf16.msra.mxu1 %v5642_v26  ;;  %v5737_v25 = vld [vmem:[%s8311_s1 + $0x484] ss:$16 sps:$4 sm:$0xff]   ;;  %v5740_v26 = vld [vmem:[%s8311_s1 + $0x48c] ss:$16 sps:$4 sm:$0xff]  }
  0x58   :  { %3773 = vmatprep.subr.bf16.mxu0 %v5647_v27  ;;  %4250 = vmatprep.subr.bf16.mxu1 %v5650_v28  ;;  %v5735_v27 = vld [vmem:[%s8311_s1 + $0x480] ss:$16 sps:$4 sm:$0xff]   ;;  %v5738_v28 = vld [vmem:[%s8311_s1 + $0x488] ss:$16 sps:$4 sm:$0xff]  }
  0x5b   :  { %3774 = vmatpush1.bf16.msra.mxu0 %v5645_v30  ;;  %4251 = vmatpush1.bf16.msra.mxu1 %v5648_v31  ;;  %v5746_v30 = vld [vmem:[%s8311_s1 + $0x4ac] ss:$16 sps:$4 sm:$0xff]   ;;  %v5741_v31 = vld [vmem:[%s8311_s1 + $0x4a0] ss:$16 sps:$4 sm:$0xff]  }
  0x5c   :  { %3775 = vmatprep.subr.bf16.mxu0 %v5653_v32  ;;  %4252 = vmatprep.subr.bf16.mxu1 %v5656_v33  ;;  %v5744_v32 = vld [vmem:[%s8311_s1 + $0x4a8] ss:$16 sps:$4 sm:$0xff]   ;;  %v5749_v33 = vld [vmem:[%s8311_s1 + $0x4c4] ss:$16 sps:$4 sm:$0xff]  }
  0x5f   :  { %3776 = vmatpush1.bf16.msra.mxu0 %v5651_v35  ;;  %4253 = vmatpush1.bf16.msra.mxu1 %v5654_v36  ;;  %v5747_v35 = vld [vmem:[%s8311_s1 + $0x4c0] ss:$16 sps:$4 sm:$0xff]   ;;  %v5750_v36 = vld [vmem:[%s8311_s1 + $0x4c8] ss:$16 sps:$4 sm:$0xff]  }
  0x60   :  { %3777 = vmatprep.subr.bf16.mxu0 %v5659_v37  ;;  %4254 = vmatprep.subr.bf16.mxu1 %v5662_v38  ;;  %v5755_v37 = vld [vmem:[%s8311_s1 + $0x4e4] ss:$16 sps:$4 sm:$0xff]   ;;  %v5758_v38 = vld [vmem:[%s8311_s1 + $0x4ec] ss:$16 sps:$4 sm:$0xff]  }
  0x63   :  { %3778 = vmatpush1.bf16.msra.mxu0 %v5657_v39  ;;  %4255 = vmatpush1.bf16.msra.mxu1 %v5660_v40  ;;  %v5753_v39 = vld [vmem:[%s8311_s1 + $0x4e0] ss:$16 sps:$4 sm:$0xff]   ;;  %v5756_v40 = vld [vmem:[%s8311_s1 + $0x4e8] ss:$16 sps:$4 sm:$0xff]  }
  0x64   :  { %3779 = vmatprep.subr.bf16.mxu0 %v5665_v41  ;;  %4256 = vmatprep.subr.bf16.mxu1 %v5668_v42  ;;  %v5761_v41 = vld [vmem:[%s8311_s1 + $0x504] ss:$16 sps:$4 sm:$0xff]   ;;  %v5764_v42 = vld [vmem:[%s8311_s1 + $0x50c] ss:$16 sps:$4 sm:$0xff]  }
  0x67   :  { %3780 = vmatpush1.bf16.msra.mxu0 %v5663_v43  ;;  %4257 = vmatpush1.bf16.msra.mxu1 %v5666_v44  ;;  %v5759_v43 = vld [vmem:[%s8311_s1 + $0x500] ss:$16 sps:$4 sm:$0xff]   ;;  %v5762_v44 = vld [vmem:[%s8311_s1 + $0x508] ss:$16 sps:$4 sm:$0xff]  }
  0x68   :  { %3781 = vmatprep.subr.bf16.mxu0 %v5671_v45  ;;  %4258 = vmatprep.subr.bf16.mxu1 %v5674_v46  ;;  %v5767_v45 = vld [vmem:[%s8311_s1 + $0x524] ss:$16 sps:$4 sm:$0xff]   ;;  %v5770_v46 = vld [vmem:[%s8311_s1 + $0x52c] ss:$16 sps:$4 sm:$0xff]  }
  0x6b   :  { %3782 = vmatpush1.bf16.msra.mxu0 %v5669_v47  ;;  %4259 = vmatpush1.bf16.msra.mxu1 %v5672_v48  ;;  %v5765_v47 = vld [vmem:[%s8311_s1 + $0x520] ss:$16 sps:$4 sm:$0xff]   ;;  %v5768_v48 = vld [vmem:[%s8311_s1 + $0x528] ss:$16 sps:$4 sm:$0xff]  }
  0x6c   :  { %3783 = vmatprep.subr.bf16.mxu0 %v5677_v49  ;;  %4260 = vmatprep.subr.bf16.mxu1 %v5680_v50  ;;  %v5773_v49 = vld [vmem:[%s8311_s1 + $0x544] ss:$16 sps:$4 sm:$0xff]   ;;  %v5776_v50 = vld [vmem:[%s8311_s1 + $0x54c] ss:$16 sps:$4 sm:$0xff]  }
  0x6f   :  { %3784 = vmatpush1.bf16.msra.mxu0 %v5675_v51  ;;  %4261 = vmatpush1.bf16.msra.mxu1 %v5678_v52  ;;  %v5771_v51 = vld [vmem:[%s8311_s1 + $0x540] ss:$16 sps:$4 sm:$0xff]   ;;  %v5774_v52 = vld [vmem:[%s8311_s1 + $0x548] ss:$16 sps:$4 sm:$0xff]  }
  0x70   :  { %3785 = vmatprep.subr.bf16.mxu0 %v5683_v53  ;;  %4262 = vmatprep.subr.bf16.mxu1 %v5686_v54  ;;  %v5779_v53 = vld [vmem:[%s8311_s1 + $0x564] ss:$16 sps:$4 sm:$0xff]   ;;  %v5782_v54 = vld [vmem:[%s8311_s1 + $0x56c] ss:$16 sps:$4 sm:$0xff]  }
  0x73   :  { %3786 = vmatpush1.bf16.msra.mxu0 %v5681_v55  ;;  %4263 = vmatpush1.bf16.msra.mxu1 %v5684_v56  ;;  %v5777_v55 = vld [vmem:[%s8311_s1 + $0x560] ss:$16 sps:$4 sm:$0xff]   ;;  %v5780_v56 = vld [vmem:[%s8311_s1 + $0x568] ss:$16 sps:$4 sm:$0xff]  }
  0x74   :  { %3787 = vmatprep.subr.bf16.mxu0 %v5689_v57  ;;  %4264 = vmatprep.subr.bf16.mxu1 %v5692_v58  ;;  %v5785_v57 = vld [vmem:[%s8311_s1 + $0x584] ss:$16 sps:$4 sm:$0xff]   ;;  %v5788_v58 = vld [vmem:[%s8311_s1 + $0x58c] ss:$16 sps:$4 sm:$0xff]  }
  0x77   :  { %3788 = vmatpush1.bf16.msra.mxu0 %v5687_v59  ;;  %4265 = vmatpush1.bf16.msra.mxu1 %v5690_v60  ;;  %v5783_v59 = vld [vmem:[%s8311_s1 + $0x580] ss:$16 sps:$4 sm:$0xff]   ;;  %v5786_v60 = vld [vmem:[%s8311_s1 + $0x588] ss:$16 sps:$4 sm:$0xff]  }
  0x78   :  { %3789 = vmatprep.subr.bf16.mxu0 %v5697_v61  ;;  %4266 = vmatprep.subr.bf16.mxu1 %v5700_v62  ;;  %v5791_v61 = vld [vmem:[%s8311_s1 + $0x5a4] ss:$16 sps:$4 sm:$0xff]   ;;  %v5794_v62 = vld [vmem:[%s8311_s1 + $0x5ac] ss:$16 sps:$4 sm:$0xff]  }
  0x7b   :  { %3790 = vmatpush1.bf16.msra.mxu0 %v5695_v63  ;;  %4267 = vmatpush1.bf16.msra.mxu1 %v5698_v0  ;;  %v5789_v63 = vld [vmem:[%s8311_s1 + $0x5a0] ss:$16 sps:$4 sm:$0xff]   ;;  %v5792_v0 = vld [vmem:[%s8311_s1 + $0x5a8] ss:$16 sps:$4 sm:$0xff]  }
  0x7c   :  { %3791 = vmatprep.subr.bf16.mxu0 %v5704_v1  ;;  %4268 = vmatprep.subr.bf16.mxu1 %v5707_v2  ;;  %v5799_v1 = vld [vmem:[%s8311_s1 + $0x5c4] ss:$16 sps:$4 sm:$0xff]   ;;  %v5802_v2 = vld [vmem:[%s8311_s1 + $0x5cc] ss:$16 sps:$4 sm:$0xff]  }
  0x7f   :  { %3792 = vmatpush1.bf16.msra.mxu0 %v5702_v3  ;;  %4269 = vmatpush1.bf16.msra.mxu1 %v5705_v4  ;;  %v5797_v3 = vld [vmem:[%s8311_s1 + $0x5c0] ss:$16 sps:$4 sm:$0xff]   ;;  %v5800_v4 = vld [vmem:[%s8311_s1 + $0x5c8] ss:$16 sps:$4 sm:$0xff]  }
  0x80   :  { %3814 = vmatprep.subr.bf16.mxu0 %v5713_v5  ;;  %4291 = vmatprep.subr.bf16.mxu1 %v5716_v6  ;;  %v5806_v5 = vld [vmem:[%s8311_s1 + $0x5e4] ss:$16 sps:$4 sm:$0xff]   ;;  %v5809_v6 = vld [vmem:[%s8311_s1 + $0x5ec] ss:$16 sps:$4 sm:$0xff]  }
  0x82   :  { %3794 = vmatmul.mubr.bf16.vlgmr.msra.gmra.mrb[0].mxu0 %v5708_v7  ;;  %4271 = vmatmul.mubr.bf16.vlgmr.msra.gmra.mrb[0].mxu1 %v5708_v7  ;;  %v5804_v7 = vld [vmem:[%s8311_s1 + $0x5e0] ss:$16 sps:$4 sm:$0xff]  }
  0x83   :  { %3815 = vmatpush1.bf16.msra.mxu0 %v5711_v8  ;;  %4292 = vmatpush1.bf16.msra.mxu1 %v5714_v9  ;;  %v5807_v8 = vld [vmem:[%s8311_s1 + $0x5e8] ss:$16 sps:$4 sm:$0xff]   ;;  %v5815_v9 = vld [vmem:[%s8311_s1 + $0x604] ss:$16 sps:$4 sm:$0xff]  }
  0x84   :  { %3816 = vmatprep.subr.bf16.mxu0 %v5719_v10  ;;  %4293 = vmatprep.subr.bf16.mxu1 %v5722_v11  ;;  %v5818_v10 = vld [vmem:[%s8311_s1 + $0x60c] ss:$16 sps:$4 sm:$0xff]   ;;  %v5810_v11 = vld [vmem:[%s8312_s0 + $0x10] ss:$72 sps:$4 sm:$0xff]  }
  0x85   :  { %3803 = vmatprep.mubr.bf16.mxu0 %v5795_v12  ;;  %4280 = vmatprep.mubr.bf16.mxu1 %v5795_v12  ;;  %v5813_v12 = vld [vmem:[%s8311_s1 + $0x600] ss:$16 sps:$4 sm:$0xff]  }
  0x87   :  { %3817 = vmatpush1.bf16.msra.mxu0 %v5717_v13  ;;  %4294 = vmatpush1.bf16.msra.mxu1 %v5720_v14  ;;  %v5816_v13 = vld [vmem:[%s8311_s1 + $0x608] ss:$16 sps:$4 sm:$0xff]   ;;  %v5821_v14 = vld [vmem:[%s8311_s1 + $0x624] ss:$16 sps:$4 sm:$0xff]  }
  0x88   :  { %3818 = vmatprep.subr.bf16.mxu0 %v5725_v15  ;;  %4295 = vmatprep.subr.bf16.mxu1 %v5728_v16  ;;  %v5824_v15 = vld [vmem:[%s8311_s1 + $0x62c] ss:$16 sps:$4 sm:$0xff]  }
  0x89   :  { %v5897_v16 = vld [vmem:[%s8312_s0 + $0xa4] ss:$72 sps:$4 sm:$0xff]  }
  0x8a   :  { %3804 = vmatmul.mubr.bf16.gmra.mrb[4].mxu0 %v5803_v19  ;;  %4281 = vmatmul.mubr.bf16.gmra.mrb[4].mxu1 %v5803_v19  ;;  %v5827_v19 = vld [vmem:[%s8311_s1 + $0x644] ss:$16 sps:$4 sm:$0xff]  }
  0x8b   :  { %3819 = vmatpush1.bf16.msra.mxu0 %v5723_v17  ;;  %4296 = vmatpush1.bf16.msra.mxu1 %v5726_v18  ;;  %v5819_v17 = vld [vmem:[%s8311_s1 + $0x620] ss:$16 sps:$4 sm:$0xff]   ;;  %v5822_v18 = vld [vmem:[%s8311_s1 + $0x628] ss:$16 sps:$4 sm:$0xff]  }
  0x8c   :  { %3820 = vmatprep.subr.bf16.mxu0 %v5731_v20  ;;  %4297 = vmatprep.subr.bf16.mxu1 %v5734_v21  ;;  %v5830_v20 = vld [vmem:[%s8311_s1 + $0x64c] ss:$16 sps:$4 sm:$0xff]   ;;  %v5825_v21 = vld [vmem:[%s8311_s1 + $0x640] ss:$16 sps:$4 sm:$0xff]  }
  0x8d   :  { %3846 = vmatprep.mubr.bf16.mxu0 %v5812_v22  ;;  %4323 = vmatprep.mubr.bf16.mxu1 %v5812_v22  ;;  %v5828_v22 = vld [vmem:[%s8311_s1 + $0x648] ss:$16 sps:$4 sm:$0xff]  }
  0x8f   :  { %3821 = vmatpush1.bf16.msra.mxu0 %v5729_v23  ;;  %4298 = vmatpush1.bf16.msra.mxu1 %v5732_v24  ;;  %v5905_v23 = vld [vmem:[%s8312_s0 + $0xa0] ss:$72 sps:$4 sm:$0xff]   ;;  %v5833_v24 = vld [vmem:[%s8311_s1 + $0x664] ss:$16 sps:$4 sm:$0xff]  }
  0x90   :  { %3822 = vmatprep.subr.bf16.mxu0 %v5737_v25  ;;  %4299 = vmatprep.subr.bf16.mxu1 %v5740_v26  ;;  %v5836_v25 = vld [vmem:[%s8311_s1 + $0x66c] ss:$16 sps:$4 sm:$0xff]  }
  0x91   :  { %v5914_v26 = vld [vmem:[%s8312_s0 + $0x1c] ss:$72 sps:$4 sm:$0xff]  }
  0x93   :  { %3823 = vmatpush1.bf16.msra.mxu0 %v5735_v27  ;;  %4300 = vmatpush1.bf16.msra.mxu1 %v5738_v28  ;;  %v5831_v27 = vld [vmem:[%s8311_s1 + $0x660] ss:$16 sps:$4 sm:$0xff]   ;;  %v5834_v28 = vld [vmem:[%s8311_s1 + $0x668] ss:$16 sps:$4 sm:$0xff]  }
  0x94   :  { %3824 = vmatprep.subr.bf16.mxu0 %v5743_v29  ;;  %4301 = vmatprep.subr.bf16.mxu1 %v5746_v30  ;;  %v5839_v29 = vld [vmem:[%s8311_s1 + $0x684] ss:$16 sps:$4 sm:$0xff]   ;;  %v5842_v30 = vld [vmem:[%s8311_s1 + $0x68c] ss:$16 sps:$4 sm:$0xff]  }
  0x97   :  { %3825 = vmatpush1.bf16.msra.mxu0 %v5741_v31  ;;  %4302 = vmatpush1.bf16.msra.mxu1 %v5744_v32  ;;  %v5837_v31 = vld [vmem:[%s8311_s1 + $0x680] ss:$16 sps:$4 sm:$0xff]   ;;  %v5840_v32 = vld [vmem:[%s8311_s1 + $0x688] ss:$16 sps:$4 sm:$0xff]  }
  0x98   :  { %3826 = vmatprep.subr.bf16.mxu0 %v5749_v33  ;;  %4303 = vmatprep.subr.bf16.mxu1 %v5752_v34  ;;  %v5845_v33 = vld [vmem:[%s8311_s1 + $0x6a4] ss:$16 sps:$4 sm:$0xff]   ;;  %v5848_v34 = vld [vmem:[%s8311_s1 + $0x6ac] ss:$16 sps:$4 sm:$0xff]  }
  0x9b   :  { %3827 = vmatpush1.bf16.msra.mxu0 %v5747_v35  ;;  %4304 = vmatpush1.bf16.msra.mxu1 %v5750_v36  ;;  %v5843_v35 = vld [vmem:[%s8311_s1 + $0x6a0] ss:$16 sps:$4 sm:$0xff]   ;;  %v5846_v36 = vld [vmem:[%s8311_s1 + $0x6a8] ss:$16 sps:$4 sm:$0xff]  }
  0x9c   :  { %3828 = vmatprep.subr.bf16.mxu0 %v5755_v37  ;;  %4305 = vmatprep.subr.bf16.mxu1 %v5758_v38  ;;  %v5851_v37 = vld [vmem:[%s8311_s1 + $0x6c4] ss:$16 sps:$4 sm:$0xff]   ;;  %v5854_v38 = vld [vmem:[%s8311_s1 + $0x6cc] ss:$16 sps:$4 sm:$0xff]  }
  0x9f   :  { %3829 = vmatpush1.bf16.msra.mxu0 %v5753_v39  ;;  %4306 = vmatpush1.bf16.msra.mxu1 %v5756_v40  ;;  %v5849_v39 = vld [vmem:[%s8311_s1 + $0x6c0] ss:$16 sps:$4 sm:$0xff]   ;;  %v5852_v40 = vld [vmem:[%s8311_s1 + $0x6c8] ss:$16 sps:$4 sm:$0xff]  }
  0xa0   :  { %3830 = vmatprep.subr.bf16.mxu0 %v5761_v41  ;;  %4307 = vmatprep.subr.bf16.mxu1 %v5764_v42  ;;  %v5857_v41 = vld [vmem:[%s8311_s1 + $0x6e4] ss:$16 sps:$4 sm:$0xff]   ;;  %v5860_v42 = vld [vmem:[%s8311_s1 + $0x6ec] ss:$16 sps:$4 sm:$0xff]  }
  0xa3   :  { %3831 = vmatpush1.bf16.msra.mxu0 %v5759_v43  ;;  %4308 = vmatpush1.bf16.msra.mxu1 %v5762_v44  ;;  %v5855_v43 = vld [vmem:[%s8311_s1 + $0x6e0] ss:$16 sps:$4 sm:$0xff]   ;;  %v5858_v44 = vld [vmem:[%s8311_s1 + $0x6e8] ss:$16 sps:$4 sm:$0xff]  }
  0xa4   :  { %3832 = vmatprep.subr.bf16.mxu0 %v5767_v45  ;;  %4309 = vmatprep.subr.bf16.mxu1 %v5770_v46  ;;  %v5863_v45 = vld [vmem:[%s8311_s1 + $0x704] ss:$16 sps:$4 sm:$0xff]   ;;  %v5866_v46 = vld [vmem:[%s8311_s1 + $0x70c] ss:$16 sps:$4 sm:$0xff]  }
  0xa7   :  { %3833 = vmatpush1.bf16.msra.mxu0 %v5765_v47  ;;  %4310 = vmatpush1.bf16.msra.mxu1 %v5768_v48  ;;  %v5861_v47 = vld [vmem:[%s8311_s1 + $0x700] ss:$16 sps:$4 sm:$0xff]   ;;  %v5864_v48 = vld [vmem:[%s8311_s1 + $0x708] ss:$16 sps:$4 sm:$0xff]  }
  0xa8   :  { %3834 = vmatprep.subr.bf16.mxu0 %v5773_v49  ;;  %4311 = vmatprep.subr.bf16.mxu1 %v5776_v50  ;;  %v5869_v49 = vld [vmem:[%s8311_s1 + $0x724] ss:$16 sps:$4 sm:$0xff]   ;;  %v5872_v50 = vld [vmem:[%s8311_s1 + $0x72c] ss:$16 sps:$4 sm:$0xff]  }
  0xab   :  { %3835 = vmatpush1.bf16.msra.mxu0 %v5771_v51  ;;  %4312 = vmatpush1.bf16.msra.mxu1 %v5774_v52  ;;  %v5867_v51 = vld [vmem:[%s8311_s1 + $0x720] ss:$16 sps:$4 sm:$0xff]   ;;  %v5870_v52 = vld [vmem:[%s8311_s1 + $0x728] ss:$16 sps:$4 sm:$0xff]  }
  0xac   :  { %3836 = vmatprep.subr.bf16.mxu0 %v5779_v53  ;;  %4313 = vmatprep.subr.bf16.mxu1 %v5782_v54  ;;  %v5875_v53 = vld [vmem:[%s8311_s1 + $0x744] ss:$16 sps:$4 sm:$0xff]   ;;  %v5878_v54 = vld [vmem:[%s8311_s1 + $0x74c] ss:$16 sps:$4 sm:$0xff]  }
  0xaf   :  { %3837 = vmatpush1.bf16.msra.mxu0 %v5777_v55  ;;  %4314 = vmatpush1.bf16.msra.mxu1 %v5780_v56  ;;  %v5873_v55 = vld [vmem:[%s8311_s1 + $0x740] ss:$16 sps:$4 sm:$0xff]   ;;  %v5876_v56 = vld [vmem:[%s8311_s1 + $0x748] ss:$16 sps:$4 sm:$0xff]  }
  0xb0   :  { %3838 = vmatprep.subr.bf16.mxu0 %v5785_v57  ;;  %4315 = vmatprep.subr.bf16.mxu1 %v5788_v58  ;;  %v5881_v57 = vld [vmem:[%s8311_s1 + $0x764] ss:$16 sps:$4 sm:$0xff]   ;;  %v5884_v58 = vld [vmem:[%s8311_s1 + $0x76c] ss:$16 sps:$4 sm:$0xff]  }
  0xb3   :  { %3839 = vmatpush1.bf16.msra.mxu0 %v5783_v59  ;;  %4316 = vmatpush1.bf16.msra.mxu1 %v5786_v60  ;;  %v5879_v59 = vld [vmem:[%s8311_s1 + $0x760] ss:$16 sps:$4 sm:$0xff]   ;;  %v5882_v60 = vld [vmem:[%s8311_s1 + $0x768] ss:$16 sps:$4 sm:$0xff]  }
  0xb4   :  { %3840 = vmatprep.subr.bf16.mxu0 %v5791_v61  ;;  %4317 = vmatprep.subr.bf16.mxu1 %v5794_v62  ;;  %v5887_v61 = vld [vmem:[%s8311_s1 + $0x784] ss:$16 sps:$4 sm:$0xff]   ;;  %v5890_v62 = vld [vmem:[%s8311_s1 + $0x78c] ss:$16 sps:$4 sm:$0xff]  }
  0xb7   :  { %3841 = vmatpush1.bf16.msra.mxu0 %v5789_v63  ;;  %4318 = vmatpush1.bf16.msra.mxu1 %v5792_v0  ;;  %v5885_v63 = vld [vmem:[%s8311_s1 + $0x780] ss:$16 sps:$4 sm:$0xff]   ;;  %v5888_v0 = vld [vmem:[%s8311_s1 + $0x788] ss:$16 sps:$4 sm:$0xff]  }
  0xb8   :  { %3842 = vmatprep.subr.bf16.mxu0 %v5799_v1  ;;  %4319 = vmatprep.subr.bf16.mxu1 %v5802_v2  ;;  %v5893_v1 = vld [vmem:[%s8311_s1 + $0x7a4] ss:$16 sps:$4 sm:$0xff]   ;;  %v5896_v2 = vld [vmem:[%s8311_s1 + $0x7ac] ss:$16 sps:$4 sm:$0xff]  }
  0xbb   :  { %3843 = vmatpush1.bf16.msra.mxu0 %v5797_v3  ;;  %4320 = vmatpush1.bf16.msra.mxu1 %v5800_v4  ;;  %v5891_v3 = vld [vmem:[%s8311_s1 + $0x7a0] ss:$16 sps:$4 sm:$0xff]   ;;  %v5894_v4 = vld [vmem:[%s8311_s1 + $0x7a8] ss:$16 sps:$4 sm:$0xff]  }
  0xbc   :  { %3844 = vmatprep.subr.bf16.mxu0 %v5806_v5  ;;  %4321 = vmatprep.subr.bf16.mxu1 %v5809_v6  ;;  %v5901_v5 = vld [vmem:[%s8311_s1 + $0x7c4] ss:$16 sps:$4 sm:$0xff]   ;;  %v5904_v6 = vld [vmem:[%s8311_s1 + $0x7cc] ss:$16 sps:$4 sm:$0xff]  }
  0xbf   :  { %3845 = vmatpush1.bf16.msra.mxu0 %v5804_v7  ;;  %4322 = vmatpush1.bf16.msra.mxu1 %v5807_v8  ;;  %v5899_v7 = vld [vmem:[%s8311_s1 + $0x7c0] ss:$16 sps:$4 sm:$0xff]   ;;  %v5902_v8 = vld [vmem:[%s8311_s1 + $0x7c8] ss:$16 sps:$4 sm:$0xff]  }
  0xc0   :  { %3867 = vmatprep.subr.bf16.mxu0 %v5815_v9  ;;  %4344 = vmatprep.subr.bf16.mxu1 %v5818_v10  ;;  %v5908_v9 = vld [vmem:[%s8311_s1 + $0x7e4] ss:$16 sps:$4 sm:$0xff]   ;;  %v5911_v10 = vld [vmem:[%s8311_s1 + $0x7ec] ss:$16 sps:$4 sm:$0xff]  }
  0xc2   :  { %3847 = vmatmul.mubr.bf16.vlgmr.msra.gmra.mrb[0].mxu0 %v5810_v11  ;;  %4324 = vmatmul.mubr.bf16.vlgmr.msra.gmra.mrb[0].mxu1 %v5810_v11  ;;  %v5906_v11 = vld [vmem:[%s8311_s1 + $0x7e0] ss:$16 sps:$4 sm:$0xff]  }
  0xc3   :  { %3868 = vmatpush1.bf16.msra.mxu0 %v5813_v12  ;;  %4345 = vmatpush1.bf16.msra.mxu1 %v5816_v13  ;;  %v5909_v12 = vld [vmem:[%s8311_s1 + $0x7e8] ss:$16 sps:$4 sm:$0xff]   ;;  %v5917_v13 = vld [vmem:[%s8311_s1 + $0x804] ss:$16 sps:$4 sm:$0xff]  }
  0xc4   :  { %3869 = vmatprep.subr.bf16.mxu0 %v5821_v14  ;;  %4346 = vmatprep.subr.bf16.mxu1 %v5824_v15  ;;  %v5920_v14 = vld [vmem:[%s8311_s1 + $0x80c] ss:$16 sps:$4 sm:$0xff]   ;;  %v5912_v15 = vld [vmem:[%s8312_s0 + $0x18] ss:$72 sps:$4 sm:$0xff]  }
  0xc5   :  { %3856 = vmatprep.mubr.bf16.mxu0 %v5897_v16  ;;  %4333 = vmatprep.mubr.bf16.mxu1 %v5897_v16  ;;  %v5915_v16 = vld [vmem:[%s8311_s1 + $0x800] ss:$16 sps:$4 sm:$0xff]  }
  0xc7   :  { %3870 = vmatpush1.bf16.msra.mxu0 %v5819_v17  ;;  %4347 = vmatpush1.bf16.msra.mxu1 %v5822_v18  ;;  %v5918_v17 = vld [vmem:[%s8311_s1 + $0x808] ss:$16 sps:$4 sm:$0xff]   ;;  %v5923_v18 = vld [vmem:[%s8311_s1 + $0x824] ss:$16 sps:$4 sm:$0xff]  }
  0xc8   :  { %3871 = vmatprep.subr.bf16.mxu0 %v5827_v19  ;;  %4348 = vmatprep.subr.bf16.mxu1 %v5830_v20  ;;  %v5926_v19 = vld [vmem:[%s8311_s1 + $0x82c] ss:$16 sps:$4 sm:$0xff]  }
  0xc9   :  { %v5999_v20 = vld [vmem:[%s8312_s0 + $0xac] ss:$72 sps:$4 sm:$0xff]  }
  0xca   :  { %3857 = vmatmul.mubr.bf16.gmra.mrb[4].mxu0 %v5905_v23  ;;  %4334 = vmatmul.mubr.bf16.gmra.mrb[4].mxu1 %v5905_v23  ;;  %v5929_v23 = vld [vmem:[%s8311_s1 + $0x844] ss:$16 sps:$4 sm:$0xff]  }
  0xcb   :  { %3872 = vmatpush1.bf16.msra.mxu0 %v5825_v21  ;;  %4349 = vmatpush1.bf16.msra.mxu1 %v5828_v22  ;;  %v5921_v21 = vld [vmem:[%s8311_s1 + $0x820] ss:$16 sps:$4 sm:$0xff]   ;;  %v5924_v22 = vld [vmem:[%s8311_s1 + $0x828] ss:$16 sps:$4 sm:$0xff]  }
  0xcc   :  { %3873 = vmatprep.subr.bf16.mxu0 %v5833_v24  ;;  %4350 = vmatprep.subr.bf16.mxu1 %v5836_v25  ;;  %v5932_v24 = vld [vmem:[%s8311_s1 + $0x84c] ss:$16 sps:$4 sm:$0xff]   ;;  %v5927_v25 = vld [vmem:[%s8311_s1 + $0x840] ss:$16 sps:$4 sm:$0xff]  }
  0xcd   :  { %3899 = vmatprep.mubr.bf16.mxu0 %v5914_v26  ;;  %4376 = vmatprep.mubr.bf16.mxu1 %v5914_v26  ;;  %v6007_v26 = vld [vmem:[%s8312_s0 + $0xa8] ss:$72 sps:$4 sm:$0xff]  }
  0xcf   :  { %3874 = vmatpush1.bf16.msra.mxu0 %v5831_v27  ;;  %4351 = vmatpush1.bf16.msra.mxu1 %v5834_v28  ;;  %v5930_v27 = vld [vmem:[%s8311_s1 + $0x848] ss:$16 sps:$4 sm:$0xff]   ;;  %v5935_v28 = vld [vmem:[%s8311_s1 + $0x864] ss:$16 sps:$4 sm:$0xff]  }
  0xd0   :  { %3875 = vmatprep.subr.bf16.mxu0 %v5839_v29  ;;  %4352 = vmatprep.subr.bf16.mxu1 %v5842_v30  ;;  %v5938_v29 = vld [vmem:[%s8311_s1 + $0x86c] ss:$16 sps:$4 sm:$0xff]  }
  0xd1   :  { %v6016_v30 = vld [vmem:[%s8312_s0 + $0x24] ss:$72 sps:$4 sm:$0xff]  }
  0xd3   :  { %3876 = vmatpush1.bf16.msra.mxu0 %v5837_v31  ;;  %4353 = vmatpush1.bf16.msra.mxu1 %v5840_v32  ;;  %v5933_v31 = vld [vmem:[%s8311_s1 + $0x860] ss:$16 sps:$4 sm:$0xff]   ;;  %v5936_v32 = vld [vmem:[%s8311_s1 + $0x868] ss:$16 sps:$4 sm:$0xff]  }
  0xd4   :  { %3877 = vmatprep.subr.bf16.mxu0 %v5845_v33  ;;  %4354 = vmatprep.subr.bf16.mxu1 %v5848_v34  ;;  %v5941_v33 = vld [vmem:[%s8311_s1 + $0x884] ss:$16 sps:$4 sm:$0xff]   ;;  %v5944_v34 = vld [vmem:[%s8311_s1 + $0x88c] ss:$16 sps:$4 sm:$0xff]  }
  0xd7   :  { %3878 = vmatpush1.bf16.msra.mxu0 %v5843_v35  ;;  %4355 = vmatpush1.bf16.msra.mxu1 %v5846_v36  ;;  %v5939_v35 = vld [vmem:[%s8311_s1 + $0x880] ss:$16 sps:$4 sm:$0xff]   ;;  %v5942_v36 = vld [vmem:[%s8311_s1 + $0x888] ss:$16 sps:$4 sm:$0xff]  }
  0xd8   :  { %3879 = vmatprep.subr.bf16.mxu0 %v5851_v37  ;;  %4356 = vmatprep.subr.bf16.mxu1 %v5854_v38  ;;  %v5947_v37 = vld [vmem:[%s8311_s1 + $0x8a4] ss:$16 sps:$4 sm:$0xff]   ;;  %v5950_v38 = vld [vmem:[%s8311_s1 + $0x8ac] ss:$16 sps:$4 sm:$0xff]  }
  0xdb   :  { %3880 = vmatpush1.bf16.msra.mxu0 %v5849_v39  ;;  %4357 = vmatpush1.bf16.msra.mxu1 %v5852_v40  ;;  %v5945_v39 = vld [vmem:[%s8311_s1 + $0x8a0] ss:$16 sps:$4 sm:$0xff]   ;;  %v5948_v40 = vld [vmem:[%s8311_s1 + $0x8a8] ss:$16 sps:$4 sm:$0xff]  }
  0xdc   :  { %3881 = vmatprep.subr.bf16.mxu0 %v5857_v41  ;;  %4358 = vmatprep.subr.bf16.mxu1 %v5860_v42  ;;  %v5953_v41 = vld [vmem:[%s8311_s1 + $0x8c4] ss:$16 sps:$4 sm:$0xff]   ;;  %v5956_v42 = vld [vmem:[%s8311_s1 + $0x8cc] ss:$16 sps:$4 sm:$0xff]  }
  0xdf   :  { %3882 = vmatpush1.bf16.msra.mxu0 %v5855_v43  ;;  %4359 = vmatpush1.bf16.msra.mxu1 %v5858_v44  ;;  %v5951_v43 = vld [vmem:[%s8311_s1 + $0x8c0] ss:$16 sps:$4 sm:$0xff]   ;;  %v5954_v44 = vld [vmem:[%s8311_s1 + $0x8c8] ss:$16 sps:$4 sm:$0xff]  }
  0xe0   :  { %3883 = vmatprep.subr.bf16.mxu0 %v5863_v45  ;;  %4360 = vmatprep.subr.bf16.mxu1 %v5866_v46  ;;  %v5959_v45 = vld [vmem:[%s8311_s1 + $0x8e4] ss:$16 sps:$4 sm:$0xff]   ;;  %v5962_v46 = vld [vmem:[%s8311_s1 + $0x8ec] ss:$16 sps:$4 sm:$0xff]  }
  0xe3   :  { %3884 = vmatpush1.bf16.msra.mxu0 %v5861_v47  ;;  %4361 = vmatpush1.bf16.msra.mxu1 %v5864_v48  ;;  %v5957_v47 = vld [vmem:[%s8311_s1 + $0x8e0] ss:$16 sps:$4 sm:$0xff]   ;;  %v5960_v48 = vld [vmem:[%s8311_s1 + $0x8e8] ss:$16 sps:$4 sm:$0xff]  }
  0xe4   :  { %3885 = vmatprep.subr.bf16.mxu0 %v5869_v49  ;;  %4362 = vmatprep.subr.bf16.mxu1 %v5872_v50  ;;  %v5965_v49 = vld [vmem:[%s8311_s1 + $0x904] ss:$16 sps:$4 sm:$0xff]   ;;  %v5968_v50 = vld [vmem:[%s8311_s1 + $0x90c] ss:$16 sps:$4 sm:$0xff]  }
  0xe7   :  { %3886 = vmatpush1.bf16.msra.mxu0 %v5867_v51  ;;  %4363 = vmatpush1.bf16.msra.mxu1 %v5870_v52  ;;  %v5963_v51 = vld [vmem:[%s8311_s1 + $0x900] ss:$16 sps:$4 sm:$0xff]   ;;  %v5966_v52 = vld [vmem:[%s8311_s1 + $0x908] ss:$16 sps:$4 sm:$0xff]  }
  0xe8   :  { %3887 = vmatprep.subr.bf16.mxu0 %v5875_v53  ;;  %4364 = vmatprep.subr.bf16.mxu1 %v5878_v54  ;;  %v5971_v53 = vld [vmem:[%s8311_s1 + $0x924] ss:$16 sps:$4 sm:$0xff]   ;;  %v5974_v54 = vld [vmem:[%s8311_s1 + $0x92c] ss:$16 sps:$4 sm:$0xff]  }
  0xeb   :  { %3888 = vmatpush1.bf16.msra.mxu0 %v5873_v55  ;;  %4365 = vmatpush1.bf16.msra.mxu1 %v5876_v56  ;;  %v5969_v55 = vld [vmem:[%s8311_s1 + $0x920] ss:$16 sps:$4 sm:$0xff]   ;;  %v5972_v56 = vld [vmem:[%s8311_s1 + $0x928] ss:$16 sps:$4 sm:$0xff]  }
  0xec   :  { %3889 = vmatprep.subr.bf16.mxu0 %v5881_v57  ;;  %4366 = vmatprep.subr.bf16.mxu1 %v5884_v58  ;;  %v5977_v57 = vld [vmem:[%s8311_s1 + $0x944] ss:$16 sps:$4 sm:$0xff]   ;;  %v5980_v58 = vld [vmem:[%s8311_s1 + $0x94c] ss:$16 sps:$4 sm:$0xff]  }
  0xef   :  { %3890 = vmatpush1.bf16.msra.mxu0 %v5879_v59  ;;  %4367 = vmatpush1.bf16.msra.mxu1 %v5882_v60  ;;  %v5975_v59 = vld [vmem:[%s8311_s1 + $0x940] ss:$16 sps:$4 sm:$0xff]   ;;  %v5978_v60 = vld [vmem:[%s8311_s1 + $0x948] ss:$16 sps:$4 sm:$0xff]  }
  0xf0   :  { %3891 = vmatprep.subr.bf16.mxu0 %v5887_v61  ;;  %4368 = vmatprep.subr.bf16.mxu1 %v5890_v62  ;;  %v5983_v61 = vld [vmem:[%s8311_s1 + $0x964] ss:$16 sps:$4 sm:$0xff]   ;;  %v5986_v62 = vld [vmem:[%s8311_s1 + $0x96c] ss:$16 sps:$4 sm:$0xff]  }
  0xf3   :  { %3892 = vmatpush1.bf16.msra.mxu0 %v5885_v63  ;;  %4369 = vmatpush1.bf16.msra.mxu1 %v5888_v0  ;;  %v5981_v63 = vld [vmem:[%s8311_s1 + $0x960] ss:$16 sps:$4 sm:$0xff]   ;;  %v5984_v0 = vld [vmem:[%s8311_s1 + $0x968] ss:$16 sps:$4 sm:$0xff]  }
  0xf4   :  { %3893 = vmatprep.subr.bf16.mxu0 %v5893_v1  ;;  %4370 = vmatprep.subr.bf16.mxu1 %v5896_v2  ;;  %v5989_v1 = vld [vmem:[%s8311_s1 + $0x984] ss:$16 sps:$4 sm:$0xff]   ;;  %v5992_v2 = vld [vmem:[%s8311_s1 + $0x98c] ss:$16 sps:$4 sm:$0xff]  }
  0xf7   :  { %3894 = vmatpush1.bf16.msra.mxu0 %v5891_v3  ;;  %4371 = vmatpush1.bf16.msra.mxu1 %v5894_v4  ;;  %v5987_v3 = vld [vmem:[%s8311_s1 + $0x980] ss:$16 sps:$4 sm:$0xff]   ;;  %v5990_v4 = vld [vmem:[%s8311_s1 + $0x988] ss:$16 sps:$4 sm:$0xff]  }
  0xf8   :  { %3895 = vmatprep.subr.bf16.mxu0 %v5901_v5  ;;  %4372 = vmatprep.subr.bf16.mxu1 %v5904_v6  ;;  %v5995_v5 = vld [vmem:[%s8311_s1 + $0x9a4] ss:$16 sps:$4 sm:$0xff]   ;;  %v5998_v6 = vld [vmem:[%s8311_s1 + $0x9ac] ss:$16 sps:$4 sm:$0xff]  }
  0xfb   :  { %3896 = vmatpush1.bf16.msra.mxu0 %v5899_v7  ;;  %4373 = vmatpush1.bf16.msra.mxu1 %v5902_v8  ;;  %v5993_v7 = vld [vmem:[%s8311_s1 + $0x9a0] ss:$16 sps:$4 sm:$0xff]   ;;  %v5996_v8 = vld [vmem:[%s8311_s1 + $0x9a8] ss:$16 sps:$4 sm:$0xff]  }
  0xfc   :  { %3897 = vmatprep.subr.bf16.mxu0 %v5908_v9  ;;  %4374 = vmatprep.subr.bf16.mxu1 %v5911_v10  ;;  %v6003_v9 = vld [vmem:[%s8311_s1 + $0x9c4] ss:$16 sps:$4 sm:$0xff]   ;;  %v6006_v10 = vld [vmem:[%s8311_s1 + $0x9cc] ss:$16 sps:$4 sm:$0xff]  }
  0xff   :  { %3898 = vmatpush1.bf16.msra.mxu0 %v5906_v11  ;;  %4375 = vmatpush1.bf16.msra.mxu1 %v5909_v12  ;;  %v6001_v11 = vld [vmem:[%s8311_s1 + $0x9c0] ss:$16 sps:$4 sm:$0xff]   ;;  %v6004_v12 = vld [vmem:[%s8311_s1 + $0x9c8] ss:$16 sps:$4 sm:$0xff]  }
 0x100   :  { %3920 = vmatprep.subr.bf16.mxu0 %v5917_v13  ;;  %4397 = vmatprep.subr.bf16.mxu1 %v5920_v14  ;;  %v6010_v13 = vld [vmem:[%s8311_s1 + $0x9e4] ss:$16 sps:$4 sm:$0xff]   ;;  %v6013_v14 = vld [vmem:[%s8311_s1 + $0x9ec] ss:$16 sps:$4 sm:$0xff]  }
 0x102   :  { %3900 = vmatmul.mubr.bf16.vlgmr.msra.gmra.mrb[0].mxu0 %v5912_v15  ;;  %4377 = vmatmul.mubr.bf16.vlgmr.msra.gmra.mrb[0].mxu1 %v5912_v15  ;;  %v6008_v15 = vld [vmem:[%s8311_s1 + $0x9e0] ss:$16 sps:$4 sm:$0xff]  }
 0x103   :  { %3921 = vmatpush1.bf16.msra.mxu0 %v5915_v16  ;;  %4398 = vmatpush1.bf16.msra.mxu1 %v5918_v17  ;;  %v6011_v16 = vld [vmem:[%s8311_s1 + $0x9e8] ss:$16 sps:$4 sm:$0xff]  }
 0x104   :  { %3922 = vmatprep.subr.bf16.mxu0 %v5923_v18  ;;  %4399 = vmatprep.subr.bf16.mxu1 %v5926_v19  ;;  %v6014_v17 = vld [vmem:[%s8312_s0 + $0x20] ss:$72 sps:$4 sm:$0xff]   ;;  %v6019_v18 = vld [vmem:[%s8311_s1 + $0xa04] ss:$16 sps:$4 sm:$0xff]   ;;  %v6022_v19 = vld [vmem:[%s8311_s1 + $0xa0c] ss:$16 sps:$4 sm:$0xff]  }
 0x105   :  { %3909 = vmatprep.mubr.bf16.mxu0 %v5999_v20  ;;  %4386 = vmatprep.mubr.bf16.mxu1 %v5999_v20  ;;  %v6017_v20 = vld [vmem:[%s8311_s1 + $0xa00] ss:$16 sps:$4 sm:$0xff]  }
 0x107   :  { %3923 = vmatpush1.bf16.msra.mxu0 %v5921_v21  ;;  %4400 = vmatpush1.bf16.msra.mxu1 %v5924_v22  ;;  %v6020_v21 = vld [vmem:[%s8311_s1 + $0xa08] ss:$16 sps:$4 sm:$0xff]   ;;  %v6025_v22 = vld [vmem:[%s8311_s1 + $0xa24] ss:$16 sps:$4 sm:$0xff]  }
 0x108   :  { %3924 = vmatprep.subr.bf16.mxu0 %v5929_v23  ;;  %4401 = vmatprep.subr.bf16.mxu1 %v5932_v24  ;;  %v6028_v23 = vld [vmem:[%s8311_s1 + $0xa2c] ss:$16 sps:$4 sm:$0xff]  }
 0x109   :  { %v6101_v24 = vld [vmem:[%s8312_s0 + $0xb4] ss:$72 sps:$4 sm:$0xff]  }
 0x10a   :  { %3910 = vmatmul.mubr.bf16.gmra.mrb[4].mxu0 %v6007_v26  ;;  %4387 = vmatmul.mubr.bf16.gmra.mrb[4].mxu1 %v6007_v26  ;;  %v6026_v26 = vld [vmem:[%s8311_s1 + $0xa28] ss:$16 sps:$4 sm:$0xff]  }
 0x10b   :  { %3925 = vmatpush1.bf16.msra.mxu0 %v5927_v25  ;;  %4402 = vmatpush1.bf16.msra.mxu1 %v5930_v27  ;;  %v6023_v25 = vld [vmem:[%s8311_s1 + $0xa20] ss:$16 sps:$4 sm:$0xff]   ;;  %v6031_v27 = vld [vmem:[%s8311_s1 + $0xa44] ss:$16 sps:$4 sm:$0xff]  }
 0x10c   :  { %3926 = vmatprep.subr.bf16.mxu0 %v5935_v28  ;;  %4403 = vmatprep.subr.bf16.mxu1 %v5938_v29  ;;  %v6034_v28 = vld [vmem:[%s8311_s1 + $0xa4c] ss:$16 sps:$4 sm:$0xff]   ;;  %v6109_v29 = vld [vmem:[%s8312_s0 + $0xb0] ss:$72 sps:$4 sm:$0xff]  }
 0x10d   :  { %3952 = vmatprep.mubr.bf16.mxu0 %v6016_v30  ;;  %4429 = vmatprep.mubr.bf16.mxu1 %v6016_v30  ;;  %v6029_v30 = vld [vmem:[%s8311_s1 + $0xa40] ss:$16 sps:$4 sm:$0xff]  }
 0x10f   :  { %3927 = vmatpush1.bf16.msra.mxu0 %v5933_v31  ;;  %4404 = vmatpush1.bf16.msra.mxu1 %v5936_v32  ;;  %v6032_v31 = vld [vmem:[%s8311_s1 + $0xa48] ss:$16 sps:$4 sm:$0xff]   ;;  %v6037_v32 = vld [vmem:[%s8311_s1 + $0xa64] ss:$16 sps:$4 sm:$0xff]  }
 0x110   :  { %3928 = vmatprep.subr.bf16.mxu0 %v5941_v33  ;;  %4405 = vmatprep.subr.bf16.mxu1 %v5944_v34  ;;  %v6040_v33 = vld [vmem:[%s8311_s1 + $0xa6c] ss:$16 sps:$4 sm:$0xff]  }
 0x111   :  { %v6118_v34 = vld [vmem:[%s8312_s0 + $0x2c] ss:$72 sps:$4 sm:$0xff]  }
 0x113   :  { %3929 = vmatpush1.bf16.msra.mxu0 %v5939_v35  ;;  %4406 = vmatpush1.bf16.msra.mxu1 %v5942_v36  ;;  %v6035_v35 = vld [vmem:[%s8311_s1 + $0xa60] ss:$16 sps:$4 sm:$0xff]   ;;  %v6038_v36 = vld [vmem:[%s8311_s1 + $0xa68] ss:$16 sps:$4 sm:$0xff]  }
 0x114   :  { %3930 = vmatprep.subr.bf16.mxu0 %v5947_v37  ;;  %4407 = vmatprep.subr.bf16.mxu1 %v5950_v38  ;;  %v6043_v37 = vld [vmem:[%s8311_s1 + $0xa84] ss:$16 sps:$4 sm:$0xff]   ;;  %v6046_v38 = vld [vmem:[%s8311_s1 + $0xa8c] ss:$16 sps:$4 sm:$0xff]  }
 0x117   :  { %3931 = vmatpush1.bf16.msra.mxu0 %v5945_v39  ;;  %4408 = vmatpush1.bf16.msra.mxu1 %v5948_v40  ;;  %v6041_v39 = vld [vmem:[%s8311_s1 + $0xa80] ss:$16 sps:$4 sm:$0xff]   ;;  %v6044_v40 = vld [vmem:[%s8311_s1 + $0xa88] ss:$16 sps:$4 sm:$0xff]  }
 0x118   :  { %3932 = vmatprep.subr.bf16.mxu0 %v5953_v41  ;;  %4409 = vmatprep.subr.bf16.mxu1 %v5956_v42  ;;  %v6049_v41 = vld [vmem:[%s8311_s1 + $0xaa4] ss:$16 sps:$4 sm:$0xff]   ;;  %v6052_v42 = vld [vmem:[%s8311_s1 + $0xaac] ss:$16 sps:$4 sm:$0xff]  }
 0x11b   :  { %3933 = vmatpush1.bf16.msra.mxu0 %v5951_v43  ;;  %4410 = vmatpush1.bf16.msra.mxu1 %v5954_v44  ;;  %v6047_v43 = vld [vmem:[%s8311_s1 + $0xaa0] ss:$16 sps:$4 sm:$0xff]   ;;  %v6050_v44 = vld [vmem:[%s8311_s1 + $0xaa8] ss:$16 sps:$4 sm:$0xff]  }
 0x11c   :  { %3934 = vmatprep.subr.bf16.mxu0 %v5959_v45  ;;  %4411 = vmatprep.subr.bf16.mxu1 %v5962_v46  ;;  %v6055_v45 = vld [vmem:[%s8311_s1 + $0xac4] ss:$16 sps:$4 sm:$0xff]   ;;  %v6058_v46 = vld [vmem:[%s8311_s1 + $0xacc] ss:$16 sps:$4 sm:$0xff]  }
 0x11f   :  { %3935 = vmatpush1.bf16.msra.mxu0 %v5957_v47  ;;  %4412 = vmatpush1.bf16.msra.mxu1 %v5960_v48  ;;  %v6053_v47 = vld [vmem:[%s8311_s1 + $0xac0] ss:$16 sps:$4 sm:$0xff]   ;;  %v6056_v48 = vld [vmem:[%s8311_s1 + $0xac8] ss:$16 sps:$4 sm:$0xff]  }
 0x120   :  { %3936 = vmatprep.subr.bf16.mxu0 %v5965_v49  ;;  %4413 = vmatprep.subr.bf16.mxu1 %v5968_v50  ;;  %v6061_v49 = vld [vmem:[%s8311_s1 + $0xae4] ss:$16 sps:$4 sm:$0xff]   ;;  %v6064_v50 = vld [vmem:[%s8311_s1 + $0xaec] ss:$16 sps:$4 sm:$0xff]  }
 0x123   :  { %3937 = vmatpush1.bf16.msra.mxu0 %v5963_v51  ;;  %4414 = vmatpush1.bf16.msra.mxu1 %v5966_v52  ;;  %v6059_v51 = vld [vmem:[%s8311_s1 + $0xae0] ss:$16 sps:$4 sm:$0xff]   ;;  %v6062_v52 = vld [vmem:[%s8311_s1 + $0xae8] ss:$16 sps:$4 sm:$0xff]  }
 0x124   :  { %3938 = vmatprep.subr.bf16.mxu0 %v5971_v53  ;;  %4415 = vmatprep.subr.bf16.mxu1 %v5974_v54  ;;  %v6067_v53 = vld [vmem:[%s8311_s1 + $0xb04] ss:$16 sps:$4 sm:$0xff]   ;;  %v6070_v54 = vld [vmem:[%s8311_s1 + $0xb0c] ss:$16 sps:$4 sm:$0xff]  }
 0x127   :  { %3939 = vmatpush1.bf16.msra.mxu0 %v5969_v55  ;;  %4416 = vmatpush1.bf16.msra.mxu1 %v5972_v56  ;;  %v6065_v55 = vld [vmem:[%s8311_s1 + $0xb00] ss:$16 sps:$4 sm:$0xff]   ;;  %v6068_v56 = vld [vmem:[%s8311_s1 + $0xb08] ss:$16 sps:$4 sm:$0xff]  }
 0x128   :  { %3940 = vmatprep.subr.bf16.mxu0 %v5977_v57  ;;  %4417 = vmatprep.subr.bf16.mxu1 %v5980_v58  ;;  %v6073_v57 = vld [vmem:[%s8311_s1 + $0xb24] ss:$16 sps:$4 sm:$0xff]   ;;  %v6076_v58 = vld [vmem:[%s8311_s1 + $0xb2c] ss:$16 sps:$4 sm:$0xff]  }
 0x12b   :  { %3941 = vmatpush1.bf16.msra.mxu0 %v5975_v59  ;;  %4418 = vmatpush1.bf16.msra.mxu1 %v5978_v60  ;;  %v6071_v59 = vld [vmem:[%s8311_s1 + $0xb20] ss:$16 sps:$4 sm:$0xff]   ;;  %v6074_v60 = vld [vmem:[%s8311_s1 + $0xb28] ss:$16 sps:$4 sm:$0xff]  }
 0x12c   :  { %3942 = vmatprep.subr.bf16.mxu0 %v5983_v61  ;;  %4419 = vmatprep.subr.bf16.mxu1 %v5986_v62  ;;  %v6079_v61 = vld [vmem:[%s8311_s1 + $0xb44] ss:$16 sps:$4 sm:$0xff]   ;;  %v6082_v62 = vld [vmem:[%s8311_s1 + $0xb4c] ss:$16 sps:$4 sm:$0xff]  }
 0x12f   :  { %3943 = vmatpush1.bf16.msra.mxu0 %v5981_v63  ;;  %4420 = vmatpush1.bf16.msra.mxu1 %v5984_v0  ;;  %v6077_v63 = vld [vmem:[%s8311_s1 + $0xb40] ss:$16 sps:$4 sm:$0xff]   ;;  %v6080_v0 = vld [vmem:[%s8311_s1 + $0xb48] ss:$16 sps:$4 sm:$0xff]  }
 0x130   :  { %3944 = vmatprep.subr.bf16.mxu0 %v5989_v1  ;;  %4421 = vmatprep.subr.bf16.mxu1 %v5992_v2  ;;  %v6085_v1 = vld [vmem:[%s8311_s1 + $0xb64] ss:$16 sps:$4 sm:$0xff]   ;;  %v6088_v2 = vld [vmem:[%s8311_s1 + $0xb6c] ss:$16 sps:$4 sm:$0xff]  }
 0x133   :  { %3945 = vmatpush1.bf16.msra.mxu0 %v5987_v3  ;;  %4422 = vmatpush1.bf16.msra.mxu1 %v5990_v4  ;;  %v6083_v3 = vld [vmem:[%s8311_s1 + $0xb60] ss:$16 sps:$4 sm:$0xff]   ;;  %v6086_v4 = vld [vmem:[%s8311_s1 + $0xb68] ss:$16 sps:$4 sm:$0xff]  }
 0x134   :  { %3946 = vmatprep.subr.bf16.mxu0 %v5995_v5  ;;  %4423 = vmatprep.subr.bf16.mxu1 %v5998_v6  ;;  %v6091_v5 = vld [vmem:[%s8311_s1 + $0xb84] ss:$16 sps:$4 sm:$0xff]   ;;  %v6094_v6 = vld [vmem:[%s8311_s1 + $0xb8c] ss:$16 sps:$4 sm:$0xff]  }
 0x137   :  { %3947 = vmatpush1.bf16.msra.mxu0 %v5993_v7  ;;  %4424 = vmatpush1.bf16.msra.mxu1 %v5996_v8  ;;  %v6089_v7 = vld [vmem:[%s8311_s1 + $0xb80] ss:$16 sps:$4 sm:$0xff]   ;;  %v6092_v8 = vld [vmem:[%s8311_s1 + $0xb88] ss:$16 sps:$4 sm:$0xff]  }
 0x138   :  { %3948 = vmatprep.subr.bf16.mxu0 %v6003_v9  ;;  %4425 = vmatprep.subr.bf16.mxu1 %v6006_v10  ;;  %v6097_v9 = vld [vmem:[%s8311_s1 + $0xba4] ss:$16 sps:$4 sm:$0xff]   ;;  %v6100_v10 = vld [vmem:[%s8311_s1 + $0xbac] ss:$16 sps:$4 sm:$0xff]  }
 0x13b   :  { %3949 = vmatpush1.bf16.msra.mxu0 %v6001_v11  ;;  %4426 = vmatpush1.bf16.msra.mxu1 %v6004_v12  ;;  %v6095_v11 = vld [vmem:[%s8311_s1 + $0xba0] ss:$16 sps:$4 sm:$0xff]   ;;  %v6098_v12 = vld [vmem:[%s8311_s1 + $0xba8] ss:$16 sps:$4 sm:$0xff]  }
 0x13c   :  { %3950 = vmatprep.subr.bf16.mxu0 %v6010_v13  ;;  %4427 = vmatprep.subr.bf16.mxu1 %v6013_v14  ;;  %v6105_v13 = vld [vmem:[%s8311_s1 + $0xbc4] ss:$16 sps:$4 sm:$0xff]   ;;  %v6108_v14 = vld [vmem:[%s8311_s1 + $0xbcc] ss:$16 sps:$4 sm:$0xff]  }
 0x13f   :  { %3951 = vmatpush1.bf16.msra.mxu0 %v6008_v15  ;;  %4428 = vmatpush1.bf16.msra.mxu1 %v6011_v16  ;;  %v6103_v15 = vld [vmem:[%s8311_s1 + $0xbc0] ss:$16 sps:$4 sm:$0xff]   ;;  %v6106_v16 = vld [vmem:[%s8311_s1 + $0xbc8] ss:$16 sps:$4 sm:$0xff]  }
 0x140   :  { %3973 = vmatprep.subr.bf16.mxu0 %v6019_v18  ;;  %4450 = vmatprep.subr.bf16.mxu1 %v6022_v19  ;;  %v6115_v18 = vld [vmem:[%s8311_s1 + $0xbec] ss:$16 sps:$4 sm:$0xff]   ;;  %v6110_v19 = vld [vmem:[%s8311_s1 + $0xbe0] ss:$16 sps:$4 sm:$0xff]  }
 0x142   :  { %3953 = vmatmul.mubr.bf16.vlgmr.msra.gmra.mrb[0].mxu0 %v6014_v17  ;;  %4430 = vmatmul.mubr.bf16.vlgmr.msra.gmra.mrb[0].mxu1 %v6014_v17  ;;  %v6112_v17 = vld [vmem:[%s8311_s1 + $0xbe4] ss:$16 sps:$4 sm:$0xff]  }
 0x143   :  { %3974 = vmatpush1.bf16.msra.mxu0 %v6017_v20  ;;  %4451 = vmatpush1.bf16.msra.mxu1 %v6020_v21  ;;  %v6113_v20 = vld [vmem:[%s8311_s1 + $0xbe8] ss:$16 sps:$4 sm:$0xff]  }
 0x144   :  { %3975 = vmatprep.subr.bf16.mxu0 %v6025_v22  ;;  %4452 = vmatprep.subr.bf16.mxu1 %v6028_v23  ;;  %v6116_v21 = vld [vmem:[%s8312_s0 + $0x28] ss:$72 sps:$4 sm:$0xff]   ;;  %v6121_v22 = vld [vmem:[%s8311_s1 + $0xc04] ss:$16 sps:$4 sm:$0xff]   ;;  %v6124_v23 = vld [vmem:[%s8311_s1 + $0xc0c] ss:$16 sps:$4 sm:$0xff]  }
 0x145   :  { %3962 = vmatprep.mubr.bf16.mxu0 %v6101_v24  ;;  %4439 = vmatprep.mubr.bf16.mxu1 %v6101_v24  ;;  %v6119_v24 = vld [vmem:[%s8311_s1 + $0xc00] ss:$16 sps:$4 sm:$0xff]  }
 0x147   :  { %3976 = vmatpush1.bf16.msra.mxu0 %v6023_v25  ;;  %4453 = vmatpush1.bf16.msra.mxu1 %v6026_v26  ;;  %v6122_v25 = vld [vmem:[%s8311_s1 + $0xc08] ss:$16 sps:$4 sm:$0xff]   ;;  %v6127_v26 = vld [vmem:[%s8311_s1 + $0xc24] ss:$16 sps:$4 sm:$0xff]  }
 0x148   :  { %3977 = vmatprep.subr.bf16.mxu0 %v6031_v27  ;;  %4454 = vmatprep.subr.bf16.mxu1 %v6034_v28  ;;  %v6130_v27 = vld [vmem:[%s8311_s1 + $0xc2c] ss:$16 sps:$4 sm:$0xff]  }
 0x149   :  { %v6203_v28 = vld [vmem:[%s8312_s0 + $0xbc] ss:$72 sps:$4 sm:$0xff]  }
 0x14a   :  { %3963 = vmatmul.mubr.bf16.gmra.mrb[4].mxu0 %v6109_v29  ;;  %4440 = vmatmul.mubr.bf16.gmra.mrb[4].mxu1 %v6109_v29  ;;  %v6125_v29 = vld [vmem:[%s8311_s1 + $0xc20] ss:$16 sps:$4 sm:$0xff]  }
 0x14b   :  { %3978 = vmatpush1.bf16.msra.mxu0 %v6029_v30  ;;  %4455 = vmatpush1.bf16.msra.mxu1 %v6032_v31  ;;  %v6128_v30 = vld [vmem:[%s8311_s1 + $0xc28] ss:$16 sps:$4 sm:$0xff]   ;;  %v6133_v31 = vld [vmem:[%s8311_s1 + $0xc44] ss:$16 sps:$4 sm:$0xff]  }
 0x14c   :  { %3979 = vmatprep.subr.bf16.mxu0 %v6037_v32  ;;  %4456 = vmatprep.subr.bf16.mxu1 %v6040_v33  ;;  %v6136_v32 = vld [vmem:[%s8311_s1 + $0xc4c] ss:$16 sps:$4 sm:$0xff]   ;;  %v6211_v33 = vld [vmem:[%s8312_s0 + $0xb8] ss:$72 sps:$4 sm:$0xff]  }
 0x14d   :  { %4005 = vmatprep.mubr.bf16.mxu0 %v6118_v34  ;;  %4482 = vmatprep.mubr.bf16.mxu1 %v6118_v34  ;;  %v6131_v34 = vld [vmem:[%s8311_s1 + $0xc40] ss:$16 sps:$4 sm:$0xff]  }
 0x14f   :  { %3980 = vmatpush1.bf16.msra.mxu0 %v6035_v35  ;;  %4457 = vmatpush1.bf16.msra.mxu1 %v6038_v36  ;;  %v6134_v35 = vld [vmem:[%s8311_s1 + $0xc48] ss:$16 sps:$4 sm:$0xff]   ;;  %v6139_v36 = vld [vmem:[%s8311_s1 + $0xc64] ss:$16 sps:$4 sm:$0xff]  }
 0x150   :  { %3981 = vmatprep.subr.bf16.mxu0 %v6043_v37  ;;  %4458 = vmatprep.subr.bf16.mxu1 %v6046_v38  ;;  %v6142_v37 = vld [vmem:[%s8311_s1 + $0xc6c] ss:$16 sps:$4 sm:$0xff]  }
 0x151   :  { %v6220_v38 = vld [vmem:[%s8312_s0 + $0x34] ss:$72 sps:$4 sm:$0xff]  }
 0x153   :  { %3982 = vmatpush1.bf16.msra.mxu0 %v6041_v39  ;;  %4459 = vmatpush1.bf16.msra.mxu1 %v6044_v40  ;;  %v6137_v39 = vld [vmem:[%s8311_s1 + $0xc60] ss:$16 sps:$4 sm:$0xff]   ;;  %v6140_v40 = vld [vmem:[%s8311_s1 + $0xc68] ss:$16 sps:$4 sm:$0xff]  }
 0x154   :  { %3983 = vmatprep.subr.bf16.mxu0 %v6049_v41  ;;  %4460 = vmatprep.subr.bf16.mxu1 %v6052_v42  ;;  %v6145_v41 = vld [vmem:[%s8311_s1 + $0xc84] ss:$16 sps:$4 sm:$0xff]   ;;  %v6148_v42 = vld [vmem:[%s8311_s1 + $0xc8c] ss:$16 sps:$4 sm:$0xff]  }
 0x157   :  { %3984 = vmatpush1.bf16.msra.mxu0 %v6047_v43  ;;  %4461 = vmatpush1.bf16.msra.mxu1 %v6050_v44  ;;  %v6143_v43 = vld [vmem:[%s8311_s1 + $0xc80] ss:$16 sps:$4 sm:$0xff]   ;;  %v6146_v44 = vld [vmem:[%s8311_s1 + $0xc88] ss:$16 sps:$4 sm:$0xff]  }
 0x158   :  { %3985 = vmatprep.subr.bf16.mxu0 %v6055_v45  ;;  %4462 = vmatprep.subr.bf16.mxu1 %v6058_v46  ;;  %v6151_v45 = vld [vmem:[%s8311_s1 + $0xca4] ss:$16 sps:$4 sm:$0xff]   ;;  %v6154_v46 = vld [vmem:[%s8311_s1 + $0xcac] ss:$16 sps:$4 sm:$0xff]  }
 0x15b   :  { %3986 = vmatpush1.bf16.msra.mxu0 %v6053_v47  ;;  %4463 = vmatpush1.bf16.msra.mxu1 %v6056_v48  ;;  %v6149_v47 = vld [vmem:[%s8311_s1 + $0xca0] ss:$16 sps:$4 sm:$0xff]   ;;  %v6152_v48 = vld [vmem:[%s8311_s1 + $0xca8] ss:$16 sps:$4 sm:$0xff]  }
 0x15c   :  { %3987 = vmatprep.subr.bf16.mxu0 %v6061_v49  ;;  %4464 = vmatprep.subr.bf16.mxu1 %v6064_v50  ;;  %v6157_v49 = vld [vmem:[%s8311_s1 + $0xcc4] ss:$16 sps:$4 sm:$0xff]   ;;  %v6160_v50 = vld [vmem:[%s8311_s1 + $0xccc] ss:$16 sps:$4 sm:$0xff]  }
 0x15f   :  { %3988 = vmatpush1.bf16.msra.mxu0 %v6059_v51  ;;  %4465 = vmatpush1.bf16.msra.mxu1 %v6062_v52  ;;  %v6155_v51 = vld [vmem:[%s8311_s1 + $0xcc0] ss:$16 sps:$4 sm:$0xff]   ;;  %v6158_v52 = vld [vmem:[%s8311_s1 + $0xcc8] ss:$16 sps:$4 sm:$0xff]  }
 0x160   :  { %3989 = vmatprep.subr.bf16.mxu0 %v6067_v53  ;;  %4466 = vmatprep.subr.bf16.mxu1 %v6070_v54  ;;  %v6163_v53 = vld [vmem:[%s8311_s1 + $0xce4] ss:$16 sps:$4 sm:$0xff]   ;;  %v6166_v54 = vld [vmem:[%s8311_s1 + $0xcec] ss:$16 sps:$4 sm:$0xff]  }
 0x163   :  { %3990 = vmatpush1.bf16.msra.mxu0 %v6065_v55  ;;  %4467 = vmatpush1.bf16.msra.mxu1 %v6068_v56  ;;  %v6161_v55 = vld [vmem:[%s8311_s1 + $0xce0] ss:$16 sps:$4 sm:$0xff]   ;;  %v6164_v56 = vld [vmem:[%s8311_s1 + $0xce8] ss:$16 sps:$4 sm:$0xff]  }
 0x164   :  { %3991 = vmatprep.subr.bf16.mxu0 %v6073_v57  ;;  %4468 = vmatprep.subr.bf16.mxu1 %v6076_v58  ;;  %v6169_v57 = vld [vmem:[%s8311_s1 + $0xd04] ss:$16 sps:$4 sm:$0xff]   ;;  %v6172_v58 = vld [vmem:[%s8311_s1 + $0xd0c] ss:$16 sps:$4 sm:$0xff]  }
 0x167   :  { %3992 = vmatpush1.bf16.msra.mxu0 %v6071_v59  ;;  %4469 = vmatpush1.bf16.msra.mxu1 %v6074_v60  ;;  %v6167_v59 = vld [vmem:[%s8311_s1 + $0xd00] ss:$16 sps:$4 sm:$0xff]   ;;  %v6170_v60 = vld [vmem:[%s8311_s1 + $0xd08] ss:$16 sps:$4 sm:$0xff]  }
 0x168   :  { %3993 = vmatprep.subr.bf16.mxu0 %v6079_v61  ;;  %4470 = vmatprep.subr.bf16.mxu1 %v6082_v62  ;;  %v6175_v61 = vld [vmem:[%s8311_s1 + $0xd24] ss:$16 sps:$4 sm:$0xff]   ;;  %v6178_v62 = vld [vmem:[%s8311_s1 + $0xd2c] ss:$16 sps:$4 sm:$0xff]  }
 0x16b   :  { %3994 = vmatpush1.bf16.msra.mxu0 %v6077_v63  ;;  %4471 = vmatpush1.bf16.msra.mxu1 %v6080_v0  ;;  %v6173_v63 = vld [vmem:[%s8311_s1 + $0xd20] ss:$16 sps:$4 sm:$0xff]   ;;  %v6176_v0 = vld [vmem:[%s8311_s1 + $0xd28] ss:$16 sps:$4 sm:$0xff]  }
 0x16c   :  { %3995 = vmatprep.subr.bf16.mxu0 %v6085_v1  ;;  %4472 = vmatprep.subr.bf16.mxu1 %v6088_v2  ;;  %v6181_v1 = vld [vmem:[%s8311_s1 + $0xd44] ss:$16 sps:$4 sm:$0xff]   ;;  %v6184_v2 = vld [vmem:[%s8311_s1 + $0xd4c] ss:$16 sps:$4 sm:$0xff]  }
 0x16f   :  { %3996 = vmatpush1.bf16.msra.mxu0 %v6083_v3  ;;  %4473 = vmatpush1.bf16.msra.mxu1 %v6086_v4  ;;  %v6179_v3 = vld [vmem:[%s8311_s1 + $0xd40] ss:$16 sps:$4 sm:$0xff]   ;;  %v6182_v4 = vld [vmem:[%s8311_s1 + $0xd48] ss:$16 sps:$4 sm:$0xff]  }
 0x170   :  { %3997 = vmatprep.subr.bf16.mxu0 %v6091_v5  ;;  %4474 = vmatprep.subr.bf16.mxu1 %v6094_v6  ;;  %v6187_v5 = vld [vmem:[%s8311_s1 + $0xd64] ss:$16 sps:$4 sm:$0xff]   ;;  %v6190_v6 = vld [vmem:[%s8311_s1 + $0xd6c] ss:$16 sps:$4 sm:$0xff]  }
 0x173   :  { %3998 = vmatpush1.bf16.msra.mxu0 %v6089_v7  ;;  %4475 = vmatpush1.bf16.msra.mxu1 %v6092_v8  ;;  %v6185_v7 = vld [vmem:[%s8311_s1 + $0xd60] ss:$16 sps:$4 sm:$0xff]   ;;  %v6188_v8 = vld [vmem:[%s8311_s1 + $0xd68] ss:$16 sps:$4 sm:$0xff]  }
 0x174   :  { %3999 = vmatprep.subr.bf16.mxu0 %v6097_v9  ;;  %4476 = vmatprep.subr.bf16.mxu1 %v6100_v10  ;;  %v6193_v9 = vld [vmem:[%s8311_s1 + $0xd84] ss:$16 sps:$4 sm:$0xff]   ;;  %v6196_v10 = vld [vmem:[%s8311_s1 + $0xd8c] ss:$16 sps:$4 sm:$0xff]  }
 0x177   :  { %4000 = vmatpush1.bf16.msra.mxu0 %v6095_v11  ;;  %4477 = vmatpush1.bf16.msra.mxu1 %v6098_v12  ;;  %v6191_v11 = vld [vmem:[%s8311_s1 + $0xd80] ss:$16 sps:$4 sm:$0xff]   ;;  %v6194_v12 = vld [vmem:[%s8311_s1 + $0xd88] ss:$16 sps:$4 sm:$0xff]  }
 0x178   :  { %4001 = vmatprep.subr.bf16.mxu0 %v6105_v13  ;;  %4478 = vmatprep.subr.bf16.mxu1 %v6108_v14  ;;  %v6199_v13 = vld [vmem:[%s8311_s1 + $0xda4] ss:$16 sps:$4 sm:$0xff]   ;;  %v6202_v14 = vld [vmem:[%s8311_s1 + $0xdac] ss:$16 sps:$4 sm:$0xff]  }
 0x17b   :  { %4002 = vmatpush1.bf16.msra.mxu0 %v6103_v15  ;;  %4479 = vmatpush1.bf16.msra.mxu1 %v6106_v16  ;;  %v6197_v15 = vld [vmem:[%s8311_s1 + $0xda0] ss:$16 sps:$4 sm:$0xff]   ;;  %v6200_v16 = vld [vmem:[%s8311_s1 + $0xda8] ss:$16 sps:$4 sm:$0xff]  }
 0x17c   :  { %4003 = vmatprep.subr.bf16.mxu0 %v6112_v17  ;;  %4480 = vmatprep.subr.bf16.mxu1 %v6115_v18  ;;  %v6207_v17 = vld [vmem:[%s8311_s1 + $0xdc4] ss:$16 sps:$4 sm:$0xff]   ;;  %v6210_v18 = vld [vmem:[%s8311_s1 + $0xdcc] ss:$16 sps:$4 sm:$0xff]  }
 0x17f   :  { %4004 = vmatpush1.bf16.msra.mxu0 %v6110_v19  ;;  %4481 = vmatpush1.bf16.msra.mxu1 %v6113_v20  ;;  %v6205_v19 = vld [vmem:[%s8311_s1 + $0xdc0] ss:$16 sps:$4 sm:$0xff]   ;;  %v6208_v20 = vld [vmem:[%s8311_s1 + $0xdc8] ss:$16 sps:$4 sm:$0xff]  }
 0x180   :  { %4026 = vmatprep.subr.bf16.mxu0 %v6121_v22  ;;  %4503 = vmatprep.subr.bf16.mxu1 %v6124_v23  ;;  %v6217_v22 = vld [vmem:[%s8311_s1 + $0xdec] ss:$16 sps:$4 sm:$0xff]   ;;  %v6212_v23 = vld [vmem:[%s8311_s1 + $0xde0] ss:$16 sps:$4 sm:$0xff]  }
 0x182   :  { %4006 = vmatmul.mubr.bf16.vlgmr.msra.gmra.mrb[0].mxu0 %v6116_v21  ;;  %4483 = vmatmul.mubr.bf16.vlgmr.msra.gmra.mrb[0].mxu1 %v6116_v21  ;;  %v6214_v21 = vld [vmem:[%s8311_s1 + $0xde4] ss:$16 sps:$4 sm:$0xff]  }
 0x183   :  { %4027 = vmatpush1.bf16.msra.mxu0 %v6119_v24  ;;  %4504 = vmatpush1.bf16.msra.mxu1 %v6122_v25  ;;  %v6215_v24 = vld [vmem:[%s8311_s1 + $0xde8] ss:$16 sps:$4 sm:$0xff]   ;;  %v6223_v25 = vld [vmem:[%s8311_s1 + $0xe04] ss:$16 sps:$4 sm:$0xff]  }
 0x184   :  { %4028 = vmatprep.subr.bf16.mxu0 %v6127_v26  ;;  %4505 = vmatprep.subr.bf16.mxu1 %v6130_v27  ;;  %v6226_v26 = vld [vmem:[%s8311_s1 + $0xe0c] ss:$16 sps:$4 sm:$0xff]   ;;  %v6218_v27 = vld [vmem:[%s8312_s0 + $0x30] ss:$72 sps:$4 sm:$0xff]  }
 0x185   :  { %4015 = vmatprep.mubr.bf16.mxu0 %v6203_v28  ;;  %4492 = vmatprep.mubr.bf16.mxu1 %v6203_v28  ;;  %v6221_v28 = vld [vmem:[%s8311_s1 + $0xe00] ss:$16 sps:$4 sm:$0xff]  }
 0x187   :  { %4029 = vmatpush1.bf16.msra.mxu0 %v6125_v29  ;;  %4506 = vmatpush1.bf16.msra.mxu1 %v6128_v30  ;;  %v6224_v29 = vld [vmem:[%s8311_s1 + $0xe08] ss:$16 sps:$4 sm:$0xff]   ;;  %v6229_v30 = vld [vmem:[%s8311_s1 + $0xe24] ss:$16 sps:$4 sm:$0xff]  }
 0x188   :  { %4030 = vmatprep.subr.bf16.mxu0 %v6133_v31  ;;  %4507 = vmatprep.subr.bf16.mxu1 %v6136_v32  ;;  %v6232_v31 = vld [vmem:[%s8311_s1 + $0xe2c] ss:$16 sps:$4 sm:$0xff]  }
 0x189   :  { %v6305_v32 = vld [vmem:[%s8312_s0 + $0xc4] ss:$72 sps:$4 sm:$0xff]  }
 0x18a   :  { %4016 = vmatmul.mubr.bf16.gmra.mrb[4].mxu0 %v6211_v33  ;;  %4493 = vmatmul.mubr.bf16.gmra.mrb[4].mxu1 %v6211_v33  ;;  %v6227_v33 = vld [vmem:[%s8311_s1 + $0xe20] ss:$16 sps:$4 sm:$0xff]  }
 0x18b   :  { %4031 = vmatpush1.bf16.msra.mxu0 %v6131_v34  ;;  %4508 = vmatpush1.bf16.msra.mxu1 %v6134_v35  ;;  %v6230_v34 = vld [vmem:[%s8311_s1 + $0xe28] ss:$16 sps:$4 sm:$0xff]   ;;  %v6235_v35 = vld [vmem:[%s8311_s1 + $0xe44] ss:$16 sps:$4 sm:$0xff]  }
 0x18c   :  { %4032 = vmatprep.subr.bf16.mxu0 %v6139_v36  ;;  %4509 = vmatprep.subr.bf16.mxu1 %v6142_v37  ;;  %v6238_v36 = vld [vmem:[%s8311_s1 + $0xe4c] ss:$16 sps:$4 sm:$0xff]   ;;  %v6313_v37 = vld [vmem:[%s8312_s0 + $0xc0] ss:$72 sps:$4 sm:$0xff]  }
 0x18d   :  { %4058 = vmatprep.mubr.bf16.mxu0 %v6220_v38  ;;  %4535 = vmatprep.mubr.bf16.mxu1 %v6220_v38  ;;  %v6233_v38 = vld [vmem:[%s8311_s1 + $0xe40] ss:$16 sps:$4 sm:$0xff]  }
 0x18f   :  { %4033 = vmatpush1.bf16.msra.mxu0 %v6137_v39  ;;  %4510 = vmatpush1.bf16.msra.mxu1 %v6140_v40  ;;  %v6236_v39 = vld [vmem:[%s8311_s1 + $0xe48] ss:$16 sps:$4 sm:$0xff]   ;;  %v6241_v40 = vld [vmem:[%s8311_s1 + $0xe64] ss:$16 sps:$4 sm:$0xff]  }
 0x190   :  { %4034 = vmatprep.subr.bf16.mxu0 %v6145_v41  ;;  %4511 = vmatprep.subr.bf16.mxu1 %v6148_v42  ;;  %v6244_v41 = vld [vmem:[%s8311_s1 + $0xe6c] ss:$16 sps:$4 sm:$0xff]  }
 0x191   :  { %v6322_v42 = vld [vmem:[%s8312_s0 + $0x3c] ss:$72 sps:$4 sm:$0xff]  }
 0x193   :  { %4035 = vmatpush1.bf16.msra.mxu0 %v6143_v43  ;;  %4512 = vmatpush1.bf16.msra.mxu1 %v6146_v44  ;;  %v6239_v43 = vld [vmem:[%s8311_s1 + $0xe60] ss:$16 sps:$4 sm:$0xff]   ;;  %v6242_v44 = vld [vmem:[%s8311_s1 + $0xe68] ss:$16 sps:$4 sm:$0xff]  }
 0x194   :  { %4036 = vmatprep.subr.bf16.mxu0 %v6151_v45  ;;  %4513 = vmatprep.subr.bf16.mxu1 %v6154_v46  ;;  %v6247_v45 = vld [vmem:[%s8311_s1 + $0xe84] ss:$16 sps:$4 sm:$0xff]   ;;  %v6250_v46 = vld [vmem:[%s8311_s1 + $0xe8c] ss:$16 sps:$4 sm:$0xff]  }
 0x197   :  { %4037 = vmatpush1.bf16.msra.mxu0 %v6149_v47  ;;  %4514 = vmatpush1.bf16.msra.mxu1 %v6152_v48  ;;  %v6245_v47 = vld [vmem:[%s8311_s1 + $0xe80] ss:$16 sps:$4 sm:$0xff]   ;;  %v6248_v48 = vld [vmem:[%s8311_s1 + $0xe88] ss:$16 sps:$4 sm:$0xff]  }
 0x198   :  { %4038 = vmatprep.subr.bf16.mxu0 %v6157_v49  ;;  %4515 = vmatprep.subr.bf16.mxu1 %v6160_v50  ;;  %v6253_v49 = vld [vmem:[%s8311_s1 + $0xea4] ss:$16 sps:$4 sm:$0xff]   ;;  %v6256_v50 = vld [vmem:[%s8311_s1 + $0xeac] ss:$16 sps:$4 sm:$0xff]  }
 0x19b   :  { %4039 = vmatpush1.bf16.msra.mxu0 %v6155_v51  ;;  %4516 = vmatpush1.bf16.msra.mxu1 %v6158_v52  ;;  %v6251_v51 = vld [vmem:[%s8311_s1 + $0xea0] ss:$16 sps:$4 sm:$0xff]   ;;  %v6254_v52 = vld [vmem:[%s8311_s1 + $0xea8] ss:$16 sps:$4 sm:$0xff]  }
 0x19c   :  { %4040 = vmatprep.subr.bf16.mxu0 %v6163_v53  ;;  %4517 = vmatprep.subr.bf16.mxu1 %v6166_v54  ;;  %v6259_v53 = vld [vmem:[%s8311_s1 + $0xec4] ss:$16 sps:$4 sm:$0xff]   ;;  %v6262_v54 = vld [vmem:[%s8311_s1 + $0xecc] ss:$16 sps:$4 sm:$0xff]  }
 0x19f   :  { %4041 = vmatpush1.bf16.msra.mxu0 %v6161_v55  ;;  %4518 = vmatpush1.bf16.msra.mxu1 %v6164_v56  ;;  %v6257_v55 = vld [vmem:[%s8311_s1 + $0xec0] ss:$16 sps:$4 sm:$0xff]   ;;  %v6260_v56 = vld [vmem:[%s8311_s1 + $0xec8] ss:$16 sps:$4 sm:$0xff]  }
 0x1a0   :  { %4042 = vmatprep.subr.bf16.mxu0 %v6169_v57  ;;  %4519 = vmatprep.subr.bf16.mxu1 %v6172_v58  ;;  %v6265_v57 = vld [vmem:[%s8311_s1 + $0xee4] ss:$16 sps:$4 sm:$0xff]   ;;  %v6268_v58 = vld [vmem:[%s8311_s1 + $0xeec] ss:$16 sps:$4 sm:$0xff]  }
 0x1a3   :  { %4043 = vmatpush1.bf16.msra.mxu0 %v6167_v59  ;;  %4520 = vmatpush1.bf16.msra.mxu1 %v6170_v60  ;;  %v6263_v59 = vld [vmem:[%s8311_s1 + $0xee0] ss:$16 sps:$4 sm:$0xff]   ;;  %v6266_v60 = vld [vmem:[%s8311_s1 + $0xee8] ss:$16 sps:$4 sm:$0xff]  }
 0x1a4   :  { %4044 = vmatprep.subr.bf16.mxu0 %v6175_v61  ;;  %4521 = vmatprep.subr.bf16.mxu1 %v6178_v62  ;;  %v6271_v61 = vld [vmem:[%s8311_s1 + $0xf04] ss:$16 sps:$4 sm:$0xff]   ;;  %v6274_v62 = vld [vmem:[%s8311_s1 + $0xf0c] ss:$16 sps:$4 sm:$0xff]  }
 0x1a7   :  { %4045 = vmatpush1.bf16.msra.mxu0 %v6173_v63  ;;  %4522 = vmatpush1.bf16.msra.mxu1 %v6176_v0  ;;  %v6269_v63 = vld [vmem:[%s8311_s1 + $0xf00] ss:$16 sps:$4 sm:$0xff]   ;;  %v6272_v0 = vld [vmem:[%s8311_s1 + $0xf08] ss:$16 sps:$4 sm:$0xff]  }
 0x1a8   :  { %4046 = vmatprep.subr.bf16.mxu0 %v6181_v1  ;;  %4523 = vmatprep.subr.bf16.mxu1 %v6184_v2  ;;  %v6277_v1 = vld [vmem:[%s8311_s1 + $0xf24] ss:$16 sps:$4 sm:$0xff]   ;;  %v6280_v2 = vld [vmem:[%s8311_s1 + $0xf2c] ss:$16 sps:$4 sm:$0xff]  }
 0x1ab   :  { %4047 = vmatpush1.bf16.msra.mxu0 %v6179_v3  ;;  %4524 = vmatpush1.bf16.msra.mxu1 %v6182_v4  ;;  %v6275_v3 = vld [vmem:[%s8311_s1 + $0xf20] ss:$16 sps:$4 sm:$0xff]   ;;  %v6278_v4 = vld [vmem:[%s8311_s1 + $0xf28] ss:$16 sps:$4 sm:$0xff]  }
 0x1ac   :  { %4048 = vmatprep.subr.bf16.mxu0 %v6187_v5  ;;  %4525 = vmatprep.subr.bf16.mxu1 %v6190_v6  ;;  %v6283_v5 = vld [vmem:[%s8311_s1 + $0xf44] ss:$16 sps:$4 sm:$0xff]   ;;  %v6286_v6 = vld [vmem:[%s8311_s1 + $0xf4c] ss:$16 sps:$4 sm:$0xff]  }
 0x1af   :  { %4049 = vmatpush1.bf16.msra.mxu0 %v6185_v7  ;;  %4526 = vmatpush1.bf16.msra.mxu1 %v6188_v8  ;;  %v6281_v7 = vld [vmem:[%s8311_s1 + $0xf40] ss:$16 sps:$4 sm:$0xff]   ;;  %v6284_v8 = vld [vmem:[%s8311_s1 + $0xf48] ss:$16 sps:$4 sm:$0xff]  }
 0x1b0   :  { %4050 = vmatprep.subr.bf16.mxu0 %v6193_v9  ;;  %4527 = vmatprep.subr.bf16.mxu1 %v6196_v10  ;;  %v6289_v9 = vld [vmem:[%s8311_s1 + $0xf64] ss:$16 sps:$4 sm:$0xff]   ;;  %v6292_v10 = vld [vmem:[%s8311_s1 + $0xf6c] ss:$16 sps:$4 sm:$0xff]  }
 0x1b3   :  { %4051 = vmatpush1.bf16.msra.mxu0 %v6191_v11  ;;  %4528 = vmatpush1.bf16.msra.mxu1 %v6194_v12  ;;  %v6287_v11 = vld [vmem:[%s8311_s1 + $0xf60] ss:$16 sps:$4 sm:$0xff]   ;;  %v6290_v12 = vld [vmem:[%s8311_s1 + $0xf68] ss:$16 sps:$4 sm:$0xff]  }
 0x1b4   :  { %4052 = vmatprep.subr.bf16.mxu0 %v6199_v13  ;;  %4529 = vmatprep.subr.bf16.mxu1 %v6202_v14  ;;  %v6295_v13 = vld [vmem:[%s8311_s1 + $0xf84] ss:$16 sps:$4 sm:$0xff]   ;;  %v6298_v14 = vld [vmem:[%s8311_s1 + $0xf8c] ss:$16 sps:$4 sm:$0xff]  }
 0x1b7   :  { %4053 = vmatpush1.bf16.msra.mxu0 %v6197_v15  ;;  %4530 = vmatpush1.bf16.msra.mxu1 %v6200_v16  ;;  %v6293_v15 = vld [vmem:[%s8311_s1 + $0xf80] ss:$16 sps:$4 sm:$0xff]   ;;  %v6296_v16 = vld [vmem:[%s8311_s1 + $0xf88] ss:$16 sps:$4 sm:$0xff]  }
 0x1b8   :  { %4054 = vmatprep.subr.bf16.mxu0 %v6207_v17  ;;  %4531 = vmatprep.subr.bf16.mxu1 %v6210_v18  ;;  %v6301_v17 = vld [vmem:[%s8311_s1 + $0xfa4] ss:$16 sps:$4 sm:$0xff]   ;;  %v6304_v18 = vld [vmem:[%s8311_s1 + $0xfac] ss:$16 sps:$4 sm:$0xff]  }
 0x1bb   :  { %4055 = vmatpush1.bf16.msra.mxu0 %v6205_v19  ;;  %4532 = vmatpush1.bf16.msra.mxu1 %v6208_v20  ;;  %v6299_v19 = vld [vmem:[%s8311_s1 + $0xfa0] ss:$16 sps:$4 sm:$0xff]   ;;  %v6302_v20 = vld [vmem:[%s8311_s1 + $0xfa8] ss:$16 sps:$4 sm:$0xff]  }
 0x1bc   :  { %4056 = vmatprep.subr.bf16.mxu0 %v6214_v21  ;;  %4533 = vmatprep.subr.bf16.mxu1 %v6217_v22  ;;  %v6309_v21 = vld [vmem:[%s8311_s1 + $0xfc4] ss:$16 sps:$4 sm:$0xff]   ;;  %v6312_v22 = vld [vmem:[%s8311_s1 + $0xfcc] ss:$16 sps:$4 sm:$0xff]  }
 0x1bf   :  { %4057 = vmatpush1.bf16.msra.mxu0 %v6212_v23  ;;  %4534 = vmatpush1.bf16.msra.mxu1 %v6215_v24  ;;  %v6307_v23 = vld [vmem:[%s8311_s1 + $0xfc0] ss:$16 sps:$4 sm:$0xff]   ;;  %v6310_v24 = vld [vmem:[%s8311_s1 + $0xfc8] ss:$16 sps:$4 sm:$0xff]  }
 0x1c0   :  { %4079 = vmatprep.subr.bf16.mxu0 %v6223_v25  ;;  %4556 = vmatprep.subr.bf16.mxu1 %v6226_v26  ;;  %v6316_v25 = vld [vmem:[%s8311_s1 + $0xfe4] ss:$16 sps:$4 sm:$0xff]   ;;  %v6319_v26 = vld [vmem:[%s8311_s1 + $0xfec] ss:$16 sps:$4 sm:$0xff]  }
 0x1c2   :  { %4059 = vmatmul.mubr.bf16.vlgmr.msra.gmra.mrb[0].mxu0 %v6218_v27  ;;  %4536 = vmatmul.mubr.bf16.vlgmr.msra.gmra.mrb[0].mxu1 %v6218_v27  ;;  %v6314_v27 = vld [vmem:[%s8311_s1 + $0xfe0] ss:$16 sps:$4 sm:$0xff]  }
 0x1c3   :  { %4080 = vmatpush1.bf16.msra.mxu0 %v6221_v28  ;;  %4557 = vmatpush1.bf16.msra.mxu1 %v6224_v29  ;;  %v6317_v28 = vld [vmem:[%s8311_s1 + $0xfe8] ss:$16 sps:$4 sm:$0xff]   ;;  %v6325_v29 = vld [vmem:[%s8311_s1 + $0x1004] ss:$16 sps:$4 sm:$0xff]  }
 0x1c4   :  { %4081 = vmatprep.subr.bf16.mxu0 %v6229_v30  ;;  %4558 = vmatprep.subr.bf16.mxu1 %v6232_v31  ;;  %v6328_v30 = vld [vmem:[%s8311_s1 + $0x100c] ss:$16 sps:$4 sm:$0xff]   ;;  %v6320_v31 = vld [vmem:[%s8312_s0 + $0x38] ss:$72 sps:$4 sm:$0xff]  }
 0x1c5   :  { %4068 = vmatprep.mubr.bf16.mxu0 %v6305_v32  ;;  %4545 = vmatprep.mubr.bf16.mxu1 %v6305_v32  ;;  %v6323_v32 = vld [vmem:[%s8311_s1 + $0x1000] ss:$16 sps:$4 sm:$0xff]  }
 0x1c7   :  { %4082 = vmatpush1.bf16.msra.mxu0 %v6227_v33  ;;  %4559 = vmatpush1.bf16.msra.mxu1 %v6230_v34  ;;  %v6326_v33 = vld [vmem:[%s8311_s1 + $0x1008] ss:$16 sps:$4 sm:$0xff]   ;;  %v6331_v34 = vld [vmem:[%s8311_s1 + $0x1024] ss:$16 sps:$4 sm:$0xff]  }
 0x1c8   :  { %4083 = vmatprep.subr.bf16.mxu0 %v6235_v35  ;;  %4560 = vmatprep.subr.bf16.mxu1 %v6238_v36  ;;  %v6334_v35 = vld [vmem:[%s8311_s1 + $0x102c] ss:$16 sps:$4 sm:$0xff]  }
 0x1c9   :  { %v6407_v36 = vld [vmem:[%s8312_s0 + $0xcc] ss:$72 sps:$4 sm:$0xff]  }
 0x1ca   :  { %4069 = vmatmul.mubr.bf16.gmra.mrb[4].mxu0 %v6313_v37  ;;  %4546 = vmatmul.mubr.bf16.gmra.mrb[4].mxu1 %v6313_v37  ;;  %v6329_v37 = vld [vmem:[%s8311_s1 + $0x1020] ss:$16 sps:$4 sm:$0xff]  }
 0x1cb   :  { %4084 = vmatpush1.bf16.msra.mxu0 %v6233_v38  ;;  %4561 = vmatpush1.bf16.msra.mxu1 %v6236_v39  ;;  %v6332_v38 = vld [vmem:[%s8311_s1 + $0x1028] ss:$16 sps:$4 sm:$0xff]   ;;  %v6337_v39 = vld [vmem:[%s8311_s1 + $0x1044] ss:$16 sps:$4 sm:$0xff]  }
 0x1cc   :  { %4085 = vmatprep.subr.bf16.mxu0 %v6241_v40  ;;  %4562 = vmatprep.subr.bf16.mxu1 %v6244_v41  ;;  %v6340_v40 = vld [vmem:[%s8311_s1 + $0x104c] ss:$16 sps:$4 sm:$0xff]   ;;  %v6409_v41 = vld [vmem:[%s8312_s0 + $0xc8] ss:$72 sps:$4 sm:$0xff]  }
 0x1cd   :  { %4111 = vmatprep.mubr.bf16.mxu0 %v6322_v42  ;;  %4588 = vmatprep.mubr.bf16.mxu1 %v6322_v42  ;;  %v6335_v42 = vld [vmem:[%s8311_s1 + $0x1040] ss:$16 sps:$4 sm:$0xff]  }
 0x1cf   :  { %4086 = vmatpush1.bf16.msra.mxu0 %v6239_v43  ;;  %4563 = vmatpush1.bf16.msra.mxu1 %v6242_v44  ;;  %v6338_v43 = vld [vmem:[%s8311_s1 + $0x1048] ss:$16 sps:$4 sm:$0xff]   ;;  %v6343_v44 = vld [vmem:[%s8311_s1 + $0x1064] ss:$16 sps:$4 sm:$0xff]  }
 0x1d0   :  { %4087 = vmatprep.subr.bf16.mxu0 %v6247_v45  ;;  %4564 = vmatprep.subr.bf16.mxu1 %v6250_v46  ;;  %v6346_v45 = vld [vmem:[%s8311_s1 + $0x106c] ss:$16 sps:$4 sm:$0xff]  }
 0x1d1   :  { %v6424_v46 = vld [vmem:[%s8312_s0 + $0x44] ss:$72 sps:$4 sm:$0xff]  }
 0x1d3   :  { %4088 = vmatpush1.bf16.msra.mxu0 %v6245_v47  ;;  %4565 = vmatpush1.bf16.msra.mxu1 %v6248_v48  ;;  %v6341_v47 = vld [vmem:[%s8311_s1 + $0x1060] ss:$16 sps:$4 sm:$0xff]   ;;  %v6344_v48 = vld [vmem:[%s8311_s1 + $0x1068] ss:$16 sps:$4 sm:$0xff]  }
 0x1d4   :  { %4089 = vmatprep.subr.bf16.mxu0 %v6253_v49  ;;  %4566 = vmatprep.subr.bf16.mxu1 %v6256_v50  ;;  %v6349_v49 = vld [vmem:[%s8311_s1 + $0x1084] ss:$16 sps:$4 sm:$0xff]   ;;  %v6352_v50 = vld [vmem:[%s8311_s1 + $0x108c] ss:$16 sps:$4 sm:$0xff]  }
 0x1d7   :  { %4090 = vmatpush1.bf16.msra.mxu0 %v6251_v51  ;;  %4567 = vmatpush1.bf16.msra.mxu1 %v6254_v52  ;;  %v6347_v51 = vld [vmem:[%s8311_s1 + $0x1080] ss:$16 sps:$4 sm:$0xff]   ;;  %v6350_v52 = vld [vmem:[%s8311_s1 + $0x1088] ss:$16 sps:$4 sm:$0xff]  }
 0x1d8   :  { %4091 = vmatprep.subr.bf16.mxu0 %v6259_v53  ;;  %4568 = vmatprep.subr.bf16.mxu1 %v6262_v54  ;;  %v6355_v53 = vld [vmem:[%s8311_s1 + $0x10a4] ss:$16 sps:$4 sm:$0xff]   ;;  %v6358_v54 = vld [vmem:[%s8311_s1 + $0x10ac] ss:$16 sps:$4 sm:$0xff]  }
 0x1db   :  { %4092 = vmatpush1.bf16.msra.mxu0 %v6257_v55  ;;  %4569 = vmatpush1.bf16.msra.mxu1 %v6260_v56  ;;  %v6353_v55 = vld [vmem:[%s8311_s1 + $0x10a0] ss:$16 sps:$4 sm:$0xff]   ;;  %v6356_v56 = vld [vmem:[%s8311_s1 + $0x10a8] ss:$16 sps:$4 sm:$0xff]  }
 0x1dc   :  { %4093 = vmatprep.subr.bf16.mxu0 %v6265_v57  ;;  %4570 = vmatprep.subr.bf16.mxu1 %v6268_v58  ;;  %v6361_v57 = vld [vmem:[%s8311_s1 + $0x10c4] ss:$16 sps:$4 sm:$0xff]   ;;  %v6364_v58 = vld [vmem:[%s8311_s1 + $0x10cc] ss:$16 sps:$4 sm:$0xff]  }
 0x1df   :  { %4094 = vmatpush1.bf16.msra.mxu0 %v6263_v59  ;;  %4571 = vmatpush1.bf16.msra.mxu1 %v6266_v60  ;;  %v6359_v59 = vld [vmem:[%s8311_s1 + $0x10c0] ss:$16 sps:$4 sm:$0xff]   ;;  %v6362_v60 = vld [vmem:[%s8311_s1 + $0x10c8] ss:$16 sps:$4 sm:$0xff]  }
 0x1e0   :  { %4095 = vmatprep.subr.bf16.mxu0 %v6271_v61  ;;  %4572 = vmatprep.subr.bf16.mxu1 %v6274_v62  ;;  %v6367_v61 = vld [vmem:[%s8311_s1 + $0x10e4] ss:$16 sps:$4 sm:$0xff]   ;;  %v6370_v62 = vld [vmem:[%s8311_s1 + $0x10ec] ss:$16 sps:$4 sm:$0xff]  }
 0x1e3   :  { %4096 = vmatpush1.bf16.msra.mxu0 %v6269_v63  ;;  %4573 = vmatpush1.bf16.msra.mxu1 %v6272_v0  ;;  %v6365_v63 = vld [vmem:[%s8311_s1 + $0x10e0] ss:$16 sps:$4 sm:$0xff]   ;;  %v6368_v0 = vld [vmem:[%s8311_s1 + $0x10e8] ss:$16 sps:$4 sm:$0xff]  }
 0x1e4   :  { %4097 = vmatprep.subr.bf16.mxu0 %v6277_v1  ;;  %4574 = vmatprep.subr.bf16.mxu1 %v6280_v2  ;;  %v6373_v1 = vld [vmem:[%s8311_s1 + $0x1104] ss:$16 sps:$4 sm:$0xff]   ;;  %v6376_v2 = vld [vmem:[%s8311_s1 + $0x110c] ss:$16 sps:$4 sm:$0xff]  }
 0x1e7   :  { %4098 = vmatpush1.bf16.msra.mxu0 %v6275_v3  ;;  %4575 = vmatpush1.bf16.msra.mxu1 %v6278_v4  ;;  %v6371_v3 = vld [vmem:[%s8311_s1 + $0x1100] ss:$16 sps:$4 sm:$0xff]   ;;  %v6374_v4 = vld [vmem:[%s8311_s1 + $0x1108] ss:$16 sps:$4 sm:$0xff]  }
 0x1e8   :  { %4099 = vmatprep.subr.bf16.mxu0 %v6283_v5  ;;  %4576 = vmatprep.subr.bf16.mxu1 %v6286_v6  ;;  %v6379_v5 = vld [vmem:[%s8311_s1 + $0x1124] ss:$16 sps:$4 sm:$0xff]   ;;  %v6382_v6 = vld [vmem:[%s8311_s1 + $0x112c] ss:$16 sps:$4 sm:$0xff]  }
 0x1eb   :  { %4100 = vmatpush1.bf16.msra.mxu0 %v6281_v7  ;;  %4577 = vmatpush1.bf16.msra.mxu1 %v6284_v8  ;;  %v6377_v7 = vld [vmem:[%s8311_s1 + $0x1120] ss:$16 sps:$4 sm:$0xff]   ;;  %v6380_v8 = vld [vmem:[%s8311_s1 + $0x1128] ss:$16 sps:$4 sm:$0xff]  }
 0x1ec   :  { %4101 = vmatprep.subr.bf16.mxu0 %v6289_v9  ;;  %4578 = vmatprep.subr.bf16.mxu1 %v6292_v10  ;;  %v6385_v9 = vld [vmem:[%s8311_s1 + $0x1144] ss:$16 sps:$4 sm:$0xff]   ;;  %v6388_v10 = vld [vmem:[%s8311_s1 + $0x114c] ss:$16 sps:$4 sm:$0xff]  }
 0x1ef   :  { %4102 = vmatpush1.bf16.msra.mxu0 %v6287_v11  ;;  %4579 = vmatpush1.bf16.msra.mxu1 %v6290_v12  ;;  %v6383_v11 = vld [vmem:[%s8311_s1 + $0x1140] ss:$16 sps:$4 sm:$0xff]   ;;  %v6386_v12 = vld [vmem:[%s8311_s1 + $0x1148] ss:$16 sps:$4 sm:$0xff]  }
 0x1f0   :  { %4103 = vmatprep.subr.bf16.mxu0 %v6295_v13  ;;  %4580 = vmatprep.subr.bf16.mxu1 %v6298_v14  ;;  %v6391_v13 = vld [vmem:[%s8311_s1 + $0x1164] ss:$16 sps:$4 sm:$0xff]   ;;  %v6394_v14 = vld [vmem:[%s8311_s1 + $0x116c] ss:$16 sps:$4 sm:$0xff]  }
 0x1f3   :  { %4104 = vmatpush1.bf16.msra.mxu0 %v6293_v15  ;;  %4581 = vmatpush1.bf16.msra.mxu1 %v6296_v16  ;;  %v6389_v15 = vld [vmem:[%s8311_s1 + $0x1160] ss:$16 sps:$4 sm:$0xff]   ;;  %v6392_v16 = vld [vmem:[%s8311_s1 + $0x1168] ss:$16 sps:$4 sm:$0xff]  }
 0x1f4   :  { %4105 = vmatprep.subr.bf16.mxu0 %v6301_v17  ;;  %4582 = vmatprep.subr.bf16.mxu1 %v6304_v18  ;;  %v6397_v17 = vld [vmem:[%s8311_s1 + $0x1184] ss:$16 sps:$4 sm:$0xff]   ;;  %v6400_v18 = vld [vmem:[%s8311_s1 + $0x118c] ss:$16 sps:$4 sm:$0xff]  }
 0x1f7   :  { %4106 = vmatpush1.bf16.msra.mxu0 %v6299_v19  ;;  %4583 = vmatpush1.bf16.msra.mxu1 %v6302_v20  ;;  %v6395_v19 = vld [vmem:[%s8311_s1 + $0x1180] ss:$16 sps:$4 sm:$0xff]   ;;  %v6398_v20 = vld [vmem:[%s8311_s1 + $0x1188] ss:$16 sps:$4 sm:$0xff]  }
 0x1f8   :  { %4107 = vmatprep.subr.bf16.mxu0 %v6309_v21  ;;  %4584 = vmatprep.subr.bf16.mxu1 %v6312_v22  ;;  %v6403_v21 = vld [vmem:[%s8311_s1 + $0x11a4] ss:$16 sps:$4 sm:$0xff]   ;;  %v6406_v22 = vld [vmem:[%s8311_s1 + $0x11ac] ss:$16 sps:$4 sm:$0xff]  }
 0x1fb   :  { %4108 = vmatpush1.bf16.msra.mxu0 %v6307_v23  ;;  %4585 = vmatpush1.bf16.msra.mxu1 %v6310_v24  ;;  %v6401_v23 = vld [vmem:[%s8311_s1 + $0x11a0] ss:$16 sps:$4 sm:$0xff]   ;;  %v6404_v24 = vld [vmem:[%s8311_s1 + $0x11a8] ss:$16 sps:$4 sm:$0xff]  }
 0x1fc   :  { %4109 = vmatprep.subr.bf16.mxu0 %v6316_v25  ;;  %4586 = vmatprep.subr.bf16.mxu1 %v6319_v26  ;;  %v6412_v25 = vld [vmem:[%s8311_s1 + $0x11c4] ss:$16 sps:$4 sm:$0xff]   ;;  %v6415_v26 = vld [vmem:[%s8311_s1 + $0x11cc] ss:$16 sps:$4 sm:$0xff]  }
 0x1ff   :  { %4110 = vmatpush1.bf16.msra.mxu0 %v6314_v27  ;;  %4587 = vmatpush1.bf16.msra.mxu1 %v6317_v28  ;;  %v6410_v27 = vld [vmem:[%s8311_s1 + $0x11c0] ss:$16 sps:$4 sm:$0xff]   ;;  %v6413_v28 = vld [vmem:[%s8311_s1 + $0x11c8] ss:$16 sps:$4 sm:$0xff]  }
 0x200   :  { %4132 = vmatprep.subr.bf16.mxu0 %v6325_v29  ;;  %4609 = vmatprep.subr.bf16.mxu1 %v6328_v30  ;;  %v6418_v29 = vld [vmem:[%s8311_s1 + $0x11e4] ss:$16 sps:$4 sm:$0xff]   ;;  %v6421_v30 = vld [vmem:[%s8311_s1 + $0x11ec] ss:$16 sps:$4 sm:$0xff]  }
 0x202   :  { %4112 = vmatmul.mubr.bf16.vlgmr.msra.gmra.mrb[0].mxu0 %v6320_v31  ;;  %4589 = vmatmul.mubr.bf16.vlgmr.msra.gmra.mrb[0].mxu1 %v6320_v31  ;;  %v6416_v31 = vld [vmem:[%s8311_s1 + $0x11e0] ss:$16 sps:$4 sm:$0xff]  }
 0x203   :  { %4133 = vmatpush1.bf16.msra.mxu0 %v6323_v32  ;;  %4610 = vmatpush1.bf16.msra.mxu1 %v6326_v33  ;;  %v6419_v32 = vld [vmem:[%s8311_s1 + $0x11e8] ss:$16 sps:$4 sm:$0xff]  }
 0x204   :  { %4134 = vmatprep.subr.bf16.mxu0 %v6331_v34  ;;  %4611 = vmatprep.subr.bf16.mxu1 %v6334_v35  ;;  %v6422_v33 = vld [vmem:[%s8312_s0 + $0x40] ss:$72 sps:$4 sm:$0xff]   ;;  %v6425_v34 = vld [vmem:[%s8312_s0 + $0xd4] ss:$72 sps:$4 sm:$0xff]   ;;  %v6427_v35 = vld [vmem:[%s8312_s0 + $0xd0] ss:$72 sps:$4 sm:$0xff]  }
 0x205   :  { %4121 = vmatprep.mubr.bf16.mxu0 %v6407_v36  ;;  %4598 = vmatprep.mubr.bf16.mxu1 %v6407_v36  ;;  %v628_v36 = vlaneseq }
 0x207   :  { %4135 = vmatpush1.bf16.msra.mxu0 %v6329_v37  ;;  %4612 = vmatpush1.bf16.msra.mxu1 %v6332_v38  ;;  %v629_v37 = vshrl.u32 %v628_v36, 7 }
 0x208   :  { %4136 = vmatprep.subr.bf16.mxu0 %v6337_v39  ;;  %4613 = vmatprep.subr.bf16.mxu1 %v6340_v40  ;;  %v626_v40 = vld [vmem:[%s8313_s2] sm:$0xf] }
 0x209   :  { %v630_v38 = vsub.s32 0, %v629_v37  ;;  %v638_v39 = vsub.s32 2, %v629_v37 }
 0x20a   :  { %4122 = vmatmul.mubr.bf16.gmra.mrb[4].mxu0 %v6409_v41  ;;  %4599 = vmatmul.mubr.bf16.gmra.mrb[4].mxu1 %v6409_v41  ;;  %v634_v41 = vsub.s32 1, %v629_v37 }
 0x20b   :  { %4137 = vmatpush1.bf16.msra.mxu0 %v6335_v42  ;;  %4614 = vmatpush1.bf16.msra.mxu1 %v6338_v43  ;;  %v642_v42 = vsub.s32 3, %v629_v37  ;;  %v631_v43 = vrot.slane %v626_v40, %v630_v38 }
 0x20c   :  { %4138 = vmatprep.subr.bf16.mxu0 %v6343_v44  ;;  %4615 = vmatprep.subr.bf16.mxu1 %v6346_v45  ;;  %v639_v44 = vrot.slane %v626_v40, %v638_v39  ;;  %v635_v45 = vrot.slane %v626_v40, %v634_v41 }
 0x20d   :  { %4164 = vmatprep.mubr.bf16.mxu0 %v6424_v46  ;;  %4641 = vmatprep.mubr.bf16.mxu1 %v6424_v46  ;;  %v643_v46 = vrot.slane %v626_v40, %v642_v42 }
 0x20f   :  { %4139 = vmatpush1.bf16.msra.mxu0 %v6341_v47  ;;  %4616 = vmatpush1.bf16.msra.mxu1 %v6344_v48 }
 0x210   :  { %4140 = vmatprep.subr.bf16.mxu0 %v6349_v49  ;;  %4617 = vmatprep.subr.bf16.mxu1 %v6352_v50 }
 0x213   :  { %4141 = vmatpush1.bf16.msra.mxu0 %v6347_v51  ;;  %4618 = vmatpush1.bf16.msra.mxu1 %v6350_v52 }
 0x214   :  { %4142 = vmatprep.subr.bf16.mxu0 %v6355_v53  ;;  %4619 = vmatprep.subr.bf16.mxu1 %v6358_v54 }
 0x217   :  { %4143 = vmatpush1.bf16.msra.mxu0 %v6353_v55  ;;  %4620 = vmatpush1.bf16.msra.mxu1 %v6356_v56 }
 0x218   :  { %4144 = vmatprep.subr.bf16.mxu0 %v6361_v57  ;;  %4621 = vmatprep.subr.bf16.mxu1 %v6364_v58 }
 0x21b   :  { %4145 = vmatpush1.bf16.msra.mxu0 %v6359_v59  ;;  %4622 = vmatpush1.bf16.msra.mxu1 %v6362_v60 }
 0x21c   :  { %4146 = vmatprep.subr.bf16.mxu0 %v6367_v61  ;;  %4623 = vmatprep.subr.bf16.mxu1 %v6370_v62 }
 0x21f   :  { %4147 = vmatpush1.bf16.msra.mxu0 %v6365_v63  ;;  %4624 = vmatpush1.bf16.msra.mxu1 %v6368_v0 }
 0x220   :  { %4148 = vmatprep.subr.bf16.mxu0 %v6373_v1  ;;  %4625 = vmatprep.subr.bf16.mxu1 %v6376_v2 }
 0x223   :  { %4149 = vmatpush1.bf16.msra.mxu0 %v6371_v3  ;;  %4626 = vmatpush1.bf16.msra.mxu1 %v6374_v4 }
 0x224   :  { %4150 = vmatprep.subr.bf16.mxu0 %v6379_v5  ;;  %4627 = vmatprep.subr.bf16.mxu1 %v6382_v6 }
 0x227   :  { %4151 = vmatpush1.bf16.msra.mxu0 %v6377_v7  ;;  %4628 = vmatpush1.bf16.msra.mxu1 %v6380_v8 }
 0x228   :  { %4152 = vmatprep.subr.bf16.mxu0 %v6385_v9  ;;  %4629 = vmatprep.subr.bf16.mxu1 %v6388_v10 }
 0x22b   :  { %4153 = vmatpush1.bf16.msra.mxu0 %v6383_v11  ;;  %4630 = vmatpush1.bf16.msra.mxu1 %v6386_v12 }
 0x22c   :  { %4154 = vmatprep.subr.bf16.mxu0 %v6391_v13  ;;  %4631 = vmatprep.subr.bf16.mxu1 %v6394_v14 }
 0x22f   :  { %4155 = vmatpush1.bf16.msra.mxu0 %v6389_v15  ;;  %4632 = vmatpush1.bf16.msra.mxu1 %v6392_v16 }
 0x230   :  { %4156 = vmatprep.subr.bf16.mxu0 %v6397_v17  ;;  %4633 = vmatprep.subr.bf16.mxu1 %v6400_v18 }
 0x233   :  { %4157 = vmatpush1.bf16.msra.mxu0 %v6395_v19  ;;  %4634 = vmatpush1.bf16.msra.mxu1 %v6398_v20 }
 0x234   :  { %4158 = vmatprep.subr.bf16.mxu0 %v6403_v21  ;;  %4635 = vmatprep.subr.bf16.mxu1 %v6406_v22 }
 0x237   :  { %4159 = vmatpush1.bf16.msra.mxu0 %v6401_v23  ;;  %4636 = vmatpush1.bf16.msra.mxu1 %v6404_v24 }
 0x238   :  { %4160 = vmatprep.subr.bf16.mxu0 %v6412_v25  ;;  %4637 = vmatprep.subr.bf16.mxu1 %v6415_v26 }
 0x23b   :  { %4161 = vmatpush1.bf16.msra.mxu0 %v6410_v27  ;;  %4638 = vmatpush1.bf16.msra.mxu1 %v6413_v28 }
 0x23c   :  { %4162 = vmatprep.subr.bf16.mxu0 %v6418_v29  ;;  %4639 = vmatprep.subr.bf16.mxu1 %v6421_v30 }
 0x23f   :  { %4163 = vmatpush1.bf16.msra.mxu0 %v6416_v31  ;;  %4640 = vmatpush1.bf16.msra.mxu1 %v6419_v32 }
 0x242   :  { %4165 = vmatmul.mubr.bf16.vlgmr.msra.gmra.mrb[0].mxu0 %v6422_v33  ;;  %4642 = vmatmul.mubr.bf16.vlgmr.msra.gmra.mrb[0].mxu1 %v6422_v33 }
 0x243   :  { %4174 = vmatprep.mubr.bf16.mxu0 %v6425_v34  ;;  %4651 = vmatprep.mubr.bf16.mxu1 %v6425_v34 }
 0x24a   :  { %4175 = vmatmul.mubr.bf16.gmra.mrb[4].mxu0 %v6427_v35  ;;  %4652 = vmatmul.mubr.bf16.gmra.mrb[4].mxu1 %v6427_v35 }
 0x315   :  { %v4166_v47 = vpop.f32.mrb[0].mxu0  ;;  %v4643_v48 = vpop.f32.mrb[0].mxu1 }
 0x316   :  { %v5366_v49 = vadd.f32 %v4166_v47, %v631_v43  ;;  %v5374_v50 = vadd.f32 %v4643_v48, %v639_v44  ;;  %v4168_v51 = vpop.f32.mrb[1].mxu0  ;;  %v4645_v52 = vpop.f32.mrb[1].mxu1 }
 0x317   :  { %v5367_v53 = vadd.f32 %v4168_v51, %v635_v45  ;;  %v5375_v54 = vadd.f32 %v4645_v52, %v643_v46  ;;  %v4170_v55 = vpop.f32.mrb[2].mxu0  ;;  %v4647_v56 = vpop.f32.mrb[2].mxu1 }
 0x318   :  { %v4662_v57 = vmax.f32 %v5366_v49, 0.0  ;;  %v4664_v58 = vmax.f32 %v5374_v50, 0.0  ;;  %v5368_v59 = vadd.f32 %v4170_v55, %v631_v43  ;;  %v5376_v60 = vadd.f32 %v4647_v56, %v639_v44  ;;  %v4172_v61 = vpop.f32.mrb[3].mxu0  ;;  %v4649_v62 = vpop.f32.mrb[3].mxu1 }
 0x319   :  { %v4663_v63 = vmax.f32 %v5367_v53, 0.0  ;;  %v4665_v0 = vmax.f32 %v5375_v54, 0.0  ;;  %v5369_v1 = vadd.f32 %v4172_v61, %v635_v45  ;;  %v5377_v2 = vadd.f32 %v4649_v62, %v643_v46 }
 0x31a   :  { %v4666_v3 = vmax.f32 %v5368_v59, 0.0  ;;  %v4668_v4 = vmax.f32 %v5376_v60, 0.0 }
 0x31b   :  { %v5358_v5 = vpack.c.bf16 %v4663_v63, %v4662_v57  ;;  %v5359_v6 = vpack.c.bf16 %v4665_v0, %v4664_v58  ;;  %v4667_v7 = vmax.f32 %v5369_v1, 0.0  ;;  %v4669_v8 = vmax.f32 %v5377_v2, 0.0 }
 0x31d   :  { %4726 = vst [vmem:[%s8314_s3] sm:$0xff] %v5358_v5  ;;  %4727 = vst [vmem:[%s8314_s3 + $0x8] sm:$0xff] %v5359_v6  ;;  %v5360_v9 = vpack.c.bf16 %v4667_v7, %v4666_v3  ;;  %v5361_v10 = vpack.c.bf16 %v4669_v8, %v4668_v4  ;;  %v4176_v11 = vpop.f32.mrb[4].mxu0  ;;  %v4653_v12 = vpop.f32.mrb[4].mxu1 }
 0x31e   :  { %v5370_v13 = vadd.f32 %v4176_v11, %v631_v43  ;;  %v5378_v14 = vadd.f32 %v4653_v12, %v639_v44  ;;  %v4178_v15 = vpop.f32.mrb[5].mxu0  ;;  %v4655_v16 = vpop.f32.mrb[5].mxu1 }
 0x31f   :  { %4728 = vst [vmem:[%s8314_s3 + $0x10] sm:$0xff] %v5360_v9  ;;  %4729 = vst [vmem:[%s8314_s3 + $0x18] sm:$0xff] %v5361_v10  ;;  %v5371_v17 = vadd.f32 %v4178_v15, %v635_v45  ;;  %v5379_v18 = vadd.f32 %v4655_v16, %v643_v46  ;;  %v4180_v19 = vpop.f32.mrb[6].mxu0  ;;  %v4657_v20 = vpop.f32.mrb[6].mxu1 }
 0x320   :  { %v4670_v21 = vmax.f32 %v5370_v13, 0.0  ;;  %v4672_v22 = vmax.f32 %v5378_v14, 0.0  ;;  %v5372_v23 = vadd.f32 %v4180_v19, %v631_v43  ;;  %v5380_v24 = vadd.f32 %v4657_v20, %v639_v44  ;;  %v4182_v25 = vpop.f32.mrb[7].mxu0  ;;  %v4659_v26 = vpop.f32.mrb[7].mxu1 }
 0x321   :  { %v4671_v27 = vmax.f32 %v5371_v17, 0.0  ;;  %v4673_v28 = vmax.f32 %v5379_v18, 0.0  ;;  %v5373_v29 = vadd.f32 %v4182_v25, %v635_v45  ;;  %v5381_v30 = vadd.f32 %v4659_v26, %v643_v46 }
 0x322   :  { %v4674_v31 = vmax.f32 %v5372_v23, 0.0  ;;  %v4676_v32 = vmax.f32 %v5380_v24, 0.0 }
 0x323   :  { %v5362_v33 = vpack.c.bf16 %v4671_v27, %v4670_v21  ;;  %v5363_v34 = vpack.c.bf16 %v4673_v28, %v4672_v22  ;;  %v4675_v35 = vmax.f32 %v5373_v29, 0.0  ;;  %v4677_v36 = vmax.f32 %v5381_v30, 0.0 }
 0x325   :  { %4730 = vst [vmem:[%s8314_s3 + $0x20] sm:$0xff] %v5362_v33  ;;  %4731 = vst [vmem:[%s8314_s3 + $0x28] sm:$0xff] %v5363_v34  ;;  %v5364_v37 = vpack.c.bf16 %v4675_v35, %v4674_v31  ;;  %v5365_v38 = vpack.c.bf16 %v4677_v36, %v4676_v32 }
 0x327   :  { %4732 = vst [vmem:[%s8314_s3 + $0x30] sm:$0xff] %v5364_v37  ;;  %4733 = vst [vmem:[%s8314_s3 + $0x38] sm:$0xff] %v5365_v38 }

// kernel: enhanced_vqvae_forward.17
= control target key start
LH: loop header
LB: loop body
LE: loop exit
PB: predicated region body
PF: predicated region fallthrough
CT: control target
= control target key end

     0   :  { %s2314_s12 = smov 0   ;;  %s2720_s0 = inlined_call_operand.vmem [shape: bf16[512,576], index: 0, kind: input, shape index: {}]   ;;  %s2721_s1 = inlined_call_operand.vmem [shape: bf16[576,128], index: 1, kind: input, shape index: {}]   ;;  %s2722_s2 = inlined_call_operand.vmem [shape: f32[1,128], index: 2, kind: input, shape index: {}]   ;;  %s2723_s3 = inlined_call_operand.vmem [shape: f32[512,128], index: 3, kind: output, shape index: {}]  }
   0x1 LB: > { %s1621_s13 = sadd.s32 4294967295, %s2292_s12   ;;  %p1625_p0 = scmp.ge.s32.totalorder %s2292_s12, 1  ;;  %s2292_s12 = sphi %s2314_s12, %s13_s12  }
   0x2   : > { %p139_p1 = scmp.lt.s32.totalorder %s2292_s12, 3 }
   0x4   : > { %p140_p2 = pnand %p1625_p0, %p139_p1 }
   0x5   : > { %v2074_v0 = vld [vmem:[%s2721_s1 + $0x40] sm:$0xff] (!%p140_p2)   ;;  %s1626_s16 = sshll.u32 (!%p140_p2), %s1621_s13, 5  ;;  %v2076_v2 = vld [vmem:[%s2721_s1 + $0x48] sm:$0xff] (!%p140_p2)   ;;  %v2078_v4 = vld [vmem:[%s2721_s1 + $0x50] sm:$0xff] (!%p140_p2)   ;;  %vm969_vm0 = vcmask (!%p140_p2), 523264  }
   0x6   : > { %143 = sbr.rel (%p140_p2) target bundleno = 424 (0x1a8), region = 32  ;;  %v2075_v1 = vld [vmem:[%s2721_s1] sm:$0xff] (!%p140_p2)   ;;  %1765 = vmatprep.subr.bf16.mxu0 (!%p140_p2), %v2074_v0  ;;  %2049 = vmatprep.subr.bf16.mxu1 (!%p140_p2), %v2074_v0  ;;  %p165_p3 = scmp.lt.s32.totalorder (!%p140_p2), %s1626_s16, 63  ;;  %v2077_v3 = vld [vmem:[%s2721_s1 + $0x8] sm:$0xff] (!%p140_p2)   ;;  %v2079_v5 = vld [vmem:[%s2721_s1 + $0x10] sm:$0xff] (!%p140_p2)  }
   0x7   : > { %1766 = vmatpush3.bf16.msra.mxu0 (!%p140_p2), %v2075_v1  ;;  %2057 = vmatpush3.bf16.msra.mxu1 (!%p140_p2), %v2075_v1  ;;  %v2080_v6 = vld [vmem:[%s2721_s1 + $0x58] sm:$0xff] (!%p140_p2)   ;;  %v2082_v8 = vld [vmem:[%s2721_s1 + $0x60] sm:$0xff] (!%p140_p2)   ;;  %v2084_v10 = vld [vmem:[%s2721_s1 + $0x68] sm:$0xff] (!%p140_p2)  }
   0x8   : > { %1767 = vmatprep.subr.bf16.mxu0 (!%p140_p2), %v2076_v2  ;;  %2050 = vmatprep.subr.bf16.mxu1 (!%p140_p2), %v2076_v2  ;;  %v2081_v7 = vld [vmem:[%s2721_s1 + $0x18] sm:$0xff] (!%p140_p2)   ;;  %v2083_v9 = vld [vmem:[%s2721_s1 + $0x20] sm:$0xff] (!%p140_p2)   ;;  %v2085_v13 = vld [vmem:[%s2721_s1 + $0x28] sm:$0xff] (!%p140_p2)  }
   0x9   : > { %v2086_v14 = vld [vmem:[%s2721_s1 + $0x70] sm:$0xff] (!%p140_p2)   ;;  %v2088_v16 = vld [vmem:[%s2721_s1 + $0x78] sm:$0xff] (!%p140_p2)   ;;  %v2096_v18 = vld [vmem:[%s2721_s1 + $0xc0] sm:$0xff] (!%p140_p2)  }
   0xa   : > { %v2087_v15 = vld [vmem:[%s2721_s1 + $0x30] sm:$0xff] (!%p140_p2)   ;;  %v2089_v17 = vld [vmem:[%s2721_s1 + $0x38] sm:$0xff] (!%p140_p2)   ;;  %v2099_v19 = vld [vmem:[%s2721_s1 + $0x100] sm:$0xff] (!%p140_p2)  }
   0xb   : > { %1768 = vmatpush3.bf16.msra.mxu0 (!%p140_p2), %v2077_v3  ;;  %2058 = vmatpush3.bf16.msra.mxu1 (!%p140_p2), %v2077_v3  ;;  %v2097_v22 = vld [vmem:[%s2721_s1 + $0x80] sm:$0xff] (!%p140_p2)   ;;  %v2098_v23 = vld [vmem:[%s2721_s1 + $0xc8] sm:$0xff] (!%p140_p2)   ;;  %v2107_v28 = vld [vmem:[%s2721_s1 + $0xd0] sm:$0xff] (!%p140_p2)  }
   0xc   : > { %1769 = vmatprep.subr.bf16.mxu0 (!%p140_p2), %v2078_v4  ;;  %2051 = vmatprep.subr.bf16.mxu1 (!%p140_p2), %v2078_v4  ;;  %v2100_v26 = vld [vmem:[%s2721_s1 + $0x88] sm:$0xff] (!%p140_p2)   ;;  %v2108_v30 = vld [vmem:[%s2721_s1 + $0x90] sm:$0xff] (!%p140_p2)   ;;  %v2109_v31 = vld [vmem:[%s2721_s1 + $0xd8] sm:$0xff] (!%p140_p2)  }
   0xd   : > { %s2725_s16 = smov (!%p165_p3, %s1626_s16), 63  ;;  %v2110_v34 = vld [vmem:[%s2721_s1 + $0x98] sm:$0xff]   ;;  %v2130_v35 = vld [vmem:[%s2721_s1 + $0x108] sm:$0xff]   ;;  %v2117_v37 = vld [vmem:[%s2721_s1 + $0xe0] sm:$0xff]  }
   0xe   : > { %s2065_s29 = smul.u32 20, %s2725_s16  ;;  %v2118_v39 = vld [vmem:[%s2721_s1 + $0xa0] sm:$0xff]   ;;  %v2119_v40 = vld [vmem:[%s2721_s1 + $0xe8] sm:$0xff]   ;;  %v2127_v46 = vld [vmem:[%s2721_s1 + $0xf0] sm:$0xff]   ;;  %s1629_s19 = sshll.u32 %s2725_s16, 3 }
   0xf   : > { %1770 = vmatpush3.bf16.msra.mxu0 %v2079_v5  ;;  %2059 = vmatpush3.bf16.msra.mxu1 %v2079_v5  ;;  %v2120_v43 = vld [vmem:[%s2721_s1 + $0xa8] sm:$0xff]   ;;  %v2150_v47 = vld [vmem:[%s2721_s1 + $0x110] sm:$0xff]   ;;  %v2129_v49 = vld [vmem:[%s2721_s1 + $0xf8] sm:$0xff]   ;;  %s2635_s16 = scalar_lea.vmem %s2723_s3, %s1629_s19 }
  0x10   : > { %1771 = vmatprep.subr.bf16.mxu0 %v2080_v6  ;;  %2052 = vmatprep.subr.bf16.mxu1 %v2080_v6  ;;  %s2355_s9 = scalar_lea.vmem %s2720_s0, %s2065_s29  ;;  %v2128_v48 = vld [vmem:[%s2721_s1 + $0xb0] sm:$0xff]   ;;  %v2131_v52 = vld [vmem:[%s2721_s1 + $0xb8] sm:$0xff]  }
  0x11   : > { %v2092_v11 = vld [vmem:[%s2355_s9 + $0x4] ss:$20 sps:$4 sm:$0xff]   ;;  %v2090_v20 = vld [vmem:[%s2355_s9] ss:$20 sps:$4 sm:$0xff]   ;;  %v2105_v27 = vld [vmem:[%s2355_s9 + $0x28] ss:$20 sps:$4 sm:$0xff]  }
  0x12   : > { %v2095_v12 = vld [vmem:[%s2355_s9 + $0x1e4] ss:$20 sps:$4 sm:$0xff]   ;;  %1050 = vmatprep.mubr.bf16.mxu0 %v2092_v11  ;;  %v2093_v21 = vld [vmem:[%s2355_s9 + $0x1e0] ss:$20 sps:$4 sm:$0xff]   ;;  %v2106_v29 = vld [vmem:[%s2355_s9 + $0x208] ss:$20 sps:$4 sm:$0xff]  }
  0x13   : > { %1772 = vmatpush3.bf16.msra.mxu0 %v2081_v7  ;;  %2060 = vmatpush3.bf16.msra.mxu1 %v2081_v7  ;;  %v2101_v24 = vld [vmem:[%s2355_s9 + $0x2c] ss:$20 sps:$4 sm:$0xff]   ;;  %v2111_v32 = vld [vmem:[%s2355_s9 + $0x54] ss:$20 sps:$4 sm:$0xff]   ;;  %v2115_v36 = vld [vmem:[%s2355_s9 + $0x50] ss:$20 sps:$4 sm:$0xff]  }
  0x14   : > { %1773 = vmatprep.subr.bf16.mxu0 %v2082_v8  ;;  %2053 = vmatprep.subr.bf16.mxu1 %v2082_v8  ;;  %v2103_v25 = vld [vmem:[%s2355_s9 + $0x20c] ss:$20 sps:$4 sm:$0xff]   ;;  %v2113_v33 = vld [vmem:[%s2355_s9 + $0x234] ss:$20 sps:$4 sm:$0xff]   ;;  %v2116_v38 = vld [vmem:[%s2355_s9 + $0x230] ss:$20 sps:$4 sm:$0xff]  }
  0x15   : > { %1146 = vmatprep.mubr.bf16.mxu1 %v2095_v12  ;;  %v2121_v41 = vld [vmem:[%s2355_s9 + $0x7c] ss:$20 sps:$4 sm:$0xff]   ;;  %v2125_v44 = vld [vmem:[%s2355_s9 + $0x78] ss:$20 sps:$4 sm:$0xff]   ;;  %v2137_v54 = vld [vmem:[%s2355_s9 + $0xa0] ss:$20 sps:$4 sm:$0xff]  }
  0x16   : > { %v2123_v42 = vld [vmem:[%s2355_s9 + $0x25c] ss:$20 sps:$4 sm:$0xff]   ;;  %v2126_v45 = vld [vmem:[%s2355_s9 + $0x258] ss:$20 sps:$4 sm:$0xff]   ;;  %v2140_v57 = vld [vmem:[%s2355_s9 + $0x34] ss:$20 sps:$4 sm:$0xff]  }
  0x17   : > { %1774 = vmatpush3.bf16.msra.mxu0 %v2083_v9  ;;  %2061 = vmatpush3.bf16.msra.mxu1 %v2083_v9  ;;  %v2132_v50 = vld [vmem:[%s2355_s9 + $0xa4] ss:$20 sps:$4 sm:$0xff]   ;;  %v2136_v51 = vld [vmem:[%s2355_s9 + $0xc] ss:$20 sps:$4 sm:$0xff]   ;;  %v2134_v53 = vld [vmem:[%s2355_s9 + $0x8] ss:$20 sps:$4 sm:$0xff]  }
  0x18   : > { %1775 = vmatprep.subr.bf16.mxu0 %v2084_v10  ;;  %2054 = vmatprep.subr.bf16.mxu1 %v2084_v10  ;;  %v2138_v55 = vld [vmem:[%s2355_s9 + $0xcc] ss:$20 sps:$4 sm:$0xff]   ;;  %v2169_v56 = vld [vmem:[%s2721_s1 + $0x118] sm:$0xff]   ;;  %v2143_v59 = vld [vmem:[%s2355_s9 + $0x30] ss:$20 sps:$4 sm:$0xff]  }
  0x19   : > { %v2142_v58 = vld [vmem:[%s2355_s9 + $0xc8] ss:$20 sps:$4 sm:$0xff]   ;;  %v2148_v62 = vld [vmem:[%s2355_s9 + $0xf0] ss:$20 sps:$4 sm:$0xff]   ;;  %v2149_v63 = vld [vmem:[%s2355_s9 + $0x58] ss:$20 sps:$4 sm:$0xff]  }
  0x1a   : > { %v2144_v60 = vld [vmem:[%s2355_s9 + $0xf4] ss:$20 sps:$4 sm:$0xff]   ;;  %v2146_v61 = vld [vmem:[%s2355_s9 + $0x5c] ss:$20 sps:$4 sm:$0xff]   ;;  %v2153_v1 = vld [vmem:[%s2355_s9 + $0x84] ss:$20 sps:$4 sm:$0xff]  }
  0x1b   : > { %1776 = vmatpush3.bf16.msra.mxu0 %v2085_v13  ;;  %2062 = vmatpush3.bf16.msra.mxu1 %v2085_v13  ;;  %v2151_v0 = vld [vmem:[%s2355_s9 + $0x11c] ss:$20 sps:$4 sm:$0xff]   ;;  %v2155_v2 = vld [vmem:[%s2355_s9 + $0x118] ss:$20 sps:$4 sm:$0xff]   ;;  %v2156_v3 = vld [vmem:[%s2355_s9 + $0x80] ss:$20 sps:$4 sm:$0xff]  }
  0x1c   : > { %1777 = vmatprep.subr.bf16.mxu0 %v2086_v14  ;;  %2055 = vmatprep.subr.bf16.mxu1 %v2086_v14  ;;  %v2157_v4 = vld [vmem:[%s2355_s9 + $0x144] ss:$20 sps:$4 sm:$0xff]   ;;  %v2159_v5 = vld [vmem:[%s2355_s9 + $0xac] ss:$20 sps:$4 sm:$0xff]   ;;  %v2162_v7 = vld [vmem:[%s2355_s9 + $0xa8] ss:$20 sps:$4 sm:$0xff]  }
  0x1d   : > { %v2161_v6 = vld [vmem:[%s2355_s9 + $0x140] ss:$20 sps:$4 sm:$0xff]   ;;  %v2167_v10 = vld [vmem:[%s2355_s9 + $0x168] ss:$20 sps:$4 sm:$0xff]   ;;  %v2168_v11 = vld [vmem:[%s2355_s9 + $0xd0] ss:$20 sps:$4 sm:$0xff]  }
  0x1e   : > { %v2163_v8 = vld [vmem:[%s2355_s9 + $0x16c] ss:$20 sps:$4 sm:$0xff]   ;;  %v2165_v9 = vld [vmem:[%s2355_s9 + $0xd4] ss:$20 sps:$4 sm:$0xff]   ;;  %v2172_v13 = vld [vmem:[%s2355_s9 + $0xfc] ss:$20 sps:$4 sm:$0xff]  }
  0x1f   : > { %1778 = vmatpush3.bf16.msra.mxu0 %v2087_v15  ;;  %2063 = vmatpush3.bf16.msra.mxu1 %v2087_v15  ;;  %v2170_v12 = vld [vmem:[%s2355_s9 + $0x194] ss:$20 sps:$4 sm:$0xff]   ;;  %v2174_v14 = vld [vmem:[%s2355_s9 + $0x190] ss:$20 sps:$4 sm:$0xff]   ;;  %v2175_v15 = vld [vmem:[%s2355_s9 + $0xf8] ss:$20 sps:$4 sm:$0xff]  }
  0x20   : > { %1779 = vmatprep.subr.bf16.mxu0 %v2088_v16  ;;  %2056 = vmatprep.subr.bf16.mxu1 %v2088_v16  ;;  %v2176_v16 = vld [vmem:[%s2355_s9 + $0x1bc] ss:$20 sps:$4 sm:$0xff]  }
  0x23   : > { %1780 = vmatpush3.bf16.msra.mxu0 %v2089_v17  ;;  %2064 = vmatpush3.bf16.msra.mxu1 %v2089_v17  ;;  %v2178_v17 = vld [vmem:[%s2355_s9 + $0x124] ss:$20 sps:$4 sm:$0xff]  }
  0x24   : > { %1877 = vmatprep.subr.bf16.mxu1 %v2096_v18  ;;  %2009 = vmatprep.subr.bf16.mxu0 %v2099_v19  ;;  %v2180_v18 = vld [vmem:[%s2355_s9 + $0x1b8] ss:$20 sps:$4 sm:$0xff]  }
  0x26   : > { %1051 = vmatmul.mubr.bf16.vlgmr.msra.gmra.mrb[0].mxu0 %v2090_v20  ;;  %1147 = vmatmul.mubr.bf16.vlgmr.msra.gmra.mrb[0].mxu1 %v2093_v21  ;;  %v2182_v20 = vld [vmem:[%s2355_s9 + $0x14c] ss:$20 sps:$4 sm:$0xff]   ;;  %v2184_v21 = vld [vmem:[%s2355_s9 + $0x10] ss:$20 sps:$4 sm:$0xff]  }
  0x27   : > { %1878 = vmatpush3.bf16.msra.mxu1 %v2097_v22  ;;  %2010 = vmatpush3.bf16.msra.mxu0 %v2099_v19  ;;  %v2181_v19 = vld [vmem:[%s2355_s9 + $0x120] ss:$20 sps:$4 sm:$0xff]   ;;  %v2185_v22 = vld [vmem:[%s2355_s9 + $0x148] ss:$20 sps:$4 sm:$0xff]  }
  0x28   : > { %1879 = vmatprep.subr.bf16.mxu1 %v2098_v23  ;;  %1058 = vmatprep.mubr.bf16.mxu0 %v2101_v24  ;;  %v2186_v23 = vld [vmem:[%s2355_s9 + $0x38] ss:$20 sps:$4 sm:$0xff]   ;;  %v2187_v24 = vld [vmem:[%s2355_s9 + $0x174] ss:$20 sps:$4 sm:$0xff]  }
  0x29   : > { %1154 = vmatprep.mubr.bf16.mxu1 %v2103_v25  ;;  %2011 = vmatprep.subr.bf16.mxu0 %v2130_v35  ;;  %v2189_v25 = vld [vmem:[%s2355_s9 + $0x60] ss:$20 sps:$4 sm:$0xff]  }
  0x2b   : > { %1880 = vmatpush3.bf16.msra.mxu1 %v2100_v26  ;;  %2012 = vmatpush3.bf16.msra.mxu0 %v2130_v35  ;;  %v2190_v26 = vld [vmem:[%s2355_s9 + $0x170] ss:$20 sps:$4 sm:$0xff]   ;;  %v2201_v35 = vld [vmem:[%s2355_s9 + $0x128] ss:$20 sps:$4 sm:$0xff]  }
  0x2c   : > { %1881 = vmatprep.subr.bf16.mxu1 %v2107_v28  ;;  %2013 = vmatprep.subr.bf16.mxu0 %v2150_v47  ;;  %v2192_v28 = vld [vmem:[%s2355_s9 + $0x19c] ss:$20 sps:$4 sm:$0xff]  }
  0x2e   : > { %1059 = vmatmul.mubr.bf16.gmra.mrb[4].mxu0 %v2105_v27  ;;  %1155 = vmatmul.mubr.bf16.gmra.mrb[4].mxu1 %v2106_v29  ;;  %v2191_v27 = vld [vmem:[%s2355_s9 + $0x88] ss:$20 sps:$4 sm:$0xff]   ;;  %v2194_v29 = vld [vmem:[%s2355_s9 + $0xb0] ss:$20 sps:$4 sm:$0xff]  }
  0x2f   : > { %1882 = vmatpush3.bf16.msra.mxu1 %v2108_v30  ;;  %1066 = vmatprep.mubr.bf16.mxu0 %v2111_v32  ;;  %v2195_v30 = vld [vmem:[%s2355_s9 + $0x198] ss:$20 sps:$4 sm:$0xff]  }
  0x30   : > { %1883 = vmatprep.subr.bf16.mxu1 %v2109_v31  ;;  %1162 = vmatprep.mubr.bf16.mxu1 %v2113_v33  ;;  %v2196_v31 = vld [vmem:[%s2355_s9 + $0xd8] ss:$20 sps:$4 sm:$0xff]   ;;  %v2199_v33 = vld [vmem:[%s2355_s9 + $0x100] ss:$20 sps:$4 sm:$0xff]  }
  0x31   : > { %2014 = vmatpush3.bf16.msra.mxu0 %v2150_v47  ;;  %v2197_v32 = vld [vmem:[%s2355_s9 + $0x1c4] ss:$20 sps:$4 sm:$0xff]  }
  0x32   : > { %2015 = vmatprep.subr.bf16.mxu0 %v2169_v56  ;;  %v2216_v47 = vld [vmem:[%s2355_s9 + $0x218] ss:$20 sps:$4 sm:$0xff]  }
  0x33   : > { %1884 = vmatpush3.bf16.msra.mxu1 %v2110_v34  ;;  %v2200_v34 = vld [vmem:[%s2355_s9 + $0x1c0] ss:$20 sps:$4 sm:$0xff]  }
  0x34   : > { %1885 = vmatprep.subr.bf16.mxu1 %v2117_v37  ;;  %v2204_v37 = vld [vmem:[%s2355_s9 + $0x150] ss:$20 sps:$4 sm:$0xff]  }
  0x35   : > { %2016 = vmatpush3.bf16.msra.mxu0 %v2169_v56 }
  0x36   : > { %1067 = vmatmul.mubr.bf16.gmra.mrb[8].mxu0 %v2115_v36  ;;  %1163 = vmatmul.mubr.bf16.gmra.mrb[8].mxu1 %v2116_v38  ;;  %v2202_v36 = vld [vmem:[%s2355_s9 + $0x1ec] ss:$20 sps:$4 sm:$0xff]   ;;  %v2205_v38 = vld [vmem:[%s2355_s9 + $0x1e8] ss:$20 sps:$4 sm:$0xff]  }
  0x37   : > { %1886 = vmatpush3.bf16.msra.mxu1 %v2118_v39  ;;  %1074 = vmatprep.mubr.bf16.mxu0 %v2121_v41  ;;  %v2206_v39 = vld [vmem:[%s2355_s9 + $0x178] ss:$20 sps:$4 sm:$0xff]   ;;  %v2209_v41 = vld [vmem:[%s2355_s9 + $0x1a0] ss:$20 sps:$4 sm:$0xff]  }
  0x38   : > { %1887 = vmatprep.subr.bf16.mxu1 %v2119_v40  ;;  %1170 = vmatprep.mubr.bf16.mxu1 %v2123_v42  ;;  %v2207_v40 = vld [vmem:[%s2355_s9 + $0x214] ss:$20 sps:$4 sm:$0xff]   ;;  %v2210_v42 = vld [vmem:[%s2355_s9 + $0x210] ss:$20 sps:$4 sm:$0xff]  }
  0x3b   : > { %1888 = vmatpush3.bf16.msra.mxu1 %v2120_v43  ;;  %v2211_v43 = vld [vmem:[%s2355_s9 + $0x1c8] ss:$20 sps:$4 sm:$0xff]  }
  0x3c   : > { %1889 = vmatprep.subr.bf16.mxu1 %v2127_v46  ;;  %v2215_v46 = vld [vmem:[%s2355_s9 + $0x238] ss:$20 sps:$4 sm:$0xff]  }
  0x3e   : > { %1075 = vmatmul.mubr.bf16.gmra.mrb[12].mxu0 %v2125_v44  ;;  %1171 = vmatmul.mubr.bf16.gmra.mrb[12].mxu1 %v2126_v45  ;;  %v2212_v44 = vld [vmem:[%s2355_s9 + $0x23c] ss:$20 sps:$4 sm:$0xff]  }
  0x3f   : > { %1890 = vmatpush3.bf16.msra.mxu1 %v2128_v48  ;;  %1082 = vmatprep.mubr.bf16.mxu0 %v2132_v50  ;;  %v2214_v45 = vld [vmem:[%s2355_s9 + $0x1f0] ss:$20 sps:$4 sm:$0xff]   ;;  %v2220_v50 = vld [vmem:[%s2355_s9 + $0x260] ss:$20 sps:$4 sm:$0xff]  }
  0x40   : > { %1891 = vmatprep.subr.bf16.mxu1 %v2129_v49  ;;  %1211 = vmatprep.mubr.bf16.mxu1 %v2136_v51  ;;  %v2217_v48 = vld [vmem:[%s2355_s9 + $0x264] ss:$20 sps:$4 sm:$0xff]   ;;  %v2219_v49 = vld [vmem:[%s2355_s9 + $0x240] ss:$20 sps:$4 sm:$0xff]   ;;  %v2221_v51 = vld [vmem:[%s2355_s9 + $0x268] ss:$20 sps:$4 sm:$0xff]  }
  0x43   : > { %1892 = vmatpush3.bf16.msra.mxu1 %v2131_v52 }
  0x46   : > { %1083 = vmatmul.mubr.bf16.gmra.mrb[16].mxu0 %v2137_v54  ;;  %1212 = vmatmul.mubr.bf16.vlgmr.msra.gmra.mrb[16].mxu1 %v2134_v53 }
  0x47   : > { %1090 = vmatprep.mubr.bf16.mxu0 %v2138_v55  ;;  %1219 = vmatprep.mubr.bf16.mxu1 %v2140_v57 }
  0x4e   : > { %1091 = vmatmul.mubr.bf16.gmra.mrb[20].mxu0 %v2142_v58  ;;  %1220 = vmatmul.mubr.bf16.gmra.mrb[20].mxu1 %v2143_v59 }
  0x4f   : > { %1098 = vmatprep.mubr.bf16.mxu0 %v2144_v60  ;;  %1227 = vmatprep.mubr.bf16.mxu1 %v2146_v61 }
  0x56   : > { %1099 = vmatmul.mubr.bf16.gmra.mrb[24].mxu0 %v2148_v62  ;;  %1228 = vmatmul.mubr.bf16.gmra.mrb[24].mxu1 %v2149_v63 }
  0x57   : > { %1106 = vmatprep.mubr.bf16.mxu0 %v2151_v0  ;;  %1235 = vmatprep.mubr.bf16.mxu1 %v2153_v1 }
  0x5e   : > { %1107 = vmatmul.mubr.bf16.gmra.mrb[28].mxu0 %v2155_v2  ;;  %1236 = vmatmul.mubr.bf16.gmra.mrb[28].mxu1 %v2156_v3 }
  0x5f   : > { %1114 = vmatprep.mubr.bf16.mxu0 %v2157_v4  ;;  %1243 = vmatprep.mubr.bf16.mxu1 %v2159_v5 }
  0x66   : > { %1115 = vmatmul.mubr.bf16.gmra.mrb[32].mxu0 %v2161_v6  ;;  %1244 = vmatmul.mubr.bf16.gmra.mrb[32].mxu1 %v2162_v7 }
  0x67   : > { %1122 = vmatprep.mubr.bf16.mxu0 %v2163_v8  ;;  %1251 = vmatprep.mubr.bf16.mxu1 %v2165_v9 }
  0x6e   : > { %1123 = vmatmul.mubr.bf16.gmra.mrb[36].mxu0 %v2167_v10  ;;  %1252 = vmatmul.mubr.bf16.gmra.mrb[36].mxu1 %v2168_v11 }
  0x6f   : > { %1130 = vmatprep.mubr.bf16.mxu0 %v2170_v12  ;;  %1259 = vmatprep.mubr.bf16.mxu1 %v2172_v13 }
  0x76   : > { %1131 = vmatmul.mubr.bf16.gmra.mrb[40].mxu0 %v2174_v14  ;;  %1260 = vmatmul.mubr.bf16.gmra.mrb[40].mxu1 %v2175_v15 }
  0x77   : > { %1138 = vmatprep.mubr.bf16.mxu0 %v2176_v16  ;;  %1267 = vmatprep.mubr.bf16.mxu1 %v2178_v17 }
  0x7e   : > { %1139 = vmatmul.mubr.bf16.gmra.mrb[44].mxu0 %v2180_v18  ;;  %1268 = vmatmul.mubr.bf16.gmra.mrb[44].mxu1 %v2181_v19 }
  0x7f   : > { %1275 = vmatprep.mubr.bf16.mxu1 %v2182_v20  ;;  %2017 = vmatprep.mubr.msk.bf16.mxu0 %vm969_vm0, %v2184_v21 }
  0x86   : > { %1276 = vmatmul.mubr.bf16.gmra.mrb[48].mxu1 %v2185_v22  ;;  %2018 = vmatmul.mubr.msk.bf16.vlgmr.msra.gmra.mrb[48].mxu0 %vm969_vm0, %v2186_v23 }
  0x87   : > { %1283 = vmatprep.mubr.bf16.mxu1 %v2187_v24  ;;  %2021 = vmatprep.mubr.msk.bf16.mxu0 %vm969_vm0, %v2189_v25 }
  0x8e   : > { %1284 = vmatmul.mubr.bf16.gmra.mrb[52].mxu1 %v2190_v26  ;;  %2022 = vmatmul.mubr.msk.bf16.gmra.mrb[52].mxu0 %vm969_vm0, %v2191_v27 }
  0x8f   : > { %1291 = vmatprep.mubr.bf16.mxu1 %v2192_v28  ;;  %2025 = vmatprep.mubr.msk.bf16.mxu0 %vm969_vm0, %v2194_v29 }
  0x96   : > { %1292 = vmatmul.mubr.bf16.gmra.mrb[56].mxu1 %v2195_v30  ;;  %2026 = vmatmul.mubr.msk.bf16.gmra.mrb[56].mxu0 %vm969_vm0, %v2196_v31 }
  0x97   : > { %1299 = vmatprep.mubr.bf16.mxu1 %v2197_v32  ;;  %2029 = vmatprep.mubr.msk.bf16.mxu0 %vm969_vm0, %v2199_v33 }
  0x9e   : > { %1300 = vmatmul.mubr.bf16.gmra.mrb[60].mxu1 %v2200_v34  ;;  %2030 = vmatmul.mubr.msk.bf16.gmra.mrb[60].mxu0 %vm969_vm0, %v2201_v35 }
  0x9f   : > { %1307 = vmatprep.mubr.bf16.mxu1 %v2202_v36  ;;  %2033 = vmatprep.mubr.msk.bf16.mxu0 %vm969_vm0, %v2204_v37 }
  0xa6   : > { %1308 = vmatmul.mubr.bf16.gmra.mrb[64].mxu1 %v2205_v38  ;;  %2034 = vmatmul.mubr.msk.bf16.gmra.mrb[64].mxu0 %vm969_vm0, %v2206_v39  ;;  %v2553_v38 = vld [vmem:[%s2722_s2] ss:$0 sm:$0xff] }
  0xa7   : > { %1315 = vmatprep.mubr.bf16.mxu1 %v2207_v40  ;;  %2037 = vmatprep.mubr.msk.bf16.mxu0 %vm969_vm0, %v2209_v41 }
  0xae   : > { %1316 = vmatmul.mubr.bf16.gmra.mrb[68].mxu1 %v2210_v42  ;;  %2038 = vmatmul.mubr.msk.bf16.gmra.mrb[68].mxu0 %vm969_vm0, %v2211_v43 }
  0xaf   : > { %1323 = vmatprep.mubr.bf16.mxu1 %v2212_v44  ;;  %2041 = vmatprep.mubr.msk.bf16.mxu0 %vm969_vm0, %v2214_v45 }
  0xb6   : > { %1324 = vmatmul.mubr.bf16.gmra.mrb[72].mxu1 %v2215_v46  ;;  %2042 = vmatmul.mubr.msk.bf16.gmra.mrb[72].mxu0 %vm969_vm0, %v2216_v47 }
  0xb7   : > { %1331 = vmatprep.mubr.bf16.mxu1 %v2217_v48  ;;  %2045 = vmatprep.mubr.msk.bf16.mxu0 %vm969_vm0, %v2219_v49 }
  0xbe   : > { %1332 = vmatmul.mubr.bf16.gmra.mrb[76].mxu1 %v2220_v50  ;;  %2046 = vmatmul.mubr.msk.bf16.gmra.mrb[76].mxu0 %vm969_vm0, %v2221_v51 }
  0xf9   : > { %v1853_v52 = vpop.f32.mrb[0].mxu1  ;;  %v1781_v53 = vpop.f32.mrb[0].mxu0 }
  0xfa   : > { %v1854_v54 = vpop.f32.mrb[1].mxu1  ;;  %v1782_v55 = vpop.f32.mrb[1].mxu0 }
  0xfb   : > { %v2534_v56 = vadd.f32 %v1854_v54, %v1853_v52  ;;  %v1856_v57 = vpop.f32.mrb[2].mxu1  ;;  %v1783_v58 = vadd.f32 %v1782_v55, %v1781_v53  ;;  %v1784_v59 = vpop.f32.mrb[2].mxu0 }
  0xfc   : > { %v1857_v60 = vpop.f32.mrb[3].mxu1  ;;  %v1785_v61 = vpop.f32.mrb[3].mxu0 }
  0xfd   : > { %v2536_v62 = vadd.f32 %v1857_v60, %v1856_v57  ;;  %v1786_v63 = vadd.f32 %v1785_v61, %v1784_v59  ;;  %v1053_v41 = vadd.f32 %v1783_v58, %v2553_v38 }
  0xff   : > { %v1056_v48 = vadd.f32 %v1786_v63, %v2553_v38 }
 0x101   : > { %v1859_v0 = vpop.f32.mrb[4].mxu1  ;;  %v1787_v1 = vpop.f32.mrb[4].mxu0 }
 0x102   : > { %v1860_v2 = vpop.f32.mrb[5].mxu1  ;;  %v1788_v3 = vpop.f32.mrb[5].mxu0 }
 0x103   : > { %v2538_v4 = vadd.f32 %v1860_v2, %v1859_v0  ;;  %v1862_v5 = vpop.f32.mrb[6].mxu1  ;;  %v1789_v6 = vadd.f32 %v1788_v3, %v1787_v1  ;;  %v1790_v7 = vpop.f32.mrb[6].mxu0 }
 0x104   : > { %v1863_v8 = vpop.f32.mrb[7].mxu1  ;;  %v1791_v9 = vpop.f32.mrb[7].mxu0 }
 0x105   : > { %v2540_v10 = vadd.f32 %v1863_v8, %v1862_v5  ;;  %v1792_v11 = vadd.f32 %v1791_v9, %v1790_v7  ;;  %v1061_v58 = vadd.f32 %v1789_v6, %v2553_v38 }
 0x107   : > { %v1064_v63 = vadd.f32 %v1792_v11, %v2553_v38 }
 0x109   : > { %v1865_v12 = vpop.f32.mrb[8].mxu1  ;;  %v1793_v13 = vpop.f32.mrb[8].mxu0 }
 0x10a   : > { %v1866_v14 = vpop.f32.mrb[9].mxu1  ;;  %v1794_v15 = vpop.f32.mrb[9].mxu0 }
 0x10b   : > { %v2542_v16 = vadd.f32 %v1866_v14, %v1865_v12  ;;  %v1868_v17 = vpop.f32.mrb[10].mxu1  ;;  %v1795_v18 = vadd.f32 %v1794_v15, %v1793_v13  ;;  %v1796_v19 = vpop.f32.mrb[10].mxu0 }
 0x10c   : > { %v1869_v20 = vpop.f32.mrb[11].mxu1  ;;  %v1797_v21 = vpop.f32.mrb[11].mxu0 }
 0x10d   : > { %v2544_v22 = vadd.f32 %v1869_v20, %v1868_v17  ;;  %v1798_v23 = vadd.f32 %v1797_v21, %v1796_v19  ;;  %v1069_v6 = vadd.f32 %v1795_v18, %v2553_v38 }
 0x10f   : > { %v1072_v11 = vadd.f32 %v1798_v23, %v2553_v38 }
 0x111   : > { %v1871_v24 = vpop.f32.mrb[12].mxu1  ;;  %v1799_v25 = vpop.f32.mrb[12].mxu0 }
 0x112   : > { %v1872_v26 = vpop.f32.mrb[13].mxu1  ;;  %v1800_v27 = vpop.f32.mrb[13].mxu0 }
 0x113   : > { %v2546_v28 = vadd.f32 %v1872_v26, %v1871_v24  ;;  %v1874_v29 = vpop.f32.mrb[14].mxu1  ;;  %v1801_v30 = vadd.f32 %v1800_v27, %v1799_v25  ;;  %v1802_v31 = vpop.f32.mrb[14].mxu0 }
 0x114   : > { %v1875_v32 = vpop.f32.mrb[15].mxu1  ;;  %v1803_v33 = vpop.f32.mrb[15].mxu0 }
 0x115   : > { %v2548_v34 = vadd.f32 %v1875_v32, %v1874_v29  ;;  %v1804_v35 = vadd.f32 %v1803_v33, %v1802_v31  ;;  %v1077_v18 = vadd.f32 %v1801_v30, %v2553_v38 }
 0x117   : > { %v1080_v23 = vadd.f32 %v1804_v35, %v2553_v38 }
 0x119   : > { %v1893_v36 = vpop.f32.mrb[16].mxu1  ;;  %v1805_v37 = vpop.f32.mrb[16].mxu0 }
 0x11a   : > { %v1894_v39 = vpop.f32.mrb[17].mxu1  ;;  %v1806_v40 = vpop.f32.mrb[17].mxu0 }
 0x11b   : > { %v1895_v42 = vadd.f32 %v1894_v39, %v1893_v36  ;;  %v1896_v43 = vpop.f32.mrb[18].mxu1  ;;  %v1807_v44 = vadd.f32 %v1806_v40, %v1805_v37  ;;  %v1808_v45 = vpop.f32.mrb[18].mxu0 }
 0x11c   : > { %v1897_v46 = vpop.f32.mrb[19].mxu1  ;;  %v1809_v47 = vpop.f32.mrb[19].mxu0 }
 0x11d   : > { %v1898_v49 = vadd.f32 %v1897_v46, %v1896_v43  ;;  %v1810_v50 = vadd.f32 %v1809_v47, %v1808_v45  ;;  %v2557_v51 = vadd.f32 %v1895_v42, %v1053_v41  ;;  %v1085_v30 = vadd.f32 %v1807_v44, %v2553_v38 }
 0x11f   : > { %v2559_v52 = vadd.f32 %v1898_v49, %v1056_v48  ;;  %v1088_v35 = vadd.f32 %v1810_v50, %v2553_v38 }
 0x121   : > { %v1899_v53 = vpop.f32.mrb[20].mxu1  ;;  %v1811_v54 = vpop.f32.mrb[20].mxu0 }
 0x122   : > { %v1900_v55 = vpop.f32.mrb[21].mxu1  ;;  %v1812_v57 = vpop.f32.mrb[21].mxu0 }
 0x123   : > { %v1901_v59 = vadd.f32 %v1900_v55, %v1899_v53  ;;  %v1902_v60 = vpop.f32.mrb[22].mxu1  ;;  %v1813_v61 = vadd.f32 %v1812_v57, %v1811_v54  ;;  %v1814_v0 = vpop.f32.mrb[22].mxu0 }
 0x124   : > { %v1903_v1 = vpop.f32.mrb[23].mxu1  ;;  %v1815_v2 = vpop.f32.mrb[23].mxu0 }
 0x125   : > { %v1904_v3 = vadd.f32 %v1903_v1, %v1902_v60  ;;  %v1816_v5 = vadd.f32 %v1815_v2, %v1814_v0  ;;  %v2563_v7 = vadd.f32 %v1901_v59, %v1061_v58  ;;  %v1093_v44 = vadd.f32 %v1813_v61, %v2553_v38 }
 0x127   : > { %v2565_v8 = vadd.f32 %v1904_v3, %v1064_v63  ;;  %v1096_v50 = vadd.f32 %v1816_v5, %v2553_v38 }
 0x129   : > { %v1905_v9 = vpop.f32.mrb[24].mxu1  ;;  %v1817_v12 = vpop.f32.mrb[24].mxu0 }
 0x12a   : > { %v1906_v13 = vpop.f32.mrb[25].mxu1  ;;  %v1818_v14 = vpop.f32.mrb[25].mxu0 }
 0x12b   : > { %v1907_v15 = vadd.f32 %v1906_v13, %v1905_v9  ;;  %v1908_v17 = vpop.f32.mrb[26].mxu1  ;;  %v1819_v19 = vadd.f32 %v1818_v14, %v1817_v12  ;;  %v1820_v20 = vpop.f32.mrb[26].mxu0 }
 0x12c   : > { %v1909_v21 = vpop.f32.mrb[27].mxu1  ;;  %v1821_v24 = vpop.f32.mrb[27].mxu0 }
 0x12d   : > { %v1910_v25 = vadd.f32 %v1909_v21, %v1908_v17  ;;  %v1822_v26 = vadd.f32 %v1821_v24, %v1820_v20  ;;  %v2569_v27 = vadd.f32 %v1907_v15, %v1069_v6 }
 0x12f   : > { %v2571_v29 = vadd.f32 %v1910_v25, %v1072_v11 }
 0x131   : > { %v1911_v31 = vpop.f32.mrb[28].mxu1  ;;  %v1823_v32 = vpop.f32.mrb[28].mxu0 }
 0x132   : > { %v1912_v33 = vpop.f32.mrb[29].mxu1  ;;  %v1824_v36 = vpop.f32.mrb[29].mxu0 }
 0x133   : > { %v1913_v37 = vadd.f32 %v1912_v33, %v1911_v31  ;;  %v1914_v39 = vpop.f32.mrb[30].mxu1  ;;  %v1825_v40 = vadd.f32 %v1824_v36, %v1823_v32  ;;  %v1826_v41 = vpop.f32.mrb[30].mxu0 }
 0x134   : > { %v1915_v42 = vpop.f32.mrb[31].mxu1  ;;  %v1827_v43 = vpop.f32.mrb[31].mxu0 }
 0x135   : > { %v1916_v45 = vadd.f32 %v1915_v42, %v1914_v39  ;;  %v1828_v46 = vadd.f32 %v1827_v43, %v1826_v41  ;;  %v2575_v47 = vadd.f32 %v1913_v37, %v1077_v18  ;;  %v1101_v39 = vadd.f32 %v1819_v19, %v2553_v38 }
 0x137   : > { %v2577_v48 = vadd.f32 %v1916_v45, %v1080_v23 }
 0x139   : > { %v1917_v49 = vpop.f32.mrb[32].mxu1  ;;  %v1829_v53 = vpop.f32.mrb[32].mxu0 }
 0x13a   : > { %v1918_v54 = vpop.f32.mrb[33].mxu1  ;;  %v1830_v55 = vpop.f32.mrb[33].mxu0 }
 0x13b   : > { %v1919_v57 = vadd.f32 %v1918_v54, %v1917_v49  ;;  %v1920_v58 = vpop.f32.mrb[34].mxu1  ;;  %v1831_v59 = vadd.f32 %v1830_v55, %v1829_v53  ;;  %v1832_v60 = vpop.f32.mrb[34].mxu0  ;;  %v1104_v49 = vadd.f32 %v1822_v26, %v2553_v38 }
 0x13c   : > { %v1921_v0 = vpop.f32.mrb[35].mxu1  ;;  %v1833_v1 = vpop.f32.mrb[35].mxu0 }
 0x13d   : > { %v1922_v2 = vadd.f32 %v1921_v0, %v1920_v58  ;;  %v1834_v63 = vadd.f32 %v1833_v1, %v1832_v60  ;;  %v2581_v3 = vadd.f32 %v1919_v57, %v1085_v30  ;;  %v1109_v0 = vadd.f32 %v1825_v40, %v2553_v38 }
 0x13f   : > { %v2583_v9 = vadd.f32 %v1922_v2, %v1088_v35 }
 0x141   : > { %v1923_v12 = vpop.f32.mrb[36].mxu1  ;;  %v1835_v13 = vpop.f32.mrb[36].mxu0 }
 0x142   : > { %v1924_v14 = vpop.f32.mrb[37].mxu1  ;;  %v1836_v6 = vpop.f32.mrb[37].mxu0 }
 0x143   : > { %v1925_v15 = vadd.f32 %v1924_v14, %v1923_v12  ;;  %v1926_v17 = vpop.f32.mrb[38].mxu1  ;;  %v2586_v20 = vadd.f32 %v1836_v6, %v1835_v13  ;;  %v1838_v21 = vpop.f32.mrb[38].mxu0  ;;  %v1112_v14 = vadd.f32 %v1828_v46, %v2553_v38 }
 0x144   : > { %v1927_v24 = vpop.f32.mrb[39].mxu1  ;;  %v1839_v11 = vpop.f32.mrb[39].mxu0 }
 0x145   : > { %v1928_v25 = vadd.f32 %v1927_v24, %v1926_v17  ;;  %v2589_v31 = vadd.f32 %v1839_v11, %v1838_v21  ;;  %v2591_v32 = vadd.f32 %v1925_v15, %v1093_v44 }
 0x147   : > { %v2593_v33 = vadd.f32 %v1928_v25, %v1096_v50  ;;  %v1117_v25 = vadd.f32 %v1831_v59, %v2553_v38 }
 0x149   : > { %v1929_v36 = vpop.f32.mrb[40].mxu1  ;;  %v1841_v18 = vpop.f32.mrb[40].mxu0 }
 0x14a   : > { %v1930_v37 = vpop.f32.mrb[41].mxu1  ;;  %v1842_v61 = vpop.f32.mrb[41].mxu0 }
 0x14b   : > { %v1931_v41 = vadd.f32 %v1930_v37, %v1929_v36  ;;  %v1932_v42 = vpop.f32.mrb[42].mxu1  ;;  %v2596_v43 = vadd.f32 %v1842_v61, %v1841_v18  ;;  %v1844_v23 = vpop.f32.mrb[42].mxu0  ;;  %v1120_v61 = vadd.f32 %v1834_v63, %v2553_v38 }
 0x14c   : > { %v1933_v45 = vpop.f32.mrb[43].mxu1  ;;  %v1845_v5 = vpop.f32.mrb[43].mxu0 }
 0x14d   : > { %v1934_v53 = vadd.f32 %v1933_v45, %v1932_v42  ;;  %v2599_v54 = vadd.f32 %v1845_v5, %v1844_v23  ;;  %v2601_v55 = vadd.f32 %v1931_v41, %v1101_v39 }
 0x14f   : > { %v2603_v30 = vadd.f32 %v1934_v53, %v1104_v49 }
 0x151   : > { %v1935_v57 = vpop.f32.mrb[44].mxu1  ;;  %v1847_v58 = vpop.f32.mrb[44].mxu0 }
 0x152   : > { %v1936_v60 = vpop.f32.mrb[45].mxu1  ;;  %v1848_v19 = vpop.f32.mrb[45].mxu0 }
 0x153   : > { %v1937_v1 = vadd.f32 %v1936_v60, %v1935_v57  ;;  %v1938_v35 = vpop.f32.mrb[46].mxu1  ;;  %v2606_v2 = vadd.f32 %v1848_v19, %v1847_v58  ;;  %v1850_v12 = vpop.f32.mrb[46].mxu0  ;;  %v1128_v19 = vadd.f32 %v2589_v31, %v2553_v38 }
 0x154   : > { %v1939_v13 = vpop.f32.mrb[47].mxu1  ;;  %v1851_v26 = vpop.f32.mrb[47].mxu0 }
 0x155   : > { %v1940_v6 = vadd.f32 %v1939_v13, %v1938_v35  ;;  %v2609_v44 = vadd.f32 %v1851_v26, %v1850_v12  ;;  %v2611_v15 = vadd.f32 %v1937_v1, %v1109_v0 }
 0x157   : > { %v2613_v17 = vadd.f32 %v1940_v6, %v1112_v14 }
 0x159   : > { %v1941_v21 = vpop.f32.mrb[48].mxu1  ;;  %v2019_v24 = vpop.f32.mrb[48].mxu0 }
 0x15a   : > { %v1383_v40 = vadd.f32 %v2019_v24, %v2563_v7  ;;  %v1942_v11 = vpop.f32.mrb[49].mxu1  ;;  %v1374_v50 = vpop.f32.mrb[49].mxu0 }
 0x15b   : > { %v1943_v36 = vadd.f32 %v1942_v11, %v1941_v21  ;;  %v1375_v18 = vadd.f32 %v1374_v50, %v2557_v51  ;;  %v1944_v46 = vpop.f32.mrb[50].mxu1  ;;  %v2020_v37 = vpop.f32.mrb[50].mxu0 }
 0x15c   : > { %2222 = vtanh.f32 %v1383_v40  ;;  %v1386_v39 = vadd.f32 %v2020_v37, %v2565_v8  ;;  %v1945_v41 = vpop.f32.mrb[51].mxu1  ;;  %v1377_v42 = vpop.f32.mrb[51].mxu0  ;;  %v1125_v8 = vadd.f32 %v2586_v20, %v2553_v38  ;;  %v1133_v40 = vadd.f32 %v2596_v43, %v2553_v38 }
 0x15d   : > { %2224 = vtanh.f32 %v1375_v18  ;;  %v1946_v23 = vadd.f32 %v1945_v41, %v1944_v46  ;;  %v1378_v7 = vadd.f32 %v1377_v42, %v2559_v52  ;;  %v2621_v45 = vadd.f32 %v1943_v36, %v1117_v25 }
 0x15e   : > { %2226 = vtanh.f32 %v1386_v39  ;;  %v1136_v18 = vadd.f32 %v2599_v54, %v2553_v38 }
 0x15f   : > { %2228 = vtanh.f32 %v1378_v7  ;;  %v2623_v59 = vadd.f32 %v1946_v23, %v1120_v61 }
 0x161   : > { %v1947_v51 = vpop.f32.mrb[52].mxu1  ;;  %v2023_v5 = vpop.f32.mrb[52].mxu0 }
 0x162   : > { %v1399_v63 = vadd.f32 %v2023_v5, %v2575_v47  ;;  %v1948_v49 = vpop.f32.mrb[53].mxu1  ;;  %v1390_v53 = vpop.f32.mrb[53].mxu0 }
 0x163   : > { %v1949_v57 = vadd.f32 %v1948_v49, %v1947_v51  ;;  %v1391_v58 = vadd.f32 %v1390_v53, %v2569_v27  ;;  %v1950_v52 = vpop.f32.mrb[54].mxu1  ;;  %v2024_v60 = vpop.f32.mrb[54].mxu0 }
 0x164   : > { %2230 = vtanh.f32 %v1399_v63  ;;  %v1402_v47 = vadd.f32 %v2024_v60, %v2577_v48  ;;  %v1951_v20 = vpop.f32.mrb[55].mxu1  ;;  %v1393_v0 = vpop.f32.mrb[55].mxu0  ;;  %v1141_v63 = vadd.f32 %v2606_v2, %v2553_v38 }
 0x165   : > { %2232 = vtanh.f32 %v1391_v58  ;;  %v1952_v27 = vadd.f32 %v1951_v20, %v1950_v52  ;;  %v1394_v1 = vadd.f32 %v1393_v0, %v2571_v29  ;;  %v2639_v35 = vadd.f32 %v1949_v57, %v1125_v8 }
 0x166   : > { %v2223_v31 = vpop.eup %2222  ;;  %2234 = vtanh.f32 %v1402_v47  ;;  %v1144_v58 = vadd.f32 %v2609_v44, %v2553_v38 }
 0x167   : > { %v2225_v12 = vpop.eup %2224  ;;  %1535 = vst [vmem:[%s2635_s16 + $0x10] sm:$0xff] %v2223_v31  ;;  %2236 = vtanh.f32 %v1394_v1  ;;  %v2642_v13 = vadd.f32 %v1952_v27, %v1128_v19 }
 0x168   : > { %v2227_v26 = vpop.eup %2226  ;;  %1533 = vst [vmem:[%s2635_s16] sm:$0xff] %v2225_v12 }
 0x169   : > { %v2229_v48 = vpop.eup %2228  ;;  %1536 = vst [vmem:[%s2635_s16 + $0x18] sm:$0xff] %v2227_v26  ;;  %v1953_v14 = vpop.f32.mrb[56].mxu1 }
 0x16a   : > { %v2027_v6 = vpop.f32.mrb[56].mxu0  ;;  %1534 = vst [vmem:[%s2635_s16 + $0x8] sm:$0xff] %v2229_v48  ;;  %v1954_v24 = vpop.f32.mrb[57].mxu1 }
 0x16b   : > { %v1415_v21 = vadd.f32 %v2027_v6, %v2591_v32  ;;  %v1406_v29 = vpop.f32.mrb[57].mxu0  ;;  %v1955_v11 = vadd.f32 %v1954_v24, %v1953_v14  ;;  %v1956_v25 = vpop.f32.mrb[58].mxu1  ;;  %v1152_v24 = vadd.f32 %v2536_v62, %v2553_v38 }
 0x16c   : > { %v1407_v50 = vadd.f32 %v1406_v29, %v2581_v3  ;;  %v2028_v36 = vpop.f32.mrb[58].mxu0  ;;  %v1957_v32 = vpop.f32.mrb[59].mxu1 }
 0x16d   : > { %2238 = vtanh.f32 %v1415_v21  ;;  %v1418_v46 = vadd.f32 %v2028_v36, %v2593_v33  ;;  %v1409_v37 = vpop.f32.mrb[59].mxu0  ;;  %v1958_v61 = vadd.f32 %v1957_v32, %v1956_v25  ;;  %v2655_v39 = vadd.f32 %v1955_v11, %v1133_v40 }
 0x16e   : > { %2240 = vtanh.f32 %v1407_v50  ;;  %v1410_v43 = vadd.f32 %v1409_v37, %v2583_v9  ;;  %v2231_v3 = vpop.eup %2230 }
 0x16f   : > { %2242 = vtanh.f32 %v1418_v46  ;;  %v2233_v41 = vpop.eup %2232  ;;  %1539 = vst [vmem:[%s2635_s16 + $0x30] sm:$0xff] %v2231_v3  ;;  %v2658_v54 = vadd.f32 %v1958_v61, %v1136_v18 }
 0x170   : > { %2244 = vtanh.f32 %v1410_v43  ;;  %v2235_v42 = vpop.eup %2234  ;;  %1537 = vst [vmem:[%s2635_s16 + $0x20] sm:$0xff] %v2233_v41 }
 0x171   : > { %v2237_v33 = vpop.eup %2236  ;;  %1540 = vst [vmem:[%s2635_s16 + $0x38] sm:$0xff] %v2235_v42  ;;  %v1959_v23 = vpop.f32.mrb[60].mxu1 }
 0x172   : > { %v2031_v7 = vpop.f32.mrb[60].mxu0  ;;  %1538 = vst [vmem:[%s2635_s16 + $0x28] sm:$0xff] %v2237_v33  ;;  %v1960_v5 = vpop.f32.mrb[61].mxu1  ;;  %v1160_v33 = vadd.f32 %v2540_v10, %v2553_v38 }
 0x173   : > { %v1431_v51 = vadd.f32 %v2031_v7, %v2611_v15  ;;  %v1422_v9 = vpop.f32.mrb[61].mxu0  ;;  %v1961_v49 = vadd.f32 %v1960_v5, %v1959_v23  ;;  %v1962_v8 = vpop.f32.mrb[62].mxu1 }
 0x174   : > { %v1423_v53 = vadd.f32 %v1422_v9, %v2601_v55  ;;  %v2032_v57 = vpop.f32.mrb[62].mxu0  ;;  %v1963_v15 = vpop.f32.mrb[63].mxu1 }
 0x175   : > { %2246 = vtanh.f32 %v1431_v51  ;;  %v1434_v52 = vadd.f32 %v2032_v57, %v2613_v17  ;;  %v1425_v60 = vpop.f32.mrb[63].mxu0  ;;  %v1964_v19 = vadd.f32 %v1963_v15, %v1962_v8  ;;  %v1302_v47 = vadd.f32 %v1961_v49, %v1141_v63 }
 0x176   : > { %2248 = vtanh.f32 %v1423_v53  ;;  %v1426_v2 = vadd.f32 %v1425_v60, %v2603_v30  ;;  %v1149_v30 = vadd.f32 %v2534_v56, %v2553_v38 }
 0x177   : > { %v2239_v20 = vpop.eup %2238  ;;  %2250 = vtanh.f32 %v1434_v52  ;;  %v1305_v0 = vadd.f32 %v1964_v19, %v1144_v58 }
 0x178   : > { %v2241_v55 = vpop.eup %2240  ;;  %1543 = vst [vmem:[%s2635_s16 + $0x50] sm:$0xff] %v2239_v20  ;;  %2252 = vtanh.f32 %v1426_v2  ;;  %v1168_v20 = vadd.f32 %v2544_v22, %v2553_v38 }
 0x179   : > { %v2243_v44 = vpop.eup %2242  ;;  %1541 = vst [vmem:[%s2635_s16 + $0x40] sm:$0xff] %v2241_v55  ;;  %v1965_v17 = vpop.f32.mrb[64].mxu1 }
 0x17a   : > { %v2245_v27 = vpop.eup %2244  ;;  %1544 = vst [vmem:[%s2635_s16 + $0x58] sm:$0xff] %v2243_v44  ;;  %v2035_v1 = vpop.f32.mrb[64].mxu0 }
 0x17b   : > { %1542 = vst [vmem:[%s2635_s16 + $0x48] sm:$0xff] %v2245_v27  ;;  %v1447_v31 = vadd.f32 %v2035_v1, %v2639_v35  ;;  %v1966_v12 = vpop.f32.mrb[65].mxu1  ;;  %v1438_v26 = vpop.f32.mrb[65].mxu0 }
 0x17c   : > { %v1967_v48 = vadd.f32 %v1966_v12, %v1965_v17  ;;  %v1439_v14 = vadd.f32 %v1438_v26, %v2621_v45  ;;  %v1968_v6 = vpop.f32.mrb[66].mxu1  ;;  %v2036_v21 = vpop.f32.mrb[66].mxu0 }
 0x17d   : > { %2254 = vtanh.f32 %v1447_v31  ;;  %v1450_v29 = vadd.f32 %v2036_v21, %v2642_v13  ;;  %v1969_v35 = vpop.f32.mrb[67].mxu1  ;;  %v1441_v40 = vpop.f32.mrb[67].mxu0  ;;  %v1173_v21 = vadd.f32 %v2546_v28, %v2553_v38 }
 0x17e   : > { %2256 = vtanh.f32 %v1439_v14  ;;  %v1970_v11 = vadd.f32 %v1969_v35, %v1968_v6  ;;  %v1442_v56 = vadd.f32 %v1441_v40, %v2623_v59  ;;  %v1310_v50 = vadd.f32 %v1967_v48, %v1149_v30 }
 0x17f   : > { %v2247_v25 = vpop.eup %2246  ;;  %2258 = vtanh.f32 %v1450_v29  ;;  %v1157_v59 = vadd.f32 %v2538_v4, %v2553_v38 }
 0x180   : > { %v2249_v45 = vpop.eup %2248  ;;  %1547 = vst [vmem:[%s2635_s16 + $0x70] sm:$0xff] %v2247_v25  ;;  %2260 = vtanh.f32 %v1442_v56  ;;  %v1313_v36 = vadd.f32 %v1970_v11, %v1152_v24  ;;  %v1176_v11 = vadd.f32 %v2548_v34, %v2553_v38 }
 0x181   : > { %v2251_v62 = vpop.eup %2250  ;;  %1545 = vst [vmem:[%s2635_s16 + $0x60] sm:$0xff] %v2249_v45  ;;  %v1971_v13 = vpop.f32.mrb[68].mxu1 }
 0x182   : > { %v2253_v18 = vpop.eup %2252  ;;  %1548 = vst [vmem:[%s2635_s16 + $0x78] sm:$0xff] %v2251_v62  ;;  %v2039_v46 = vpop.f32.mrb[68].mxu0 }
 0x183   : > { %1546 = vst [vmem:[%s2635_s16 + $0x68] sm:$0xff] %v2253_v18  ;;  %v1463_v32 = vadd.f32 %v2039_v46, %v1302_v47  ;;  %v1972_v37 = vpop.f32.mrb[69].mxu1  ;;  %v1454_v61 = vpop.f32.mrb[69].mxu0 }
 0x184   : > { %v1973_v43 = vadd.f32 %v1972_v37, %v1971_v13  ;;  %v1455_v3 = vadd.f32 %v1454_v61, %v2655_v39  ;;  %v1974_v41 = vpop.f32.mrb[70].mxu1  ;;  %v2040_v42 = vpop.f32.mrb[70].mxu0 }
 0x185   : > { %2262 = vtanh.f32 %v1463_v32  ;;  %v1466_v23 = vadd.f32 %v2040_v42, %v1305_v0  ;;  %v1975_v7 = vpop.f32.mrb[71].mxu1  ;;  %v1457_v51 = vpop.f32.mrb[71].mxu0 }
 0x186   : > { %2264 = vtanh.f32 %v1455_v3  ;;  %v1976_v5 = vadd.f32 %v1975_v7, %v1974_v41  ;;  %v1458_v4 = vadd.f32 %v1457_v51, %v2658_v54  ;;  %v1318_v9 = vadd.f32 %v1973_v43, %v1157_v59 }
 0x187   : > { %v2255_v63 = vpop.eup %2254  ;;  %2266 = vtanh.f32 %v1466_v23  ;;  %v1165_v54 = vadd.f32 %v2542_v16, %v2553_v38 }
 0x188   : > { %v2257_v39 = vpop.eup %2256  ;;  %1551 = vst [vmem:[%s2635_s16 + $0x90] sm:$0xff] %v2255_v63  ;;  %2268 = vtanh.f32 %v1458_v4  ;;  %v1321_v49 = vadd.f32 %v1976_v5, %v1160_v33 }
 0x189   : > { %v2259_v53 = vpop.eup %2258  ;;  %1549 = vst [vmem:[%s2635_s16 + $0x80] sm:$0xff] %v2257_v39  ;;  %v1977_v8 = vpop.f32.mrb[72].mxu1 }
 0x18a   : > { %v2261_v10 = vpop.eup %2260  ;;  %1552 = vst [vmem:[%s2635_s16 + $0x98] sm:$0xff] %v2259_v53  ;;  %v2043_v57 = vpop.f32.mrb[72].mxu0 }
 0x18b   : > { %1550 = vst [vmem:[%s2635_s16 + $0x88] sm:$0xff] %v2261_v10  ;;  %v1479_v58 = vadd.f32 %v2043_v57, %v1318_v9  ;;  %v1978_v52 = vpop.f32.mrb[73].mxu1  ;;  %v1470_v15 = vpop.f32.mrb[73].mxu0 }
 0x18c   : > { %v1979_v60 = vadd.f32 %v1978_v52, %v1977_v8  ;;  %v1471_v19 = vadd.f32 %v1470_v15, %v1310_v50  ;;  %v1980_v2 = vpop.f32.mrb[74].mxu1  ;;  %v2044_v47 = vpop.f32.mrb[74].mxu0 }
 0x18d   : > { %2270 = vtanh.f32 %v1479_v58  ;;  %v1482_v55 = vadd.f32 %v2044_v47, %v1321_v49  ;;  %v1981_v0 = vpop.f32.mrb[75].mxu1  ;;  %v1473_v44 = vpop.f32.mrb[75].mxu0 }
 0x18e   : > { %2272 = vtanh.f32 %v1471_v19  ;;  %v1982_v27 = vadd.f32 %v1981_v0, %v1980_v2  ;;  %v1474_v17 = vadd.f32 %v1473_v44, %v1313_v36  ;;  %v1326_v1 = vadd.f32 %v1979_v60, %v1165_v54 }
 0x18f   : > { %v2263_v16 = vpop.eup %2262  ;;  %2274 = vtanh.f32 %v1482_v55 }
 0x190   : > { %v2265_v31 = vpop.eup %2264  ;;  %1555 = vst [vmem:[%s2635_s16 + $0xb0] sm:$0xff] %v2263_v16  ;;  %2276 = vtanh.f32 %v1474_v17  ;;  %v1329_v12 = vadd.f32 %v1982_v27, %v1168_v20 }
 0x191   : > { %v2267_v26 = vpop.eup %2266  ;;  %1553 = vst [vmem:[%s2635_s16 + $0xa0] sm:$0xff] %v2265_v31  ;;  %v1983_v30 = vpop.f32.mrb[76].mxu1 }
 0x192   : > { %v2269_v22 = vpop.eup %2268  ;;  %1556 = vst [vmem:[%s2635_s16 + $0xb8] sm:$0xff] %v2267_v26  ;;  %v2047_v48 = vpop.f32.mrb[76].mxu0 }
 0x193   : > { %1554 = vst [vmem:[%s2635_s16 + $0xa8] sm:$0xff] %v2269_v22  ;;  %v1984_v14 = vpop.f32.mrb[77].mxu1  ;;  %v1486_v6 = vpop.f32.mrb[77].mxu0 }
 0x194   : > { %v1985_v24 = vadd.f32 %v1984_v14, %v1983_v30  ;;  %v1487_v29 = vadd.f32 %v1486_v6, %v1326_v1  ;;  %v1986_v35 = vpop.f32.mrb[78].mxu1  ;;  %v2048_v40 = vpop.f32.mrb[78].mxu0 }
 0x195   : > { %v1987_v56 = vpop.f32.mrb[79].mxu1  ;;  %v1489_v50 = vpop.f32.mrb[79].mxu0 }
 0x196   : > { %v1334_v25 = vadd.f32 %v1985_v24, %v1173_v21  ;;  %2278 = vtanh.f32 %v1487_v29  ;;  %v1988_v45 = vadd.f32 %v1987_v56, %v1986_v35  ;;  %v1490_v36 = vadd.f32 %v1489_v50, %v1329_v12 }
 0x197   : > { %v2271_v62 = vpop.eup %2270 }
 0x198   : > { %v2273_v18 = vpop.eup %2272  ;;  %1559 = vst [vmem:[%s2635_s16 + $0xd0] sm:$0xff] %v2271_v62  ;;  %v1495_v28 = vadd.f32 %v2047_v48, %v1334_v25  ;;  %v1337_v13 = vadd.f32 %v1988_v45, %v1176_v11  ;;  %2280 = vtanh.f32 %v1490_v36 }
 0x199   : > { %v2275_v46 = vpop.eup %2274  ;;  %1557 = vst [vmem:[%s2635_s16 + $0xc0] sm:$0xff] %v2273_v18 }
 0x19a   : > { %v2277_v34 = vpop.eup %2276  ;;  %1560 = vst [vmem:[%s2635_s16 + $0xd8] sm:$0xff] %v2275_v46  ;;  %2282 = vtanh.f32 %v1495_v28  ;;  %v1498_v38 = vadd.f32 %v2048_v40, %v1337_v13 }
 0x19b   : > { %1558 = vst [vmem:[%s2635_s16 + $0xc8] sm:$0xff] %v2277_v34 }
 0x19c   : > { %2284 = vtanh.f32 %v1498_v38 }
 0x1a0   : > { %v2279_v32 = vpop.eup %2278 }
 0x1a1   : > { %1561 = vst [vmem:[%s2635_s16 + $0xe0] sm:$0xff] %v2279_v32 }
 0x1a2   : > { %v2281_v37 = vpop.eup %2280 }
 0x1a3   : > { %1562 = vst [vmem:[%s2635_s16 + $0xe8] sm:$0xff] %v2281_v37 }
 0x1a4   : > { %v2283_v61 = vpop.eup %2282 }
 0x1a5   : > { %1563 = vst [vmem:[%s2635_s16 + $0xf0] sm:$0xff] %v2283_v61 }
 0x1a6   : > { %v2285_v59 = vpop.eup %2284 }
 0x1a7   : > { %1564 = vst [vmem:[%s2635_s16 + $0xf8] sm:$0xff] %v2285_v59 }
 0x1a8 PF: > { %s13_s12 = sadd.s32 1, %s2292_s12  }
 0x1a9   : > { %p10_p4 = scmp.ge.s32.totalorder %s13_s12, 4  }
 0x1ab   :  { %12 = sbr.rel (!%p10_p4) target bundleno = 1 (0x1), region = 62 }

</bundles_post_ra>
